<compile_context>
chip_gen: v5e
topology: v5e:2x2
jax: 0.10.0
libtpu: 0.0.40
codegen_flags: <defaults>
</compile_context>

<pallas_src>
import functools

import jax
import jax.numpy as jnp
import numpy as np
from jax import lax
from jax.experimental import pallas as pl
from jax.experimental.pallas import tpu as pltpu


# ------------------------------- Pallas kernel -------------------------------

def _gn_conv_kernel(*refs, H, W, eps, count, apply_silu, res_mode):
    """Fused GroupNorm(+SiLU) -> 3x3 SAME conv (+bias) (+fused residual).

    One sample per grid step, channels on lanes.  The conv runs as 3 accumulating MXU
    matmuls with K = 3*C over a kx-folded bf16 operand built in VMEM scratch.
    """
    if res_mode == "conv":
        (x_ref, gcg_ref, ggc_ref, gamma_ref, beta_ref, w_ref, b_ref,
         r_ref, wr_ref, br_ref, o_ref, shf_ref, acc_ref) = refs
    elif res_mode == "add":
        (x_ref, gcg_ref, ggc_ref, gamma_ref, beta_ref, w_ref, b_ref,
         r_ref, o_ref, shf_ref, acc_ref) = refs
        wr_ref = br_ref = None
    else:
        (x_ref, gcg_ref, ggc_ref, gamma_ref, beta_ref, w_ref, b_ref,
         o_ref, shf_ref, acc_ref) = refs
        r_ref = wr_ref = br_ref = None

    C = x_ref.shape[-1]
    C3 = 3 * C
    Cp = o_ref.shape[-1]

    x3 = x_ref[0].astype(jnp.float32)                                  # (H, W, C)

    # ---- GroupNorm stats: per-channel sums (XLU) -> per-group via tiny one-hot matmuls ----
    s1 = jnp.sum(jnp.sum(x3, axis=0), axis=0, keepdims=True)           # (1, C)
    s2 = jnp.sum(jnp.sum(x3 * x3, axis=0), axis=0, keepdims=True)      # (1, C)
    inv_n = 1.0 / float(count)
    gmean = jnp.dot(s1, gcg_ref[...], preferred_element_type=jnp.float32) * inv_n   # (1, G)
    gsq = jnp.dot(s2, gcg_ref[...], preferred_element_type=jnp.float32) * inv_n
    gvar = jnp.maximum(gsq - gmean * gmean, 0.0)
    grstd = lax.rsqrt(gvar + eps)
    mean_c = jnp.dot(gmean, ggc_ref[...], preferred_element_type=jnp.float32)        # (1, C)
    rstd_c = jnp.dot(grstd, ggc_ref[...], preferred_element_type=jnp.float32)
    scale = rstd_c * gamma_ref[...]                                    # (1, C)
    shift = beta_ref[...] - mean_c * scale

    y = x3 * scale + shift                                             # (H, W, C) f32
    if apply_silu:
        y = y * jax.nn.sigmoid(y)
    y = y.astype(jnp.bfloat16)          # cast ONCE; bf16 is the MXU operand dtype

    # ---- build the kx-folded SAME-padded operand in bf16 scratch ----
    # shf[r, j, kx*C + c] == zero-padded activation at (row r-1, col j+kx-1, channel c).
    # Zero only the 1-px halo (top/bottom rows, left col of band0, right col of band2)
    # each step; the interior is fully overwritten.
    zrow = jnp.zeros((1, W, C3), jnp.bfloat16)
    shf_ref[0:1] = zrow
    shf_ref[H + 1:H + 2] = zrow
    zcol = jnp.zeros((H, 1, C), jnp.bfloat16)
    shf_ref[1:H + 1, 0:1, 0:C] = zcol
    shf_ref[1:H + 1, W - 1:W, 2 * C:3 * C] = zcol
    shf_ref[1:H + 1, 1:W, 0:C] = y[:, :W - 1, :]            # kx = 0 (left tap)
    shf_ref[1:H + 1, :, C:2 * C] = y                        # kx = 1 (center tap, aligned)
    shf_ref[1:H + 1, 0:W - 1, 2 * C:3 * C] = y[:, 1:, :]    # kx = 2 (right tap)

    # ---- 3x3 conv = 3 accumulating matmuls (K = 3*C), f32 scratch accumulator ----
    acc_ref[...] = jnp.dot(shf_ref[0:H].reshape(H * W, C3), w_ref[0],
                           preferred_element_type=jnp.float32)
    acc_ref[...] += jnp.dot(shf_ref[1:H + 1].reshape(H * W, C3), w_ref[1],
                            preferred_element_type=jnp.float32)
    acc_ref[...] += jnp.dot(shf_ref[2:H + 2].reshape(H * W, C3), w_ref[2],
                            preferred_element_type=jnp.float32)

    acc = acc_ref[...] + b_ref[...]

    # ---- fused residual epilogue ----
    if res_mode == "conv":        # real 1x1 conv: bf16 MXU matmul
        r2 = r_ref[0].astype(jnp.bfloat16).reshape(H * W, r_ref.shape[-1])
        acc = acc + jnp.dot(r2, wr_ref[...], preferred_element_type=jnp.float32)
        acc = acc + br_ref[...]
    elif res_mode == "add":       # identity: plain elementwise add (no identity matmul)
        acc = acc + r_ref[0].astype(jnp.float32).reshape(H * W, Cp)

    o_ref[0] = acc.reshape(H, W, Cp).astype(o_ref.dtype)


# ------------------------------ Pallas wrapper --------------------------------

def _fused_gn_conv3x3(x_nhwc, grp_cg, grp_gc, gamma, beta, w, b, *,
                      apply_silu, eps, count, out_dtype, residual=None):
    N, H, W, C = x_nhwc.shape
    G = grp_cg.shape[1]
    Cp = w.shape[-1]
    res_mode = residual[0] if residual is not None else "none"
    kern = functools.partial(_gn_conv_kernel, H=H, W=W, eps=eps, count=count,
                             apply_silu=apply_silu, res_mode=res_mode)

    # TODO(synk): single-buffer the grid-invariant operand specs (folded weight, one-hot
    # matrices, gamma/beta/bias) via pipeline_mode=pl.Buffered(1) once that path is verified
    # on this JAX version; they are re-fetched cheaply but double-buffered by default.
    in_specs = [
        pl.BlockSpec((1, H, W, C), lambda n: (n, 0, 0, 0)),       # activation, one sample
        pl.BlockSpec((C, G), lambda n: (0, 0)),                   # channel -> group one-hot
        pl.BlockSpec((G, C), lambda n: (0, 0)),                   # group -> channel scatter
        pl.BlockSpec((1, C), lambda n: (0, 0)),                   # gamma
        pl.BlockSpec((1, C), lambda n: (0, 0)),                   # beta
        pl.BlockSpec((3, 3 * C, Cp), lambda n: (0, 0, 0)),        # kx-folded conv weight (bf16)
        pl.BlockSpec((1, Cp), lambda n: (0, 0)),                  # conv bias (f32)
    ]
    args = [x_nhwc, grp_cg, grp_gc, gamma, beta, w, b]
    if res_mode == "conv":
        _, r, wr, br = residual
        Cr = r.shape[-1]
        in_specs += [pl.BlockSpec((1, H, W, Cr), lambda n: (n, 0, 0, 0)),   # residual input
                     pl.BlockSpec((Cr, Cp), lambda n: (0, 0)),              # 1x1 weight (bf16)
                     pl.BlockSpec((1, Cp), lambda n: (0, 0))]               # residual bias
        args += [r, wr, br]
    elif res_mode == "add":
        _, r, _, _ = residual
        in_specs += [pl.BlockSpec((1, H, W, Cp), lambda n: (n, 0, 0, 0))]   # channel-padded x
        args += [r]

    # Explicit scoped-VMEM limit sized from the block footprint (v5e default is only 16 MiB).
    def nbytes(shape, dtype):
        return int(np.prod(shape)) * jnp.dtype(dtype).itemsize
    blocks = (nbytes((H, W, C), x_nhwc.dtype) + nbytes((H, W, Cp), out_dtype)
              + nbytes(w.shape, w.dtype) + 2 * nbytes((C, G), jnp.float32)
              + 2 * nbytes((1, C), jnp.float32) + nbytes((1, Cp), jnp.float32))
    if res_mode == "conv":
        blocks += (nbytes((H, W, args[7].shape[-1]), args[7].dtype)
                   + nbytes(args[8].shape, args[8].dtype) + nbytes((1, Cp), jnp.float32))
    elif res_mode == "add":
        blocks += nbytes((H, W, Cp), args[7].dtype)
    scratch = nbytes((H + 2, W, 3 * C), jnp.bfloat16) + nbytes((H * W, Cp), jnp.float32)
    vmem_limit = int(min(max(2 * blocks + scratch + (4 << 20), 16 << 20), 100 << 20))

    return pl.pallas_call(
        kern,
        out_shape=jax.ShapeDtypeStruct((N, H, W, Cp), out_dtype),
        grid=(N,),
        in_specs=in_specs,
        out_specs=pl.BlockSpec((1, H, W, Cp), lambda n: (n, 0, 0, 0)),
        scratch_shapes=[pltpu.VMEM((H + 2, W, 3 * C), jnp.bfloat16),   # kx-folded operand
                        pltpu.VMEM((H * W, Cp), jnp.float32)],         # f32 conv accumulator
        compiler_params=pltpu.CompilerParams(
            dimension_semantics=("parallel",),
            vmem_limit_bytes=vmem_limit),
    )(*args)


# ------------------------------ parameter prep --------------------------------

def _group_matrices(c_real, c_padded, groups):
    """(Cp, G) one-hot channel->group and its transpose; padded channels map to no group."""
    cpg = c_real // groups
    c_idx = np.arange(c_padded)
    g_of_c = np.where(c_idx < c_real, c_idx // cpg, -1)
    m = (g_of_c[:, None] == np.arange(groups)[None, :]).astype(np.float32)
    return jnp.asarray(m), jnp.asarray(m.T)


def _folded_conv_weight(w_oihw, c_in_p, c_out_p):
    """(Cout, Cin, 3, 3) -> (3, 3*Cin_p, Cout_p) bf16 with kx folded into the K dim."""
    c_out, c_in, _, _ = w_oihw.shape
    w = jnp.transpose(w_oihw, (2, 3, 1, 0))                    # (ky, kx, Cin, Cout)
    w = jnp.pad(w, ((0, 0), (0, 0), (0, c_in_p - c_in), (0, c_out_p - c_out)))
    return w.reshape(3, 3 * c_in_p, c_out_p).astype(jnp.bfloat16)


def _pad_row(v, cp):
    return jnp.pad(v, (0, cp - v.shape[0])).reshape(1, cp).astype(jnp.float32)


def residual_block_forward(x, params, *, groups=32, eps=1e-5):
    """x: (N, Cin, H, W) float32 -> (N, Cout, H, W); matches the PyTorch module forward."""
    N, Cin, H, W = x.shape
    Cout = params["conv1_w"].shape[0]
    assert Cin % groups == 0 and Cout % groups == 0
    # TODO(synk): generalize to W not a multiple of 8 (sublane-aligned in-kernel reshapes).
    assert W % 8 == 0
    # Lane-dense output channels; use 256-wide padding when Cout > 128 so one dot fills the
    # 256-wide MXU on v6e/v7x (128 already fills the v5e MXU and small channel counts).
    lane = 256 if Cout > 128 else 128
    Cp = -(-Cout // lane) * lane

    x_nhwc = jnp.transpose(x, (0, 2, 3, 1))                    # single layout change in

    # ---- stage 1: GN1 + SiLU + conv1 (3x3, SAME); intermediate written as bf16 ----
    g1_cg, g1_gc = _group_matrices(Cin, Cin, groups)
    h = _fused_gn_conv3x3(
        x_nhwc, g1_cg, g1_gc,
        params["gn1_g"].reshape(1, Cin).astype(jnp.float32),
        params["gn1_b"].reshape(1, Cin).astype(jnp.float32),
        _folded_conv_weight(params["conv1_w"], Cin, Cp),
        _pad_row(params["conv1_b"], Cp),
        apply_silu=True, eps=eps, count=H * W * (Cin // groups),
        out_dtype=jnp.bfloat16)

    # ---- stage 2: GN2 + conv2 (3x3, SAME) + fused residual ----
    g2_cg, g2_gc = _group_matrices(Cout, Cp, groups)
    if Cin == Cout:
        r = x_nhwc if Cin == Cp else jnp.pad(x_nhwc, ((0, 0), (0, 0), (0, 0), (0, Cp - Cin)))
        residual = ("add", r, None, None)
    else:
        wr = jnp.pad(params["res_w"].reshape(Cout, Cin).T,
                     ((0, 0), (0, Cp - Cout))).astype(jnp.bfloat16)
        residual = ("conv", x_nhwc, wr, _pad_row(params["res_b"], Cp))
    out = _fused_gn_conv3x3(
        h, g2_cg, g2_gc,
        _pad_row(params["gn2_g"], Cp),
        _pad_row(params["gn2_b"], Cp),
        _folded_conv_weight(params["conv2_w"], Cp, Cp),
        _pad_row(params["conv2_b"], Cp),
        apply_silu=False, eps=eps, count=H * W * (Cout // groups),
        out_dtype=jnp.float32, residual=residual)

    # TODO(synk): for large H*W*C (v7x has only 64 MiB VMEM) split into a GN-stats pass plus
    # a conv pass row-tiled with a 2-row halo instead of one full sample per grid step.
    return jnp.transpose(out[..., :Cout], (0, 3, 1, 2))        # back to NCHW


# ------------------------------ reference (pure JAX) ---------------------------

def _gn_ref(x, gamma, beta, groups=32, eps=1e-5):
    N, C, H, W = x.shape
    xg = x.reshape(N, groups, -1)
    mean = xg.mean(axis=2, keepdims=True)
    var = ((xg - mean) ** 2).mean(axis=2, keepdims=True)
    xn = ((xg - mean) / jnp.sqrt(var + eps)).reshape(N, C, H, W)
    return xn * gamma[None, :, None, None] + beta[None, :, None, None]


def _conv_ref(x, w, b, pad):
    y = lax.conv_general_dilated(x, w, (1, 1), [(pad, pad), (pad, pad)],
                                 dimension_numbers=("NCHW", "OIHW", "NCHW"),
                                 precision=lax.Precision.HIGHEST)
    return y + b[None, :, None, None]


def residual_block_ref(x, p):
    h = _gn_ref(x, p["gn1_g"], p["gn1_b"])
    h = h * jax.nn.sigmoid(h)
    h = _conv_ref(h, p["conv1_w"], p["conv1_b"], 1)
    h = _gn_ref(h, p["gn2_g"], p["gn2_b"])
    h = _conv_ref(h, p["conv2_w"], p["conv2_b"], 1)
    res = _conv_ref(x, p["res_w"], p["res_b"], 0) if "res_w" in p else x
    return h + res


# ----------------------------------- main --------------------------------------

if __name__ == "__main__":
    key = jax.random.PRNGKey(0)
    # GroupNorm(32, C) requires channel counts that are multiples of 32.
    N, Cin, Cout, H, W = 2, 32, 64, 16, 16

    ks = jax.random.split(key, 12)
    params = {
        "gn1_g": 1.0 + 0.1 * jax.random.normal(ks[0], (Cin,), jnp.float32),
        "gn1_b": 0.1 * jax.random.normal(ks[1], (Cin,), jnp.float32),
        "conv1_w": 0.05 * jax.random.normal(ks[2], (Cout, Cin, 3, 3), jnp.float32),
        "conv1_b": 0.01 * jax.random.normal(ks[3], (Cout,), jnp.float32),
        "gn2_g": 1.0 + 0.1 * jax.random.normal(ks[4], (Cout,), jnp.float32),
        "gn2_b": 0.1 * jax.random.normal(ks[5], (Cout,), jnp.float32),
        "conv2_w": 0.05 * jax.random.normal(ks[6], (Cout, Cout, 3, 3), jnp.float32),
        "conv2_b": 0.01 * jax.random.normal(ks[7], (Cout,), jnp.float32),
        "res_w": 0.05 * jax.random.normal(ks[8], (Cout, Cin, 1, 1), jnp.float32),
        "res_b": 0.01 * jax.random.normal(ks[9], (Cout,), jnp.float32),
    }
    x = jax.random.normal(ks[10], (N, Cin, H, W), jnp.float32)

    fwd = jax.jit(residual_block_forward)
    out = jax.block_until_ready(fwd(x, params))

    ref = jax.block_until_ready(residual_block_ref(x, params))
    err = float(jnp.max(jnp.abs(out - ref)))
    assert out.shape == (N, Cout, H, W), out.shape
    # bf16 MXU operands + bf16 stage-1 intermediate vs. an f32 HIGHEST-precision reference.
    assert err < 1e-1, f"max abs error too large: {err}"

    print("KERNEL_OK")
</pallas_src>

<mosaic_0001>
module attributes {stable_mosaic.version = 11 : i64} {
  func.func @_gn_conv_kernel(%arg0: i32, %arg1: memref<1x16x16x32xf32, #tpu.memory_space<vmem>>, %arg2: memref<32x32xf32, #tpu.memory_space<vmem>>, %arg3: memref<32x32xf32, #tpu.memory_space<vmem>>, %arg4: memref<1x32xf32, #tpu.memory_space<vmem>>, %arg5: memref<1x32xf32, #tpu.memory_space<vmem>>, %arg6: memref<3x96x128xbf16, #tpu.memory_space<vmem>>, %arg7: memref<1x128xf32, #tpu.memory_space<vmem>>, %arg8: memref<1x16x16x128xbf16, #tpu.memory_space<vmem>>, %arg9: memref<18x16x96xbf16, #tpu.memory_space<vmem>>, %arg10: memref<256x128xf32, #tpu.memory_space<vmem>>) attributes {dimension_semantics = [#tpu.dimension_semantics<parallel>], iteration_bounds = array<i64: 2>, scalar_prefetch = 0 : i64, scratch_operands = 2 : i64, tpu.core_type = #tpu.core_type<tc>, window_params = [{transform_indices = @transform_0, window_bounds = array<i64: 1, 16, 16, 32>}, {pipeline_mode = #tpu.pipeline_mode<synchronous>, transform_indices = @transform_1, window_bounds = array<i64: 32, 32>}, {pipeline_mode = #tpu.pipeline_mode<synchronous>, transform_indices = @transform_2, window_bounds = array<i64: 32, 32>}, {pipeline_mode = #tpu.pipeline_mode<synchronous>, transform_indices = @transform_3, window_bounds = array<i64: 1, 32>}, {pipeline_mode = #tpu.pipeline_mode<synchronous>, transform_indices = @transform_4, window_bounds = array<i64: 1, 32>}, {pipeline_mode = #tpu.pipeline_mode<synchronous>, transform_indices = @transform_5, window_bounds = array<i64: 3, 96, 128>}, {pipeline_mode = #tpu.pipeline_mode<synchronous>, transform_indices = @transform_6, window_bounds = array<i64: 1, 128>}, {transform_indices = @transform_7, window_bounds = array<i64: 1, 16, 16, 128>}]} {
    %c0 = arith.constant 0 : index
    %c0_0 = arith.constant 0 : index
    %c0_1 = arith.constant 0 : index
    %c0_2 = arith.constant 0 : index
    %0 = vector.load %arg1[%c0, %c0_0, %c0_1, %c0_2] : memref<1x16x16x32xf32, #tpu.memory_space<vmem>>, vector<1x16x16x32xf32>
    %1 = vector.shape_cast %0 : vector<1x16x16x32xf32> to vector<16x16x32xf32>
    %cst = arith.constant dense<0.000000e+00> : vector<16x32xf32>
    %2 = vector.multi_reduction <add>, %1, %cst [0] : vector<16x16x32xf32> to vector<16x32xf32>
    %cst_3 = arith.constant dense<0.000000e+00> : vector<32xf32>
    %3 = vector.multi_reduction <add>, %2, %cst_3 [0] : vector<16x32xf32> to vector<32xf32>
    %4 = vector.shape_cast %3 : vector<32xf32> to vector<1x32xf32>
    %5 = arith.mulf %1, %1 : vector<16x16x32xf32>
    %cst_4 = arith.constant dense<0.000000e+00> : vector<16x32xf32>
    %6 = vector.multi_reduction <add>, %5, %cst_4 [0] : vector<16x16x32xf32> to vector<16x32xf32>
    %cst_5 = arith.constant dense<0.000000e+00> : vector<32xf32>
    %7 = vector.multi_reduction <add>, %6, %cst_5 [0] : vector<16x32xf32> to vector<32xf32>
    %8 = vector.shape_cast %7 : vector<32xf32> to vector<1x32xf32>
    %c0_6 = arith.constant 0 : index
    %c0_7 = arith.constant 0 : index
    %9 = vector.load %arg2[%c0_6, %c0_7] : memref<32x32xf32, #tpu.memory_space<vmem>>, vector<32x32xf32>
    %cst_8 = arith.constant dense<0.000000e+00> : vector<1x32xf32>
    %10 = tpu.matmul %4, %9, %cst_8 {dimension_numbers = #tpu.dot_dimension_numbers<[1], [0], [0], [1], [0, 0, 1, 1], [], []>} : vector<1x32xf32>, vector<32x32xf32>, vector<1x32xf32> -> vector<1x32xf32>
    %cst_9 = arith.constant 3.906250e-03 : f32
    %11 = vector.broadcast %cst_9 : f32 to vector<1x32xf32>
    %12 = arith.mulf %10, %11 : vector<1x32xf32>
    %c0_10 = arith.constant 0 : index
    %c0_11 = arith.constant 0 : index
    %13 = vector.load %arg2[%c0_10, %c0_11] : memref<32x32xf32, #tpu.memory_space<vmem>>, vector<32x32xf32>
    %cst_12 = arith.constant dense<0.000000e+00> : vector<1x32xf32>
    %14 = tpu.matmul %8, %13, %cst_12 {dimension_numbers = #tpu.dot_dimension_numbers<[1], [0], [0], [1], [0, 0, 1, 1], [], []>} : vector<1x32xf32>, vector<32x32xf32>, vector<1x32xf32> -> vector<1x32xf32>
    %cst_13 = arith.constant 3.906250e-03 : f32
    %15 = vector.broadcast %cst_13 : f32 to vector<1x32xf32>
    %16 = arith.mulf %14, %15 : vector<1x32xf32>
    %17 = arith.mulf %12, %12 : vector<1x32xf32>
    %18 = arith.subf %16, %17 : vector<1x32xf32>
    %cst_14 = arith.constant 0.000000e+00 : f32
    %19 = vector.broadcast %cst_14 : f32 to vector<1x32xf32>
    %20 = arith.maximumf %18, %19 : vector<1x32xf32>
    %cst_15 = arith.constant 9.99999974E-6 : f32
    %21 = vector.broadcast %cst_15 : f32 to vector<1x32xf32>
    %22 = arith.addf %20, %21 : vector<1x32xf32>
    %23 = math.rsqrt %22 : vector<1x32xf32>
    %c0_16 = arith.constant 0 : index
    %c0_17 = arith.constant 0 : index
    %24 = vector.load %arg3[%c0_16, %c0_17] : memref<32x32xf32, #tpu.memory_space<vmem>>, vector<32x32xf32>
    %cst_18 = arith.constant dense<0.000000e+00> : vector<1x32xf32>
    %25 = tpu.matmul %12, %24, %cst_18 {dimension_numbers = #tpu.dot_dimension_numbers<[1], [0], [0], [1], [0, 0, 1, 1], [], []>} : vector<1x32xf32>, vector<32x32xf32>, vector<1x32xf32> -> vector<1x32xf32>
    %c0_19 = arith.constant 0 : index
    %c0_20 = arith.constant 0 : index
    %26 = vector.load %arg3[%c0_19, %c0_20] : memref<32x32xf32, #tpu.memory_space<vmem>>, vector<32x32xf32>
    %cst_21 = arith.constant dense<0.000000e+00> : vector<1x32xf32>
    %27 = tpu.matmul %23, %26, %cst_21 {dimension_numbers = #tpu.dot_dimension_numbers<[1], [0], [0], [1], [0, 0, 1, 1], [], []>} : vector<1x32xf32>, vector<32x32xf32>, vector<1x32xf32> -> vector<1x32xf32>
    %c0_22 = arith.constant 0 : index
    %c0_23 = arith.constant 0 : index
    %28 = vector.load %arg4[%c0_22, %c0_23] : memref<1x32xf32, #tpu.memory_space<vmem>>, vector<1x32xf32>
    %29 = arith.mulf %27, %28 : vector<1x32xf32>
    %c0_24 = arith.constant 0 : index
    %c0_25 = arith.constant 0 : index
    %30 = vector.load %arg5[%c0_24, %c0_25] : memref<1x32xf32, #tpu.memory_space<vmem>>, vector<1x32xf32>
    %31 = arith.mulf %25, %29 : vector<1x32xf32>
    %32 = arith.subf %30, %31 : vector<1x32xf32>
    %33 = vector.shape_cast %29 : vector<1x32xf32> to vector<1x1x32xf32>
    %34 = vector.broadcast %33 : vector<1x1x32xf32> to vector<16x16x32xf32>
    %35 = arith.mulf %1, %34 : vector<16x16x32xf32>
    %36 = vector.shape_cast %32 : vector<1x32xf32> to vector<1x1x32xf32>
    %37 = vector.broadcast %36 : vector<1x1x32xf32> to vector<16x16x32xf32>
    %38 = arith.addf %35, %37 : vector<16x16x32xf32>
    %39 = arith.negf %38 : vector<16x16x32xf32>
    %40 = math.exp %39 : vector<16x16x32xf32>
    %cst_26 = arith.constant 1.000000e+00 : f32
    %41 = vector.broadcast %cst_26 : f32 to vector<16x16x32xf32>
    %42 = arith.addf %41, %40 : vector<16x16x32xf32>
    %43 = arith.divf %41, %42 : vector<16x16x32xf32>
    %44 = arith.mulf %38, %43 : vector<16x16x32xf32>
    %45 = arith.truncf %44 : vector<16x16x32xf32> to vector<16x16x32xbf16>
    %cst_27 = arith.constant 0.000000e+00 : bf16
    %46 = vector.broadcast %cst_27 : bf16 to vector<1x16x96xbf16>
    %c0_28 = arith.constant 0 : index
    %c0_29 = arith.constant 0 : index
    %c0_30 = arith.constant 0 : index
    %47 = vector.load %arg9[%c0_28, %c0_29, %c0_30] : memref<18x16x96xbf16, #tpu.memory_space<vmem>>, vector<1x16x96xbf16>
    tpu.vector_store %arg9[%c0_28, %c0_29, %c0_30], %46 {strides = array<i32>} : memref<18x16x96xbf16, #tpu.memory_space<vmem>>, vector<1x16x96xbf16>,
    %c17 = arith.constant 17 : index
    %c0_31 = arith.constant 0 : index
    %c0_32 = arith.constant 0 : index
    %48 = vector.load %arg9[%c17, %c0_31, %c0_32] : memref<18x16x96xbf16, #tpu.memory_space<vmem>>, vector<1x16x96xbf16>
    tpu.vector_store %arg9[%c17, %c0_31, %c0_32], %46 {strides = array<i32>} : memref<18x16x96xbf16, #tpu.memory_space<vmem>>, vector<1x16x96xbf16>,
    %cst_33 = arith.constant 0.000000e+00 : bf16
    %49 = vector.broadcast %cst_33 : bf16 to vector<16x1x32xbf16>
    %c1 = arith.constant 1 : index
    %c0_34 = arith.constant 0 : index
    %c0_35 = arith.constant 0 : index
    %50 = vector.load %arg9[%c1, %c0_34, %c0_35] : memref<18x16x96xbf16, #tpu.memory_space<vmem>>, vector<16x1x32xbf16>
    tpu.vector_store %arg9[%c1, %c0_34, %c0_35], %49 {strides = array<i32>} : memref<18x16x96xbf16, #tpu.memory_space<vmem>>, vector<16x1x32xbf16>,
    %c1_36 = arith.constant 1 : index
    %c15 = arith.constant 15 : index
    %c64 = arith.constant 64 : index
    %51 = vector.load %arg9[%c1_36, %c15, %c64] : memref<18x16x96xbf16, #tpu.memory_space<vmem>>, vector<16x1x32xbf16>
    tpu.vector_store %arg9[%c1_36, %c15, %c64], %49 {strides = array<i32>} : memref<18x16x96xbf16, #tpu.memory_space<vmem>>, vector<16x1x32xbf16>,
    %52 = vector.extract_strided_slice %45 {offsets = [0, 0, 0], sizes = [16, 15, 32], strides = [1, 1, 1]} : vector<16x16x32xbf16> to vector<16x15x32xbf16>
    %c1_37 = arith.constant 1 : index
    %c1_38 = arith.constant 1 : index
    %c0_39 = arith.constant 0 : index
    %53 = vector.load %arg9[%c1_37, %c1_38, %c0_39] : memref<18x16x96xbf16, #tpu.memory_space<vmem>>, vector<16x15x32xbf16>
    tpu.vector_store %arg9[%c1_37, %c1_38, %c0_39], %52 {strides = array<i32>} : memref<18x16x96xbf16, #tpu.memory_space<vmem>>, vector<16x15x32xbf16>,
    %c1_40 = arith.constant 1 : index
    %c0_41 = arith.constant 0 : index
    %c32 = arith.constant 32 : index
    %54 = vector.load %arg9[%c1_40, %c0_41, %c32] : memref<18x16x96xbf16, #tpu.memory_space<vmem>>, vector<16x16x32xbf16>
    tpu.vector_store %arg9[%c1_40, %c0_41, %c32], %45 {strides = array<i32>} : memref<18x16x96xbf16, #tpu.memory_space<vmem>>, vector<16x16x32xbf16>,
    %55 = vector.extract_strided_slice %45 {offsets = [0, 1, 0], sizes = [16, 15, 32], strides = [1, 1, 1]} : vector<16x16x32xbf16> to vector<16x15x32xbf16>
    %c1_42 = arith.constant 1 : index
    %c0_43 = arith.constant 0 : index
    %c64_44 = arith.constant 64 : index
    %56 = vector.load %arg9[%c1_42, %c0_43, %c64_44] : memref<18x16x96xbf16, #tpu.memory_space<vmem>>, vector<16x15x32xbf16>
    tpu.vector_store %arg9[%c1_42, %c0_43, %c64_44], %55 {strides = array<i32>} : memref<18x16x96xbf16, #tpu.memory_space<vmem>>, vector<16x15x32xbf16>,
    %c0_45 = arith.constant 0 : index
    %c0_46 = arith.constant 0 : index
    %c0_47 = arith.constant 0 : index
    %57 = vector.load %arg9[%c0_45, %c0_46, %c0_47] : memref<18x16x96xbf16, #tpu.memory_space<vmem>>, vector<16x16x96xbf16>
    %58 = vector.shape_cast %57 : vector<16x16x96xbf16> to vector<256x96xbf16>
    %c0_48 = arith.constant 0 : index
    %c0_49 = arith.constant 0 : index
    %c0_50 = arith.constant 0 : index
    %59 = vector.load %arg6[%c0_48, %c0_49, %c0_50] : memref<3x96x128xbf16, #tpu.memory_space<vmem>>, vector<1x96x128xbf16>
    %60 = vector.shape_cast %59 : vector<1x96x128xbf16> to vector<96x128xbf16>
    %cst_51 = arith.constant dense<0.000000e+00> : vector<256x128xf32>
    %61 = tpu.matmul %58, %60, %cst_51 {dimension_numbers = #tpu.dot_dimension_numbers<[1], [0], [0], [1], [0, 0, 1, 1], [], []>} : vector<256x96xbf16>, vector<96x128xbf16>, vector<256x128xf32> -> vector<256x128xf32>
    %c0_52 = arith.constant 0 : index
    %c0_53 = arith.constant 0 : index
    %62 = vector.load %arg10[%c0_52, %c0_53] : memref<256x128xf32, #tpu.memory_space<vmem>>, vector<256x128xf32>
    tpu.vector_store %arg10[%c0_52, %c0_53], %61 {strides = array<i32>} : memref<256x128xf32, #tpu.memory_space<vmem>>, vector<256x128xf32>,
    %c0_54 = arith.constant 0 : index
    %c0_55 = arith.constant 0 : index
    %63 = vector.load %arg10[%c0_54, %c0_55] : memref<256x128xf32, #tpu.memory_space<vmem>>, vector<256x128xf32>
    %c1_56 = arith.constant 1 : index
    %c0_57 = arith.constant 0 : index
    %c0_58 = arith.constant 0 : index
    %64 = vector.load %arg9[%c1_56, %c0_57, %c0_58] : memref<18x16x96xbf16, #tpu.memory_space<vmem>>, vector<16x16x96xbf16>
    %65 = vector.shape_cast %64 : vector<16x16x96xbf16> to vector<256x96xbf16>
    %c1_59 = arith.constant 1 : index
    %c0_60 = arith.constant 0 : index
    %c0_61 = arith.constant 0 : index
    %66 = vector.load %arg6[%c1_59, %c0_60, %c0_61] : memref<3x96x128xbf16, #tpu.memory_space<vmem>>, vector<1x96x128xbf16>
    %67 = vector.shape_cast %66 : vector<1x96x128xbf16> to vector<96x128xbf16>
    %cst_62 = arith.constant dense<0.000000e+00> : vector<256x128xf32>
    %68 = tpu.matmul %65, %67, %cst_62 {dimension_numbers = #tpu.dot_dimension_numbers<[1], [0], [0], [1], [0, 0, 1, 1], [], []>} : vector<256x96xbf16>, vector<96x128xbf16>, vector<256x128xf32> -> vector<256x128xf32>
    %69 = arith.addf %63, %68 : vector<256x128xf32>
    %c0_63 = arith.constant 0 : index
    %c0_64 = arith.constant 0 : index
    %70 = vector.load %arg10[%c0_63, %c0_64] : memref<256x128xf32, #tpu.memory_space<vmem>>, vector<256x128xf32>
    tpu.vector_store %arg10[%c0_63, %c0_64], %69 {strides = array<i32>} : memref<256x128xf32, #tpu.memory_space<vmem>>, vector<256x128xf32>,
    %c0_65 = arith.constant 0 : index
    %c0_66 = arith.constant 0 : index
    %71 = vector.load %arg10[%c0_65, %c0_66] : memref<256x128xf32, #tpu.memory_space<vmem>>, vector<256x128xf32>
    %c2 = arith.constant 2 : index
    %c0_67 = arith.constant 0 : index
    %c0_68 = arith.constant 0 : index
    %72 = vector.load %arg9[%c2, %c0_67, %c0_68] : memref<18x16x96xbf16, #tpu.memory_space<vmem>>, vector<16x16x96xbf16>
    %73 = vector.shape_cast %72 : vector<16x16x96xbf16> to vector<256x96xbf16>
    %c2_69 = arith.constant 2 : index
    %c0_70 = arith.constant 0 : index
    %c0_71 = arith.constant 0 : index
    %74 = vector.load %arg6[%c2_69, %c0_70, %c0_71] : memref<3x96x128xbf16, #tpu.memory_space<vmem>>, vector<1x96x128xbf16>
    %75 = vector.shape_cast %74 : vector<1x96x128xbf16> to vector<96x128xbf16>
    %cst_72 = arith.constant dense<0.000000e+00> : vector<256x128xf32>
    %76 = tpu.matmul %73, %75, %cst_72 {dimension_numbers = #tpu.dot_dimension_numbers<[1], [0], [0], [1], [0, 0, 1, 1], [], []>} : vector<256x96xbf16>, vector<96x128xbf16>, vector<256x128xf32> -> vector<256x128xf32>
    %77 = arith.addf %71, %76 : vector<256x128xf32>
    %c0_73 = arith.constant 0 : index
    %c0_74 = arith.constant 0 : index
    %78 = vector.load %arg10[%c0_73, %c0_74] : memref<256x128xf32, #tpu.memory_space<vmem>>, vector<256x128xf32>
    tpu.vector_store %arg10[%c0_73, %c0_74], %77 {strides = array<i32>} : memref<256x128xf32, #tpu.memory_space<vmem>>, vector<256x128xf32>,
    %c0_75 = arith.constant 0 : index
    %c0_76 = arith.constant 0 : index
    %79 = vector.load %arg10[%c0_75, %c0_76] : memref<256x128xf32, #tpu.memory_space<vmem>>, vector<256x128xf32>
    %c0_77 = arith.constant 0 : index
    %c0_78 = arith.constant 0 : index
    %80 = vector.load %arg7[%c0_77, %c0_78] : memref<1x128xf32, #tpu.memory_space<vmem>>, vector<1x128xf32>
    %81 = vector.broadcast %80 : vector<1x128xf32> to vector<256x128xf32>
    %82 = arith.addf %79, %81 : vector<256x128xf32>
    %83 = vector.shape_cast %82 : vector<256x128xf32> to vector<16x16x128xf32>
    %84 = arith.truncf %83 : vector<16x16x128xf32> to vector<16x16x128xbf16>
    %c0_79 = arith.constant 0 : index
    %c0_80 = arith.constant 0 : index
    %c0_81 = arith.constant 0 : index
    %c0_82 = arith.constant 0 : index
    %85 = vector.load %arg8[%c0_79, %c0_80, %c0_81, %c0_82] : memref<1x16x16x128xbf16, #tpu.memory_space<vmem>>, vector<1x16x16x128xbf16>
    %86 = vector.shape_cast %85 : vector<1x16x16x128xbf16> to vector<16x16x128xbf16>
    %87 = vector.shape_cast %84 : vector<16x16x128xbf16> to vector<1x16x16x128xbf16>
    tpu.vector_store %arg8[%c0_79, %c0_80, %c0_81, %c0_82], %87 {strides = array<i32>} : memref<1x16x16x128xbf16, #tpu.memory_space<vmem>>, vector<1x16x16x128xbf16>,
    return
  }
  func.func @transform_0(%arg0: i32) -> (i32, i32, i32, i32) {
    %c0_i32 = arith.constant 0 : i32
    %c0_i32_0 = arith.constant 0 : i32
    %c0_i32_1 = arith.constant 0 : i32
    %c0_i32_2 = arith.constant 0 : i32
    return %arg0, %c0_i32, %c0_i32_0, %c0_i32_1 : i32, i32, i32, i32
  }
  func.func @transform_1(%arg0: i32) -> (i32, i32) {
    %c0_i32 = arith.constant 0 : i32
    %c0_i32_0 = arith.constant 0 : i32
    %c0_i32_1 = arith.constant 0 : i32
    return %c0_i32, %c0_i32_0 : i32, i32
  }
  func.func @transform_2(%arg0: i32) -> (i32, i32) {
    %c0_i32 = arith.constant 0 : i32
    %c0_i32_0 = arith.constant 0 : i32
    %c0_i32_1 = arith.constant 0 : i32
    return %c0_i32, %c0_i32_0 : i32, i32
  }
  func.func @transform_3(%arg0: i32) -> (i32, i32) {
    %c0_i32 = arith.constant 0 : i32
    %c0_i32_0 = arith.constant 0 : i32
    %c0_i32_1 = arith.constant 0 : i32
    return %c0_i32, %c0_i32_0 : i32, i32
  }
  func.func @transform_4(%arg0: i32) -> (i32, i32) {
    %c0_i32 = arith.constant 0 : i32
    %c0_i32_0 = arith.constant 0 : i32
    %c0_i32_1 = arith.constant 0 : i32
    return %c0_i32, %c0_i32_0 : i32, i32
  }
  func.func @transform_5(%arg0: i32) -> (i32, i32, i32) {
    %c0_i32 = arith.constant 0 : i32
    %c0_i32_0 = arith.constant 0 : i32
    %c0_i32_1 = arith.constant 0 : i32
    %c0_i32_2 = arith.constant 0 : i32
    return %c0_i32, %c0_i32_0, %c0_i32_1 : i32, i32, i32
  }
  func.func @transform_6(%arg0: i32) -> (i32, i32) {
    %c0_i32 = arith.constant 0 : i32
    %c0_i32_0 = arith.constant 0 : i32
    %c0_i32_1 = arith.constant 0 : i32
    return %c0_i32, %c0_i32_0 : i32, i32
  }
  func.func @transform_7(%arg0: i32) -> (i32, i32, i32, i32) {
    %c0_i32 = arith.constant 0 : i32
    %c0_i32_0 = arith.constant 0 : i32
    %c0_i32_1 = arith.constant 0 : i32
    %c0_i32_2 = arith.constant 0 : i32
    return %arg0, %c0_i32, %c0_i32_0, %c0_i32_1 : i32, i32, i32, i32
  }
}

module attributes {stable_mosaic.version = 11 : i64} {
  func.func @_gn_conv_kernel(%arg0: i32, %arg1: memref<1x16x16x128xbf16, #tpu.memory_space<vmem>>, %arg2: memref<128x32xf32, #tpu.memory_space<vmem>>, %arg3: memref<32x128xf32, #tpu.memory_space<vmem>>, %arg4: memref<1x128xf32, #tpu.memory_space<vmem>>, %arg5: memref<1x128xf32, #tpu.memory_space<vmem>>, %arg6: memref<3x384x128xbf16, #tpu.memory_space<vmem>>, %arg7: memref<1x128xf32, #tpu.memory_space<vmem>>, %arg8: memref<1x16x16x32xf32, #tpu.memory_space<vmem>>, %arg9: memref<32x128xbf16, #tpu.memory_space<vmem>>, %arg10: memref<1x128xf32, #tpu.memory_space<vmem>>, %arg11: memref<1x16x16x128xf32, #tpu.memory_space<vmem>>, %arg12: memref<18x16x384xbf16, #tpu.memory_space<vmem>>, %arg13: memref<256x128xf32, #tpu.memory_space<vmem>>) attributes {dimension_semantics = [#tpu.dimension_semantics<parallel>], iteration_bounds = array<i64: 2>, scalar_prefetch = 0 : i64, scratch_operands = 2 : i64, tpu.core_type = #tpu.core_type<tc>, window_params = [{transform_indices = @transform_0, window_bounds = array<i64: 1, 16, 16, 128>}, {pipeline_mode = #tpu.pipeline_mode<synchronous>, transform_indices = @transform_1, window_bounds = array<i64: 128, 32>}, {pipeline_mode = #tpu.pipeline_mode<synchronous>, transform_indices = @transform_2, window_bounds = array<i64: 32, 128>}, {pipeline_mode = #tpu.pipeline_mode<synchronous>, transform_indices = @transform_3, window_bounds = array<i64: 1, 128>}, {pipeline_mode = #tpu.pipeline_mode<synchronous>, transform_indices = @transform_4, window_bounds = array<i64: 1, 128>}, {pipeline_mode = #tpu.pipeline_mode<synchronous>, transform_indices = @transform_5, window_bounds = array<i64: 3, 384, 128>}, {pipeline_mode = #tpu.pipeline_mode<synchronous>, transform_indices = @transform_6, window_bounds = array<i64: 1, 128>}, {transform_indices = @transform_7, window_bounds = array<i64: 1, 16, 16, 32>}, {pipeline_mode = #tpu.pipeline_mode<synchronous>, transform_indices = @transform_8, window_bounds = array<i64: 32, 128>}, {pipeline_mode = #tpu.pipeline_mode<synchronous>, transform_indices = @transform_9, window_bounds = array<i64: 1, 128>}, {transform_indices = @transform_10, window_bounds = array<i64: 1, 16, 16, 128>}]} {
    %c0 = arith.constant 0 : index
    %c0_0 = arith.constant 0 : index
    %c0_1 = arith.constant 0 : index
    %c0_2 = arith.constant 0 : index
    %0 = vector.load %arg1[%c0, %c0_0, %c0_1, %c0_2] : memref<1x16x16x128xbf16, #tpu.memory_space<vmem>>, vector<1x16x16x128xbf16>
    %1 = vector.shape_cast %0 : vector<1x16x16x128xbf16> to vector<16x16x128xbf16>
    %2 = arith.extf %1 : vector<16x16x128xbf16> to vector<16x16x128xf32>
    %cst = arith.constant dense<0.000000e+00> : vector<16x128xf32>
    %3 = vector.multi_reduction <add>, %2, %cst [0] : vector<16x16x128xf32> to vector<16x128xf32>
    %cst_3 = arith.constant dense<0.000000e+00> : vector<128xf32>
    %4 = vector.multi_reduction <add>, %3, %cst_3 [0] : vector<16x128xf32> to vector<128xf32>
    %5 = vector.shape_cast %4 : vector<128xf32> to vector<1x128xf32>
    %6 = arith.mulf %2, %2 : vector<16x16x128xf32>
    %cst_4 = arith.constant dense<0.000000e+00> : vector<16x128xf32>
    %7 = vector.multi_reduction <add>, %6, %cst_4 [0] : vector<16x16x128xf32> to vector<16x128xf32>
    %cst_5 = arith.constant dense<0.000000e+00> : vector<128xf32>
    %8 = vector.multi_reduction <add>, %7, %cst_5 [0] : vector<16x128xf32> to vector<128xf32>
    %9 = vector.shape_cast %8 : vector<128xf32> to vector<1x128xf32>
    %c0_6 = arith.constant 0 : index
    %c0_7 = arith.constant 0 : index
    %10 = vector.load %arg2[%c0_6, %c0_7] : memref<128x32xf32, #tpu.memory_space<vmem>>, vector<128x32xf32>
    %cst_8 = arith.constant dense<0.000000e+00> : vector<1x32xf32>
    %11 = tpu.matmul %5, %10, %cst_8 {dimension_numbers = #tpu.dot_dimension_numbers<[1], [0], [0], [1], [0, 0, 1, 1], [], []>} : vector<1x128xf32>, vector<128x32xf32>, vector<1x32xf32> -> vector<1x32xf32>
    %cst_9 = arith.constant 0.001953125 : f32
    %12 = vector.broadcast %cst_9 : f32 to vector<1x32xf32>
    %13 = arith.mulf %11, %12 : vector<1x32xf32>
    %c0_10 = arith.constant 0 : index
    %c0_11 = arith.constant 0 : index
    %14 = vector.load %arg2[%c0_10, %c0_11] : memref<128x32xf32, #tpu.memory_space<vmem>>, vector<128x32xf32>
    %cst_12 = arith.constant dense<0.000000e+00> : vector<1x32xf32>
    %15 = tpu.matmul %9, %14, %cst_12 {dimension_numbers = #tpu.dot_dimension_numbers<[1], [0], [0], [1], [0, 0, 1, 1], [], []>} : vector<1x128xf32>, vector<128x32xf32>, vector<1x32xf32> -> vector<1x32xf32>
    %cst_13 = arith.constant 0.001953125 : f32
    %16 = vector.broadcast %cst_13 : f32 to vector<1x32xf32>
    %17 = arith.mulf %15, %16 : vector<1x32xf32>
    %18 = arith.mulf %13, %13 : vector<1x32xf32>
    %19 = arith.subf %17, %18 : vector<1x32xf32>
    %cst_14 = arith.constant 0.000000e+00 : f32
    %20 = vector.broadcast %cst_14 : f32 to vector<1x32xf32>
    %21 = arith.maximumf %19, %20 : vector<1x32xf32>
    %cst_15 = arith.constant 9.99999974E-6 : f32
    %22 = vector.broadcast %cst_15 : f32 to vector<1x32xf32>
    %23 = arith.addf %21, %22 : vector<1x32xf32>
    %24 = math.rsqrt %23 : vector<1x32xf32>
    %c0_16 = arith.constant 0 : index
    %c0_17 = arith.constant 0 : index
    %25 = vector.load %arg3[%c0_16, %c0_17] : memref<32x128xf32, #tpu.memory_space<vmem>>, vector<32x128xf32>
    %cst_18 = arith.constant dense<0.000000e+00> : vector<1x128xf32>
    %26 = tpu.matmul %13, %25, %cst_18 {dimension_numbers = #tpu.dot_dimension_numbers<[1], [0], [0], [1], [0, 0, 1, 1], [], []>} : vector<1x32xf32>, vector<32x128xf32>, vector<1x128xf32> -> vector<1x128xf32>
    %c0_19 = arith.constant 0 : index
    %c0_20 = arith.constant 0 : index
    %27 = vector.load %arg3[%c0_19, %c0_20] : memref<32x128xf32, #tpu.memory_space<vmem>>, vector<32x128xf32>
    %cst_21 = arith.constant dense<0.000000e+00> : vector<1x128xf32>
    %28 = tpu.matmul %24, %27, %cst_21 {dimension_numbers = #tpu.dot_dimension_numbers<[1], [0], [0], [1], [0, 0, 1, 1], [], []>} : vector<1x32xf32>, vector<32x128xf32>, vector<1x128xf32> -> vector<1x128xf32>
    %c0_22 = arith.constant 0 : index
    %c0_23 = arith.constant 0 : index
    %29 = vector.load %arg4[%c0_22, %c0_23] : memref<1x128xf32, #tpu.memory_space<vmem>>, vector<1x128xf32>
    %30 = arith.mulf %28, %29 : vector<1x128xf32>
    %c0_24 = arith.constant 0 : index
    %c0_25 = arith.constant 0 : index
    %31 = vector.load %arg5[%c0_24, %c0_25] : memref<1x128xf32, #tpu.memory_space<vmem>>, vector<1x128xf32>
    %32 = arith.mulf %26, %30 : vector<1x128xf32>
    %33 = arith.subf %31, %32 : vector<1x128xf32>
    %34 = vector.shape_cast %30 : vector<1x128xf32> to vector<1x1x128xf32>
    %35 = vector.broadcast %34 : vector<1x1x128xf32> to vector<16x16x128xf32>
    %36 = arith.mulf %2, %35 : vector<16x16x128xf32>
    %37 = vector.shape_cast %33 : vector<1x128xf32> to vector<1x1x128xf32>
    %38 = vector.broadcast %37 : vector<1x1x128xf32> to vector<16x16x128xf32>
    %39 = arith.addf %36, %38 : vector<16x16x128xf32>
    %40 = arith.truncf %39 : vector<16x16x128xf32> to vector<16x16x128xbf16>
    %cst_26 = arith.constant 0.000000e+00 : bf16
    %41 = vector.broadcast %cst_26 : bf16 to vector<1x16x384xbf16>
    %c0_27 = arith.constant 0 : index
    %c0_28 = arith.constant 0 : index
    %c0_29 = arith.constant 0 : index
    %42 = vector.load %arg12[%c0_27, %c0_28, %c0_29] : memref<18x16x384xbf16, #tpu.memory_space<vmem>>, vector<1x16x384xbf16>
    tpu.vector_store %arg12[%c0_27, %c0_28, %c0_29], %41 {strides = array<i32>} : memref<18x16x384xbf16, #tpu.memory_space<vmem>>, vector<1x16x384xbf16>,
    %c17 = arith.constant 17 : index
    %c0_30 = arith.constant 0 : index
    %c0_31 = arith.constant 0 : index
    %43 = vector.load %arg12[%c17, %c0_30, %c0_31] : memref<18x16x384xbf16, #tpu.memory_space<vmem>>, vector<1x16x384xbf16>
    tpu.vector_store %arg12[%c17, %c0_30, %c0_31], %41 {strides = array<i32>} : memref<18x16x384xbf16, #tpu.memory_space<vmem>>, vector<1x16x384xbf16>,
    %cst_32 = arith.constant 0.000000e+00 : bf16
    %44 = vector.broadcast %cst_32 : bf16 to vector<16x1x128xbf16>
    %c1 = arith.constant 1 : index
    %c0_33 = arith.constant 0 : index
    %c0_34 = arith.constant 0 : index
    %45 = vector.load %arg12[%c1, %c0_33, %c0_34] : memref<18x16x384xbf16, #tpu.memory_space<vmem>>, vector<16x1x128xbf16>
    tpu.vector_store %arg12[%c1, %c0_33, %c0_34], %44 {strides = array<i32>} : memref<18x16x384xbf16, #tpu.memory_space<vmem>>, vector<16x1x128xbf16>,
    %c1_35 = arith.constant 1 : index
    %c15 = arith.constant 15 : index
    %c256 = arith.constant 256 : index
    %46 = vector.load %arg12[%c1_35, %c15, %c256] : memref<18x16x384xbf16, #tpu.memory_space<vmem>>, vector<16x1x128xbf16>
    tpu.vector_store %arg12[%c1_35, %c15, %c256], %44 {strides = array<i32>} : memref<18x16x384xbf16, #tpu.memory_space<vmem>>, vector<16x1x128xbf16>,
    %47 = vector.extract_strided_slice %40 {offsets = [0, 0, 0], sizes = [16, 15, 128], strides = [1, 1, 1]} : vector<16x16x128xbf16> to vector<16x15x128xbf16>
    %c1_36 = arith.constant 1 : index
    %c1_37 = arith.constant 1 : index
    %c0_38 = arith.constant 0 : index
    %48 = vector.load %arg12[%c1_36, %c1_37, %c0_38] : memref<18x16x384xbf16, #tpu.memory_space<vmem>>, vector<16x15x128xbf16>
    tpu.vector_store %arg12[%c1_36, %c1_37, %c0_38], %47 {strides = array<i32>} : memref<18x16x384xbf16, #tpu.memory_space<vmem>>, vector<16x15x128xbf16>,
    %c1_39 = arith.constant 1 : index
    %c0_40 = arith.constant 0 : index
    %c128 = arith.constant 128 : index
    %49 = vector.load %arg12[%c1_39, %c0_40, %c128] : memref<18x16x384xbf16, #tpu.memory_space<vmem>>, vector<16x16x128xbf16>
    tpu.vector_store %arg12[%c1_39, %c0_40, %c128], %40 {strides = array<i32>} : memref<18x16x384xbf16, #tpu.memory_space<vmem>>, vector<16x16x128xbf16>,
    %50 = vector.extract_strided_slice %40 {offsets = [0, 1, 0], sizes = [16, 15, 128], strides = [1, 1, 1]} : vector<16x16x128xbf16> to vector<16x15x128xbf16>
    %c1_41 = arith.constant 1 : index
    %c0_42 = arith.constant 0 : index
    %c256_43 = arith.constant 256 : index
    %51 = vector.load %arg12[%c1_41, %c0_42, %c256_43] : memref<18x16x384xbf16, #tpu.memory_space<vmem>>, vector<16x15x128xbf16>
    tpu.vector_store %arg12[%c1_41, %c0_42, %c256_43], %50 {strides = array<i32>} : memref<18x16x384xbf16, #tpu.memory_space<vmem>>, vector<16x15x128xbf16>,
    %c0_44 = arith.constant 0 : index
    %c0_45 = arith.constant 0 : index
    %c0_46 = arith.constant 0 : index
    %52 = vector.load %arg12[%c0_44, %c0_45, %c0_46] : memref<18x16x384xbf16, #tpu.memory_space<vmem>>, vector<16x16x384xbf16>
    %53 = vector.shape_cast %52 : vector<16x16x384xbf16> to vector<256x384xbf16>
    %c0_47 = arith.constant 0 : index
    %c0_48 = arith.constant 0 : index
    %c0_49 = arith.constant 0 : index
    %54 = vector.load %arg6[%c0_47, %c0_48, %c0_49] : memref<3x384x128xbf16, #tpu.memory_space<vmem>>, vector<1x384x128xbf16>
    %55 = vector.shape_cast %54 : vector<1x384x128xbf16> to vector<384x128xbf16>
    %cst_50 = arith.constant dense<0.000000e+00> : vector<256x128xf32>
    %56 = tpu.matmul %53, %55, %cst_50 {dimension_numbers = #tpu.dot_dimension_numbers<[1], [0], [0], [1], [0, 0, 1, 1], [], []>} : vector<256x384xbf16>, vector<384x128xbf16>, vector<256x128xf32> -> vector<256x128xf32>
    %c0_51 = arith.constant 0 : index
    %c0_52 = arith.constant 0 : index
    %57 = vector.load %arg13[%c0_51, %c0_52] : memref<256x128xf32, #tpu.memory_space<vmem>>, vector<256x128xf32>
    tpu.vector_store %arg13[%c0_51, %c0_52], %56 {strides = array<i32>} : memref<256x128xf32, #tpu.memory_space<vmem>>, vector<256x128xf32>,
    %c0_53 = arith.constant 0 : index
    %c0_54 = arith.constant 0 : index
    %58 = vector.load %arg13[%c0_53, %c0_54] : memref<256x128xf32, #tpu.memory_space<vmem>>, vector<256x128xf32>
    %c1_55 = arith.constant 1 : index
    %c0_56 = arith.constant 0 : index
    %c0_57 = arith.constant 0 : index
    %59 = vector.load %arg12[%c1_55, %c0_56, %c0_57] : memref<18x16x384xbf16, #tpu.memory_space<vmem>>, vector<16x16x384xbf16>
    %60 = vector.shape_cast %59 : vector<16x16x384xbf16> to vector<256x384xbf16>
    %c1_58 = arith.constant 1 : index
    %c0_59 = arith.constant 0 : index
    %c0_60 = arith.constant 0 : index
    %61 = vector.load %arg6[%c1_58, %c0_59, %c0_60] : memref<3x384x128xbf16, #tpu.memory_space<vmem>>, vector<1x384x128xbf16>
    %62 = vector.shape_cast %61 : vector<1x384x128xbf16> to vector<384x128xbf16>
    %cst_61 = arith.constant dense<0.000000e+00> : vector<256x128xf32>
    %63 = tpu.matmul %60, %62, %cst_61 {dimension_numbers = #tpu.dot_dimension_numbers<[1], [0], [0], [1], [0, 0, 1, 1], [], []>} : vector<256x384xbf16>, vector<384x128xbf16>, vector<256x128xf32> -> vector<256x128xf32>
    %64 = arith.addf %58, %63 : vector<256x128xf32>
    %c0_62 = arith.constant 0 : index
    %c0_63 = arith.constant 0 : index
    %65 = vector.load %arg13[%c0_62, %c0_63] : memref<256x128xf32, #tpu.memory_space<vmem>>, vector<256x128xf32>
    tpu.vector_store %arg13[%c0_62, %c0_63], %64 {strides = array<i32>} : memref<256x128xf32, #tpu.memory_space<vmem>>, vector<256x128xf32>,
    %c0_64 = arith.constant 0 : index
    %c0_65 = arith.constant 0 : index
    %66 = vector.load %arg13[%c0_64, %c0_65] : memref<256x128xf32, #tpu.memory_space<vmem>>, vector<256x128xf32>
    %c2 = arith.constant 2 : index
    %c0_66 = arith.constant 0 : index
    %c0_67 = arith.constant 0 : index
    %67 = vector.load %arg12[%c2, %c0_66, %c0_67] : memref<18x16x384xbf16, #tpu.memory_space<vmem>>, vector<16x16x384xbf16>
    %68 = vector.shape_cast %67 : vector<16x16x384xbf16> to vector<256x384xbf16>
    %c2_68 = arith.constant 2 : index
    %c0_69 = arith.constant 0 : index
    %c0_70 = arith.constant 0 : index
    %69 = vector.load %arg6[%c2_68, %c0_69, %c0_70] : memref<3x384x128xbf16, #tpu.memory_space<vmem>>, vector<1x384x128xbf16>
    %70 = vector.shape_cast %69 : vector<1x384x128xbf16> to vector<384x128xbf16>
    %cst_71 = arith.constant dense<0.000000e+00> : vector<256x128xf32>
    %71 = tpu.matmul %68, %70, %cst_71 {dimension_numbers = #tpu.dot_dimension_numbers<[1], [0], [0], [1], [0, 0, 1, 1], [], []>} : vector<256x384xbf16>, vector<384x128xbf16>, vector<256x128xf32> -> vector<256x128xf32>
    %72 = arith.addf %66, %71 : vector<256x128xf32>
    %c0_72 = arith.constant 0 : index
    %c0_73 = arith.constant 0 : index
    %73 = vector.load %arg13[%c0_72, %c0_73] : memref<256x128xf32, #tpu.memory_space<vmem>>, vector<256x128xf32>
    tpu.vector_store %arg13[%c0_72, %c0_73], %72 {strides = array<i32>} : memref<256x128xf32, #tpu.memory_space<vmem>>, vector<256x128xf32>,
    %c0_74 = arith.constant 0 : index
    %c0_75 = arith.constant 0 : index
    %74 = vector.load %arg13[%c0_74, %c0_75] : memref<256x128xf32, #tpu.memory_space<vmem>>, vector<256x128xf32>
    %c0_76 = arith.constant 0 : index
    %c0_77 = arith.constant 0 : index
    %75 = vector.load %arg7[%c0_76, %c0_77] : memref<1x128xf32, #tpu.memory_space<vmem>>, vector<1x128xf32>
    %76 = vector.broadcast %75 : vector<1x128xf32> to vector<256x128xf32>
    %77 = arith.addf %74, %76 : vector<256x128xf32>
    %c0_78 = arith.constant 0 : index
    %c0_79 = arith.constant 0 : index
    %c0_80 = arith.constant 0 : index
    %c0_81 = arith.constant 0 : index
    %78 = vector.load %arg8[%c0_78, %c0_79, %c0_80, %c0_81] : memref<1x16x16x32xf32, #tpu.memory_space<vmem>>, vector<1x16x16x32xf32>
    %79 = vector.shape_cast %78 : vector<1x16x16x32xf32> to vector<16x16x32xf32>
    %80 = arith.truncf %79 : vector<16x16x32xf32> to vector<16x16x32xbf16>
    %81 = vector.shape_cast %80 : vector<16x16x32xbf16> to vector<256x32xbf16>
    %c0_82 = arith.constant 0 : index
    %c0_83 = arith.constant 0 : index
    %82 = vector.load %arg9[%c0_82, %c0_83] : memref<32x128xbf16, #tpu.memory_space<vmem>>, vector<32x128xbf16>
    %cst_84 = arith.constant dense<0.000000e+00> : vector<256x128xf32>
    %83 = tpu.matmul %81, %82, %cst_84 {dimension_numbers = #tpu.dot_dimension_numbers<[1], [0], [0], [1], [0, 0, 1, 1], [], []>} : vector<256x32xbf16>, vector<32x128xbf16>, vector<256x128xf32> -> vector<256x128xf32>
    %84 = arith.addf %77, %83 : vector<256x128xf32>
    %c0_85 = arith.constant 0 : index
    %c0_86 = arith.constant 0 : index
    %85 = vector.load %arg10[%c0_85, %c0_86] : memref<1x128xf32, #tpu.memory_space<vmem>>, vector<1x128xf32>
    %86 = vector.broadcast %85 : vector<1x128xf32> to vector<256x128xf32>
    %87 = arith.addf %84, %86 : vector<256x128xf32>
    %88 = vector.shape_cast %87 : vector<256x128xf32> to vector<16x16x128xf32>
    %c0_87 = arith.constant 0 : index
    %c0_88 = arith.constant 0 : index
    %c0_89 = arith.constant 0 : index
    %c0_90 = arith.constant 0 : index
    %89 = vector.load %arg11[%c0_87, %c0_88, %c0_89, %c0_90] : memref<1x16x16x128xf32, #tpu.memory_space<vmem>>, vector<1x16x16x128xf32>
    %90 = vector.shape_cast %89 : vector<1x16x16x128xf32> to vector<16x16x128xf32>
    %91 = vector.shape_cast %88 : vector<16x16x128xf32> to vector<1x16x16x128xf32>
    tpu.vector_store %arg11[%c0_87, %c0_88, %c0_89, %c0_90], %91 {strides = array<i32>} : memref<1x16x16x128xf32, #tpu.memory_space<vmem>>, vector<1x16x16x128xf32>,
    return
  }
  func.func @transform_0(%arg0: i32) -> (i32, i32, i32, i32) {
    %c0_i32 = arith.constant 0 : i32
    %c0_i32_0 = arith.constant 0 : i32
    %c0_i32_1 = arith.constant 0 : i32
    %c0_i32_2 = arith.constant 0 : i32
    return %arg0, %c0_i32, %c0_i32_0, %c0_i32_1 : i32, i32, i32, i32
  }
  func.func @transform_1(%arg0: i32) -> (i32, i32) {
    %c0_i32 = arith.constant 0 : i32
    %c0_i32_0 = arith.constant 0 : i32
    %c0_i32_1 = arith.constant 0 : i32
    return %c0_i32, %c0_i32_0 : i32, i32
  }
  func.func @transform_2(%arg0: i32) -> (i32, i32) {
    %c0_i32 = arith.constant 0 : i32
    %c0_i32_0 = arith.constant 0 : i32
    %c0_i32_1 = arith.constant 0 : i32
    return %c0_i32, %c0_i32_0 : i32, i32
  }
  func.func @transform_3(%arg0: i32) -> (i32, i32) {
    %c0_i32 = arith.constant 0 : i32
    %c0_i32_0 = arith.constant 0 : i32
    %c0_i32_1 = arith.constant 0 : i32
    return %c0_i32, %c0_i32_0 : i32, i32
  }
  func.func @transform_4(%arg0: i32) -> (i32, i32) {
    %c0_i32 = arith.constant 0 : i32
    %c0_i32_0 = arith.constant 0 : i32
    %c0_i32_1 = arith.constant 0 : i32
    return %c0_i32, %c0_i32_0 : i32, i32
  }
  func.func @transform_5(%arg0: i32) -> (i32, i32, i32) {
    %c0_i32 = arith.constant 0 : i32
    %c0_i32_0 = arith.constant 0 : i32
    %c0_i32_1 = arith.constant 0 : i32
    %c0_i32_2 = arith.constant 0 : i32
    return %c0_i32, %c0_i32_0, %c0_i32_1 : i32, i32, i32
  }
  func.func @transform_6(%arg0: i32) -> (i32, i32) {
    %c0_i32 = arith.constant 0 : i32
    %c0_i32_0 = arith.constant 0 : i32
    %c0_i32_1 = arith.constant 0 : i32
    return %c0_i32, %c0_i32_0 : i32, i32
  }
  func.func @transform_7(%arg0: i32) -> (i32, i32, i32, i32) {
    %c0_i32 = arith.constant 0 : i32
    %c0_i32_0 = arith.constant 0 : i32
    %c0_i32_1 = arith.constant 0 : i32
    %c0_i32_2 = arith.constant 0 : i32
    return %arg0, %c0_i32, %c0_i32_0, %c0_i32_1 : i32, i32, i32, i32
  }
  func.func @transform_8(%arg0: i32) -> (i32, i32) {
    %c0_i32 = arith.constant 0 : i32
    %c0_i32_0 = arith.constant 0 : i32
    %c0_i32_1 = arith.constant 0 : i32
    return %c0_i32, %c0_i32_0 : i32, i32
  }
  func.func @transform_9(%arg0: i32) -> (i32, i32) {
    %c0_i32 = arith.constant 0 : i32
    %c0_i32_0 = arith.constant 0 : i32
    %c0_i32_1 = arith.constant 0 : i32
    return %c0_i32, %c0_i32_0 : i32, i32
  }
  func.func @transform_10(%arg0: i32) -> (i32, i32, i32, i32) {
    %c0_i32 = arith.constant 0 : i32
    %c0_i32_0 = arith.constant 0 : i32
    %c0_i32_1 = arith.constant 0 : i32
    %c0_i32_2 = arith.constant 0 : i32
    return %arg0, %c0_i32, %c0_i32_0, %c0_i32_1 : i32, i32, i32, i32
  }
}

</mosaic_0001>

<bundles_post_ra>
// kernel: residual_block_forward.2
= control target key start
LH: loop header
LB: loop body
LE: loop exit
PB: predicated region body
PF: predicated region fallthrough
CT: control target
= control target key end

     0   :  { %12 = vsyncpa [#allocation5], 0  ;;  %s6631_s0 = inlined_call_operand.hbm [shape: f32[2,16,16,32], index: 0, kind: input, shape index: {}]   ;;  %s6632_s1 = inlined_call_operand.vmem [shape: f32[32,32], index: 1, kind: input, shape index: {}, may-alias: {1,2}]   ;;  %s6633_s2 = inlined_call_operand.vmem [shape: f32[32,32], index: 2, kind: input, shape index: {}, may-alias: {1,2}]   ;;  %s6634_s3 = inlined_call_operand.vmem [shape: f32[1,32], index: 3, kind: input, shape index: {}]   ;;  %s6635_s4 = inlined_call_operand.vmem [shape: f32[1,32], index: 4, kind: input, shape index: {}]   ;;  %s6636_s5 = inlined_call_operand.vmem [shape: bf16[3,96,128], index: 5, kind: input, shape index: {}]   ;;  %s6637_s6 = inlined_call_operand.vmem [shape: f32[1,128], index: 6, kind: input, shape index: {}]   ;;  %s6638_s7 = inlined_call_operand.vmem [shape: bf16[2,16,16,128], index: 7, kind: output, shape index: {}]  }
   0x1   :  { %14 = vsyncpa [#allocation5 + $0x1], 0  ;;  %s4498_s24 = smov 0   ;;  %s4500_s25 = smov 0  }
   0x2   :  { %s4502_s26 = smov 0   ;;  %s4504_s27 = smov 0  }
   0x3 LB: > { %s4517_s28 = sadd.s32 4294967295, %s4451_s27   ;;  %s4520_s29 = sadd.s32 1, %s4451_s27   ;;  %s4451_s27 = sphi %s4504_s27, %s6766_s27   ;;  %s4447_s26 = sphi %s4502_s26, %s6765_s26   ;;  %s4443_s25 = sphi %s4500_s25, %s6764_s25   ;;  %s4439_s24 = sphi %s4498_s24, %s6763_s24  }
   0x4   : > { %s24_s30 = ssub.s32 %s4451_s27, %s4520_s29  ;;  %s27_s8 = sadd.s32 1, %s4447_s26 }
   0x5   : > { %p25_p0 = scmp.eq.s32.totalorder %s24_s30, 0  ;;  %p34_p1 = scmp.ne.s32.totalorder %s4447_s26, %s4443_s25 }
   0x6   : > { %p35_p2 = scmp.eq.s32.totalorder %s4451_s27, 0  ;;  %p40_p3 = scmp.ne.s32.totalorder %s4443_s25, %s4439_s24 }
   0x7   : > { %s4530_s9 = scalar_select %p25_p0, %s4447_s26, %s27_s8  }
   0x8   : > { %p4532_p4 = por %p35_p2, %p34_p1  ;;  %p41_p5 = scmp.eq.s32.totalorder %s4517_s28, 0 }
   0x9   : > { %p4197_p6 = scmp.lt.s32.totalorder %s4451_s27, 2  ;;  %s234_s12 = sand.u32 1, %s4447_s26  }
   0xa   : > { %p4538_p7 = por %p41_p5, %p40_p3  ;;  %s3629_s13 = sshll.u32 %s234_s12, 8 }
   0xb   : > { %s4010_s14 = sshll.u32 %s4451_s27, 8  ;;  %s238_s18 = scalar_lea.vmem [#allocation4], %s3629_s13 }
   0xc   : > { %s243_s17 = scalar_lea.hbm %s6631_s0, %s4010_s14  ;;  %s246_s19 = sshll.u32 %s238_s18, 4  ;;  %s247_s19 = int_to_ptr.vmem [resolvable:$true] %s246_s19 }
   0xd   : > { %s244_s20 = sshll.u32 %s243_s17, 4  ;;  %p4549_p8 = pnand %p4197_p6, %p4532_p4  ;;  %s245_s20 = int_to_ptr.hbm [resolvable:$true] %s244_s20 }
   0xe   : > { %p3632_p9 = scmp.ge.s32.totalorder %s4451_s27, 1  ;;  %s235_s22 = scalar_lea.sflag [#allocation5], %s234_s12 }
   0xf   : > { %s4387_s23 = sshra.s32 %s245_s20, 4  ;;  %p4391_p11 = pneg %p4549_p8  ;;  %s4388_s23 = int_to_ptr.hbm [resolvable:$true] %s4387_s23 }
  0x10   : > { %s4389_s24 = scalar_lea.hbm %s4388_s23, 256  ;;  %s4394_s13 = scalar_lea.hbm %s6631_s0, 512 }
  0x11   : > { %p4390_p10 = scmp.ne.s32.totalorder %s4388_s23, %s4389_s24  ;;  %p4395_p0 = scmp.lt.s32.totalorder %s4388_s23, %s6631_s0 }
  0x12   : > { %p4396_p1 = scmp.lt.s32.totalorder %s4394_s13, %s4389_s24 }
  0x13   : > { %p4392_p12 = pnand %p4391_p11, %p4390_p10 }
  0x14   : > { %p4397_p2 = por %p4396_p1, %p4395_p0 }
  0x15   : > { %p4393_p13 = pneg %p4392_p12 }
  0x17   : > { %p4398_p3 = pnand %p4397_p2, %p4393_p13 }
  0x19   : > { %4401 = shalt.err (!%p4398_p3)
}
  0x1a   : > { %s4453_s12 = smov 128   ;;  %s4454_s15 = smov 8  }
  0x1b   : > { %4196 = dma.hbm_to_vmem [thread:$0]  (!%p4549_p8), %s245_s20, 4096, %s247_s19, %s235_s22, %s4453_s12, %s4453_s12, %s4454_s15  }
  0x1c   : > { %p254_p4 = scmp.lt.s32.totalorder %s4451_s27, 3 }
  0x1e   : > { %p255_p5 = pnand %p3632_p9, %p254_p4 }
  0x1f   : > { %s260_s16 = sand.u32 (!%p255_p5), 1, %s4443_s25  }
  0x20   : > { %258 = sbr.rel (%p255_p5) target bundleno = 976 (0x3d0), region = 48  ;;  %s3633_s17 = sshll.u32 (!%p255_p5), %s260_s16, 8 }
  0x21   : > { %s261_s18 = scalar_lea.sflag (!%p255_p5), [#allocation5], %s260_s16  ;;  %s4568_s23 = scalar_lea.vmem (!%p255_p5), [#allocation4], %s3633_s17 }
  0x25   : > { %4434 = dma.done.wait (%p4538_p7), %s261_s18, 4096  }
  0x26   : > { %4436 = vsyncadd (%p4538_p7), %s261_s18, 4294963200  ;;  %vm334_vm0 = vcmask 261120   ;;  %v512_v0 = vld [vmem:[%s6632_s1 + $0x18] sm:$0xff]  ;;  %v511_v1 = vld [vmem:[%s6632_s1 + $0x10] sm:$0xff]  ;;  %vm1377_vm4 = vcmask 253952   ;;  %s4455_s21 = smov 32  }
  0x27   : > { %528 = vmatpush.msra.mxu0 %v512_v0  ;;  %552 = vmatpush.msra.mxu1 %v512_v0  ;;  %v510_v2 = vld [vmem:[%s6632_s1 + $0x8] sm:$0xff]  ;;  %v4584_v3 = vld [vmem:[%s4568_s23] sm:$0xff]  ;;  %v4587_v4 = vld [vmem:[%s4568_s23 + $0x8] sm:$0xff]  ;;  %vm6639_vm5 = vsmask.f32 256  ;;  %s4456_s11 = smov 64  }
  0x28   : > { %v4590_v5 = vld [vmem:[%s4568_s23 + $0x10] sm:$0xff]  ;;  %v4593_v6 = vld [vmem:[%s4568_s23 + $0x18] sm:$0xff]  ;;  %v4596_v7 = vld [vmem:[%s4568_s23 + $0x20] sm:$0xff]  ;;  %v335_v8 = vsel %vm334_vm0, %v4584_v3, 0.0  ;;  %v366_v9 = vsel %vm334_vm0, %v4587_v4, 0.0  ;;  %v406_v62 = vmul.f32 %v4584_v3, %v4584_v3  ;;  %v407_v63 = vmul.f32 %v4587_v4, %v4587_v4  ;;  %p296_p6 = scmp.lt.s32.totalorder %s4517_s28, 1 }
  0x29   : > { %529 = vmatpush.msra.mxu0 %v511_v1  ;;  %553 = vmatpush.msra.mxu1 %v511_v1  ;;  %v4603_v10 = vld [vmem:[%s4568_s23 + $0x28] sm:$0xff]  ;;  %v4606_v11 = vld [vmem:[%s4568_s23 + $0x30] sm:$0xff]  ;;  %v4609_v12 = vld [vmem:[%s4568_s23 + $0x38] sm:$0xff]  ;;  %v336_v13 = vsel %vm334_vm0, %v4590_v5, 0.0  ;;  %v338_v14 = vsel %vm334_vm0, %v4596_v7, 0.0  ;;  %v367_v15 = vsel %vm334_vm0, %v4593_v6, 0.0 }
  0x2a   : > { %v509_v16 = vld [vmem:[%s6632_s1] sm:$0xff]  ;;  %v4621_v17 = vld [vmem:[%s4568_s23 + $0x40] sm:$0xff]  ;;  %v4624_v18 = vld [vmem:[%s4568_s23 + $0x48] sm:$0xff]  ;;  %v337_v19 = vadd.f32 %v336_v13, %v335_v8  ;;  %v368_v20 = vadd.f32 %v367_v15, %v366_v9  ;;  %v369_v21 = vsel %vm334_vm0, %v4603_v10, 0.0  ;;  %v340_v22 = vsel %vm334_vm0, %v4606_v11, 0.0  ;;  %s6768_s28 = smov (!%p296_p6, %s4517_s28), 1 }
  0x2b   : > { %530 = vmatpush.msra.mxu0 %v510_v2  ;;  %554 = vmatpush.msra.mxu1 %v510_v2  ;;  %v371_v23 = vsel %vm334_vm0, %v4609_v12, 0.0  ;;  %v4633_v24 = vld [vmem:[%s4568_s23 + $0x50] sm:$0xff]  ;;  %v4636_v25 = vld [vmem:[%s4568_s23 + $0x58] sm:$0xff]  ;;  %v342_v28 = vsel %vm334_vm0, %v4621_v17, 0.0  ;;  %v373_v29 = vsel %vm334_vm0, %v4624_v18, 0.0  ;;  %v4643_v30 = vld [vmem:[%s4568_s23 + $0x60] sm:$0xff]  ;;  %v408_v13 = vmul.f32 %v4590_v5, %v4590_v5 }
  0x2c   : > { %v339_v26 = vadd.f32 %v338_v14, %v337_v19  ;;  %v370_v27 = vadd.f32 %v369_v21, %v368_v20  ;;  %v4646_v31 = vld [vmem:[%s4568_s23 + $0x68] sm:$0xff]  ;;  %v344_v34 = vsel %vm334_vm0, %v4633_v24, 0.0  ;;  %v375_v35 = vsel %vm334_vm0, %v4636_v25, 0.0  ;;  %v4653_v36 = vld [vmem:[%s4568_s23 + $0x70] sm:$0xff]  ;;  %v4656_v37 = vld [vmem:[%s4568_s23 + $0x78] sm:$0xff]  ;;  %s4011_s10 = sshll.u32 %s6768_s28, 7 }
  0x2d   : > { %531 = vmatpush.msra.mxu0 %v509_v16  ;;  %555 = vmatpush.msra.mxu1 %v509_v16  ;;  %v346_v40 = vsel %vm334_vm0, %v4643_v30, 0.0  ;;  %v377_v41 = vsel %vm334_vm0, %v4646_v31, 0.0  ;;  %v4663_v42 = vld [vmem:[%s4568_s23 + $0x80] sm:$0xff]  ;;  %v4666_v43 = vld [vmem:[%s4568_s23 + $0x88] sm:$0xff]  ;;  %v348_v46 = vsel %vm334_vm0, %v4653_v36, 0.0  ;;  %v379_v47 = vsel %vm334_vm0, %v4656_v37, 0.0  ;;  %vm4875_vm6 = vmand %vm1377_vm4, %vm6639_vm5  ;;  %s6517_s15 = scalar_lea.vmem %s6638_s7, %s4011_s10 }
  0x2e   : > { %v341_v32 = vadd.f32 %v340_v22, %v339_v26  ;;  %v372_v33 = vadd.f32 %v371_v23, %v370_v27  ;;  %v4673_v48 = vld [vmem:[%s4568_s23 + $0x90] sm:$0xff]  ;;  %v4676_v49 = vld [vmem:[%s4568_s23 + $0x98] sm:$0xff]  ;;  %v350_v52 = vsel %vm334_vm0, %v4663_v42, 0.0  ;;  %v381_v53 = vsel %vm334_vm0, %v4666_v43, 0.0  ;;  %v4683_v54 = vld [vmem:[%s4568_s23 + $0xa0] sm:$0xff] }
  0x2f   : > { %v4686_v55 = vld [vmem:[%s4568_s23 + $0xa8] sm:$0xff]  ;;  %v4689_v56 = vld [vmem:[%s4568_s23 + $0xb0] sm:$0xff]  ;;  %v4692_v59 = vld [vmem:[%s4568_s23 + $0xc0] sm:$0xff]  ;;  %v352_v60 = vsel %vm334_vm0, %v4673_v48, 0.0  ;;  %v383_v61 = vsel %vm334_vm0, %v4676_v49, 0.0  ;;  %v409_v14 = vmul.f32 %v4593_v6, %v4593_v6  ;;  %v354_v19 = vsel %vm334_vm0, %v4683_v54, 0.0 }
  0x30   : > { %v343_v38 = vadd.f32 %v342_v28, %v341_v32  ;;  %v374_v39 = vadd.f32 %v373_v29, %v372_v33  ;;  %v4703_v0 = vld [vmem:[%s4568_s23 + $0xb8] sm:$0xff]  ;;  %v4706_v1 = vld [vmem:[%s4568_s23 + $0xd0] sm:$0xff]  ;;  %v4709_v2 = vld [vmem:[%s4568_s23 + $0xe0] sm:$0xff]  ;;  %v356_v20 = vsel %vm334_vm0, %v4689_v56, 0.0  ;;  %v385_v21 = vsel %vm334_vm0, %v4686_v55, 0.0 }
  0x31   : > { %v4716_v15 = vld [vmem:[%s4568_s23 + $0xc8] sm:$0xff]  ;;  %v4719_v16 = vld [vmem:[%s4568_s23 + $0xf0] sm:$0xff]  ;;  %v410_v22 = vmul.f32 %v4596_v7, %v4596_v7  ;;  %v358_v26 = vsel %vm334_vm0, %v4692_v59, 0.0  ;;  %v411_v28 = vmul.f32 %v4603_v10, %v4603_v10  ;;  %v4734_v29 = vld [vmem:[%s4568_s23 + $0xd8] sm:$0xff]  ;;  %v360_v32 = vsel %vm334_vm0, %v4706_v1, 0.0 }
  0x32   : > { %v345_v44 = vadd.f32 %v344_v34, %v343_v38  ;;  %v376_v45 = vadd.f32 %v375_v35, %v374_v39  ;;  %v362_v33 = vsel %vm334_vm0, %v4709_v2, 0.0  ;;  %v387_v34 = vsel %vm334_vm0, %v4703_v0, 0.0  ;;  %v4745_v38 = vld [vmem:[%s4568_s23 + $0xe8] sm:$0xff]  ;;  %v4748_v39 = vld [vmem:[%s4568_s23 + $0xf8] sm:$0xff] }
  0x33   : > { %v412_v35 = vmul.f32 %v4606_v11, %v4606_v11  ;;  %v441_v11 = vsel %vm334_vm0, %v410_v22, 0.0 }
  0x34   : > { %v347_v50 = vadd.f32 %v346_v40, %v345_v44  ;;  %v378_v51 = vadd.f32 %v377_v41, %v376_v45  ;;  %v364_v41 = vsel %vm334_vm0, %v4719_v16, 0.0  ;;  %v389_v45 = vsel %vm334_vm0, %v4716_v15, 0.0 }
  0x36   : > { %v349_v57 = vadd.f32 %v348_v46, %v347_v50  ;;  %v380_v58 = vadd.f32 %v379_v47, %v378_v51  ;;  %v414_v46 = vmul.f32 %v4621_v17, %v4621_v17  ;;  %v438_v47 = vsel %vm334_vm0, %v406_v62, 0.0 }
  0x37   : > { %v439_v50 = vsel %vm334_vm0, %v408_v13, 0.0  ;;  %v416_v17 = vmul.f32 %v4633_v24, %v4633_v24 }
  0x38   : > { %v351_v8 = vadd.f32 %v350_v52, %v349_v57  ;;  %v382_v9 = vadd.f32 %v381_v53, %v380_v58  ;;  %v391_v53 = vsel %vm334_vm0, %v4734_v29, 0.0  ;;  %v440_v57 = vadd.f32 %v439_v50, %v438_v47 }
  0x39   : > { %v393_v58 = vsel %vm334_vm0, %v4745_v38, 0.0  ;;  %v445_v22 = vsel %vm334_vm0, %v414_v46, 0.0 }
  0x3a   : > { %v353_v23 = vadd.f32 %v352_v60, %v351_v8  ;;  %v384_v27 = vadd.f32 %v383_v61, %v382_v9  ;;  %v395_v60 = vsel %vm334_vm0, %v4748_v39, 0.0  ;;  %v443_v61 = vsel %vm334_vm0, %v412_v35, 0.0 }
  0x3b   : > { %v413_v9 = vmul.f32 %v4609_v12, %v4609_v12  ;;  %v442_v13 = vadd.f32 %v441_v11, %v440_v57  ;;  %v447_v12 = vsel %vm334_vm0, %v416_v17, 0.0  ;;  %v472_v35 = vsel %vm334_vm0, %v411_v28, 0.0 }
  0x3c   : > { %v355_v40 = vadd.f32 %v354_v19, %v353_v23  ;;  %v386_v44 = vadd.f32 %v385_v21, %v384_v27  ;;  %v415_v19 = vmul.f32 %v4624_v18, %v4624_v18  ;;  %v418_v21 = vmul.f32 %v4643_v30, %v4643_v30 }
  0x3d   : > { %v444_v27 = vadd.f32 %v443_v61, %v442_v13  ;;  %v470_v18 = vsel %vm334_vm0, %v409_v14, 0.0  ;;  %v474_v46 = vsel %vm334_vm0, %v413_v9, 0.0  ;;  %v421_v28 = vmul.f32 %v4656_v37, %v4656_v37 }
  0x3e   : > { %v357_v51 = vadd.f32 %v356_v20, %v355_v40  ;;  %v388_v52 = vadd.f32 %v387_v34, %v386_v44  ;;  %v417_v20 = vmul.f32 %v4636_v25, %v4636_v25  ;;  %v469_v34 = vsel %vm334_vm0, %v407_v63, 0.0 }
  0x3f   : > { %v446_v44 = vadd.f32 %v445_v22, %v444_v27  ;;  %v471_v30 = vadd.f32 %v470_v18, %v469_v34  ;;  %v426_v57 = vmul.f32 %v4683_v54, %v4683_v54  ;;  %v425_v54 = vmul.f32 %v4676_v49, %v4676_v49 }
  0x40   : > { %v359_v62 = vadd.f32 %v358_v26, %v357_v51  ;;  %v390_v8 = vadd.f32 %v389_v45, %v388_v52  ;;  %v420_v26 = vmul.f32 %v4653_v36, %v4653_v36  ;;  %v422_v45 = vmul.f32 %v4663_v42, %v4663_v42 }
  0x41   : > { %v449_v36 = vsel %vm334_vm0, %v418_v21, 0.0  ;;  %v448_v50 = vadd.f32 %v447_v12, %v446_v44  ;;  %v473_v14 = vadd.f32 %v472_v35, %v471_v30  ;;  %v478_v37 = vsel %vm334_vm0, %v417_v20, 0.0 }
  0x42   : > { %v361_v24 = vadd.f32 %v360_v32, %v359_v62  ;;  %v392_v23 = vadd.f32 %v391_v53, %v390_v8  ;;  %v419_v32 = vmul.f32 %v4646_v31, %v4646_v31  ;;  %v451_v11 = vsel %vm334_vm0, %v420_v26, 0.0 }
  0x43   : > { %v476_v31 = vsel %vm334_vm0, %v415_v19, 0.0  ;;  %v450_v52 = vadd.f32 %v449_v36, %v448_v50  ;;  %v475_v53 = vadd.f32 %v474_v46, %v473_v14  ;;  %v428_v62 = vmul.f32 %v4689_v56, %v4689_v56 }
  0x44   : > { %v363_v25 = vadd.f32 %v362_v33, %v361_v24  ;;  %v394_v40 = vadd.f32 %v393_v58, %v392_v23  ;;  %v424_v33 = vmul.f32 %v4673_v48, %v4673_v48  ;;  %v453_v58 = vsel %vm334_vm0, %v422_v45, 0.0 }
  0x45   : > { %v423_v48 = vmul.f32 %v4666_v43, %v4666_v43  ;;  %v477_v17 = vadd.f32 %v476_v31, %v475_v53  ;;  %v480_v9 = vsel %vm334_vm0, %v419_v32, 0.0  ;;  %v430_v20 = vmul.f32 %v4692_v59, %v4692_v59  ;;  %v577_v32 = vld [vmem:[%s6633_s2 + $0x10] sm:$0xff] }
  0x46   : > { %v365_v47 = vadd.f32 %v364_v41, %v363_v25  ;;  %v396_v63 = vadd.f32 %v395_v60, %v394_v40  ;;  %v452_v60 = vadd.f32 %v451_v11, %v450_v52  ;;  %v455_v8 = vsel %vm334_vm0, %v424_v33, 0.0 }
  0x47   : > { %v479_v19 = vadd.f32 %v478_v37, %v477_v17  ;;  %v457_v43 = vsel %vm334_vm0, %v426_v57, 0.0  ;;  %v482_v22 = vsel %vm334_vm0, %v421_v28, 0.0  ;;  %v427_v24 = vmul.f32 %v4686_v55, %v4686_v55 }
  0x48   : > { %v397_v42 = vsel %vm334_vm0, %v365_v47, 0.0  ;;  %v398_v51 = vsel %vm334_vm0, %v396_v63, 0.0  ;;  %v454_v13 = vadd.f32 %v453_v58, %v452_v60  ;;  %v432_v12 = vmul.f32 %v4706_v1, %v4706_v1  ;;  %v578_v1 = vld [vmem:[%s6633_s2 + $0x18] sm:$0xff] }
  0x49   : > { %v399_v41 = vadd.f32 %v398_v51, %v397_v42  ;;  %v481_v26 = vadd.f32 %v480_v9, %v479_v19  ;;  %v459_v49 = vsel %vm334_vm0, %v428_v62, 0.0  ;;  %v484_v34 = vsel %vm334_vm0, %v423_v48, 0.0  ;;  %594 = vmatpush.msra.mxu2 %v578_v1  ;;  %617 = vmatpush.msra.mxu3 %v578_v1 }
  0x4a   : > { %v456_v23 = vadd.f32 %v455_v8, %v454_v13  ;;  %v429_v18 = vmul.f32 %v4703_v0, %v4703_v0  ;;  %v434_v44 = vmul.f32 %v4709_v2, %v4709_v2  ;;  %v461_v55 = vsel %vm334_vm0, %v430_v20, 0.0 }
  0x4b   : > { %v400_v61 = vrot.slane %v399_v41, 4  ;;  %v483_v25 = vadd.f32 %v482_v22, %v481_v26  ;;  %v486_v30 = vsel %vm334_vm0, %v425_v54, 0.0  ;;  %v431_v2 = vmul.f32 %v4716_v15, %v4716_v15  ;;  %595 = vmatpush.msra.mxu2 %v577_v32  ;;  %618 = vmatpush.msra.mxu3 %v577_v32  ;;  %v575_v26 = vld [vmem:[%s6633_s2] sm:$0xff] }
  0x4c   : > { %v458_v35 = vadd.f32 %v457_v43, %v456_v23  ;;  %v463_v47 = vsel %vm334_vm0, %v432_v12, 0.0  ;;  %v488_v63 = vsel %vm334_vm0, %v427_v24, 0.0  ;;  %v433_v50 = vmul.f32 %v4734_v29, %v4734_v29  ;;  %v576_v23 = vld [vmem:[%s6633_s2 + $0x8] sm:$0xff] }
  0x4d   : > { %v401_v21 = vadd.f32 %v400_v61, %v399_v41  ;;  %v485_v36 = vadd.f32 %v484_v34, %v483_v25  ;;  %v436_v11 = vmul.f32 %v4719_v16, %v4719_v16  ;;  %v465_v31 = vsel %vm334_vm0, %v434_v44, 0.0  ;;  %596 = vmatpush.msra.mxu2 %v576_v23  ;;  %619 = vmatpush.msra.mxu3 %v576_v23 }
  0x4e   : > { %v460_v45 = vadd.f32 %v459_v49, %v458_v35  ;;  %v490_v42 = vsel %vm334_vm0, %v429_v18, 0.0  ;;  %v435_v53 = vmul.f32 %v4745_v38, %v4745_v38  ;;  %v492_v41 = vsel %vm334_vm0, %v431_v2, 0.0 }
  0x4f   : > { %v402_v27 = vrot.slane %v401_v21, 2  ;;  %v487_v28 = vadd.f32 %v486_v30, %v485_v36  ;;  %v437_v37 = vmul.f32 %v4748_v39, %v4748_v39  ;;  %v467_v16 = vsel %vm334_vm0, %v436_v11, 0.0  ;;  %597 = vmatpush.msra.mxu2 %v575_v26  ;;  %620 = vmatpush.msra.mxu3 %v575_v26 }
  0x50   : > { %v462_v14 = vadd.f32 %v461_v55, %v460_v45  ;;  %v494_v48 = vsel %vm334_vm0, %v433_v50, 0.0  ;;  %v496_v17 = vsel %vm334_vm0, %v435_v53, 0.0  ;;  %v627_v50 = vld [vmem:[%s6635_s4] sm:$0x1] }
  0x51   : > { %v403_v40 = vadd.f32 %v402_v27, %v401_v21  ;;  %v489_v52 = vadd.f32 %v488_v63, %v487_v28  ;;  %v498_v8 = vsel %vm334_vm0, %v437_v37, 0.0 }
  0x52   : > { %v464_v51 = vadd.f32 %v463_v47, %v462_v14 }
  0x53   : > { %v404_v46 = vrot.slane %v403_v40, 1  ;;  %v491_v58 = vadd.f32 %v490_v42, %v489_v52 }
  0x54   : > { %v466_v57 = vadd.f32 %v465_v31, %v464_v51  ;;  %v1413_v51 = vld [vmem:[#allocation2 + $0x60] sm:$0x1] }
  0x55   : > { %v405_v33 = vadd.f32 %v404_v46, %v403_v40  ;;  %v493_v60 = vadd.f32 %v492_v41, %v491_v58  ;;  %v625_v46 = vld [vmem:[%s6634_s3] sm:$0x1]  ;;  %v1414_v41 = vsel %vm4875_vm6, 0, %v1413_v51 }
  0x56   : > { %v468_v61 = vadd.f32 %v467_v16, %v466_v57  ;;  %1415 = vst [vmem:[#allocation2 + $0x60] sm:$0x1] %v1414_v41 }
  0x57   : > { %3636 = vmatmul.msk.f32.vlgmr.msra.gmra.mxu0 %vm334_vm0, %v405_v33  ;;  %v495_v62 = vadd.f32 %v494_v48, %v493_v60 }
  0x58   : > { %v500_v54 = vsel %vm334_vm0, %v468_v61, 0.0  ;;  %v1386_v61 = vld [vmem:[#allocation2 + $0x18] sm:$0x1] }
  0x59   : > { %v497_v9 = vadd.f32 %v496_v17, %v495_v62  ;;  %v1387_v62 = vsel %vm4875_vm6, 0, %v1386_v61 }
  0x5a   : > { %1388 = vst [vmem:[#allocation2 + $0x18] sm:$0x1] %v1387_v62 }
  0x5b   : > { %v499_v38 = vadd.f32 %v498_v8, %v497_v9 }
  0x5d   : > { %v501_v13 = vsel %vm334_vm0, %v499_v38, 0.0 }
  0x5e   : > { %v502_v19 = vadd.f32 %v501_v13, %v500_v54 }
  0x60   : > { %v503_v21 = vrot.slane %v502_v19, 4 }
  0x62   : > { %v504_v39 = vadd.f32 %v503_v21, %v502_v19  ;;  %v1383_v21 = vld [vmem:[#allocation2 + $0x10] sm:$0x1] }
  0x64   : > { %v505_v20 = vrot.slane %v504_v39, 2 }
  0x66   : > { %v506_v43 = vadd.f32 %v505_v20, %v504_v39  ;;  %v1384_v20 = vsel %vm4875_vm6, 0, %v1383_v21 }
  0x67   : > { %1385 = vst [vmem:[#allocation2 + $0x10] sm:$0x1] %v1384_v20 }
  0x68   : > { %v507_v22 = vrot.slane %v506_v43, 1 }
  0x6a   : > { %v508_v24 = vadd.f32 %v507_v22, %v506_v43 }
  0x6c   : > { %3637 = vmatmul.msk.f32.vlgmr.msra.gmra.mxu1 %vm334_vm0, %v508_v24 }
  0xd4   : > { %v533_v27 = vpop.f32.mrf.mxu0 }
  0xd5   : > { %v536_v12 = vmul.f32 0.00390625, %v533_v27 }
  0xd7   : > { %3638 = vmatmul.msk.f32.vlgmr.msra.gmra.mxu2 %vm334_vm0, %v536_v12  ;;  %v561_v49 = vmul.f32 %v536_v12, %v536_v12 }
  0xe9   : > { %v557_v34 = vpop.f32.mrf.mxu1 }
  0xea   : > { %v560_v18 = vmul.f32 0.00390625, %v557_v34 }
  0xec   : > { %v562_v35 = vsub.f32 %v560_v18, %v561_v49 }
  0xee   : > { %v563_v25 = vmax.f32 %v562_v35, 0.0 }
  0xf0   : > { %v564_v40 = vadd.f32 1e-05, %v563_v25 }
  0xf2   : > { %4236 = vrsqrt.f32 %v564_v40  ;;  %vm571_vm2 = vweird.f32 %v564_v40 }
  0xf8   : > { %v4237_v44 = vpop.eup %4236 }
  0xf9   : > { %v566_v55 = vmul.f32 %v4237_v44, %v564_v40  ;;  %vm572_vm1 = vweird.f32 %v4237_v44 }
  0xfa   : > { %vm573_vm3 = vmor %vm571_vm2, %vm572_vm1 }
  0xfb   : > { %v567_v30 = vmul.f32 %v4237_v44, %v566_v55 }
  0xfd   : > { %v568_v1 = vmul.f32 0.5, %v567_v30 }
  0xff   : > { %v569_v32 = vsub.f32 1.5, %v568_v1 }
 0x101   : > { %v570_v45 = vmul.f32 %v4237_v44, %v569_v32 }
 0x103   : > { %v574_v36 = vsel %vm573_vm3, %v4237_v44, %v570_v45 }
 0x104   : > { %3639 = vmatmul.msk.f32.vlgmr.msra.gmra.mxu3 %vm334_vm0, %v574_v36 }
 0x15a   : > { %v599_v63 = vpop.f32.mrf.mxu2 }
 0x187   : > { %v622_v2 = vpop.f32.mrf.mxu3 }
 0x188   : > { %v626_v47 = vmul.f32 %v625_v46, %v622_v2 }
 0x18a   : > { %v628_v14 = vmul.f32 %v626_v47, %v599_v63  ;;  %v4868_v28 = vperm.slane %v626_v47, 0 }
 0x18c   : > { %v629_v33 = vsub.f32 %v627_v50, %v628_v14  ;;  %v653_v31 = vmul.f32 %v4868_v28, %v4689_v56  ;;  %v634_v52 = vmul.f32 %v4868_v28, %v4593_v6  ;;  %v632_v53 = vmul.f32 %v4868_v28, %v4587_v4 }
 0x18d   : > { %v635_v57 = vmul.f32 %v4868_v28, %v4596_v7  ;;  %v654_v56 = vmul.f32 %v4868_v28, %v4703_v0  ;;  %v633_v58 = vmul.f32 %v4868_v28, %v4590_v5  ;;  %v656_v38 = vmul.f32 %v4868_v28, %v4716_v15 }
 0x18e   : > { %v4870_v11 = vperm.slane %v629_v33, 0  ;;  %v631_v54 = vmul.f32 %v4868_v28, %v4584_v3  ;;  %v636_v26 = vmul.f32 %v4868_v28, %v4603_v10 }
 0x190   : > { %v4892_v37 = vadd.f32 %v4870_v11, %v653_v31  ;;  %v4895_v6 = vadd.f32 %v4870_v11, %v634_v52  ;;  %v4898_v4 = vadd.f32 %v4870_v11, %v632_v53  ;;  %v4901_v16 = vadd.f32 %v4870_v11, %v635_v57 }
 0x191   : > { %v4904_v7 = vadd.f32 %v4870_v11, %v654_v56  ;;  %v4907_v0 = vadd.f32 %v4870_v11, %v633_v58  ;;  %v4922_v13 = vadd.f32 %v4870_v11, %v656_v38  ;;  %v4925_v19 = vadd.f32 %v4870_v11, %v631_v54 }
 0x192   : > { %v3662_v5 = vmul.f32 -1.442695, %v4892_v37  ;;  %v3643_v48 = vmul.f32 -1.442695, %v4895_v6  ;;  %v3641_v60 = vmul.f32 -1.442695, %v4898_v4  ;;  %v4940_v49 = vadd.f32 %v4870_v11, %v636_v26 }
 0x193   : > { %v3644_v17 = vmul.f32 -1.442695, %v4901_v16  ;;  %v3663_v8 = vmul.f32 -1.442695, %v4904_v7  ;;  %v3642_v9 = vmul.f32 -1.442695, %v4907_v0 }
 0x194   : > { %4238 = vpow2.f32 %v3662_v5  ;;  %v3665_v3 = vmul.f32 -1.442695, %v4922_v13  ;;  %v3640_v23 = vmul.f32 -1.442695, %v4925_v19  ;;  %v4958_v32 = vmul.f32 -1.442695, %v4940_v49 }
 0x195   : > { %4240 = vpow2.f32 %v3643_v48 }
 0x196   : > { %4242 = vpow2.f32 %v3641_v60 }
 0x197   : > { %4244 = vpow2.f32 %v3644_v17 }
 0x198   : > { %4246 = vpow2.f32 %v3663_v8 }
 0x199   : > { %4248 = vpow2.f32 %v3642_v9 }
 0x19a   : > { %v4239_v39 = vpop.eup %4238 }
 0x19b   : > { %v4241_v43 = vpop.eup %4240  ;;  %v4929_v15 = vadd.f32 1.0, %v4239_v39 }
 0x19c   : > { %v4243_v22 = vpop.eup %4242  ;;  %v4932_v24 = vadd.f32 1.0, %v4241_v43 }
 0x19d   : > { %v4245_v27 = vpop.eup %4244  ;;  %4250 = vrcp.f32 %v4929_v15  ;;  %v4942_v18 = vadd.f32 1.0, %v4243_v22  ;;  %v1165_v25 = vand.u32 2147483647, %v4929_v15  ;;  %v1167_v40 = vand.u32 2147483648, %v4929_v15 }
 0x19e   : > { %v4247_v12 = vpop.eup %4246  ;;  %4252 = vrcp.f32 %v4932_v24  ;;  %v4944_v35 = vadd.f32 1.0, %v4245_v27  ;;  %v880_v44 = vand.u32 2147483647, %v4932_v24  ;;  %v882_v55 = vand.u32 2147483648, %v4932_v24 }
 0x19f   : > { %v4249_v34 = vpop.eup %4248  ;;  %4254 = vpow2.f32 %v3665_v3  ;;  %v4948_v10 = vadd.f32 1.0, %v4247_v12  ;;  %v852_v30 = vand.u32 2147483648, %v4942_v18  ;;  %vm1161_vm7 = vweird.f32 %v4929_v15 }
 0x1a0   : > { %4256 = vpow2.f32 %v3640_v23  ;;  %v4955_v1 = vadd.f32 1.0, %v4249_v34  ;;  %vm876_vm8 = vweird.f32 %v4932_v24  ;;  %v897_v36 = vand.u32 2147483648, %v4944_v35 }
 0x1a1   : > { %4258 = vrcp.f32 %v4942_v18  ;;  %vm4965_vm9 = vcmp.eq.f32.partialorder %v1165_v25, 8.507059e+37  ;;  %v1168_v63 = vor.u32 1.1754944e-38, %v1167_v40  ;;  %v850_v50 = vand.u32 2147483647, %v4942_v18 }
 0x1a2   : > { %4260 = vrcp.f32 %v4944_v35  ;;  %vm4971_vm10 = vcmp.eq.f32.partialorder %v880_v44, 8.507059e+37  ;;  %v883_v51 = vor.u32 1.1754944e-38, %v882_v55  ;;  %v895_v52 = vand.u32 2147483647, %v4944_v35 }
 0x1a3   : > { %v4251_v45 = vpop.eup %4250  ;;  %4262 = vrcp.f32 %v4948_v10  ;;  %v1182_v53 = vand.u32 2147483648, %v4948_v10  ;;  %v853_v56 = vor.u32 1.1754944e-38, %v852_v30  ;;  %v4982_v48 = vor.u32 1.1754944e-38, %v897_v36 }
 0x1a4   : > { %v4253_v46 = vpop.eup %4252  ;;  %v1157_v2 = vmul.f32 %v4251_v45, %v4929_v15  ;;  %vm1162_vm11 = vweird.f32 %v4251_v45  ;;  %4264 = vrcp.f32 %v4955_v1  ;;  %v1180_v60 = vand.u32 2147483647, %v4948_v10 }
 0x1a5   : > { %v4255_v14 = vpop.eup %4254  ;;  %v872_v33 = vmul.f32 %v4253_v46, %v4932_v24  ;;  %v867_v17 = vand.u32 2147483648, %v4955_v1  ;;  %vm877_vm14 = vweird.f32 %v4253_v46  ;;  %vm4987_vm15 = vcmp.eq.f32.partialorder %v850_v50, 8.507059e+37  ;;  %vm1163_vm13 = vmor %vm1161_vm7, %vm1162_vm11 }
 0x1a6   : > { %v4977_v41 = vpop.eup %4256  ;;  %v1158_v57 = vsub.f32 1.0, %v1157_v2  ;;  %v865_v38 = vand.u32 2147483647, %v4955_v1  ;;  %vm4995_vm1 = vcmp.eq.f32.partialorder %v895_v52, 8.507059e+37  ;;  %vm1176_vm2 = vweird.f32 %v4948_v10  ;;  %vm878_vm4 = vmor %vm876_vm8, %vm877_vm14 }
 0x1a7   : > { %v4259_v58 = vpop.eup %4258  ;;  %v873_v5 = vsub.f32 1.0, %v872_v33  ;;  %v1183_v43 = vor.u32 1.1754944e-38, %v1182_v53  ;;  %vm5006_vm0 = vcmp.eq.f32.partialorder %v1180_v60, 8.507059e+37  ;;  %vm861_vm3 = vweird.f32 %v4955_v1 }
 0x1a8   : > { %v4261_v61 = vpop.eup %4260  ;;  %v1159_v62 = vmul.f32 %v4251_v45, %v1158_v57  ;;  %v842_v8 = vmul.f32 %v4259_v58, %v4942_v18  ;;  %v868_v34 = vor.u32 1.1754944e-38, %v867_v17  ;;  %v5014_v55 = vadd.f32 1.0, %v4255_v14 }
 0x1a9   : > { %v4992_v54 = vpop.eup %4262  ;;  %v874_v21 = vmul.f32 %v4253_v46, %v873_v5  ;;  %v887_v39 = vmul.f32 %v4261_v61, %v4944_v35  ;;  %vm892_vm5 = vweird.f32 %v4261_v61  ;;  %vm6657_vm7 = vweird.f32 %v4259_v58 }
 0x1aa   : > { %v1160_v3 = vadd.f32 %v4251_v45, %v1159_v62  ;;  %v843_v22 = vsub.f32 1.0, %v842_v8  ;;  %v1172_v23 = vmul.f32 %v4992_v54, %v4948_v10  ;;  %vm1177_vm12 = vweird.f32 %v4992_v54  ;;  %v4265_v25 = vpop.eup %4264  ;;  %v1817_v8 = vld [vmem:[#allocation2 + $0x60] sm:$0xf] }
 0x1ab   : > { %v875_v26 = vadd.f32 %v4253_v46, %v874_v21  ;;  %v888_v27 = vsub.f32 1.0, %v887_v39  ;;  %v857_v50 = vmul.f32 %v4265_v25, %v4955_v1  ;;  %vm6658_vm8 = vweird.f32 %v4942_v18 }
 0x1ac   : > { %v1164_v40 = vsel %vm1163_vm13, %v4251_v45, %v1160_v3  ;;  %v844_v44 = vmul.f32 %v4259_v58, %v843_v22  ;;  %v1173_v15 = vsub.f32 1.0, %v1172_v23  ;;  %vm848_vm11 = vmor %vm6658_vm8, %vm6657_vm7  ;;  %vm6659_vm13 = vweird.f32 %v4944_v35 }
 0x1ad   : > { %v1169_v30 = vsel %vm4965_vm9, %v1168_v63, %v1164_v40  ;;  %v879_v36 = vsel %vm878_vm4, %v4253_v46, %v875_v26  ;;  %v889_v2 = vmul.f32 %v4261_v61, %v888_v27  ;;  %v858_v63 = vsub.f32 1.0, %v857_v50  ;;  %vm893_vm14 = vmor %vm6659_vm13, %vm892_vm5 }
 0x1ae   : > { %v1328_v33 = vmul.f32 %v1169_v30, %v4892_v37  ;;  %v884_v45 = vsel %vm4971_vm10, %v883_v51, %v879_v36  ;;  %v845_v52 = vadd.f32 %v4259_v58, %v844_v44  ;;  %v1174_v24 = vmul.f32 %v4992_v54, %v1173_v15  ;;  %vm1178_vm5 = vmor %vm1176_vm2, %vm1177_vm12 }
 0x1af   : > { %v1309_v53 = vmul.f32 %v884_v45, %v4895_v6  ;;  %v890_v47 = vadd.f32 %v4261_v61, %v889_v2  ;;  %vm862_vm9 = vweird.f32 %v4265_v25  ;;  %4266 = vrcp.f32 %v5014_v55  ;;  %v1380_v2 = vld [vmem:[#allocation2 + $0x8] sm:$0x1] }
 0x1b0   : > { %v5027_v46 = vpack.c.bf16 %v1328_v33, %v1328_v33  ;;  %v849_v14 = vsel %vm848_vm11, %v4259_v58, %v845_v52  ;;  %v1175_v37 = vadd.f32 %v4992_v54, %v1174_v24  ;;  %v859_v51 = vmul.f32 %v4265_v25, %v858_v63  ;;  %vm863_vm10 = vmor %vm861_vm3, %vm862_vm9  ;;  %v1777_v63 = vld [vmem:[#allocation2 + $0x10] sm:$0xf] }
 0x1b1   : > { %v1341_v31 = vpack.c.bf16 %v1309_v53, %v1309_v53  ;;  %v854_v6 = vsel %vm4987_vm15, %v853_v56, %v849_v14  ;;  %v894_v18 = vsel %vm893_vm14, %v4261_v61, %v890_v47  ;;  %vm6660_vm12 = vsmask.f32 7938 }
 0x1b2   : > { %1913 = vrot.lane.b32.xlu2 %v5027_v46, %s4455_s21  ;;  %v1658_v57 = vshrl.u32 %v5027_v46, 16  ;;  %v1661_v58 = vshll.u32 %v5027_v46, 16  ;;  %v1307_v35 = vmul.f32 %v854_v6, %v4898_v4  ;;  %v899_v5 = vsel %vm4995_vm1, %v4982_v48, %v894_v18 }
 0x1b3   : > { %1875 = vrot.lane.b32.xlu0 %v1341_v31, %s4455_s21  ;;  %v1310_v56 = vmul.f32 %v899_v5, %v4901_v16  ;;  %v1179_v60 = vsel %vm1178_vm5, %v4992_v54, %v1175_v37  ;;  %v860_v17 = vadd.f32 %v4265_v25, %v859_v51  ;;  %v1506_v61 = vshrl.u32 %v1341_v31, 16 }
 0x1b4   : > { %v5053_v4 = vrot.slane %v1658_v57, 7  ;;  %v5055_v62 = vpack.c.bf16 %v1307_v35, %v1307_v35  ;;  %v1184_v48 = vsel %vm5006_vm0, %v1183_v43, %v1179_v60  ;;  %v1509_v10 = vshll.u32 %v1341_v31, 16 }
 0x1b5   : > { %vm6661_vm15 = vcmask 257024   ;;  %v5068_v9 = vpack.c.bf16 %v1310_v56, %v1310_v56  ;;  %v1329_v54 = vmul.f32 %v1184_v48, %v4904_v7  ;;  %v864_v21 = vsel %vm863_vm10, %v4265_v25, %v860_v17  ;;  %v4267_v39 = vpop.eup %4266 }
 0x1b6   : > { %vm5064_vm1 = vmand %vm6661_vm15, %vm6660_vm12  ;;  %vm866_vm0 = vcmp.eq.f32.partialorder %v865_v38, 8.507059e+37  ;;  %v1663_v20 = vor.u32 %v1661_v58, %v5053_v4  ;;  %1871 = vrot.lane.b32.xlu1 %v5055_v62, %s4455_s21  ;;  %v5078_v3 = vrot.slane %v1509_v10, 5  ;;  %v2016_v22 = vrot.slane %v1506_v61, 4 }
 0x1b7   : > { %v869_v43 = vsel %vm866_vm0, %v868_v34, %v864_v21  ;;  %v1514_v23 = vshrl.u32 %v5068_v9, 16  ;;  %4268 = vpow2.f32 %v4958_v32  ;;  %v655_v1 = vmul.f32 %v4868_v28, %v4692_v59  ;;  %v1781_v59 = vld [vmem:[#allocation2 + $0x18] sm:$0xf] }
 0x1b8   : > { %v1308_v7 = vmul.f32 %v869_v43, %v4907_v0  ;;  %v1818_v38 = vsel %vm5064_vm1, %v1663_v20, %v1817_v8  ;;  %v1508_v26 = vrot.slane %v1506_v61, 7  ;;  %v1202_v27 = vmul.f32 %v4267_v39, %v5014_v55 }
 0x1b9   : > { %v5089_v12 = vadd.f32 1.0, %v4977_v41  ;;  %1819 = vst [vmem:[#allocation2 + $0x60] sm:$0xf] %v1818_v38  ;;  %v5093_v34 = vrot.slane %v1514_v23, 7  ;;  %v1517_v0 = vshll.u32 %v5068_v9, 16  ;;  %v5096_v32 = vpack.c.bf16 %v1329_v54, %v1329_v54 }
 0x1ba   : > { %v5098_v25 = vpack.c.bf16 %v1308_v7, %v1308_v7  ;;  %1877 = vrot.lane.b32.xlu2 %v5068_v9, %s4455_s21  ;;  %v2017_v40 = vor.u32 %v2016_v22, %v5078_v3  ;;  %v1511_v44 = vor.u32 %v1509_v10, %v1508_v26  ;;  %v1203_v41 = vsub.f32 1.0, %v1202_v27 }
 0x1bb   : > { %v1210_v15 = vand.u32 2147483647, %v5014_v55  ;;  %v1519_v30 = vor.u32 %v1517_v0, %v5093_v34  ;;  %1915 = vrot.lane.b32.xlu0 %v5096_v32, %s4455_s21  ;;  %vm1479_vm2 = vsmask.f32 4368  ;;  %v5111_v50 = vadd.f32 %v4870_v11, %v655_v1 }
 0x1bc   : > { %v1498_v36 = vshrl.u32 %v5098_v25, 16  ;;  %v1204_v33 = vmul.f32 %v4267_v39, %v1203_v41  ;;  %vm1207_vm3 = vweird.f32 %v4267_v39  ;;  %v1212_v45 = vand.u32 2147483648, %v5014_v55 }
 0x1bd   : > { %4270 = vrcp.f32 %v5089_v12  ;;  %v4269_v52 = vpop.eup %4268  ;;  %v1782_v24 = vsel %vm5064_vm1, %v1519_v30, %v1781_v59  ;;  %v1501_v47 = vshll.u32 %v5098_v25, 16  ;;  %vm1206_vm4 = vweird.f32 %v5014_v55 }
 0x1be   : > { %v1500_v53 = vrot.slane %v1498_v36, 7  ;;  %1783 = vst [vmem:[#allocation2 + $0x18] sm:$0xf] %v1782_v24  ;;  %1873 = vrot.lane.b32.xlu1 %v5098_v25, %s4455_s21  ;;  %vm6664_vm7 = vsmask.f32 256  ;;  %v2018_v37 = vrot.slane %v2017_v40, 4  ;;  %v1205_v31 = vadd.f32 %v4267_v39, %v1204_v33  ;;  %vm1208_vm9 = vmor %vm1206_vm4, %vm1207_vm3 }
 0x1bf   : > { %vm5125_vm8 = vmor %vm6664_vm7, %vm1479_vm2  ;;  %vm1211_vm11 = vcmp.eq.f32.partialorder %v1210_v15, 8.507059e+37  ;;  %v1381_v6 = vsel %vm4875_vm6, 0, %v1380_v2  ;;  %v1213_v51 = vor.u32 1.1754944e-38, %v1212_v45  ;;  %v1490_v35 = vshrl.u32 %v5055_v62, 16  ;;  %v1416_v45 = vld [vmem:[#allocation2 + $0x68] sm:$0x1] }
 0x1c0   : > { %v1503_v18 = vor.u32 %v1501_v47, %v1500_v53  ;;  %v1504_v55 = vrot.slane %v1500_v53, 4  ;;  %1382 = vst [vmem:[#allocation2 + $0x8] sm:$0x1] %v1381_v6  ;;  %v1209_v5 = vsel %vm1208_vm9, %v4267_v39, %v1205_v31  ;;  %v835_v56 = vand.u32 2147483647, %v5089_v12 }
 0x1c1   : > { %v1493_v60 = vshll.u32 %v5055_v62, 16  ;;  %v5137_v17 = vadd.f32 1.0, %v4269_v52  ;;  %v1214_v10 = vsel %vm1211_vm11, %v1213_v51, %v1209_v5  ;;  %v837_v8 = vand.u32 2147483648, %v5089_v12 }
 0x1c2   : > { %v1778_v61 = vsel %vm5064_vm1, %v1503_v18, %v1777_v63  ;;  %v5143_v48 = vsel %vm5125_vm8, %v1504_v55, %v1511_v44  ;;  %2151 = vrot.lane.b32.xlu2 %v2018_v37, %s4456_s11  ;;  %v1331_v21 = vmul.f32 %v1214_v10, %v4922_v13  ;;  %v1492_v62 = vrot.slane %v1490_v35, 7 }
 0x1c3   : > { %v4271_v54 = vpop.eup %4270  ;;  %1779 = vst [vmem:[#allocation2 + $0x10] sm:$0xf] %v1778_v61  ;;  %4272 = vrcp.f32 %v5137_v17  ;;  %v5150_v20 = vrot.slane %v1493_v60, 5  ;;  %v2007_v43 = vrot.slane %v1490_v35, 4  ;;  %v3664_v22 = vmul.f32 -1.442695, %v5111_v50 }
 0x1c4   : > { %v827_v39 = vmul.f32 %v4271_v54, %v5089_v12  ;;  %v1664_v7 = vrot.slane %v5053_v4, 4  ;;  %v1520_v1 = vrot.slane %v5093_v34, 4  ;;  %v1363_v38 = vpack.c.bf16 %v1331_v21, %v1331_v21 }
 0x1c5   : > { %v5155_v26 = vor.u32 %v1493_v60, %v1492_v62  ;;  %vm831_vm13 = vweird.f32 %v5089_v12  ;;  %vm5158_vm14 = vcmp.eq.f32.partialorder %v835_v56, 8.507059e+37  ;;  %v838_v59 = vor.u32 1.1754944e-38, %v837_v8  ;;  %v4366_v62 = vld [vmem:[%s4568_s23 + $0x30] sm:$0xff] }
 0x1c6   : > { %v828_v27 = vsub.f32 1.0, %v827_v39  ;;  %1919 = vrot.lane.b32.xlu1 %v1363_v38, %s4455_s21  ;;  %vm832_vm5 = vweird.f32 %v4271_v54  ;;  %v1682_v40 = vshrl.u32 %v1363_v38, 16  ;;  %v1685_v44 = vshll.u32 %v1363_v38, 16 }
 0x1c7   : > { %v910_v41 = vand.u32 2147483647, %v5137_v17  ;;  %v2008_v30 = vor.u32 %v2007_v43, %v5150_v20  ;;  %v2100_v2 = vrot.slane %v1658_v57, 4  ;;  %v2101_v33 = vrot.slane %v1661_v58, 5  ;;  %vm833_vm10 = vmor %vm831_vm13, %vm832_vm5 }
 0x1c8   : > { %v829_v15 = vmul.f32 %v4271_v54, %v828_v27  ;;  %v1684_v24 = vrot.slane %v1682_v40, 7  ;;  %v5169_v53 = vrot.slane %v1685_v44, 5  ;;  %v2115_v63 = vrot.slane %v1682_v40, 4 }
 0x1c9   : > { %v4273_v52 = vpop.eup %4272  ;;  %v912_v37 = vand.u32 2147483648, %v5137_v17  ;;  %v1669_v18 = vshll.u32 %v5096_v32, 16  ;;  %v2102_v55 = vor.u32 %v2101_v33, %v2100_v2  ;;  %4274 = vpow2.f32 %v3664_v22 }
 0x1ca   : > { %v830_v31 = vadd.f32 %v4271_v54, %v829_v15  ;;  %v902_v6 = vmul.f32 %v4273_v52, %v5137_v17  ;;  %v5177_v46 = vor.u32 %v1685_v44, %v1684_v24  ;;  %v2116_v57 = vor.u32 %v2115_v63, %v5169_v53  ;;  %v1389_v24 = vld [vmem:[#allocation2 + $0x20] sm:$0x1]  ;;  %v1772_v63 = vld [vmem:[#allocation2 + $0x8] sm:$0xf] }
 0x1cb   : > { %v1417_v58 = vsel %vm4875_vm6, 0, %v1416_v45  ;;  %v2009_v35 = vrot.slane %v2008_v30, 4  ;;  %vm6640_vm12 = vsmask.f32 3328  ;;  %vm1999_vm15 = vsmask.f32 7440 }
 0x1cc   : > { %v834_v51 = vsel %vm833_vm10, %v4271_v54, %v830_v31  ;;  %v903_v5 = vsub.f32 1.0, %v902_v6  ;;  %1418 = vst [vmem:[#allocation2 + $0x68] sm:$0x1] %v1417_v58  ;;  %v2117_v60 = vrot.slane %v2116_v57, 4  ;;  %v1666_v12 = vshrl.u32 %v5096_v32, 16  ;;  %vm5197_vm4 = vmor %vm6640_vm12, %vm1999_vm15 }
 0x1cd   : > { %v839_v56 = vsel %vm5158_vm14, %v838_v59, %v834_v51  ;;  %vm906_vm0 = vweird.f32 %v5137_v17  ;;  %vm907_vm2 = vweird.f32 %v4273_v52  ;;  %vm5189_vm3 = vcmp.eq.f32.partialorder %v910_v41, 8.507059e+37  ;;  %v4367_v51 = vld [vmem:[%s4568_s23 + $0x38] sm:$0xff] }
 0x1ce   : > { %v1306_v61 = vmul.f32 %v839_v56, %v4925_v19  ;;  %v904_v10 = vmul.f32 %v4273_v52, %v903_v5  ;;  %2195 = vrot.lane.b32.xlu2 %v2117_v60, %s4456_s11  ;;  %2147 = vrot.lane.b32.xlu1 %v2009_v35, %s4456_s11  ;;  %v2103_v54 = vrot.slane %v2102_v55, 4  ;;  %v1668_v21 = vrot.slane %v1666_v12, 7  ;;  %vm908_vm7 = vmor %vm906_vm0, %vm907_vm2 }
 0x1cf   : > { %v637_v39 = vmul.f32 %v4366_v62, %v4868_v28  ;;  %v5203_v22 = vrot.slane %v1498_v36, 4  ;;  %v5207_v38 = vrot.slane %v1501_v47, 5  ;;  %v4275_v27 = vpop.eup %4274  ;;  %v913_v13 = vor.u32 1.1754944e-38, %v912_v37 }
 0x1d0   : > { %v1338_v32 = vpack.c.bf16 %v1306_v61, %v1306_v61  ;;  %v905_v43 = vadd.f32 %v4273_v52, %v904_v10  ;;  %v5211_v59 = vrot.slane %v1669_v18, 5  ;;  %v1671_v40 = vor.u32 %v1669_v18, %v1668_v21 }
 0x1d1   : > { %v5214_v44 = vadd.f32 %v4870_v11, %v637_v39  ;;  %v5217_v30 = vadd.f32 1.0, %v4275_v27  ;;  %v658_v2 = vmul.f32 %v4868_v28, %v4734_v29  ;;  %v5236_v37 = vrot.slane %v1666_v12, 4  ;;  %v4368_v39 = vld [vmem:[%s4568_s23 + $0xd0] sm:$0xff] }
 0x1d2   : > { %1869 = vrot.lane.b32.xlu0 %v1338_v32, %s4455_s21  ;;  %v1482_v41 = vshrl.u32 %v1338_v32, 16  ;;  %v1485_v36 = vshll.u32 %v1338_v32, 16  ;;  %v909_v15 = vsel %vm908_vm7, %v4273_v52, %v905_v43  ;;  %v2105_v47 = vsel %vm5197_vm4, %v2103_v54, %v5211_v59 }
 0x1d3   : > { %v914_v25 = vsel %vm5189_vm3, %v913_v13, %v909_v15  ;;  %v5228_v17 = vsel %vm5125_vm8, %v1664_v7, %v1671_v40  ;;  %4276 = vrcp.f32 %v5217_v30  ;;  %v2012_v52 = vor.u32 %v5207_v38, %v5203_v22 }
 0x1d4   : > { %v1484_v33 = vrot.slane %v1482_v41, 7  ;;  %v1311_v45 = vmul.f32 %v914_v25, %v4940_v49  ;;  %v2001_v4 = vrot.slane %v1482_v41, 4  ;;  %v2002_v31 = vrot.slane %v1485_v36, 5 }
 0x1d5   : > { %v5239_v7 = vadd.f32 %v4870_v11, %v658_v2  ;;  %v3646_v49 = vmul.f32 -1.442695, %v5214_v44  ;;  %v1195_v55 = vand.u32 2147483647, %v5217_v30  ;;  %v1390_v58 = vsel %vm4875_vm6, 0, %v1389_v24 }
 0x1d6   : > { %v1487_v6 = vor.u32 %v1485_v36, %v1484_v33  ;;  %v1488_v29 = vrot.slane %v1484_v33, 4  ;;  %v1343_v18 = vpack.c.bf16 %v1311_v45, %v1311_v45  ;;  %2189 = vrot.lane.b32.xlu2 %v2105_v47, %s4456_s11  ;;  %v2003_v57 = vor.u32 %v2002_v31, %v2001_v4  ;;  %1391 = vst [vmem:[#allocation2 + $0x20] sm:$0x1] %v1390_v58  ;;  %v4369_v47 = vld [vmem:[%s4568_s23 + $0xe8] sm:$0xff] }
 0x1d7   : > { %v638_v35 = vmul.f32 %v4367_v51, %v4868_v28  ;;  %4278 = vpow2.f32 %v3646_v49  ;;  %v3667_v10 = vmul.f32 -1.442695, %v5239_v7  ;;  %v657_v32 = vmul.f32 %v4368_v39, %v4868_v28  ;;  %v4370_v33 = vld [vmem:[%s4568_s23 + $0x48] sm:$0xff] }
 0x1d8   : > { %v1773_v5 = vsel %vm5064_vm1, %v1487_v6, %v1772_v63  ;;  %v5253_v56 = vsel %vm5125_vm8, %v1488_v29, %v5155_v26  ;;  %v1522_v60 = vshrl.u32 %v1343_v18, 16  ;;  %v1525_v12 = vshll.u32 %v1343_v18, 16 }
 0x1d9   : > { %1774 = vst [vmem:[#allocation2 + $0x8] sm:$0xf] %v1773_v5  ;;  %v2004_v61 = vrot.slane %v2003_v57, 4  ;;  %v5257_v8 = vadd.f32 %v4870_v11, %v638_v35  ;;  %v4277_v54 = vpop.eup %4276  ;;  %v1197_v27 = vand.u32 2147483648, %v5217_v30  ;;  %4280 = vpow2.f32 %v3667_v10 }
 0x1da   : > { %1879 = vrot.lane.b32.xlu0 %v1343_v18, %s4455_s21  ;;  %v1524_v21 = vrot.slane %v1522_v60, 7  ;;  %v5260_v62 = vrot.slane %v1525_v12, 5  ;;  %v2025_v26 = vrot.slane %v1522_v60, 4  ;;  %v1187_v43 = vmul.f32 %v4277_v54, %v5217_v30  ;;  %v1419_v18 = vld [vmem:[#allocation2 + $0x70] sm:$0x1] }
 0x1db   : > { %vm1192_vm11 = vweird.f32 %v4277_v54  ;;  %v3647_v41 = vmul.f32 -1.442695, %v5257_v8  ;;  %v5269_v36 = vadd.f32 %v4870_v11, %v657_v32  ;;  %v2006_v25 = vsel %vm5197_vm4, %v2004_v61, %v5150_v20 }
 0x1dc   : > { %v1527_v13 = vor.u32 %v1525_v12, %v1524_v21  ;;  %v2026_v40 = vor.u32 %v2025_v26, %v5260_v62  ;;  %v1188_v15 = vsub.f32 1.0, %v1187_v43  ;;  %v660_v2 = vmul.f32 %v4369_v47, %v4868_v28  ;;  %v4371_v26 = vld [vmem:[%s4568_s23 + $0xe0] sm:$0xff] }
 0x1dd   : > { %v640_v45 = vmul.f32 %v4370_v33, %v4868_v28  ;;  %4282 = vpow2.f32 %v3647_v41  ;;  %v3666_v4 = vmul.f32 -1.442695, %v5269_v36  ;;  %v4279_v31 = vpop.eup %4278  ;;  %v2019_v20 = vrot.slane %v1514_v23, 4 }
 0x1de   : > { %v5282_v24 = vsel %vm5125_vm8, %v1520_v1, %v1527_v13  ;;  %v2027_v63 = vrot.slane %v2026_v40, 4  ;;  %v1189_v6 = vmul.f32 %v4277_v54, %v1188_v15  ;;  %2145 = vrot.lane.b32.xlu2 %v2006_v25, %s4456_s11  ;;  %v2020_v29 = vrot.slane %v1517_v0, 5 }
 0x1df   : > { %v5291_v34 = vadd.f32 %v4870_v11, %v660_v2  ;;  %vm1191_vm9 = vweird.f32 %v5217_v30  ;;  %v5295_v1 = vadd.f32 1.0, %v4279_v31  ;;  %4284 = vpow2.f32 %v3666_v4  ;;  %v4281_v57 = vpop.eup %4280 }
 0x1e0   : > { %2155 = vrot.lane.b32.xlu1 %v2027_v63, %s4456_s11  ;;  %v1420_v49 = vsel %vm4875_vm6, 0, %v1419_v18  ;;  %v1190_v58 = vadd.f32 %v4277_v54, %v1189_v6  ;;  %v2021_v23 = vor.u32 %v2020_v29, %v2019_v20  ;;  %v5301_v0 = vadd.f32 %v4870_v11, %v640_v45  ;;  %vm1193_vm13 = vmor %vm1191_vm9, %vm1192_vm11  ;;  %v1821_v20 = vld [vmem:[#allocation2 + $0x68] sm:$0xf] }
 0x1e1   : > { %1421 = vst [vmem:[#allocation2 + $0x70] sm:$0x1] %v1420_v49  ;;  %v3669_v9 = vmul.f32 -1.442695, %v5291_v34  ;;  %v1198_v51 = vor.u32 1.1754944e-38, %v1197_v27  ;;  %v2013_v35 = vrot.slane %v2012_v52, 4  ;;  %4286 = vrcp.f32 %v5295_v1 }
 0x1e2   : > { %v1194_v5 = vsel %vm1193_vm13, %v4277_v54, %v1190_v58  ;;  %vm1196_vm14 = vcmp.eq.f32.partialorder %v1195_v55, 8.507059e+37  ;;  %v2107_v60 = vor.u32 %v5236_v37, %v5211_v59  ;;  %v5312_v12 = vadd.f32 1.0, %v4281_v57 }
 0x1e3   : > { %v4283_v61 = vpop.eup %4282  ;;  %v1199_v10 = vsel %vm1196_vm14, %v1198_v51, %v1194_v5  ;;  %v927_v21 = vand.u32 2147483648, %v5295_v1  ;;  %4288 = vpow2.f32 %v3669_v9  ;;  %v659_v22 = vmul.f32 %v4371_v26, %v4868_v28 }
 0x1e4   : > { %v1330_v38 = vmul.f32 %v1199_v10, %v5111_v50  ;;  %v925_v52 = vand.u32 2147483647, %v5295_v1  ;;  %4290 = vrcp.f32 %v5312_v12  ;;  %v3649_v30 = vmul.f32 -1.442695, %v5301_v0 }
 0x1e5   : > { %v4285_v55 = vpop.eup %4284  ;;  %v5321_v59 = vadd.f32 1.0, %v4283_v61  ;;  %v5323_v37 = vrot.slane %v2021_v23, 4  ;;  %v5326_v54 = vadd.f32 %v4870_v11, %v659_v22  ;;  %v2015_v32 = vsel %vm5197_vm4, %v2013_v35, %v5078_v3 }
 0x1e6   : > { %v1362_v39 = vpack.c.bf16 %v1330_v38, %v1330_v38  ;;  %v2108_v50 = vrot.slane %v2107_v60, 4  ;;  %v5331_v43 = vadd.f32 1.0, %v4285_v55  ;;  %vm921_vm5 = vweird.f32 %v5295_v1 }
 0x1e7   : > { %v4287_v27 = vpop.eup %4286  ;;  %v928_v13 = vor.u32 1.1754944e-38, %v927_v21  ;;  %v1240_v40 = vand.u32 2147483647, %v5312_v12  ;;  %4292 = vrcp.f32 %v5321_v59  ;;  %vm5339_vm10 = vcmp.eq.f32.partialorder %v925_v52, 8.507059e+37 }
 0x1e8   : > { %2149 = vrot.lane.b32.xlu1 %v2015_v32, %s4456_s11  ;;  %v1674_v41 = vshrl.u32 %v1362_v39, 16  ;;  %v1677_v15 = vshll.u32 %v1362_v39, 16  ;;  %1917 = vrot.lane.b32.xlu0 %v1362_v39, %s4455_s21  ;;  %v917_v25 = vmul.f32 %v4287_v27, %v5295_v1  ;;  %4294 = vpow2.f32 %v3649_v30 }
 0x1e9   : > { %v4289_v47 = vpop.eup %4288  ;;  %vm1236_vm15 = vweird.f32 %v5312_v12  ;;  %v1242_v2 = vand.u32 2147483648, %v5312_v12  ;;  %v2024_v33 = vsel %vm5197_vm4, %v5323_v37, %v5260_v62  ;;  %4296 = vrcp.f32 %v5331_v43 }
 0x1ea   : > { %v5351_v45 = vmul.f32 -1.442695, %v5326_v54  ;;  %v4291_v63 = vpop.eup %4290  ;;  %v1676_v4 = vrot.slane %v1674_v41, 7  ;;  %v918_v31 = vsub.f32 1.0, %v917_v25  ;;  %vm922_vm0 = vweird.f32 %v4287_v27 }
 0x1eb   : > { %v940_v6 = vand.u32 2147483647, %v5321_v59  ;;  %v1232_v29 = vmul.f32 %v4291_v63, %v5312_v12  ;;  %vm5355_vm2 = vcmp.eq.f32.partialorder %v1240_v40, 8.507059e+37  ;;  %v942_v49 = vand.u32 2147483648, %v5321_v59  ;;  %vm923_vm9 = vmor %vm921_vm5, %vm922_vm0 }
 0x1ec   : > { %v2109_v57 = vrot.slane %v1674_v41, 4  ;;  %v2110_v58 = vrot.slane %v1677_v15, 5  ;;  %v1679_v23 = vor.u32 %v1677_v15, %v1676_v4  ;;  %v1680_v9 = vrot.slane %v1676_v4, 4 }
 0x1ed   : > { %v919_v51 = vmul.f32 %v4287_v27, %v918_v31  ;;  %v1225_v35 = vand.u32 2147483647, %v5331_v43  ;;  %v4293_v5 = vpop.eup %4292  ;;  %v1233_v60 = vsub.f32 1.0, %v1232_v29  ;;  %v1243_v61 = vor.u32 1.1754944e-38, %v1242_v2 }
 0x1ee   : > { %vm936_vm3 = vweird.f32 %v5321_v59  ;;  %v5362_v10 = vadd.f32 1.0, %v4289_v47  ;;  %v4295_v21 = vpop.eup %4294  ;;  %v5367_v26 = vsel %vm5125_vm8, %v1680_v9, %v5177_v46  ;;  %v1822_v22 = vsel %vm5064_vm1, %v1679_v23, %v1821_v20 }
 0x1ef   : > { %v920_v38 = vadd.f32 %v4287_v27, %v919_v51  ;;  %v932_v52 = vmul.f32 %v4293_v5, %v5321_v59  ;;  %vm5372_vm7 = vcmp.eq.f32.partialorder %v940_v6, 8.507059e+37  ;;  %vm1221_vm11 = vweird.f32 %v5331_v43  ;;  %v4297_v55 = vpop.eup %4296  ;;  %1823 = vst [vmem:[#allocation2 + $0x68] sm:$0xf] %v1822_v22  ;;  %v1785_v22 = vld [vmem:[#allocation2 + $0x20] sm:$0xf] }
 0x1f0   : > { %v1234_v46 = vmul.f32 %v4291_v63, %v1233_v60  ;;  %vm1237_vm13 = vweird.f32 %v4291_v63  ;;  %v943_v39 = vor.u32 1.1754944e-38, %v942_v49  ;;  %v2111_v32 = vor.u32 %v2110_v58, %v2109_v57  ;;  %2191 = vrot.lane.b32.xlu0 %v2108_v50, %s4456_s11 }
 0x1f1   : > { %v924_v40 = vsel %vm923_vm9, %v4287_v27, %v920_v38  ;;  %v933_v41 = vsub.f32 1.0, %v932_v52  ;;  %v1217_v15 = vmul.f32 %v4297_v55, %v5331_v43  ;;  %vm5382_vm14 = vcmp.eq.f32.partialorder %v1225_v35, 8.507059e+37  ;;  %vm1238_vm5 = vmor %vm1236_vm15, %vm1237_vm13 }
 0x1f2   : > { %v929_v47 = vsel %vm5339_vm10, %v928_v13, %v924_v40  ;;  %v1235_v2 = vadd.f32 %v4291_v63, %v1234_v46  ;;  %v1227_v1 = vand.u32 2147483648, %v5331_v43  ;;  %4298 = vrcp.f32 %v5362_v10 }
 0x1f3   : > { %v1312_v4 = vmul.f32 %v929_v47, %v5214_v44  ;;  %v934_v50 = vmul.f32 %v4293_v5, %v933_v41  ;;  %vm937_vm0 = vweird.f32 %v4293_v5  ;;  %v1218_v27 = vsub.f32 1.0, %v1217_v15 }
 0x1f4   : > { %v1239_v31 = vsel %vm1238_vm5, %v4291_v63, %v1235_v2  ;;  %v2112_v6 = vrot.slane %v2111_v32, 4  ;;  %vm1222_vm9 = vweird.f32 %v4297_v55  ;;  %v5393_v20 = vadd.f32 1.0, %v4295_v21  ;;  %vm938_vm10 = vmor %vm936_vm3, %vm937_vm0 }
 0x1f5   : > { %v5395_v3 = vpack.c.bf16 %v1312_v4, %v1312_v4  ;;  %v1244_v13 = vsel %vm5355_vm2, %v1243_v61, %v1239_v31  ;;  %v935_v29 = vadd.f32 %v4293_v5, %v934_v50  ;;  %v1219_v49 = vmul.f32 %v4297_v55, %v1218_v27  ;;  %vm1223_vm15 = vmor %vm1221_vm11, %vm1222_vm9 }
 0x1f6   : > { %v1333_v44 = vmul.f32 %v1244_v13, %v5239_v7  ;;  %v1228_v12 = vor.u32 1.1754944e-38, %v1227_v1  ;;  %v1270_v57 = vand.u32 2147483647, %v5362_v10  ;;  %4300 = vrcp.f32 %v5393_v20 }
 0x1f7   : > { %v1530_v63 = vshrl.u32 %v5395_v3, 16  ;;  %1881 = vrot.lane.b32.xlu1 %v5395_v3, %s4455_s21  ;;  %v939_v58 = vsel %vm938_vm10, %v4293_v5, %v935_v29  ;;  %v1220_v18 = vadd.f32 %v4297_v55, %v1219_v49  ;;  %v1272_v23 = vand.u32 2147483648, %v5362_v10 }
 0x1f8   : > { %v5408_v9 = vpop.eup %4298  ;;  %v1533_v7 = vshll.u32 %v5395_v3, 16  ;;  %v1365_v59 = vpack.c.bf16 %v1333_v44, %v1333_v44  ;;  %v944_v51 = vsel %vm5372_vm7, %v943_v39, %v939_v58  ;;  %v2114_v35 = vsel %vm5197_vm4, %v2112_v6, %v5169_v53 }
 0x1f9   : > { %v1532_v5 = vrot.slane %v1530_v63, 7  ;;  %v1313_v60 = vmul.f32 %v944_v51, %v5257_v8  ;;  %v1224_v61 = vsel %vm1223_vm15, %v4297_v55, %v1220_v18  ;;  %v1262_v21 = vmul.f32 %v5408_v9, %v5362_v10 }
 0x1fa   : > { %1923 = vrot.lane.b32.xlu0 %v1365_v59, %s4455_s21  ;;  %v1229_v38 = vsel %vm5382_vm14, %v1228_v12, %v1224_v61  ;;  %v1698_v53 = vshrl.u32 %v1365_v59, 16  ;;  %v1701_v52 = vshll.u32 %v1365_v59, 16  ;;  %vm1266_vm2 = vweird.f32 %v5362_v10  ;;  %v1825_v59 = vld [vmem:[#allocation2 + $0x70] sm:$0xf] }
 0x1fb   : > { %v1535_v43 = vor.u32 %v1533_v7, %v1532_v5  ;;  %v1345_v30 = vpack.c.bf16 %v1313_v60, %v1313_v60  ;;  %v1332_v8 = vmul.f32 %v1229_v38, %v5269_v36  ;;  %vm5431_vm3 = vcmp.eq.f32.partialorder %v1270_v57, 8.507059e+37  ;;  %v1422_v38 = vld [vmem:[#allocation2 + $0x78] sm:$0x1] }
 0x1fc   : > { %v1273_v46 = vor.u32 1.1754944e-38, %v1272_v23  ;;  %v4301_v39 = vpop.eup %4300  ;;  %v1700_v32 = vrot.slane %v1698_v53, 7  ;;  %v5435_v40 = vrot.slane %v1701_v52, 5  ;;  %v2124_v41 = vrot.slane %v1698_v53, 4 }
 0x1fd   : > { %v1263_v15 = vsub.f32 1.0, %v1262_v21  ;;  %vm966_vm7 = vweird.f32 %v5393_v20  ;;  %v1786_v25 = vsel %vm5064_vm1, %v1535_v43, %v1785_v22  ;;  %1883 = vrot.lane.b32.xlu2 %v1345_v30, %s4455_s21  ;;  %v1364_v47 = vpack.c.bf16 %v1332_v8, %v1332_v8 }
 0x1fe   : > { %v1538_v36 = vshrl.u32 %v1345_v30, 16  ;;  %v1541_v2 = vshll.u32 %v1345_v30, 16  ;;  %1787 = vst [vmem:[#allocation2 + $0x20] sm:$0xf] %v1786_v25  ;;  %v1703_v1 = vor.u32 %v1701_v52, %v1700_v32  ;;  %vm1267_vm11 = vweird.f32 %v5408_v9 }
 0x1ff   : > { %v1264_v4 = vmul.f32 %v5408_v9, %v1263_v15  ;;  %v962_v50 = vmul.f32 %v4301_v39, %v5393_v20  ;;  %v1536_v27 = vrot.slane %v1532_v5, 4  ;;  %2193 = vrot.lane.b32.xlu1 %v2114_v35, %s4456_s11  ;;  %v1690_v31 = vshrl.u32 %v1364_v47, 16  ;;  %vm1268_vm13 = vmor %vm1266_vm2, %vm1267_vm11  ;;  %v4373_v15 = vld [vmem:[%s4568_s23 + $0x50] sm:$0xff] }
 0x200   : > { %v2125_v6 = vor.u32 %v2124_v41, %v5435_v40  ;;  %v1540_v13 = vrot.slane %v1538_v36, 7  ;;  %v5446_v29 = vrot.slane %v1541_v2, 5  ;;  %v2034_v49 = vrot.slane %v1538_v36, 4 }
 0x201   : > { %v1265_v44 = vadd.f32 %v5408_v9, %v1264_v4  ;;  %v963_v12 = vsub.f32 1.0, %v962_v50  ;;  %v1692_v57 = vrot.slane %v1690_v31, 7  ;;  %v1693_v58 = vshll.u32 %v1364_v47, 16  ;;  %v1395_v4 = vld [vmem:[#allocation2 + $0x30] sm:$0x1]  ;;  %v4375_v50 = vld [vmem:[%s4568_s23 + $0x68] sm:$0xff] }
 0x202   : > { %v1543_v18 = vor.u32 %v1541_v2, %v1540_v13  ;;  %v970_v23 = vand.u32 2147483647, %v5393_v20  ;;  %2153 = vrot.lane.b32.xlu0 %v2024_v33, %s4456_s11  ;;  %vm967_vm14 = vweird.f32 %v4301_v39  ;;  %v972_v5 = vand.u32 2147483648, %v5393_v20 }
 0x203   : > { %v1269_v51 = vsel %vm1268_vm13, %v5408_v9, %v1265_v44  ;;  %v964_v35 = vmul.f32 %v4301_v39, %v963_v12  ;;  %v1695_v60 = vor.u32 %v1693_v58, %v1692_v57  ;;  %v1696_v61 = vrot.slane %v1692_v57, 4  ;;  %vm968_vm5 = vmor %vm966_vm7, %vm967_vm14 }
 0x204   : > { %v2126_v10 = vrot.slane %v2125_v6, 4  ;;  %v5462_v21 = vsel %vm5125_vm8, %v1536_v27, %v1543_v18  ;;  %v2035_v22 = vor.u32 %v2034_v49, %v5446_v29  ;;  %v1274_v62 = vsel %vm5431_vm3, %v1273_v46, %v1269_v51 }
 0x205   : > { %v965_v37 = vadd.f32 %v4301_v39, %v964_v35  ;;  %v973_v33 = vor.u32 1.1754944e-38, %v972_v5  ;;  %v1826_v9 = vsel %vm5064_vm1, %v1695_v60, %v1825_v59  ;;  %1921 = vrot.lane.b32.xlu2 %v1364_v47, %s4455_s21  ;;  %v5472_v53 = vsel %vm5125_vm8, %v1696_v61, %v1703_v1  ;;  %v4376_v59 = vld [vmem:[%s4568_s23 + $0x60] sm:$0xff] }
 0x206   : > { %v2118_v52 = vrot.slane %v1690_v31, 4  ;;  %v2119_v43 = vrot.slane %v1693_v58, 5  ;;  %1827 = vst [vmem:[#allocation2 + $0x70] sm:$0xf] %v1826_v9  ;;  %vm971_vm0 = vcmp.eq.f32.partialorder %v970_v23, 8.507059e+37  ;;  %v2028_v8 = vrot.slane %v1530_v63, 4 }
 0x207   : > { %v969_v30 = vsel %vm968_vm5, %v4301_v39, %v965_v37  ;;  %v2029_v55 = vrot.slane %v1533_v7, 5  ;;  %2199 = vrot.lane.b32.xlu1 %v2126_v10, %s4456_s11  ;;  %v1335_v46 = vmul.f32 %v1274_v62, %v5291_v34  ;;  %4302 = vpow2.f32 %v5351_v45  ;;  %v4372_v63 = vld [vmem:[%s4568_s23 + $0x40] sm:$0xff]  ;;  %v4374_v34 = vld [vmem:[%s4568_s23 + $0x58] sm:$0xff] }
 0x208   : > { %v974_v20 = vsel %vm971_vm0, %v973_v33, %v969_v30  ;;  %v1423_v32 = vsel %vm4875_vm6, 0, %v1422_v38  ;;  %v2036_v41 = vrot.slane %v2035_v22, 4  ;;  %v639_v3 = vmul.f32 %v4372_v63, %v4868_v28 }
 0x209   : > { %v1315_v39 = vmul.f32 %v974_v20, %v5301_v0  ;;  %1424 = vst [vmem:[#allocation2 + $0x78] sm:$0x1] %v1423_v32  ;;  %v641_v7 = vmul.f32 %v4373_v15, %v4868_v28  ;;  %v2120_v25 = vor.u32 %v2119_v43, %v2118_v52  ;;  %v2030_v47 = vor.u32 %v2029_v55, %v2028_v8  ;;  %v1392_v0 = vld [vmem:[#allocation2 + $0x28] sm:$0x1] }
 0x20a   : > { %v642_v36 = vmul.f32 %v4374_v34, %v4868_v28  ;;  %2159 = vrot.lane.b32.xlu0 %v2036_v41, %s4456_s11  ;;  %v5494_v2 = vadd.f32 %v4870_v11, %v639_v3  ;;  %v644_v27 = vmul.f32 %v4375_v50, %v4868_v28  ;;  %v1367_v31 = vpack.c.bf16 %v1335_v46, %v1335_v46  ;;  %v4377_v8 = vld [vmem:[%s4568_s23 + $0x78] sm:$0xff] }
 0x20b   : > { %v1347_v45 = vpack.c.bf16 %v1315_v39, %v1315_v39  ;;  %v5497_v1 = vadd.f32 %v4870_v11, %v641_v7  ;;  %v1393_v6 = vsel %vm4875_vm6, 0, %v1392_v0  ;;  %v1396_v13 = vsel %vm4875_vm6, 0, %v1395_v4  ;;  %v4378_v0 = vld [vmem:[%s4568_s23 + $0x70] sm:$0xff] }
 0x20c   : > { %v5506_v49 = vadd.f32 %v4870_v11, %v642_v36  ;;  %v3648_v44 = vmul.f32 -1.442695, %v5494_v2  ;;  %1394 = vst [vmem:[#allocation2 + $0x28] sm:$0x1] %v1393_v6  ;;  %v5511_v57 = vadd.f32 %v4870_v11, %v644_v27  ;;  %v2121_v18 = vrot.slane %v2120_v25, 4  ;;  %v1914_v7 = vpop.permute.xlu2 %1913 }
 0x20d   : > { %v3650_v12 = vmul.f32 -1.442695, %v5497_v1  ;;  %v4303_v58 = vpop.eup %4302  ;;  %1927 = vrot.lane.b32.xlu2 %v1367_v31, %s4455_s21  ;;  %v2031_v23 = vrot.slane %v2030_v47, 4  ;;  %1397 = vst [vmem:[#allocation2 + $0x30] sm:$0x1] %v1396_v13  ;;  %v643_v51 = vmul.f32 %v4376_v59, %v4868_v28  ;;  %v1554_v5 = vshrl.u32 %v1347_v45, 16 }
 0x20e   : > { %v5516_v35 = vadd.f32 1.0, %v4303_v58  ;;  %4304 = vpow2.f32 %v3648_v44  ;;  %v1557_v60 = vshll.u32 %v1347_v45, 16  ;;  %v1714_v61 = vshrl.u32 %v1367_v31, 16 }
 0x20f   : > { %1887 = vrot.lane.b32.xlu1 %v1347_v45, %s4455_s21  ;;  %v1717_v10 = vshll.u32 %v1367_v31, 16  ;;  %4306 = vpow2.f32 %v3650_v12  ;;  %v3651_v22 = vmul.f32 -1.442695, %v5506_v49  ;;  %v3653_v62 = vmul.f32 -1.442695, %v5511_v57 }
 0x210   : > { %4308 = vrcp.f32 %v5516_v35  ;;  %v5523_v37 = vadd.f32 %v4870_v11, %v643_v51  ;;  %v2123_v33 = vsel %vm5197_vm4, %v2121_v18, %v5435_v40  ;;  %v1556_v38 = vrot.slane %v1554_v5, 7 }
 0x211   : > { %v1716_v9 = vrot.slane %v1714_v61, 7  ;;  %v2033_v52 = vsel %vm5197_vm4, %v2031_v23, %v5446_v29  ;;  %v5532_v43 = vrot.slane %v1557_v60, 5  ;;  %v2043_v30 = vrot.slane %v1554_v5, 4 }
 0x212   : > { %2197 = vrot.lane.b32.xlu0 %v2123_v33, %s4456_s11  ;;  %v646_v55 = vmul.f32 %v4377_v8, %v4868_v28  ;;  %v5536_v46 = vor.u32 %v1557_v60, %v1556_v38  ;;  %v5540_v32 = vrot.slane %v1717_v10, 5  ;;  %4310 = vpow2.f32 %v3651_v22 }
 0x213   : > { %v5538_v20 = vor.u32 %v1717_v10, %v1716_v9  ;;  %v2133_v41 = vrot.slane %v1714_v61, 4  ;;  %4312 = vpow2.f32 %v3653_v62  ;;  %v3652_v39 = vmul.f32 -1.442695, %v5523_v37 }
 0x214   : > { %v4305_v40 = vpop.eup %4304  ;;  %v5544_v29 = vadd.f32 %v4870_v11, %v646_v55  ;;  %v1255_v3 = vand.u32 2147483647, %v5516_v35  ;;  %vm6641_vm9 = vcmask 519424   ;;  %v2044_v45 = vor.u32 %v2043_v30, %v5532_v43 }
 0x215   : > { %v4307_v63 = vpop.eup %4306  ;;  %2157 = vrot.lane.b32.xlu2 %v2033_v52, %s4456_s11  ;;  %v5548_v15 = vadd.f32 1.0, %v4305_v40  ;;  %1988 = vst.msk [vmem:[#allocation2 + $0x60] sm:$0xf] %vm6641_vm9, %v1914_v7  ;;  %4314 = vpow2.f32 %v3652_v39  ;;  %v645_v4 = vmul.f32 %v4378_v0, %v4868_v28  ;;  %vm1251_vm10 = vweird.f32 %v5516_v35  ;;  %v1878_v52 = vpop.permute.xlu2 %1877 }
 0x216   : > { %v4309_v25 = vpop.eup %4308  ;;  %v5551_v47 = vadd.f32 1.0, %v4307_v63  ;;  %v3655_v34 = vmul.f32 -1.442695, %v5544_v29  ;;  %v1257_v50 = vand.u32 2147483648, %v5516_v35  ;;  %v2134_v27 = vor.u32 %v2133_v41, %v5540_v32  ;;  %1970 = vst.msk [vmem:[#allocation2 + $0x18] sm:$0xf] %vm6641_vm9, %v1878_v52 }
 0x217   : > { %v1247_v36 = vmul.f32 %v4309_v25, %v5516_v35  ;;  %4316 = vrcp.f32 %v5548_v15  ;;  %vm5563_vm15 = vcmp.eq.f32.partialorder %v1255_v3, 8.507059e+37  ;;  %v5568_v44 = vadd.f32 %v4870_v11, %v645_v4 }
 0x218   : > { %4318 = vrcp.f32 %v5551_v47  ;;  %v4311_v31 = vpop.eup %4310  ;;  %v955_v58 = vand.u32 2147483647, %v5548_v15  ;;  %v957_v18 = vand.u32 2147483648, %v5548_v15  ;;  %v987_v23 = vand.u32 2147483648, %v5551_v47 }
 0x219   : > { %v1248_v6 = vsub.f32 1.0, %v1247_v36  ;;  %4320 = vpow2.f32 %v3655_v34  ;;  %v4313_v12 = vpop.eup %4312  ;;  %v5573_v59 = vadd.f32 1.0, %v4311_v31  ;;  %vm1252_vm2 = vweird.f32 %v4309_v25 }
 0x21a   : > { %v2045_v5 = vrot.slane %v2044_v45, 4  ;;  %v5575_v60 = vadd.f32 1.0, %v4313_v12  ;;  %v1258_v10 = vor.u32 1.1754944e-38, %v1257_v50  ;;  %v5577_v22 = vrot.slane %v2134_v27, 4  ;;  %vm1253_vm7 = vmor %vm1251_vm10, %vm1252_vm2 }
 0x21b   : > { %v1249_v51 = vmul.f32 %v4309_v25, %v1248_v6  ;;  %v4315_v61 = vpop.eup %4314  ;;  %v985_v62 = vand.u32 2147483647, %v5551_v47  ;;  %4322 = vrcp.f32 %v5573_v59  ;;  %vm951_vm3 = vweird.f32 %v5548_v15 }
 0x21c   : > { %v1002_v9 = vand.u32 2147483648, %v5573_v59  ;;  %4324 = vrcp.f32 %v5575_v60  ;;  %vm5591_vm11 = vcmp.eq.f32.partialorder %v955_v58, 8.507059e+37  ;;  %v958_v40 = vor.u32 1.1754944e-38, %v957_v18 }
 0x21d   : > { %v4317_v33 = vpop.eup %4316  ;;  %v1250_v38 = vadd.f32 %v4309_v25, %v1249_v51  ;;  %2163 = vrot.lane.b32.xlu2 %v2045_v5, %s4456_s11  ;;  %vm981_vm13 = vweird.f32 %v5551_v47  ;;  %v5596_v41 = vor.u32 1.1754944e-38, %v987_v23  ;;  %v3654_v39 = vmul.f32 -1.442695, %v5568_v44  ;;  %v1789_v5 = vld [vmem:[#allocation2 + $0x28] sm:$0xf] }
 0x21e   : > { %v5585_v30 = vpop.eup %4318  ;;  %v947_v8 = vmul.f32 %v4317_v33, %v5548_v15  ;;  %v1000_v7 = vand.u32 2147483647, %v5573_v59  ;;  %v1030_v34 = vand.u32 2147483647, %v5575_v60  ;;  %vm5606_vm14 = vcmp.eq.f32.partialorder %v985_v62, 8.507059e+37 }
 0x21f   : > { %v4321_v63 = vpop.eup %4320  ;;  %v1254_v3 = vsel %vm1253_vm7, %v4309_v25, %v1250_v38  ;;  %v977_v35 = vmul.f32 %v5585_v30, %v5551_v47  ;;  %v1032_v4 = vand.u32 2147483648, %v5575_v60  ;;  %v5611_v50 = vadd.f32 1.0, %v4315_v61 }
 0x220   : > { %v1259_v36 = vsel %vm5563_vm15, %v1258_v10, %v1254_v3  ;;  %v948_v45 = vsub.f32 1.0, %v947_v8  ;;  %vm952_vm5 = vweird.f32 %v4317_v33  ;;  %v5614_v31 = vor.u32 1.1754944e-38, %v1002_v9  ;;  %v4033_v8 = vld [vmem:[%s6636_s5 + $0x28] sm:$0xff] }
 0x221   : > { %v1334_v25 = vmul.f32 %v1259_v36, %v5326_v54  ;;  %v978_v27 = vsub.f32 1.0, %v977_v35  ;;  %v5616_v6 = vpop.eup %4322  ;;  %vm982_vm0 = vweird.f32 %v5585_v30  ;;  %vm996_vm10 = vweird.f32 %v5573_v59  ;;  %vm953_vm12 = vmor %vm951_vm3, %vm952_vm5  ;;  %2519 = vmatpush.bf16.msrb.mxu0 %v4033_v8  ;;  %4173 = vmatpush.bf16.msrb.mxu3 %v4033_v8 }
 0x222   : > { %v949_v12 = vmul.f32 %v4317_v33, %v948_v45  ;;  %4326 = vrcp.f32 %v5611_v50  ;;  %v5621_v13 = vadd.f32 1.0, %v4321_v63  ;;  %v5623_v58 = vpop.eup %4324  ;;  %v992_v23 = vmul.f32 %v5616_v6, %v5573_v59 }
 0x223   : > { %v1366_v18 = vpack.c.bf16 %v1334_v25, %v1334_v25  ;;  %v979_v54 = vmul.f32 %v5585_v30, %v978_v27  ;;  %4328 = vpow2.f32 %v3654_v39  ;;  %vm997_vm2 = vweird.f32 %v5616_v6 }
 0x224   : > { %v950_v51 = vadd.f32 %v4317_v33, %v949_v12  ;;  %vm5630_vm7 = vcmp.eq.f32.partialorder %v1000_v7, 8.507059e+37  ;;  %v1022_v61 = vmul.f32 %v5623_v58, %v5575_v60  ;;  %v1033_v10 = vor.u32 1.1754944e-38, %v1032_v4  ;;  %vm998_vm3 = vmor %vm996_vm10, %vm997_vm2 }
 0x225   : > { %v1706_v62 = vshrl.u32 %v1366_v18, 16  ;;  %v1709_v38 = vshll.u32 %v1366_v18, 16  ;;  %1925 = vrot.lane.b32.xlu1 %v1366_v18, %s4455_s21  ;;  %v980_v9 = vadd.f32 %v5585_v30, %v979_v54  ;;  %v993_v52 = vsub.f32 1.0, %v992_v23 }
 0x226   : > { %v954_v39 = vsel %vm953_vm12, %v4317_v33, %v950_v51  ;;  %v1023_v63 = vsub.f32 1.0, %v1022_v61  ;;  %vm1027_vm9 = vweird.f32 %v5623_v58  ;;  %vm5645_vm15 = vcmp.eq.f32.partialorder %v1030_v34, 8.507059e+37  ;;  %vm983_vm12 = vmor %vm981_vm13, %vm982_vm0  ;;  %v1829_v34 = vld [vmem:[#allocation2 + $0x78] sm:$0xf] }
 0x227   : > { %v1015_v35 = vand.u32 2147483647, %v5611_v50  ;;  %v1708_v7 = vrot.slane %v1706_v62, 7  ;;  %v959_v15 = vsel %vm5591_vm11, %v958_v40, %v954_v39  ;;  %v2127_v36 = vrot.slane %v1706_v62, 4 }
 0x228   : > { %v2128_v45 = vrot.slane %v1709_v38, 5  ;;  %v5656_v33 = vpop.eup %4326  ;;  %v1314_v4 = vmul.f32 %v959_v15, %v5494_v2  ;;  %v984_v25 = vsel %vm983_vm12, %v5585_v30, %v980_v9  ;;  %v994_v27 = vmul.f32 %v5616_v6, %v993_v52 }
 0x229   : > { %v1024_v55 = vmul.f32 %v5623_v58, %v1023_v63  ;;  %v5662_v40 = vpop.eup %4328  ;;  %v1711_v12 = vor.u32 %v1709_v38, %v1708_v7  ;;  %v1712_v18 = vrot.slane %v1708_v7, 4  ;;  %v989_v47 = vsel %vm5606_vm14, %v5596_v41, %v984_v25 }
 0x22a   : > { %v2129_v54 = vor.u32 %v2128_v45, %v2127_v36  ;;  %v1346_v23 = vpack.c.bf16 %v1314_v4, %v1314_v4  ;;  %v1316_v51 = vmul.f32 %v989_v47, %v5497_v1  ;;  %v995_v2 = vadd.f32 %v5616_v6, %v994_v27 }
 0x22b   : > { %v1025_v30 = vadd.f32 %v5623_v58, %v1024_v55  ;;  %v1830_v61 = vsel %vm5064_vm1, %v1711_v12, %v1829_v34  ;;  %v5675_v62 = vsel %vm5125_vm8, %v1712_v18, %v5538_v20  ;;  %v1007_v1 = vmul.f32 %v5656_v33, %v5611_v50  ;;  %v4031_v34 = vld [vmem:[%s6636_s5 + $0x18] sm:$0xff]  ;;  %v1793_v12 = vld [vmem:[#allocation2 + $0x30] sm:$0xf] }
 0x22c   : > { %v2130_v38 = vrot.slane %v2129_v54, 4  ;;  %1831 = vst [vmem:[#allocation2 + $0x78] sm:$0xf] %v1830_v61  ;;  %v1546_v41 = vshrl.u32 %v1346_v23, 16  ;;  %v1549_v0 = vshll.u32 %v1346_v23, 16  ;;  %1885 = vrot.lane.b32.xlu0 %v1346_v23, %s4455_s21  ;;  %v5684_v9 = vpack.c.bf16 %v1316_v51, %v1316_v51 }
 0x22d   : > { %v999_v52 = vsel %vm998_vm3, %v5616_v6, %v995_v2  ;;  %vm6693_vm11 = vweird.f32 %v5575_v60  ;;  %v1008_v39 = vsub.f32 1.0, %v1007_v1  ;;  %vm1011_vm14 = vweird.f32 %v5611_v50  ;;  %v4032_v60 = vld [vmem:[%s6636_s5 + $0x20] sm:$0xff]  ;;  %v1398_v2 = vld [vmem:[#allocation2 + $0x38] sm:$0x1]  ;;  %v5729_v1 = vpop.permute.xlu2 %2151 }
 0x22e   : > { %vm5691_vm13 = vmor %vm6693_vm11, %vm1027_vm9  ;;  %v2132_v59 = vsel %vm5197_vm4, %v2130_v38, %v5540_v32  ;;  %v1004_v8 = vsel %vm5630_vm7, %v5614_v31, %v999_v52  ;;  %v1548_v63 = vrot.slane %v1546_v41, 7  ;;  %v2037_v7 = vrot.slane %v1546_v41, 4  ;;  %2520 = vmatpush.bf16.msrb.mxu0 %v4032_v60  ;;  %4174 = vmatpush.bf16.msrb.mxu3 %v4032_v60 }
 0x22f   : > { %v1029_v6 = vsel %vm5691_vm13, %v5623_v58, %v1025_v30  ;;  %v2038_v15 = vrot.slane %v1549_v0, 5  ;;  %2201 = vrot.lane.b32.xlu2 %v2132_v59, %s4456_s11  ;;  %v1562_v32 = vshrl.u32 %v5684_v9, 16  ;;  %v1565_v31 = vshll.u32 %v5684_v9, 16 }
 0x230   : > { %v1317_v36 = vmul.f32 %v1004_v8, %v5506_v49  ;;  %v1034_v58 = vsel %vm5645_vm15, %v1033_v10, %v1029_v6  ;;  %v1009_v45 = vmul.f32 %v5656_v33, %v1008_v39  ;;  %v1551_v4 = vor.u32 %v1549_v0, %v1548_v63 }
 0x231   : > { %v1552_v25 = vrot.slane %v1548_v63, 4  ;;  %v2039_v27 = vor.u32 %v2038_v15, %v2037_v7  ;;  %v1564_v55 = vrot.slane %v1562_v32, 7  ;;  %v1319_v54 = vmul.f32 %v1034_v58, %v5511_v57 }
 0x232   : > { %v1349_v18 = vpack.c.bf16 %v1317_v36, %v1317_v36  ;;  %v2046_v49 = vrot.slane %v1562_v32, 4  ;;  %v1017_v3 = vand.u32 2147483648, %v5611_v50  ;;  %v1790_v10 = vsel %vm5064_vm1, %v1551_v4, %v1789_v5  ;;  %2521 = vmatpush.bf16.msrb.mxu0 %v4031_v34  ;;  %4175 = vmatpush.bf16.msrb.mxu3 %v4031_v34  ;;  %v1434_v36 = vld [vmem:[#allocation2 + $0x14] sm:$0x8]  ;;  %v1431_v34 = vld [vmem:[#allocation2 + $0xc] sm:$0x8] }
 0x233   : > { %v5725_v47 = vsel %vm5125_vm8, %v1552_v25, %v5536_v46  ;;  %v2040_v23 = vrot.slane %v2039_v27, 4  ;;  %v1567_v51 = vor.u32 %v1565_v31, %v1564_v55  ;;  %1791 = vst [vmem:[#allocation2 + $0x28] sm:$0xf] %v1790_v10  ;;  %v5727_v38 = vpack.c.bf16 %v1319_v54, %v1319_v54  ;;  %v1872_v10 = vpop.permute.xlu1 %1871 }
 0x234   : > { %v1570_v30 = vshrl.u32 %v1349_v18, 16  ;;  %v1573_v61 = vshll.u32 %v1349_v18, 16  ;;  %v2047_v57 = vrot.slane %v1565_v31, 5  ;;  %2203 = vrot.lane.b32.xlu0 %v5577_v22, %s4456_s11  ;;  %v1568_v46 = vrot.slane %v1564_v55, 4 }
 0x235   : > { %v2042_v41 = vsel %vm5197_vm4, %v2040_v23, %v5532_v43  ;;  %v1794_v0 = vsel %vm5064_vm1, %v1567_v51, %v1793_v12  ;;  %v1010_v52 = vadd.f32 %v5656_v33, %v1009_v45  ;;  %vm1012_vm9 = vweird.f32 %v5656_v33  ;;  %v1876_v45 = vpop.permute.xlu0 %1875  ;;  %v1401_v23 = vld [vmem:[#allocation2 + $0x40] sm:$0x1] }
 0x236   : > { %2161 = vrot.lane.b32.xlu1 %v2042_v41, %s4456_s11  ;;  %1795 = vst [vmem:[#allocation2 + $0x30] sm:$0xf] %v1794_v0  ;;  %v1572_v20 = vrot.slane %v1570_v30, 7  ;;  %v5740_v59 = vrot.slane %v1573_v61, 5  ;;  %v2052_v8 = vrot.slane %v1570_v30, 4  ;;  %vm1013_vm5 = vmor %vm1011_vm14, %vm1012_vm9  ;;  %vm1016_vm0 = vcmp.eq.f32.partialorder %v1015_v35, 8.507059e+37 }
 0x237   : > { %v1018_v43 = vor.u32 1.1754944e-38, %v1017_v3  ;;  %v1399_v22 = vsel %vm4875_vm6, 0, %v1398_v2  ;;  %v1014_v60 = vsel %vm1013_vm5, %v5656_v33, %v1010_v52  ;;  %v1586_v63 = vshrl.u32 %v5727_v38, 16  ;;  %v5775_v3 = vpop.permute.xlu2 %2195  ;;  %v4030_v0 = vld [vmem:[%s6636_s5 + $0x10] sm:$0xff] }
 0x238   : > { %v1575_v6 = vor.u32 %v1573_v61, %v1572_v20  ;;  %v2053_v39 = vor.u32 %v2052_v8, %v5740_v59  ;;  %1400 = vst [vmem:[#allocation2 + $0x38] sm:$0x1] %v1399_v22  ;;  %v2048_v7 = vor.u32 %v2047_v57, %v2046_v49  ;;  %v1589_v32 = vshll.u32 %v5727_v38, 16  ;;  %2522 = vmatpush.bf16.msrb.mxu0 %v4030_v0 }
 0x239   : > { %v1019_v15 = vsel %vm1016_vm0, %v1018_v43, %v1014_v60  ;;  %4330 = vrcp.f32 %v5621_v13  ;;  %v1588_v31 = vrot.slane %v1586_v63, 7  ;;  %vm1428_vm10 = vcmask 781827   ;;  %4176 = vmatpush.bf16.msrb.mxu3 %v4030_v0 }
 0x23a   : > { %v5756_v50 = vsel %vm5125_vm8, %v1568_v46, %v1575_v6  ;;  %v2054_v35 = vrot.slane %v2053_v39, 4  ;;  %v1318_v5 = vmul.f32 %v1019_v15, %v5523_v37  ;;  %vm1429_vm15 = vsmask.f32 7950  ;;  %v4379_v39 = vld [vmem:[%s4568_s23 + $0xf8] sm:$0xff] }
 0x23b   : > { %v1591_v58 = vor.u32 %v1589_v32, %v1588_v31  ;;  %v2049_v4 = vrot.slane %v2048_v7, 4  ;;  %v5761_v25 = vrot.slane %v1589_v32, 5  ;;  %v5763_v27 = vrot.slane %v1586_v63, 4  ;;  %vm5766_vm2 = vmand %vm1428_vm10, %vm1429_vm15  ;;  %v4380_v63 = vld [vmem:[%s4568_s23 + $0x88] sm:$0xff] }
 0x23c   : > { %2167 = vrot.lane.b32.xlu2 %v2054_v35, %s4456_s11  ;;  %v1350_v33 = vpack.c.bf16 %v1318_v5, %v1318_v5  ;;  %1891 = vrot.lane.b32.xlu0 %v1349_v18, %s4455_s21  ;;  %v1060_v55 = vand.u32 2147483647, %v5621_v13  ;;  %v1062_v49 = vand.u32 2147483648, %v5621_v13  ;;  %v1435_v18 = vsel %vm5766_vm2, 0, %v1434_v36 }
 0x23d   : > { %1436 = vst [vmem:[#allocation2 + $0x14] sm:$0x8] %v1435_v18  ;;  %v1432_v2 = vsel %vm5766_vm2, 0, %v1431_v34  ;;  %v5782_v30 = vadd.f32 1.0, %v5662_v40  ;;  %vm6698_vm7 = vcmask 257024   ;;  %v2051_v52 = vsel %vm5197_vm4, %v2049_v4, %v5740_v59  ;;  %v4029_v59 = vld [vmem:[%s6636_s5 + $0x8] sm:$0xff] }
 0x23e   : > { %1889 = vrot.lane.b32.xlu1 %v5684_v9, %s4455_s21  ;;  %v1578_v12 = vshrl.u32 %v1350_v33, 16  ;;  %v1581_v54 = vshll.u32 %v1350_v33, 16  ;;  %v1464_v9 = vld [vmem:[#allocation2 + $0x64] sm:$0x8]  ;;  %1780 = vst.msk [vmem:[#allocation2 + $0x14] sm:$0xf] %vm6698_vm7, %v5143_v48  ;;  %vm1056_vm12 = vweird.f32 %v5621_v13  ;;  %vm6700_vm14 = vmmov %vm6698_vm7  ;;  %v662_v60 = vmul.f32 %v4379_v39, %v4868_v28  ;;  %2523 = vmatpush.bf16.msrb.mxu0 %v4029_v59 }
 0x23f   : > { %v5777_v51 = vpop.eup %4330  ;;  %v1797_v40 = vld [vmem:[#allocation2 + $0x38] sm:$0xf]  ;;  %vm2241_vm3 = vcmask 781824   ;;  %vm6699_vm11 = vcmask 519424   ;;  %4332 = vrcp.f32 %v5782_v30  ;;  %1433 = vst [vmem:[#allocation2 + $0xc] sm:$0x8] %v1432_v2  ;;  %v648_v7 = vmul.f32 %v4380_v63, %v4868_v28  ;;  %4177 = vmatpush.bf16.msrb.mxu3 %v4029_v59 }
 0x240   : > { %v1580_v61 = vrot.slane %v1578_v12, 7  ;;  %v2055_v57 = vrot.slane %v1578_v12, 4  ;;  %v2056_v41 = vrot.slane %v1581_v54, 5  ;;  %v1052_v46 = vmul.f32 %v5777_v51, %v5621_v13  ;;  %1969 = vst.msk [vmem:[#allocation2 + $0x14] sm:$0xf] %vm6699_vm11, %v1876_v45  ;;  %v5800_v48 = vld [vmem:[%s6636_s5 + $0x58] sm:$0xff]  ;;  %vm6701_vm9 = vmmov %vm6699_vm11  ;;  %v1916_v12 = vpop.permute.xlu0 %1915  ;;  %v1874_v13 = vpop.permute.xlu1 %1873 }
 0x241   : > { %vm1057_vm13 = vweird.f32 %v5777_v51  ;;  %1776 = vst.msk [vmem:[#allocation2 + $0xc] sm:$0xf] %vm6700_vm14, %v5253_v56  ;;  %v1402_v6 = vsel %vm4875_vm6, 0, %v1401_v23  ;;  %2881 = vmatpush.bf16.msrb.mxu1 %v5800_v48  ;;  %v1465_v35 = vsel %vm5766_vm2, 0, %v1464_v9  ;;  %vm5827_vm5 = vcmp.eq.f32.partialorder %v1060_v55, 8.507059e+37 }
 0x242   : > { %v1583_v20 = vor.u32 %v1581_v54, %v1580_v61  ;;  %v1584_v8 = vrot.slane %v1580_v61, 4  ;;  %v2057_v43 = vor.u32 %v2056_v41, %v2055_v57  ;;  %v1053_v22 = vsub.f32 1.0, %v1052_v46  ;;  %1967 = vst.msk [vmem:[#allocation2 + $0xc] sm:$0xf] %vm6701_vm9, %v1872_v10  ;;  %v4382_v54 = vld [vmem:[%s4568_s23 + $0xf0] sm:$0xff]  ;;  %vm1058_vm15 = vmor %vm1056_vm12, %vm1057_vm13 }
 0x243   : > { %v5832_v31 = vadd.f32 %v4870_v11, %v662_v60  ;;  %v5835_v36 = vadd.f32 %v4870_v11, %v648_v7  ;;  %v1063_v4 = vor.u32 1.1754944e-38, %v1062_v49  ;;  %vm6704_vm0 = vsmask.f32 3328  ;;  %1403 = vst [vmem:[#allocation2 + $0x40] sm:$0x1] %v1402_v6  ;;  %vm6707_vm12 = vmmov %vm6701_vm9  ;;  %v4383_v6 = vld [vmem:[%s4568_s23 + $0x98] sm:$0xff] }
 0x244   : > { %v1798_v15 = vsel %vm5064_vm1, %v1583_v20, %v1797_v40  ;;  %1893 = vrot.lane.b32.xlu2 %v1350_v33, %s4455_s21  ;;  %v5820_v56 = vsel %vm5125_vm8, %v1584_v8, %v1591_v58  ;;  %v1054_v32 = vmul.f32 %v5777_v51, %v1053_v22  ;;  %2165 = vrot.lane.b32.xlu0 %v2051_v52, %s4456_s11  ;;  %v4381_v33 = vld [vmem:[%s4568_s23 + $0x80] sm:$0xff]  ;;  %v2058_v45 = vrot.slane %v2057_v43, 4  ;;  %vm5844_vm10 = vmand %vm2241_vm3, %vm6704_vm0  ;;  %v1404_v41 = vld [vmem:[#allocation2 + $0x48] sm:$0x1] }
 0x245   : > { %1799 = vst [vmem:[#allocation2 + $0x38] sm:$0xf] %v1798_v15  ;;  %v647_v58 = vmul.f32 %v4381_v33, %v4868_v28  ;;  %v661_v18 = vmul.f32 %v4382_v54, %v4868_v28  ;;  %v4333_v10 = vpop.eup %4332  ;;  %v3671_v49 = vmul.f32 -1.442695, %v5832_v31  ;;  %v3657_v23 = vmul.f32 -1.442695, %v5835_v36  ;;  %vm6708_vm13 = vmmov %vm6701_vm9 }
 0x246   : > { %1895 = vrot.lane.b32.xlu1 %v5727_v38, %s4455_s21  ;;  %v1055_v34 = vadd.f32 %v5777_v51, %v1054_v32  ;;  %v2062_v38 = vor.u32 %v5763_v27, %v5761_v25  ;;  %1466 = vst [vmem:[#allocation2 + $0x64] sm:$0x8] %v1465_v35  ;;  %v1037_v57 = vmul.f32 %v4333_v10, %v5782_v30  ;;  %v2190_v27 = vpop.permute.xlu2 %2189  ;;  %v1405_v20 = vsel %vm4875_vm6, 0, %v1404_v41  ;;  %vm6709_vm0 = vmmov %vm6698_vm7 }
 0x247   : > { %v5859_v2 = vadd.f32 %v4870_v11, %v647_v58  ;;  %v2249_v61 = vld [vmem:[#allocation2 + $0x14] sm:$0xf]  ;;  %1820 = vst.msk [vmem:[#allocation2 + $0x64] sm:$0xf] %vm6698_vm7, %v5228_v17  ;;  %v5866_v46 = vadd.f32 %v4870_v11, %v661_v18  ;;  %4334 = vpow2.f32 %v3671_v49  ;;  %v1045_v43 = vand.u32 2147483647, %v5782_v30  ;;  %vm6711_vm7 = vmmov %vm6707_vm12 }
 0x248   : > { %v1059_v9 = vsel %vm1058_vm15, %v5777_v51, %v1055_v34  ;;  %v2250_v52 = vsel %vm5844_vm10, %v5729_v1, %v2249_v61  ;;  %1989 = vst.msk [vmem:[#allocation2 + $0x64] sm:$0xf] %vm6707_vm12, %v1916_v12  ;;  %v1038_v40 = vsub.f32 1.0, %v1037_v57  ;;  %4336 = vpow2.f32 %v3657_v23  ;;  %v4384_v34 = vld [vmem:[%s4568_s23 + $0x90] sm:$0xff]  ;;  %v1870_v57 = vpop.permute.xlu0 %1869  ;;  %vm6710_vm15 = vmmov %vm6707_vm12 }
 0x249   : > { %v1064_v0 = vsel %vm5827_vm5, %v1063_v4, %v1059_v9  ;;  %v3656_v51 = vmul.f32 -1.442695, %v5859_v2  ;;  %2251 = vst [vmem:[#allocation2 + $0x14] sm:$0xf] %v2250_v52  ;;  %v2063_v8 = vrot.slane %v2062_v38, 4  ;;  %v1047_v22 = vand.u32 2147483648, %v5782_v30 }
 0x24a   : > { %v1321_v17 = vmul.f32 %v1064_v0, %v5544_v29  ;;  %2288 = vst.msk [vmem:[#allocation2 + $0x60] sm:$0xf] %vm2241_vm3, %v2190_v27  ;;  %v1039_v59 = vmul.f32 %v4333_v10, %v1038_v40  ;;  %vm1042_vm11 = vweird.f32 %v4333_v10  ;;  %v2060_v29 = vsel %vm5197_vm4, %v2058_v45, %v5761_v25  ;;  %v1467_v45 = vld [vmem:[#allocation2 + $0x6c] sm:$0x8]  ;;  %v4028_v27 = vld [vmem:[%s6636_s5] sm:$0xff] }
 0x24b   : > { %4338 = vpow2.f32 %v3656_v51  ;;  %1968 = vst.msk [vmem:[#allocation2 + $0x10] sm:$0xf] %vm6708_vm13, %v1874_v13  ;;  %vm1041_vm14 = vweird.f32 %v5782_v30  ;;  %v650_v39 = vmul.f32 %v4383_v6, %v4868_v28  ;;  %v3670_v25 = vmul.f32 -1.442695, %v5866_v46  ;;  %v4054_v13 = vld [vmem:[%s6636_s5 + $0x50] sm:$0xff]  ;;  %2524 = vmatpush.bf16.msrb.mxu0 %v4028_v27  ;;  %4178 = vmatpush.bf16.msrb.mxu3 %v4028_v27 }
 0x24c   : > { %v5881_v1 = vpack.c.bf16 %v1321_v17, %v1321_v17  ;;  %2171 = vrot.lane.b32.xlu0 %v2063_v8, %s4456_s11  ;;  %1406 = vst [vmem:[#allocation2 + $0x48] sm:$0x1] %v1405_v20  ;;  %v1040_v7 = vadd.f32 %v4333_v10, %v1039_v59  ;;  %vm1043_vm9 = vmor %vm1041_vm14, %vm1042_vm11  ;;  %vm1046_vm5 = vcmp.eq.f32.partialorder %v1045_v43, 8.507059e+37  ;;  %v1048_v30 = vor.u32 1.1754944e-38, %v1047_v22  ;;  %2882 = vmatpush.bf16.msrb.mxu1 %v4054_v13  ;;  %v5937_v17 = vld [vmem:[%s6636_s5 + $0x48] sm:$0xff]  ;;  %v4385_v59 = vld [vmem:[%s4568_s23 + $0xa0] sm:$0xff] }
 0x24d   : > { %v4335_v15 = vpop.eup %4334  ;;  %v5899_v32 = vadd.f32 %v4870_v11, %v650_v39  ;;  %v649_v4 = vmul.f32 %v4384_v34, %v4868_v28  ;;  %v1468_v49 = vsel %vm5766_vm2, 0, %v1467_v45  ;;  %4340 = vpow2.f32 %v3670_v25  ;;  %1966 = vst.msk [vmem:[#allocation2 + $0x8] sm:$0xf] %vm6711_vm7, %v1870_v57  ;;  %v1801_v43 = vld [vmem:[#allocation2 + $0x40] sm:$0xf] }
 0x24e   : > { %2169 = vrot.lane.b32.xlu1 %v2060_v29, %s4456_s11  ;;  %1899 = vrot.lane.b32.xlu2 %v5881_v1, %s4455_s21  ;;  %v1602_v60 = vshrl.u32 %v5881_v1, 16  ;;  %v1605_v63 = vshll.u32 %v5881_v1, 16  ;;  %v4337_v35 = vpop.eup %4336  ;;  %v1044_v58 = vsel %vm1043_vm9, %v4333_v10, %v1040_v7  ;;  %v5909_v18 = vadd.f32 1.0, %v4335_v15  ;;  %1469 = vst [vmem:[#allocation2 + $0x6c] sm:$0x8] %v1468_v49  ;;  %v1920_v10 = vpop.permute.xlu1 %1919  ;;  %v5981_v57 = vld [vmem:[%s6636_s5 + $0x40] sm:$0xff] }
 0x24f   : > { %v1049_v54 = vsel %vm1046_vm5, %v1048_v30, %v1044_v58  ;;  %v5911_v38 = vadd.f32 1.0, %v4337_v35  ;;  %1824 = vst.msk [vmem:[#allocation2 + $0x6c] sm:$0xf] %vm6709_vm0, %v5367_v26  ;;  %v3659_v41 = vmul.f32 -1.442695, %v5899_v32  ;;  %v5930_v0 = vadd.f32 %v4870_v11, %v649_v4  ;;  %4179 = vmatpush.bf16.msra.mxu3 %v5800_v48 }
 0x250   : > { %v5903_v5 = vrot.slane %v1605_v63, 5  ;;  %v2070_v33 = vrot.slane %v1602_v60, 4  ;;  %v1320_v9 = vmul.f32 %v1049_v54, %v5568_v44  ;;  %4342 = vrcp.f32 %v5909_v18  ;;  %v2146_v44 = vpop.permute.xlu2 %2145  ;;  %1991 = vst.msk [vmem:[#allocation2 + $0x6c] sm:$0xf] %vm6710_vm15, %v1920_v10  ;;  %2883 = vmatpush.bf16.msrb.mxu1 %v5937_v17  ;;  %v1425_v10 = vld [vmem:[#allocation2 + $0x80] sm:$0x1] }
 0x251   : > { %v4339_v12 = vpop.eup %4338  ;;  %4344 = vrcp.f32 %v5911_v38  ;;  %v1302_v26 = vand.u32 2147483648, %v5909_v18  ;;  %v1300_v8 = vand.u32 2147483647, %v5909_v18  ;;  %v5946_v22 = vmul.f32 -1.442695, %v5930_v0 }
 0x252   : > { %v2071_v23 = vor.u32 %v2070_v33, %v5903_v5  ;;  %v5917_v61 = vadd.f32 1.0, %v4339_v12  ;;  %v1352_v51 = vpack.c.bf16 %v1320_v9, %v1320_v9  ;;  %v651_v29 = vmul.f32 %v4385_v59, %v4868_v28  ;;  %2242 = vst.msk [vmem:[#allocation2 + $0x8] sm:$0xf] %vm2241_vm3, %v2146_v44 }
 0x253   : > { %v4341_v6 = vpop.eup %4340  ;;  %vm1370_vm12 = vcmask 781312   ;;  %v5957_v30 = vor.u32 1.1754944e-38, %v1302_v26  ;;  %v1090_v35 = vand.u32 2147483647, %v5911_v38  ;;  %v1092_v33 = vand.u32 2147483648, %v5911_v38  ;;  %4180 = vmatpush.bf16.msra.mxu3 %v4054_v13 }
 0x254   : > { %v2072_v52 = vrot.slane %v2071_v23, 4  ;;  %v1594_v40 = vshrl.u32 %v1352_v51, 16  ;;  %v1597_v20 = vshll.u32 %v1352_v51, 16  ;;  %1897 = vrot.lane.b32.xlu0 %v1352_v51, %s4455_s21  ;;  %4346 = vrcp.f32 %v5917_v61  ;;  %v1437_v26 = vld [vmem:[#allocation2 + $0x1c] sm:$0x8]  ;;  %2884 = vmatpush.bf16.msrb.mxu1 %v5981_v57 }
 0x255   : > { %4348 = vpow2.f32 %v3659_v41  ;;  %vm5966_vm11 = vcmp.eq.f32.partialorder %v1300_v8, 8.507059e+37  ;;  %v1075_v12 = vand.u32 2147483647, %v5917_v61  ;;  %v4457_v54 = vmov 0  }
 0x256   : > { %2175 = vrot.lane.b32.xlu1 %v2072_v52, %s4456_s11  ;;  %v5951_v39 = vrot.slane %v1594_v40, 7  ;;  %v2064_v7 = vrot.slane %v1594_v40, 4  ;;  %v2065_v25 = vrot.slane %v1597_v20, 5  ;;  %v5955_v15 = vpop.eup %4342  ;;  %1371 = vst.msk [vmem:[#allocation2] sm:$0xf] %vm1370_vm12, %v4457_v54  ;;  %vm1296_vm13 = vweird.f32 %v5909_v18  ;;  %v5992_v40 = vpop.permute.xlu0 %1879 }
 0x257   : > { %v5961_v58 = vpop.eup %4344  ;;  %v1292_v34 = vmul.f32 %v5955_v15, %v5909_v18  ;;  %v2293_v23 = vld [vmem:[#allocation2 + $0x6c] sm:$0xf]  ;;  %1372 = vst.msk [vmem:[#allocation2 + $0x4] sm:$0xf] %vm1370_vm12, %v4457_v54  ;;  %v5976_v9 = vadd.f32 1.0, %v4341_v6  ;;  %v5984_v27 = vadd.f32 %v4870_v11, %v651_v29  ;;  %vm1086_vm14 = vweird.f32 %v5911_v38  ;;  %v2148_v29 = vpop.permute.xlu1 %2147  ;;  %4181 = vmatpush.bf16.msra.mxu3 %v5937_v17  ;;  %v6053_v17 = vld [vmem:[%s6636_s5 + $0x30] sm:$0xff] }
 0x258   : > { %v1599_v48 = vor.u32 %v1597_v20, %v5951_v39  ;;  %v2066_v45 = vor.u32 %v2065_v25, %v2064_v7  ;;  %v1082_v49 = vmul.f32 %v5961_v58, %v5911_v38  ;;  %1374 = vst.msk [vmem:[#allocation2 + $0x88] sm:$0xf] %vm1370_vm12, %v4457_v54  ;;  %v1077_v59 = vand.u32 2147483648, %v5917_v61  ;;  %v6000_v6 = vpop.permute.xlu2 %1883  ;;  %v6006_v7 = vld [vmem:[%s6636_s5 + $0x88] sm:$0xff]  ;;  %v6011_v25 = vld [vmem:[%s6636_s5 + $0x38] sm:$0xff] }
 0x259   : > { %v1293_v51 = vsub.f32 1.0, %v1292_v34  ;;  %vm1297_vm9 = vweird.f32 %v5955_v15  ;;  %4350 = vrcp.f32 %v5976_v9  ;;  %vm1087_vm5 = vweird.f32 %v5961_v58  ;;  %1375 = vst.msk [vmem:[#allocation2 + $0x8c] sm:$0xf] %vm1370_vm12, %v4457_v54  ;;  %3276 = vmatpush.bf16.msrb.mxu2 %v6006_v7  ;;  %v1440_v54 = vld [vmem:[#allocation2 + $0x24] sm:$0x8]  ;;  %2885 = vmatpush.bf16.msrb.mxu1 %v6011_v25  ;;  %v6085_v38 = vld [vmem:[%s6636_s5 + $0x78] sm:$0xff] }
 0x25a   : > { %v5986_v44 = vpop.eup %4346  ;;  %v1802_v41 = vsel %vm5064_vm1, %v1599_v48, %v1801_v43  ;;  %v2067_v52 = vrot.slane %v2066_v45, 4  ;;  %v1083_v8 = vsub.f32 1.0, %v1082_v49  ;;  %v2294_v43 = vsel %vm5844_vm10, %v5775_v3, %v2293_v23  ;;  %v2245_v49 = vld [vmem:[#allocation2 + $0xc] sm:$0xf]  ;;  %vm6042_vm15 = vmor %vm1296_vm13, %vm1297_vm9 }
 0x25b   : > { %v4349_v20 = vpop.eup %4348  ;;  %1803 = vst [vmem:[#allocation2 + $0x40] sm:$0xf] %v1802_v41  ;;  %v1067_v13 = vmul.f32 %v5986_v44, %v5917_v61  ;;  %v1294_v3 = vmul.f32 %v5955_v15, %v1293_v51  ;;  %vm1071_vm0 = vweird.f32 %v5917_v61  ;;  %v1426_v41 = vsel %vm4875_vm6, 0, %v1425_v10  ;;  %vm6062_vm13 = vmor %vm1086_vm14, %vm1087_vm5  ;;  %4182 = vmatpush.bf16.msra.mxu3 %v5981_v57 }
 0x25c   : > { %v2069_v48 = vsel %vm5197_vm4, %v2067_v52, %v5903_v5  ;;  %2295 = vst [vmem:[#allocation2 + $0x6c] sm:$0xf] %v2294_v43  ;;  %v1084_v45 = vmul.f32 %v5961_v58, %v1083_v8  ;;  %v6028_v5 = vld [vmem:[%s6636_s5 + $0x80] sm:$0xff]  ;;  %v2246_v52 = vsel %vm5844_vm10, %v2148_v29, %v2245_v49  ;;  %v1438_v51 = vsel %vm5766_vm2, 0, %v1437_v26 }
 0x25d   : > { %2173 = vrot.lane.b32.xlu2 %v2069_v48, %s4456_s11  ;;  %v1068_v34 = vsub.f32 1.0, %v1067_v13  ;;  %v1295_v23 = vadd.f32 %v5955_v15, %v1294_v3  ;;  %vm1072_vm7 = vweird.f32 %v5986_v44  ;;  %vm2468_vm12 = vcmask 785408   ;;  %1427 = vst [vmem:[#allocation2 + $0x80] sm:$0x1] %v1426_v41  ;;  %3277 = vmatpush.bf16.msrb.mxu2 %v6028_v5 }
 0x25e   : > { %v1085_v13 = vadd.f32 %v5961_v58, %v1084_v45  ;;  %vm1091_vm9 = vcmp.eq.f32.partialorder %v1090_v35, 8.507059e+37  ;;  %v1093_v43 = vor.u32 1.1754944e-38, %v1092_v33  ;;  %v4012_v29 = vld [vmem:[#allocation2] sm:$0xff]  ;;  %2247 = vst [vmem:[#allocation2 + $0xc] sm:$0xf] %v2246_v52  ;;  %v6070_v48 = vadd.f32 1.0, %v4349_v20  ;;  %2886 = vmatpush.bf16.msrb.mxu1 %v6053_v17  ;;  %v1918_v57 = vpop.permute.xlu0 %1917 }
 0x25f   : > { %v1069_v10 = vmul.f32 %v5986_v44, %v1068_v34  ;;  %v1299_v18 = vsel %vm6042_vm15, %v5955_v15, %v1295_v23  ;;  %1439 = vst [vmem:[#allocation2 + $0x1c] sm:$0x8] %v1438_v51  ;;  %v1441_v35 = vsel %vm5766_vm2, 0, %v1440_v54  ;;  %v6087_v33 = vpop.eup %4350  ;;  %vm1076_vm14 = vcmp.eq.f32.partialorder %v1075_v12, 8.507059e+37  ;;  %3760 = vmatmul.msk.bf16.vlgmr.msrb.gmra.mxu0 %vm2468_vm12, %v4012_v29  ;;  %4183 = vmatpush.bf16.msra.mxu3 %v6011_v25 }
 0x260   : > { %v1304_v15 = vsel %vm5966_vm11, %v5957_v30, %v1299_v18  ;;  %v1089_v3 = vsel %vm6062_vm13, %v5961_v58, %v1085_v13  ;;  %vm1073_vm11 = vmor %vm1071_vm0, %vm1072_vm7  ;;  %v1078_v58 = vor.u32 1.1754944e-38, %v1077_v59  ;;  %vm6718_vm5 = vcmask 257024   ;;  %1442 = vst [vmem:[#allocation2 + $0x24] sm:$0x8] %v1441_v35 }
 0x261   : > { %v1070_v45 = vadd.f32 %v5986_v44, %v1069_v10  ;;  %v1337_v30 = vmul.f32 %v1304_v15, %v5832_v31  ;;  %v1094_v4 = vsel %vm1091_vm9, %v1093_v43, %v1089_v3  ;;  %1784 = vst.msk [vmem:[#allocation2 + $0x1c] sm:$0xf] %vm6718_vm5, %v5282_v24  ;;  %v1277_v34 = vmul.f32 %v6087_v33, %v5976_v9  ;;  %vm6720_vm15 = vmmov %vm6718_vm5 }
 0x262   : > { %v1323_v20 = vmul.f32 %v1094_v4, %v5835_v36  ;;  %vm6719_vm0 = vcmask 519424   ;;  %4352 = vrcp.f32 %v6070_v48  ;;  %v1285_v24 = vand.u32 2147483647, %v5976_v9  ;;  %1788 = vst.msk [vmem:[#allocation2 + $0x24] sm:$0xf] %vm6720_vm15, %v5462_v21  ;;  %3278 = vmatpush.bf16.msrb.mxu2 %v6085_v38 }
 0x263   : > { %v1074_v31 = vsel %vm1073_vm11, %v5986_v44, %v1070_v45  ;;  %1971 = vst.msk [vmem:[#allocation2 + $0x1c] sm:$0xf] %vm6719_vm0, %v5992_v40  ;;  %v6108_v61 = vpack.c.bf16 %v1337_v30, %v1337_v30  ;;  %v1278_v59 = vsub.f32 1.0, %v1277_v34  ;;  %v1287_v49 = vand.u32 2147483648, %v5976_v9  ;;  %v1922_v40 = vpop.permute.xlu2 %1921  ;;  %vm6721_vm7 = vmmov %vm6719_vm0  ;;  %4184 = vmatpush.bf16.msra.mxu3 %v6053_v17  ;;  %v1805_v30 = vld [vmem:[#allocation2 + $0x48] sm:$0xf] }
 0x264   : > { %v1079_v12 = vsel %vm1076_vm14, %v1078_v58, %v1074_v31  ;;  %v6111_v36 = vpack.c.bf16 %v1323_v20, %v1323_v20  ;;  %1973 = vst.msk [vmem:[#allocation2 + $0x24] sm:$0xf] %vm6721_vm7, %v6000_v6  ;;  %4354 = vpow2.f32 %v5946_v22  ;;  %v3660_v52 = vmul.f32 -1.442695, %v5984_v27  ;;  %vm6722_vm13 = vmmov %vm6719_vm0 }
 0x265   : > { %v1322_v44 = vmul.f32 %v1079_v12, %v5859_v2  ;;  %1931 = vrot.lane.b32.xlu1 %v6108_v61, %s4455_s21  ;;  %v1730_v23 = vshrl.u32 %v6108_v61, 16  ;;  %v1733_v41 = vshll.u32 %v6108_v61, 16  ;;  %v6124_v2 = vpop.permute.xlu1 %2155  ;;  %v1279_v8 = vmul.f32 %v6087_v33, %v1278_v59  ;;  %1990 = vst.msk [vmem:[#allocation2 + $0x68] sm:$0xf] %vm6722_vm13, %v1918_v57  ;;  %v4034_v6 = vld [vmem:[#allocation2 + $0x8] sm:$0xff]  ;;  %vm6723_vm11 = vmmov %vm6719_vm0 }
 0x266   : > { %1903 = vrot.lane.b32.xlu0 %v6111_v36, %s4455_s21  ;;  %v1618_v51 = vshrl.u32 %v6111_v36, 16  ;;  %v1621_v54 = vshll.u32 %v6111_v36, 16  ;;  %vm1282_vm9 = vweird.f32 %v6087_v33  ;;  %1992 = vst.msk [vmem:[#allocation2 + $0x70] sm:$0xf] %vm6723_vm11, %v1922_v40  ;;  %3876 = vmatmul.msk.bf16.vlgmr.msrb.gmra.mxu1 %vm2468_vm12, %v4034_v6  ;;  %vm1281_vm14 = vweird.f32 %v5976_v9  ;;  %v1407_v57 = vld [vmem:[#allocation2 + $0x50] sm:$0x1] }
 0x267   : > { %v1354_v21 = vpack.c.bf16 %v1322_v44, %v1322_v44  ;;  %v6138_v22 = vrot.slane %v1733_v41, 5  ;;  %v2142_v25 = vrot.slane %v1730_v23, 4  ;;  %v1280_v29 = vadd.f32 %v6087_v33, %v1279_v8  ;;  %vm1283_vm5 = vmor %vm1281_vm14, %vm1282_vm9  ;;  %v4013_v40 = vld [vmem:[#allocation2 + $0x8] sm:$0xff] }
 0x268   : > { %v6143_v13 = vpop.eup %4352  ;;  %v6148_v26 = vrot.slane %v1621_v54, 5  ;;  %v2079_v43 = vrot.slane %v1618_v51, 4  ;;  %4356 = vpow2.f32 %v3660_v52  ;;  %vm1286_vm0 = vcmp.eq.f32.partialorder %v1285_v24, 8.507059e+37 }
 0x269   : > { %v1610_v10 = vshrl.u32 %v1354_v21, 16  ;;  %v1613_v18 = vshll.u32 %v1354_v21, 16  ;;  %1901 = vrot.lane.b32.xlu2 %v1354_v21, %s4455_s21  ;;  %v1288_v3 = vor.u32 1.1754944e-38, %v1287_v49  ;;  %v2143_v45 = vor.u32 %v2142_v25, %v6138_v22 }
 0x26a   : > { %v4355_v35 = vpop.eup %4354  ;;  %v2080_v4 = vor.u32 %v2079_v43, %v6148_v26  ;;  %v1284_v58 = vsel %vm1283_vm5, %v6087_v33, %v1280_v29  ;;  %v1112_v9 = vmul.f32 %v6143_v13, %v6070_v48  ;;  %v1120_v17 = vand.u32 2147483647, %v6070_v48  ;;  %v2253_v24 = vld [vmem:[#allocation2 + $0x1c] sm:$0xf]  ;;  %v6183_v43 = vld [vmem:[%s6636_s5 + $0x70] sm:$0xff] }
 0x26b   : > { %v6156_v15 = vrot.slane %v1610_v10, 7  ;;  %v1289_v31 = vsel %vm1286_vm0, %v1288_v3, %v1284_v58  ;;  %v2073_v34 = vrot.slane %v1610_v10, 4  ;;  %v2074_v12 = vrot.slane %v1613_v18, 5  ;;  %v1473_v33 = vld [vmem:[#allocation2 + $0x7c] sm:$0x8]  ;;  %3279 = vmatpush.bf16.msrb.mxu2 %v6183_v43 }
 0x26c   : > { %v2081_v44 = vrot.slane %v2080_v4, 4  ;;  %v1336_v59 = vmul.f32 %v1289_v31, %v5866_v46  ;;  %v1113_v49 = vsub.f32 1.0, %v1112_v9  ;;  %vm1116_vm15 = vweird.f32 %v6070_v48  ;;  %v2289_v3 = vld [vmem:[#allocation2 + $0x64] sm:$0xf]  ;;  %v1410_v31 = vld [vmem:[#allocation2 + $0x58] sm:$0x1] }
 0x26d   : > { %v1615_v20 = vor.u32 %v1613_v18, %v6156_v15  ;;  %v2144_v21 = vrot.slane %v2143_v45, 4  ;;  %vm1117_vm7 = vweird.f32 %v6143_v13  ;;  %v1122_v8 = vand.u32 2147483648, %v6070_v48  ;;  %v2150_v29 = vpop.permute.xlu1 %2149  ;;  %v2192_v45 = vpop.permute.xlu0 %2191  ;;  %v4386_v48 = vld [vmem:[%s4568_s23 + $0xa8] sm:$0xff] }
 0x26e   : > { %v4357_v6 = vpop.eup %4356  ;;  %2179 = vrot.lane.b32.xlu1 %v2081_v44, %s4456_s11  ;;  %v1368_v25 = vpack.c.bf16 %v1336_v59, %v1336_v59  ;;  %v1114_v46 = vmul.f32 %v6143_v13, %v1113_v49  ;;  %v2254_v10 = vsel %vm5844_vm10, %v6124_v2, %v2253_v24  ;;  %v6178_v18 = vadd.f32 1.0, %v4355_v35  ;;  %vm6200_vm13 = vmor %vm1116_vm15, %vm1117_vm7  ;;  %2248 = vst.msk [vmem:[#allocation2 + $0x10] sm:$0xf] %vm2241_vm3, %v2150_v29 }
 0x26f   : > { %v1806_v52 = vsel %vm5064_vm1, %v1615_v20, %v1805_v30  ;;  %v2075_v30 = vor.u32 %v2074_v12, %v2073_v34  ;;  %2255 = vst [vmem:[#allocation2 + $0x1c] sm:$0xf] %v2254_v10  ;;  %v1408_v4 = vsel %vm4875_vm6, 0, %v1407_v57  ;;  %v2290_v2 = vsel %vm5844_vm10, %v2192_v45, %v2289_v3  ;;  %3761 = vmatmul.msk.bf16.gmra.mxu0 %vm2468_vm12, %v4013_v40  ;;  %v6213_v57 = vld [vmem:[%s6636_s5 + $0x68] sm:$0xff] }
 0x270   : > { %1807 = vst [vmem:[#allocation2 + $0x48] sm:$0xf] %v1806_v52  ;;  %v1474_v35 = vsel %vm5766_vm2, 0, %v1473_v33  ;;  %v1722_v58 = vshrl.u32 %v1368_v25, 16  ;;  %v1725_v9 = vshll.u32 %v1368_v25, 16  ;;  %1929 = vrot.lane.b32.xlu0 %v1368_v25, %s4455_s21  ;;  %v1115_v20 = vadd.f32 %v6143_v13, %v1114_v46  ;;  %v1928_v52 = vpop.permute.xlu2 %1927  ;;  %3280 = vmatpush.bf16.msrb.mxu2 %v6213_v57 }
 0x271   : > { %2207 = vrot.lane.b32.xlu2 %v2144_v21, %s4456_s11  ;;  %4358 = vrcp.f32 %v6178_v18  ;;  %1409 = vst [vmem:[#allocation2 + $0x50] sm:$0x1] %v1408_v4  ;;  %vm6204_vm9 = vcmp.eq.f32.partialorder %v1120_v17, 8.507059e+37  ;;  %v1123_v24 = vor.u32 1.1754944e-38, %v1122_v8  ;;  %v6215_v44 = vadd.f32 1.0, %v4357_v6 }
 0x272   : > { %v652_v59 = vmul.f32 %v4386_v48, %v4868_v28  ;;  %v6219_v49 = vrot.slane %v1722_v58, 7  ;;  %v2136_v17 = vrot.slane %v1722_v58, 4  ;;  %v2137_v40 = vrot.slane %v1725_v9, 5  ;;  %2291 = vst [vmem:[#allocation2 + $0x64] sm:$0xf] %v2290_v2 }
 0x273   : > { %v1119_v33 = vsel %vm6200_vm13, %v6143_v13, %v1115_v20  ;;  %v1833_v21 = vld [vmem:[#allocation2 + $0x80] sm:$0xf]  ;;  %v2076_v8 = vrot.slane %v2075_v30, 4  ;;  %1475 = vst [vmem:[#allocation2 + $0x7c] sm:$0x8] %v1474_v35  ;;  %4360 = vrcp.f32 %v6215_v44  ;;  %vm6728_vm11 = vcmask 257024  }
 0x274   : > { %v1124_v25 = vsel %vm6204_vm9, %v1123_v24, %v1119_v33  ;;  %v1727_v28 = vor.u32 %v1725_v9, %v6219_v49  ;;  %v2138_v6 = vor.u32 %v2137_v40, %v2136_v17  ;;  %1832 = vst.msk [vmem:[#allocation2 + $0x7c] sm:$0xf] %vm6728_vm11, %v5675_v62  ;;  %v6232_v13 = vadd.f32 %v4870_v11, %v652_v59 }
 0x275   : > { %v1325_v46 = vmul.f32 %v1124_v25, %v5899_v32  ;;  %vm6729_vm14 = vcmask 519424   ;;  %v1411_v10 = vsel %vm4875_vm6, 0, %v1410_v31  ;;  %v2078_v11 = vsel %vm5197_vm4, %v2076_v8, %v6148_v26  ;;  %v1470_v8 = vld [vmem:[#allocation2 + $0x74] sm:$0x8]  ;;  %v1443_v25 = vld [vmem:[#allocation2 + $0x2c] sm:$0x8] }
 0x276   : > { %1995 = vst.msk [vmem:[#allocation2 + $0x7c] sm:$0xf] %vm6729_vm14, %v1928_v52  ;;  %v1834_v3 = vsel %vm5064_vm1, %v1727_v28, %v1833_v21  ;;  %v2139_v45 = vrot.slane %v2138_v6, 4  ;;  %v3661_v2 = vmul.f32 -1.442695, %v6232_v13  ;;  %v1107_v20 = vand.u32 2147483648, %v6178_v18 }
 0x277   : > { %v4359_v29 = vpop.eup %4358  ;;  %v6240_v30 = vpack.c.bf16 %v1325_v46, %v1325_v46  ;;  %1412 = vst [vmem:[#allocation2 + $0x58] sm:$0x1] %v1411_v10  ;;  %v1105_v58 = vand.u32 2147483647, %v6178_v18  ;;  %v1135_v12 = vand.u32 2147483647, %v6215_v44  ;;  %vm1101_vm5 = vweird.f32 %v6178_v18 }
 0x278   : > { %1835 = vst [vmem:[#allocation2 + $0x80] sm:$0xf] %v1834_v3  ;;  %v1097_v62 = vmul.f32 %v4359_v29, %v6178_v18  ;;  %v2141_v42 = vsel %vm5197_vm4, %v2139_v45, %v6138_v22  ;;  %2177 = vrot.lane.b32.xlu0 %v2078_v11, %s4456_s11  ;;  %vm1102_vm6 = vweird.f32 %v4359_v29  ;;  %4362 = vpow2.f32 %v3661_v2  ;;  %v1924_v2 = vpop.permute.xlu0 %1923 }
 0x279   : > { %1907 = vrot.lane.b32.xlu2 %v6240_v30, %s4455_s21  ;;  %v1634_v32 = vshrl.u32 %v6240_v30, 16  ;;  %v1637_v4 = vshll.u32 %v6240_v30, 16  ;;  %v4361_v35 = vpop.eup %4360  ;;  %2205 = vrot.lane.b32.xlu1 %v2141_v42, %s4456_s11  ;;  %v1604_v24 = vrot.slane %v1602_v60, 7  ;;  %v1137_v17 = vand.u32 2147483648, %v6215_v44  ;;  %vm1103_vm15 = vmor %vm1101_vm5, %vm1102_vm6  ;;  %v1882_v42 = vpop.permute.xlu1 %1881 }
 0x27a   : > { %v1098_v26 = vsub.f32 1.0, %v1097_v62  ;;  %v1127_v31 = vmul.f32 %v4361_v35, %v6215_v44  ;;  %v1600_v40 = vrot.slane %v5951_v39, 4  ;;  %vm1132_vm0 = vweird.f32 %v4361_v35  ;;  %v6292_v62 = vld [vmem:[%s6636_s5 + $0x60] sm:$0xff] }
 0x27b   : > { %v6259_v22 = vrot.slane %v1637_v4, 5  ;;  %v2088_v9 = vrot.slane %v1634_v32, 4  ;;  %vm1106_vm7 = vcmp.eq.f32.partialorder %v1105_v58, 8.507059e+37  ;;  %v1108_v52 = vor.u32 1.1754944e-38, %v1107_v20  ;;  %v1452_v58 = vld [vmem:[#allocation2 + $0x44] sm:$0x8]  ;;  %3281 = vmatpush.bf16.msrb.mxu2 %v6292_v62 }
 0x27c   : > { %v1099_v34 = vmul.f32 %v4359_v29, %v1098_v26  ;;  %v1128_v59 = vsub.f32 1.0, %v1127_v31  ;;  %vm1131_vm13 = vweird.f32 %v6215_v44  ;;  %vm6273_vm9 = vcmp.eq.f32.partialorder %v1135_v12, 8.507059e+37  ;;  %v4014_v26 = vld [vmem:[#allocation2 + $0x10] sm:$0xff]  ;;  %v4024_v20 = vld [vmem:[#allocation2 + $0x60] sm:$0xff] }
 0x27d   : > { %v2089_v48 = vor.u32 %v2088_v9, %v6259_v22  ;;  %v1471_v39 = vsel %vm5766_vm2, 0, %v1470_v8  ;;  %vm6279_vm11 = vmor %vm1131_vm13, %vm1132_vm0  ;;  %v1138_v3 = vor.u32 1.1754944e-38, %v1137_v17  ;;  %v1444_v44 = vsel %vm5766_vm2, 0, %v1443_v25  ;;  %v4056_v9 = vld [vmem:[#allocation2 + $0x10] sm:$0xff]  ;;  %3772 = vmatmul.msk.bf16.vlgmr.msrb.gmra.mxu3 %vm2468_vm12, %v4024_v20  ;;  %v1455_v20 = vld [vmem:[#allocation2 + $0x4c] sm:$0x8] }
 0x27e   : > { %v1100_v33 = vadd.f32 %v4359_v29, %v1099_v34  ;;  %v1129_v21 = vmul.f32 %v4361_v35, %v1128_v59  ;;  %1472 = vst [vmem:[#allocation2 + $0x74] sm:$0x8] %v1471_v39  ;;  %v4363_v45 = vpop.eup %4362  ;;  %vm6734_vm14 = vcmask 257024   ;;  %vm6735_vm6 = vcmask 519424   ;;  %v4035_v31 = vld [vmem:[#allocation2 + $0x10] sm:$0xff]  ;;  %4185 = vmatpush.bf16.msrb.mxu3 %v6006_v7  ;;  %3992 = vmatmul.msk.bf16.vlgmr.msrb.gmra.mxu2 %vm2468_vm12, %v4056_v9 }
 0x27f   : > { %v2090_v60 = vrot.slane %v2089_v48, 4  ;;  %1828 = vst.msk [vmem:[#allocation2 + $0x74] sm:$0xf] %vm6734_vm14, %v5472_v53  ;;  %vm6736_vm5 = vmmov %vm6735_vm6  ;;  %3762 = vmatmul.msk.bf16.gmra.mxu0 %vm2468_vm12, %v4014_v26  ;;  %v1446_v53 = vld [vmem:[#allocation2 + $0x34] sm:$0x8]  ;;  %3877 = vmatmul.msk.bf16.gmra.mxu1 %vm2468_vm12, %v4035_v31  ;;  %v1616_v26 = vrot.slane %v6156_v15, 4 }
 0x280   : > { %v1104_v28 = vsel %vm1103_vm15, %v4359_v29, %v1100_v33  ;;  %v1130_v18 = vadd.f32 %v4361_v35, %v1129_v21  ;;  %v1607_v29 = vor.u32 %v1605_v63, %v1604_v24  ;;  %v6298_v63 = vadd.f32 1.0, %v4363_v45  ;;  %1972 = vst.msk [vmem:[#allocation2 + $0x20] sm:$0xf] %vm6735_vm6, %v1882_v42  ;;  %vm6737_vm0 = vmmov %vm6734_vm14  ;;  %v1813_v39 = vld [vmem:[#allocation2 + $0x58] sm:$0xf] }
 0x281   : > { %v1109_v46 = vsel %vm1106_vm7, %v1108_v52, %v1104_v28  ;;  %2183 = vrot.lane.b32.xlu1 %v2090_v60, %s4456_s11  ;;  %1993 = vst.msk [vmem:[#allocation2 + $0x74] sm:$0xf] %vm6736_vm5, %v1924_v2  ;;  %v1453_v24 = vsel %vm5766_vm2, 0, %v1452_v58  ;;  %v1449_v52 = vld [vmem:[#allocation2 + $0x3c] sm:$0x8]  ;;  %vm6738_vm15 = vmmov %vm6737_vm0  ;;  %v1620_v42 = vrot.slane %v1618_v51, 7 }
 0x282   : > { %v1324_v11 = vmul.f32 %v1109_v46, %v5930_v0  ;;  %v1134_v1 = vsel %vm6279_vm11, %v4361_v35, %v1130_v18  ;;  %v2158_v0 = vpop.permute.xlu2 %2157  ;;  %4364 = vrcp.f32 %v6298_v63  ;;  %v1608_v48 = vsel %vm5125_vm8, %v1600_v40, %v1607_v29  ;;  %1445 = vst [vmem:[#allocation2 + $0x2c] sm:$0x8] %v1444_v44  ;;  %v1809_v60 = vld [vmem:[#allocation2 + $0x50] sm:$0xf]  ;;  %v2154_v46 = vpop.permute.xlu0 %2153  ;;  %4186 = vmatpush.bf16.msrb.mxu3 %v6028_v5  ;;  %vm6739_vm7 = vmmov %vm6737_vm0  ;;  %v1476_v15 = vld [vmem:[#allocation2 + $0x84] sm:$0x8] }
 0x283   : > { %v1139_v12 = vsel %vm6273_vm9, %v1138_v3, %v1134_v1  ;;  %2256 = vst.msk [vmem:[#allocation2 + $0x20] sm:$0xf] %vm2241_vm3, %v2158_v0  ;;  %v1447_v40 = vsel %vm5766_vm2, 0, %v1446_v53  ;;  %v1450_v45 = vsel %vm5766_vm2, 0, %v1449_v52  ;;  %v1152_v61 = vand.u32 2147483648, %v6298_v63  ;;  %vm6740_vm9 = vmmov %vm6737_vm0 }
 0x284   : > { %v1356_v34 = vpack.c.bf16 %v1324_v11, %v1324_v11  ;;  %v1326_v35 = vmul.f32 %v1139_v12, %v5984_v27  ;;  %v1636_v27 = vrot.slane %v1634_v32, 7  ;;  %1792 = vst.msk [vmem:[#allocation2 + $0x2c] sm:$0xf] %vm6737_vm0, %v5725_v47  ;;  %v1732_v32 = vrot.slane %v1730_v23, 7  ;;  %v2194_v47 = vpop.permute.xlu1 %2193  ;;  %v2257_v9 = vld [vmem:[#allocation2 + $0x24] sm:$0xf]  ;;  %vm6743_vm14 = vmmov %vm6737_vm0 }
 0x285   : > { %1454 = vst [vmem:[#allocation2 + $0x44] sm:$0x8] %v1453_v24  ;;  %v1150_v16 = vand.u32 2147483647, %v6298_v63  ;;  %v1623_v31 = vor.u32 %v1621_v54, %v1620_v42  ;;  %v1153_v36 = vor.u32 1.1754944e-38, %v1152_v61  ;;  %vm6744_vm5 = vmmov %vm6737_vm0 }
 0x286   : > { %v1626_v59 = vshrl.u32 %v1356_v34, 16  ;;  %v1629_v17 = vshll.u32 %v1356_v34, 16  ;;  %1905 = vrot.lane.b32.xlu0 %v1356_v34, %s4455_s21  ;;  %v6319_v33 = vpack.c.bf16 %v1326_v35, %v1326_v35  ;;  %1804 = vst.msk [vmem:[#allocation2 + $0x44] sm:$0xf] %vm6738_vm15, %v1608_v48  ;;  %v1639_v10 = vor.u32 %v1637_v4, %v1636_v27  ;;  %v1458_v4 = vld [vmem:[#allocation2 + $0x54] sm:$0x8]  ;;  %4187 = vmatpush.bf16.msrb.mxu3 %v6085_v38 }
 0x287   : > { %1448 = vst [vmem:[#allocation2 + $0x34] sm:$0x8] %v1447_v40  ;;  %v1735_v58 = vor.u32 %v1733_v41, %v1732_v32  ;;  %v1459_v41 = vsel %vm5766_vm2, 0, %v1458_v4  ;;  %vm1151_vm6 = vcmp.eq.f32.partialorder %v1150_v16, 8.507059e+37  ;;  %v1461_v52 = vld [vmem:[#allocation2 + $0x5c] sm:$0x8]  ;;  %v1624_v32 = vsel %vm5125_vm8, %v1616_v26, %v1623_v31 }
 0x288   : > { %v1628_v21 = vrot.slane %v1626_v59, 7  ;;  %v2082_v8 = vrot.slane %v1626_v59, 4  ;;  %v2083_v25 = vrot.slane %v1629_v17, 5  ;;  %v1642_v7 = vshrl.u32 %v6319_v33, 16  ;;  %v6333_v18 = vpop.eup %4364  ;;  %2292 = vst.msk [vmem:[#allocation2 + $0x68] sm:$0xf] %vm2241_vm3, %v2194_v47 }
 0x289   : > { %1909 = vrot.lane.b32.xlu1 %v6319_v33, %s4455_s21  ;;  %v1645_v23 = vshll.u32 %v6319_v33, 16  ;;  %v1142_v30 = vmul.f32 %v6333_v18, %v6298_v63  ;;  %2252 = vst.msk [vmem:[#allocation2 + $0x18] sm:$0xf] %vm2241_vm3, %v2154_v46  ;;  %vm1147_vm13 = vweird.f32 %v6333_v18  ;;  %v2297_v53 = vld [vmem:[#allocation2 + $0x74] sm:$0xf]  ;;  %v1462_v33 = vsel %vm5766_vm2, 0, %v1461_v52 }
 0x28a   : > { %v1631_v28 = vor.u32 %v1629_v17, %v1628_v21  ;;  %v2084_v6 = vor.u32 %v2083_v25, %v2082_v8  ;;  %v6339_v3 = vrot.slane %v1642_v7, 7  ;;  %v6343_v44 = vpop.permute.xlu2 %2163  ;;  %v1632_v29 = vrot.slane %v1628_v21, 4  ;;  %1796 = vst.msk [vmem:[#allocation2 + $0x34] sm:$0xf] %vm6739_vm7, %v5756_v50  ;;  %v2160_v35 = vpop.permute.xlu0 %2159  ;;  %4188 = vmatpush.bf16.msrb.mxu3 %v6183_v43 }
 0x28b   : > { %v1143_v0 = vsub.f32 1.0, %v1142_v30  ;;  %1451 = vst [vmem:[#allocation2 + $0x3c] sm:$0x8] %v1450_v45  ;;  %v2258_v24 = vsel %vm5844_vm10, %v2160_v35, %v2257_v9  ;;  %v2091_v8 = vrot.slane %v1642_v7, 4  ;;  %v2092_v25 = vrot.slane %v1645_v23, 5 }
 0x28c   : > { %v1810_v5 = vsel %vm5064_vm1, %v1631_v28, %v1809_v60  ;;  %v2085_v11 = vrot.slane %v2084_v6, 4  ;;  %v1647_v2 = vor.u32 %v1645_v23, %v6339_v3  ;;  %v1640_v50 = vsel %vm5125_vm8, %v1632_v29, %v1639_v10  ;;  %1800 = vst.msk [vmem:[#allocation2 + $0x3c] sm:$0xf] %vm6740_vm9, %v5820_v56  ;;  %v2200_v12 = vpop.permute.xlu1 %2199 }
 0x28d   : > { %1811 = vst [vmem:[#allocation2 + $0x50] sm:$0xf] %v1810_v5  ;;  %v1144_v38 = vmul.f32 %v6333_v18, %v1143_v0  ;;  %v1477_v56 = vsel %vm5766_vm2, 0, %v1476_v15  ;;  %v2298_v54 = vsel %vm5844_vm10, %v2200_v12, %v2297_v53  ;;  %v1456_v60 = vsel %vm5766_vm2, 0, %v1455_v20  ;;  %vm6746_vm2 = vmmov %vm6737_vm0 }
 0x28e   : > { %v2087_v1 = vsel %vm5197_vm4, %v2085_v11, %v6259_v22  ;;  %v1814_v51 = vsel %vm5064_vm1, %v1647_v2, %v1813_v39  ;;  %v1728_v22 = vrot.slane %v6219_v49, 4  ;;  %vm1146_vm1 = vweird.f32 %v6298_v63  ;;  %1460 = vst [vmem:[#allocation2 + $0x54] sm:$0x8] %v1459_v41  ;;  %4189 = vmatpush.bf16.msrb.mxu3 %v6213_v57 }
 0x28f   : > { %2181 = vrot.lane.b32.xlu2 %v2087_v1, %s4456_s11  ;;  %1815 = vst [vmem:[#allocation2 + $0x58] sm:$0xf] %v1814_v51  ;;  %v1145_v49 = vadd.f32 %v6333_v18, %v1144_v38  ;;  %vm6384_vm11 = vmor %vm1146_vm1, %vm1147_vm13  ;;  %v4025_v63 = vld [vmem:[#allocation2 + $0x68] sm:$0xff]  ;;  %v2093_v6 = vor.u32 %v2092_v25, %v2091_v8  ;;  %vm6745_vm15 = vcmask 519424   ;;  %v1648_v37 = vrot.slane %v6339_v3, 4 }
 0x290   : > { %v4057_v59 = vld [vmem:[#allocation2 + $0x18] sm:$0xff]  ;;  %1812 = vst.msk [vmem:[#allocation2 + $0x54] sm:$0xf] %vm6743_vm14, %v1640_v50  ;;  %v1736_v40 = vsel %vm5125_vm8, %v1728_v22, %v1735_v58  ;;  %3773 = vmatmul.msk.bf16.gmra.mxu3 %vm2468_vm12, %v4025_v63  ;;  %vm6747_vm7 = vmmov %vm6745_vm15 }
 0x291   : > { %v4015_v17 = vld [vmem:[#allocation2 + $0x18] sm:$0xff]  ;;  %v1149_v43 = vsel %vm6384_vm11, %v6333_v18, %v1145_v49  ;;  %2299 = vst [vmem:[#allocation2 + $0x74] sm:$0xf] %v2298_v54  ;;  %3993 = vmatmul.msk.bf16.gmra.mxu2 %vm2468_vm12, %v4057_v59  ;;  %v2094_v45 = vrot.slane %v2093_v6, 4 }
 0x292   : > { %v2202_v48 = vpop.permute.xlu2 %2201  ;;  %v4036_v27 = vld [vmem:[#allocation2 + $0x18] sm:$0xff]  ;;  %v1154_v21 = vsel %vm1151_vm6, %v1153_v36, %v1149_v43  ;;  %2259 = vst [vmem:[#allocation2 + $0x24] sm:$0xf] %v2258_v24  ;;  %3763 = vmatmul.msk.bf16.gmra.mxu0 %vm2468_vm12, %v4015_v17  ;;  %v2198_v46 = vpop.permute.xlu0 %2197  ;;  %4190 = vmatpush.bf16.msrb.mxu3 %v6292_v62  ;;  %v4046_v36 = vld [vmem:[#allocation2 + $0x68] sm:$0xff] }
 0x293   : > { %v1327_v28 = vmul.f32 %v1154_v21, %v6232_v13  ;;  %3878 = vmatmul.msk.bf16.gmra.mxu1 %vm2468_vm12, %v4036_v27  ;;  %1478 = vst [vmem:[#allocation2 + $0x84] sm:$0x8] %v1477_v56  ;;  %v2301_v51 = vld [vmem:[#allocation2 + $0x7c] sm:$0xf] }
 0x294   : > { %1836 = vst.msk [vmem:[#allocation2 + $0x84] sm:$0xf] %vm6744_vm5, %v1736_v40  ;;  %v1888_v47 = vpop.permute.xlu1 %1887 }
 0x295   : > { %v1359_v7 = vpack.c.bf16 %v1327_v28, %v1327_v28  ;;  %1457 = vst [vmem:[#allocation2 + $0x4c] sm:$0x8] %v1456_v60 }
 0x296   : > { %1808 = vst.msk [vmem:[#allocation2 + $0x4c] sm:$0xf] %vm6737_vm0, %v1624_v32 }
 0x297   : > { %1911 = vrot.lane.b32.xlu0 %v1359_v7, %s4455_s21  ;;  %v1650_v13 = vshrl.u32 %v1359_v7, 16  ;;  %v1653_v39 = vshll.u32 %v1359_v7, 16  ;;  %1463 = vst [vmem:[#allocation2 + $0x5c] sm:$0x8] %v1462_v33 }
 0x298   : > { %1975 = vst.msk [vmem:[#allocation2 + $0x2c] sm:$0xf] %vm6745_vm15, %v1888_v47 }
 0x299   : > { %v1652_v18 = vrot.slane %v1650_v13, 7  ;;  %v2095_v10 = vrot.slane %v1653_v39, 5  ;;  %v2097_v23 = vrot.slane %v1650_v13, 4  ;;  %2296 = vst.msk [vmem:[#allocation2 + $0x70] sm:$0xf] %vm2241_vm3, %v2198_v46  ;;  %v4016_v26 = vld [vmem:[#allocation2 + $0x20] sm:$0xff] }
 0x29a   : > { %v2168_v57 = vpop.permute.xlu2 %2167  ;;  %v4037_v19 = vld [vmem:[#allocation2 + $0x20] sm:$0xff] }
 0x29b   : > { %v1655_v29 = vor.u32 %v1653_v39, %v1652_v18  ;;  %v2098_v5 = vor.u32 %v2097_v23, %v2095_v10  ;;  %v2096_v62 = vsel %vm5197_vm4, %v2094_v45, %v2095_v10  ;;  %v4058_v1 = vld [vmem:[#allocation2 + $0x20] sm:$0xff]  ;;  %vm6749_vm4 = vmmov %vm6747_vm7 }
 0x29c   : > { %v1926_v4 = vpop.permute.xlu1 %1925  ;;  %vm6750_vm13 = vmmov %vm6749_vm4 }
 0x29d   : > { %v1656_v11 = vsel %vm5125_vm8, %v1648_v37, %v1655_v29  ;;  %v2099_v30 = vrot.slane %v2098_v5, 4  ;;  %1994 = vst.msk [vmem:[#allocation2 + $0x78] sm:$0xf] %vm6747_vm7, %v1926_v4  ;;  %vm6748_vm8 = vmmov %vm6747_vm7 }
 0x29e   : > { %1816 = vst.msk [vmem:[#allocation2 + $0x5c] sm:$0xf] %vm6746_vm2, %v1656_v11  ;;  %v1886_v42 = vpop.permute.xlu0 %1885  ;;  %vm6751_vm1 = vmmov %vm6749_vm4 }
 0x29f   : > { %2187 = vrot.lane.b32.xlu2 %v2099_v30, %s4456_s11  ;;  %2185 = vrot.lane.b32.xlu0 %v2096_v62, %s4456_s11  ;;  %v2261_v3 = vld [vmem:[#allocation2 + $0x2c] sm:$0xf]  ;;  %2300 = vst.msk [vmem:[#allocation2 + $0x78] sm:$0xf] %vm2241_vm3, %v2202_v48  ;;  %vm6752_vm9 = vmmov %vm6751_vm1 }
 0x2a0   : > { %v2262_v2 = vsel %vm5844_vm10, %v6343_v44, %v2261_v3  ;;  %v4026_v58 = vld [vmem:[#allocation2 + $0x70] sm:$0xff]  ;;  %1974 = vst.msk [vmem:[#allocation2 + $0x28] sm:$0xf] %vm6748_vm8, %v1886_v42  ;;  %vm6753_vm11 = vmmov %vm6751_vm1 }
 0x2a1   : > { %2263 = vst [vmem:[#allocation2 + $0x2c] sm:$0xf] %v2262_v2  ;;  %3774 = vmatmul.msk.bf16.gmra.mxu3 %vm2468_vm12, %v4026_v58  ;;  %3994 = vmatmul.msk.bf16.gmra.mxu2 %vm2468_vm12, %v4058_v1  ;;  %vm6754_vm14 = vmmov %vm6751_vm1  ;;  %v4047_v8 = vld [vmem:[#allocation2 + $0x70] sm:$0xff] }
 0x2a2   : > { %v1894_v14 = vpop.permute.xlu2 %1893  ;;  %3764 = vmatmul.msk.bf16.gmra.mxu0 %vm2468_vm12, %v4016_v26  ;;  %vm6755_vm6 = vmmov %vm6751_vm1 }
 0x2a3   : > { %3879 = vmatmul.msk.bf16.gmra.mxu1 %vm2468_vm12, %v4037_v19  ;;  %1978 = vst.msk [vmem:[#allocation2 + $0x38] sm:$0xf] %vm6749_vm4, %v1894_v14  ;;  %vm6756_vm5 = vmmov %vm6751_vm1 }
 0x2a4   : > { %vm6757_vm0 = vmmov %vm6751_vm1 }
 0x2a5   : > { %vm6758_vm15 = vmmov %vm6757_vm0 }
 0x2a6   : > { %v2204_v0 = vpop.permute.xlu0 %2203  ;;  %vm6759_vm2 = vmmov %vm6757_vm0 }
 0x2a7   : > { %v2302_v61 = vsel %vm5844_vm10, %v2204_v0, %v2301_v51  ;;  %vm6760_vm7 = vmmov %vm6757_vm0 }
 0x2a8   : > { %v2162_v44 = vpop.permute.xlu1 %2161  ;;  %2303 = vst [vmem:[#allocation2 + $0x7c] sm:$0xf] %v2302_v61  ;;  %vm6761_vm8 = vmmov %vm6757_vm0 }
 0x2a9   : > { %2260 = vst.msk [vmem:[#allocation2 + $0x28] sm:$0xf] %vm2241_vm3, %v2162_v44  ;;  %vm6762_vm4 = vmmov %vm6757_vm0 }
 0x2aa   : > { %v1900_v41 = vpop.permute.xlu2 %1899 }
 0x2ab   : > { %1981 = vst.msk [vmem:[#allocation2 + $0x44] sm:$0xf] %vm6750_vm13, %v1900_v41 }
 0x2ae   : > { %v1892_v22 = vpop.permute.xlu0 %1891 }
 0x2af   : > { %v4027_v9 = vld [vmem:[#allocation2 + $0x78] sm:$0xff]  ;;  %1977 = vst.msk [vmem:[#allocation2 + $0x34] sm:$0xf] %vm6752_vm9, %v1892_v22  ;;  %v4068_v22 = vld [vmem:[#allocation2 + $0x70] sm:$0xff] }
 0x2b0   : > { %v1890_v15 = vpop.permute.xlu1 %1889  ;;  %v4017_v50 = vld [vmem:[#allocation2 + $0x28] sm:$0xff]  ;;  %v4048_v37 = vld [vmem:[#allocation2 + $0x78] sm:$0xff] }
 0x2b1   : > { %v4038_v38 = vld [vmem:[#allocation2 + $0x28] sm:$0xff]  ;;  %1976 = vst.msk [vmem:[#allocation2 + $0x30] sm:$0xf] %vm6751_vm1, %v1890_v15  ;;  %3775 = vmatmul.msk.bf16.gmra.mxu3 %vm2468_vm12, %v4027_v9 }
 0x2b2   : > { %v4059_v16 = vld [vmem:[#allocation2 + $0x28] sm:$0xff]  ;;  %3765 = vmatmul.msk.bf16.gmra.mxu0 %vm2468_vm12, %v4017_v50  ;;  %v2273_v40 = vld [vmem:[#allocation2 + $0x44] sm:$0xf] }
 0x2b3   : > { %3880 = vmatmul.msk.bf16.gmra.mxu1 %vm2468_vm12, %v4038_v38  ;;  %3995 = vmatmul.msk.bf16.gmra.mxu2 %vm2468_vm12, %v4059_v16 }
 0x2b6   : > { %v2166_v49 = vpop.permute.xlu0 %2165  ;;  %v2265_v34 = vld [vmem:[#allocation2 + $0x34] sm:$0xf] }
 0x2b7   : > { %v2174_v20 = vpop.permute.xlu2 %2173  ;;  %v2266_v12 = vsel %vm5844_vm10, %v2168_v57, %v2265_v34  ;;  %2264 = vst.msk [vmem:[#allocation2 + $0x30] sm:$0xf] %vm2241_vm3, %v2166_v49 }
 0x2b8   : > { %v1896_v31 = vpop.permute.xlu1 %1895  ;;  %2267 = vst [vmem:[#allocation2 + $0x34] sm:$0xf] %v2266_v12 }
 0x2b9   : > { %1979 = vst.msk [vmem:[#allocation2 + $0x3c] sm:$0xf] %vm6753_vm11, %v1896_v31 }
 0x2be   : > { %v2172_v56 = vpop.permute.xlu0 %2171 }
 0x2bf   : > { %v4018_v24 = vld [vmem:[#allocation2 + $0x30] sm:$0xff] }
 0x2c0   : > { %v2170_v35 = vpop.permute.xlu1 %2169  ;;  %v2269_v63 = vld [vmem:[#allocation2 + $0x3c] sm:$0xf]  ;;  %v4039_v48 = vld [vmem:[#allocation2 + $0x30] sm:$0xff] }
 0x2c1   : > { %2268 = vst.msk [vmem:[#allocation2 + $0x38] sm:$0xf] %vm2241_vm3, %v2170_v35  ;;  %v2270_v54 = vsel %vm5844_vm10, %v2172_v56, %v2269_v63  ;;  %v4060_v59 = vld [vmem:[#allocation2 + $0x30] sm:$0xff]  ;;  %3888 = vmatmul.msk.bf16.vlgmr.msra.gmra.mxu3 %vm2468_vm12, %v4046_v36 }
 0x2c2   : > { %2271 = vst [vmem:[#allocation2 + $0x3c] sm:$0xf] %v2270_v54  ;;  %3766 = vmatmul.msk.bf16.gmra.mxu0 %vm2468_vm12, %v4018_v24 }
 0x2c3   : > { %v1902_v53 = vpop.permute.xlu2 %1901  ;;  %3881 = vmatmul.msk.bf16.gmra.mxu1 %vm2468_vm12, %v4039_v48  ;;  %3996 = vmatmul.msk.bf16.gmra.mxu2 %vm2468_vm12, %v4060_v59 }
 0x2c4   : > { %1982 = vst.msk [vmem:[#allocation2 + $0x48] sm:$0xf] %vm6754_vm14, %v1902_v53  ;;  %v6507_v53 = vld [vmem:[%s6637_s6] ss:$0 sm:$0xff] }
 0x2c6   : > { %v1898_v52 = vpop.permute.xlu0 %1897 }
 0x2c7   : > { %1980 = vst.msk [vmem:[#allocation2 + $0x40] sm:$0xf] %vm6755_vm6, %v1898_v52 }
 0x2c8   : > { %v2176_v27 = vpop.permute.xlu1 %2175  ;;  %2272 = vst.msk [vmem:[#allocation2 + $0x40] sm:$0xf] %vm2241_vm3, %v2174_v20 }
 0x2c9   : > { %v2274_v43 = vsel %vm5844_vm10, %v2176_v27, %v2273_v40  ;;  %v4019_v25 = vld [vmem:[#allocation2 + $0x38] sm:$0xff] }
 0x2ca   : > { %2275 = vst [vmem:[#allocation2 + $0x44] sm:$0xf] %v2274_v43  ;;  %v4040_v60 = vld [vmem:[#allocation2 + $0x38] sm:$0xff] }
 0x2cb   : > { %v2208_v17 = vpop.permute.xlu2 %2207  ;;  %v4061_v32 = vld [vmem:[#allocation2 + $0x38] sm:$0xff] }
 0x2cc   : > { %v4069_v43 = vld [vmem:[#allocation2 + $0x78] sm:$0xff] }
 0x2d1   : > { %3889 = vmatmul.msk.bf16.gmra.mxu3 %vm2468_vm12, %v4047_v8  ;;  %v4020_v18 = vld [vmem:[#allocation2 + $0x40] sm:$0xff] }
 0x2d2   : > { %3767 = vmatmul.msk.bf16.gmra.mxu0 %vm2468_vm12, %v4019_v25  ;;  %v4041_v10 = vld [vmem:[#allocation2 + $0x40] sm:$0xff] }
 0x2d3   : > { %v1908_v21 = vpop.permute.xlu2 %1907  ;;  %3882 = vmatmul.msk.bf16.gmra.mxu1 %vm2468_vm12, %v4040_v60  ;;  %3997 = vmatmul.msk.bf16.gmra.mxu2 %vm2468_vm12, %v4061_v32  ;;  %v4062_v23 = vld [vmem:[#allocation2 + $0x40] sm:$0xff] }
 0x2d4   : > { %1985 = vst.msk [vmem:[#allocation2 + $0x54] sm:$0xf] %vm6756_vm5, %v1908_v21 }
 0x2d7   : > { %v1932_v28 = vpop.permute.xlu1 %1931 }
 0x2d8   : > { %1997 = vst.msk [vmem:[#allocation2 + $0x84] sm:$0xf] %vm6757_vm0, %v1932_v28  ;;  %v1904_v33 = vpop.permute.xlu0 %1903 }
 0x2d9   : > { %1983 = vst.msk [vmem:[#allocation2 + $0x4c] sm:$0xf] %vm6758_vm15, %v1904_v33 }
 0x2db   : > { %v2281_v30 = vld [vmem:[#allocation2 + $0x54] sm:$0xf] }
 0x2dc   : > { %v2526_v57 = vpop.f32.mrf.mxu0 }
 0x2df   : > { %v2305_v7 = vld [vmem:[#allocation2 + $0x84] sm:$0xf] }
 0x2e0   : > { %v2306_v6 = vsel %vm5844_vm10, %v2208_v17, %v2305_v7  ;;  %v2277_v13 = vld [vmem:[#allocation2 + $0x4c] sm:$0xf]  ;;  %v2180_v39 = vpop.permute.xlu1 %2179 }
 0x2e1   : > { %2307 = vst [vmem:[#allocation2 + $0x84] sm:$0xf] %v2306_v6  ;;  %v2278_v47 = vsel %vm5844_vm10, %v2180_v39, %v2277_v13  ;;  %3890 = vmatmul.msk.bf16.gmra.mxu3 %vm2468_vm12, %v4048_v37 }
 0x2e2   : > { %2279 = vst [vmem:[#allocation2 + $0x4c] sm:$0xf] %v2278_v47  ;;  %v1930_v46 = vpop.permute.xlu0 %1929  ;;  %3768 = vmatmul.msk.bf16.gmra.mxu0 %vm2468_vm12, %v4020_v18 }
 0x2e3   : > { %1996 = vst.msk [vmem:[#allocation2 + $0x80] sm:$0xf] %vm6759_vm2, %v1930_v46  ;;  %3883 = vmatmul.msk.bf16.gmra.mxu1 %vm2468_vm12, %v4041_v10  ;;  %3998 = vmatmul.msk.bf16.gmra.mxu2 %vm2468_vm12, %v4062_v23  ;;  %v2888_v3 = vpop.f32.mrf.mxu1 }
 0x2e4   : > { %v2528_v5 = vpop.f32.mrf.mxu0  ;;  %v2968_v31 = vadd.f32 %v2888_v3, %v2526_v57 }
 0x2e9   : > { %v2182_v19 = vpop.permute.xlu2 %2181 }
 0x2ea   : > { %v2178_v45 = vpop.permute.xlu0 %2177 }
 0x2eb   : > { %v2206_v29 = vpop.permute.xlu1 %2205  ;;  %2276 = vst.msk [vmem:[#allocation2 + $0x48] sm:$0xf] %vm2241_vm3, %v2178_v45  ;;  %v2890_v44 = vpop.f32.mrf.mxu1 }
 0x2ec   : > { %2304 = vst.msk [vmem:[#allocation2 + $0x80] sm:$0xf] %vm2241_vm3, %v2206_v29  ;;  %v2531_v2 = vpop.f32.mrf.mxu0  ;;  %v2969_v34 = vadd.f32 %v2890_v44, %v2528_v5  ;;  %v4045_v29 = vld [vmem:[#allocation2 + $0x60] sm:$0xff] }
 0x2ed   : > { %v4066_v5 = vld [vmem:[#allocation2 + $0x60] sm:$0xff] }
 0x2f2   : > { %v4021_v4 = vld [vmem:[#allocation2 + $0x48] sm:$0xff] }
 0x2f3   : > { %v2184_v11 = vpop.permute.xlu1 %2183  ;;  %v4042_v42 = vld [vmem:[#allocation2 + $0x48] sm:$0xff]  ;;  %v4049_v14 = vld [vmem:[#allocation2 + $0x80] sm:$0xff]  ;;  %3769 = vmatmul.msk.bf16.gmra.mxu0 %vm2468_vm12, %v4021_v4 }
 0x2f4   : > { %v2282_v62 = vsel %vm5844_vm10, %v2184_v11, %v2281_v30  ;;  %v4063_v26 = vld [vmem:[#allocation2 + $0x48] sm:$0xff]  ;;  %3884 = vmatmul.msk.bf16.gmra.mxu1 %vm2468_vm12, %v4042_v42  ;;  %3891 = vmatmul.msk.bf16.gmra.mxu3 %vm2468_vm12, %v4049_v14  ;;  %v2533_v0 = vpop.f32.mrf.mxu0  ;;  %v4070_v18 = vld [vmem:[#allocation2 + $0x80] sm:$0xff] }
 0x2f5   : > { %2283 = vst [vmem:[#allocation2 + $0x54] sm:$0xf] %v2282_v62  ;;  %3999 = vmatmul.msk.bf16.gmra.mxu2 %vm2468_vm12, %v4063_v26 }
 0x2f8   : > { %v1906_v58 = vpop.permute.xlu0 %1905 }
 0x2f9   : > { %1984 = vst.msk [vmem:[#allocation2 + $0x50] sm:$0xf] %vm6760_vm7, %v1906_v58  ;;  %v2188_v56 = vpop.permute.xlu2 %2187 }
 0x2fa   : > { %2280 = vst.msk [vmem:[#allocation2 + $0x50] sm:$0xf] %vm2241_vm3, %v2182_v19  ;;  %v4071_v19 = vld [vmem:[#allocation2 + $0x88] sm:$0xff] }
 0x2fb   : > { %v1910_v1 = vpop.permute.xlu1 %1909 }
 0x2fc   : > { %1986 = vst.msk [vmem:[#allocation2 + $0x58] sm:$0xf] %vm6761_vm8, %v1910_v1  ;;  %v2893_v51 = vpop.f32.mrf.mxu1  ;;  %v2536_v16 = vpop.f32.mrf.mxu0 }
 0x2fd   : > { %v2970_v32 = vadd.f32 %v2893_v51, %v2531_v2 }
 0x300   : > { %v6495_v50 = vpop.f32.mrf.mxu3 }
 0x301   : > { %v4022_v61 = vld [vmem:[#allocation2 + $0x50] sm:$0xff]  ;;  %v3283_v38 = vpop.f32.mrf.mxu2 }
 0x302   : > { %v4043_v41 = vld [vmem:[#allocation2 + $0x50] sm:$0xff]  ;;  %v3363_v12 = vadd.f32 %v3283_v38, %v2968_v31 }
 0x303   : > { %v4064_v15 = vld [vmem:[#allocation2 + $0x50] sm:$0xff]  ;;  %3770 = vmatmul.msk.bf16.gmra.mxu0 %vm2468_vm12, %v4022_v61 }
 0x304   : > { %3885 = vmatmul.msk.bf16.gmra.mxu1 %vm2468_vm12, %v4043_v41  ;;  %4004 = vmatmul.msk.bf16.vlgmr.msrb.gmra.mxu3 %vm2468_vm12, %v4068_v22  ;;  %v2895_v20 = vpop.f32.mrf.mxu1  ;;  %v3463_v48 = vadd.f32 %v6507_v53, %v3363_v12  ;;  %v2538_v59 = vpop.f32.mrf.mxu0  ;;  %v4067_v41 = vld [vmem:[#allocation2 + $0x68] sm:$0xff] }
 0x305   : > { %4000 = vmatmul.msk.bf16.gmra.mxu2 %vm2468_vm12, %v4064_v15  ;;  %v2971_v7 = vadd.f32 %v2895_v20, %v2533_v0 }
 0x308   : > { %v6502_v49 = vpop.f32.mrf.mxu3 }
 0x309   : > { %v1912_v9 = vpop.permute.xlu0 %1911  ;;  %v3285_v35 = vpop.f32.mrf.mxu2 }
 0x30a   : > { %1987 = vst.msk [vmem:[#allocation2 + $0x5c] sm:$0xf] %vm6762_vm4, %v1912_v9  ;;  %v3364_v63 = vadd.f32 %v3285_v35, %v2969_v34 }
 0x30c   : > { %v3464_v17 = vadd.f32 %v6507_v53, %v3364_v63 }
 0x30e   : > { %v4081_v40 = vpack.c.bf16 %v3464_v17, %v3463_v48 }
 0x30f   : > { %v2541_v28 = vpop.f32.mrf.mxu0 }
 0x310   : > { %v2898_v27 = vpop.f32.mrf.mxu1  ;;  %4082 = vst [vmem:[%s6517_s15] sm:$0xff] %v4081_v40  }
 0x311   : > { %v2285_v36 = vld [vmem:[#allocation2 + $0x5c] sm:$0xf]  ;;  %v2186_v54 = vpop.permute.xlu0 %2185  ;;  %v2972_v30 = vadd.f32 %v2898_v27, %v2536_v16 }
 0x312   : > { %v2286_v24 = vsel %vm5844_vm10, %v2188_v56, %v2285_v36  ;;  %2284 = vst.msk [vmem:[#allocation2 + $0x58] sm:$0xf] %vm2241_vm3, %v2186_v54 }
 0x313   : > { %2287 = vst [vmem:[#allocation2 + $0x5c] sm:$0xf] %v2286_v24  ;;  %v6519_v52 = vpop.f32.mrf.mxu3 }
 0x314   : > { %4005 = vmatmul.msk.bf16.gmra.mxu3 %vm2468_vm12, %v4069_v43  ;;  %v3288_v55 = vpop.f32.mrf.mxu2 }
 0x315   : > { %v3365_v6 = vadd.f32 %v3288_v55, %v2970_v32 }
 0x317   : > { %v3465_v47 = vadd.f32 %v6507_v53, %v3365_v6  ;;  %v2543_v23 = vpop.f32.mrf.mxu0 }
 0x318   : > { %v2900_v60 = vpop.f32.mrf.mxu1 }
 0x319   : > { %v2973_v3 = vadd.f32 %v2900_v60, %v2538_v59 }
 0x31a   : > { %v4023_v21 = vld [vmem:[#allocation2 + $0x58] sm:$0xff] }
 0x31b   : > { %v4044_v8 = vld [vmem:[#allocation2 + $0x58] sm:$0xff]  ;;  %3771 = vmatmul.msk.bf16.gmra.mxu0 %vm2468_vm12, %v4023_v21  ;;  %v6526_v33 = vpop.f32.mrf.mxu3 }
 0x31c   : > { %v4065_v25 = vld [vmem:[#allocation2 + $0x58] sm:$0xff]  ;;  %3886 = vmatmul.msk.bf16.gmra.mxu1 %vm2468_vm12, %v4044_v8  ;;  %v3290_v13 = vpop.f32.mrf.mxu2 }
 0x31d   : > { %4001 = vmatmul.msk.bf16.gmra.mxu2 %vm2468_vm12, %v4065_v25  ;;  %v3366_v39 = vadd.f32 %v3290_v13, %v2971_v7 }
 0x31f   : > { %v3466_v46 = vadd.f32 %v6507_v53, %v3366_v39  ;;  %v2546_v2 = vpop.f32.mrf.mxu0 }
 0x320   : > { %v2903_v57 = vpop.f32.mrf.mxu1 }
 0x321   : > { %v4086_v37 = vpack.c.bf16 %v3466_v46, %v3465_v47  ;;  %v2974_v22 = vadd.f32 %v2903_v57, %v2541_v28 }
 0x323   : > { %4158 = vst [vmem:[%s6517_s15 + $0x8] sm:$0xff] %v4086_v37  }
 0x324   : > { %v6530_v10 = vpop.f32.mrf.mxu3  ;;  %4006 = vmatmul.msk.bf16.gmra.mxu3 %vm2468_vm12, %v4070_v18  ;;  %v3293_v45 = vpop.f32.mrf.mxu2 }
 0x325   : > { %v3367_v4 = vadd.f32 %v3293_v45, %v2972_v30 }
 0x327   : > { %v3467_v26 = vadd.f32 %v6507_v53, %v3367_v4  ;;  %v2548_v61 = vpop.f32.mrf.mxu0 }
 0x328   : > { %v2905_v11 = vpop.f32.mrf.mxu1 }
 0x329   : > { %v2975_v16 = vadd.f32 %v2905_v11, %v2543_v23 }
 0x32c   : > { %3887 = vmatmul.msk.bf16.gmra.mxu1 %vm2468_vm12, %v4045_v29  ;;  %v6536_v62 = vpop.f32.mrf.mxu3  ;;  %v3295_v42 = vpop.f32.mrf.mxu2 }
 0x32d   : > { %4002 = vmatmul.msk.bf16.gmra.mxu2 %vm2468_vm12, %v4066_v5  ;;  %v3368_v14 = vadd.f32 %v3295_v42, %v2973_v3 }
 0x32f   : > { %v3468_v58 = vadd.f32 %v6507_v53, %v3368_v14  ;;  %v2551_v63 = vpop.f32.mrf.mxu0 }
 0x330   : > { %v2908_v1 = vpop.f32.mrf.mxu1 }
 0x331   : > { %v4091_v44 = vpack.c.bf16 %v3468_v58, %v3467_v26  ;;  %v2976_v48 = vadd.f32 %v2908_v1, %v2546_v2 }
 0x333   : > { %4159 = vst [vmem:[%s6517_s15 + $0x10] sm:$0xff] %v4091_v44  }
 0x334   : > { %v6540_v0 = vpop.f32.mrf.mxu3  ;;  %4007 = vmatmul.msk.bf16.gmra.mxu3 %vm2468_vm12, %v4071_v19 }
 0x336   : > { %v3298_v51 = vpop.f32.mrf.mxu2 }
 0x337   : > { %v3369_v9 = vadd.f32 %v3298_v51, %v2974_v22  ;;  %v2553_v27 = vpop.f32.mrf.mxu0 }
 0x338   : > { %v2910_v15 = vpop.f32.mrf.mxu1 }
 0x339   : > { %v3469_v34 = vadd.f32 %v6507_v53, %v3369_v9  ;;  %v2977_v40 = vadd.f32 %v2910_v15, %v2548_v61 }
 0x33c   : > { %v6545_v38 = vpop.f32.mrf.mxu3 }
 0x33d   : > { %4003 = vmatmul.msk.bf16.gmra.mxu2 %vm2468_vm12, %v4067_v41 }
 0x33e   : > { %v3300_v20 = vpop.f32.mrf.mxu2 }
 0x33f   : > { %v3370_v31 = vadd.f32 %v3300_v20, %v2975_v16  ;;  %v2556_v6 = vpop.f32.mrf.mxu0 }
 0x340   : > { %v2913_v35 = vpop.f32.mrf.mxu1 }
 0x341   : > { %v3470_v12 = vadd.f32 %v6507_v53, %v3370_v31  ;;  %v2978_v13 = vadd.f32 %v2913_v35, %v2551_v63 }
 0x343   : > { %v4096_v56 = vpack.c.bf16 %v3470_v12, %v3469_v34 }
 0x344   : > { %v2948_v36 = vpop.f32.mrf.mxu3 }
 0x345   : > { %4160 = vst [vmem:[%s6517_s15 + $0x18] sm:$0xff] %v4096_v56   ;;  %v6551_v54 = vadd.f32 %v2948_v36, %v6495_v50 }
 0x346   : > { %v3303_v24 = vpop.f32.mrf.mxu2 }
 0x347   : > { %v3371_v43 = vadd.f32 %v3303_v24, %v2976_v48  ;;  %v2558_v23 = vpop.f32.mrf.mxu0 }
 0x348   : > { %v2915_v59 = vpop.f32.mrf.mxu1 }
 0x349   : > { %v3471_v8 = vadd.f32 %v6507_v53, %v3371_v43  ;;  %v2979_v47 = vadd.f32 %v2915_v59, %v2553_v27 }
 0x34c   : > { %v6553_v17 = vpop.f32.mrf.mxu3 }
 0x34d   : > { %v2993_v43 = vadd.f32 %v6553_v17, %v6502_v49 }
 0x34e   : > { %v3305_v55 = vpop.f32.mrf.mxu2 }
 0x34f   : > { %v3372_v21 = vadd.f32 %v3305_v55, %v2977_v40  ;;  %v2561_v4 = vpop.f32.mrf.mxu0 }
 0x350   : > { %v2918_v28 = vpop.f32.mrf.mxu1 }
 0x351   : > { %v3472_v25 = vadd.f32 %v6507_v53, %v3372_v21  ;;  %v2980_v42 = vadd.f32 %v2918_v28, %v2556_v6 }
 0x353   : > { %v4101_v60 = vpack.c.bf16 %v3472_v25, %v3471_v8 }
 0x354   : > { %v2953_v32 = vpop.f32.mrf.mxu3 }
 0x355   : > { %4161 = vst [vmem:[%s6517_s15 + $0x20] sm:$0xff] %v4101_v60   ;;  %v6559_v50 = vadd.f32 %v2953_v32, %v6519_v52 }
 0x356   : > { %v3308_v7 = vpop.f32.mrf.mxu2 }
 0x357   : > { %v3373_v46 = vadd.f32 %v3308_v7, %v2978_v13  ;;  %v2563_v41 = vpop.f32.mrf.mxu0 }
 0x358   : > { %v2920_v37 = vpop.f32.mrf.mxu1 }
 0x359   : > { %v3473_v45 = vadd.f32 %v6507_v53, %v3373_v46  ;;  %v2981_v2 = vadd.f32 %v2920_v37, %v2558_v23 }
 0x35c   : > { %v6561_v39 = vpop.f32.mrf.mxu3 }
 0x35e   : > { %v3310_v57 = vpop.f32.mrf.mxu2 }
 0x35f   : > { %v3374_v18 = vadd.f32 %v3310_v57, %v2979_v47  ;;  %v2566_v20 = vpop.f32.mrf.mxu0 }
 0x360   : > { %v2923_v3 = vpop.f32.mrf.mxu1 }
 0x361   : > { %v3474_v29 = vadd.f32 %v6507_v53, %v3374_v18  ;;  %v2982_v16 = vadd.f32 %v2923_v3, %v2561_v4 }
 0x363   : > { %v4106_v5 = vpack.c.bf16 %v3474_v29, %v3473_v45  ;;  %v2995_v45 = vadd.f32 %v6561_v39, %v6526_v33 }
 0x364   : > { %v2958_v11 = vpop.f32.mrf.mxu3 }
 0x365   : > { %4162 = vst [vmem:[%s6517_s15 + $0x28] sm:$0xff] %v4106_v5   ;;  %v6567_v52 = vadd.f32 %v2958_v11, %v6530_v10 }
 0x366   : > { %v3313_v30 = vpop.f32.mrf.mxu2 }
 0x367   : > { %v3375_v14 = vadd.f32 %v3313_v30, %v2980_v42 }
 0x368   : > { %v2925_v51 = vpop.f32.mrf.mxu1 }
 0x369   : > { %v3475_v1 = vadd.f32 %v6507_v53, %v3375_v14  ;;  %v2983_v31 = vadd.f32 %v2925_v51, %v2563_v41 }
 0x36c   : > { %v6569_v26 = vpop.f32.mrf.mxu3 }
 0x36e   : > { %v3315_v58 = vpop.f32.mrf.mxu2 }
 0x36f   : > { %v3376_v19 = vadd.f32 %v3315_v58, %v2981_v2 }
 0x371   : > { %v3476_v44 = vadd.f32 %v6507_v53, %v3376_v19  ;;  %v2928_v9 = vpop.f32.mrf.mxu1 }
 0x372   : > { %v2984_v40 = vadd.f32 %v2928_v9, %v2566_v20 }
 0x373   : > { %v4111_v61 = vpack.c.bf16 %v3476_v44, %v3475_v1 }
 0x375   : > { %4163 = vst [vmem:[%s6517_s15 + $0x30] sm:$0xff] %v4111_v61  }
 0x377   : > { %v2963_v10 = vpop.f32.mrf.mxu3 }
 0x378   : > { %v3318_v15 = vpop.f32.mrf.mxu2  ;;  %v6575_v22 = vadd.f32 %v2963_v10, %v6540_v0  ;;  %v2568_v0 = vpop.f32.mrf.mxu0  ;;  %v2997_v10 = vadd.f32 %v6569_v26, %v6536_v62 }
 0x379   : > { %v3377_v34 = vadd.f32 %v3318_v15, %v2982_v16  ;;  %v2930_v48 = vpop.f32.mrf.mxu1 }
 0x37a   : > { %v2985_v55 = vadd.f32 %v2930_v48, %v2568_v0 }
 0x37b   : > { %v3477_v56 = vadd.f32 %v6507_v53, %v3377_v34 }
 0x37f   : > { %v6577_v12 = vpop.f32.mrf.mxu3 }
 0x380   : > { %v3320_v35 = vpop.f32.mrf.mxu2  ;;  %v2571_v6 = vpop.f32.mrf.mxu0 }
 0x381   : > { %v3378_v63 = vadd.f32 %v3320_v35, %v2983_v31  ;;  %v2933_v32 = vpop.f32.mrf.mxu1 }
 0x382   : > { %v2986_v30 = vadd.f32 %v2933_v32, %v2571_v6 }
 0x383   : > { %v3478_v36 = vadd.f32 %v6507_v53, %v3378_v63 }
 0x385   : > { %v4116_v24 = vpack.c.bf16 %v3478_v36, %v3477_v56 }
 0x387   : > { %4164 = vst [vmem:[%s6517_s15 + $0x38] sm:$0xff] %v4116_v24   ;;  %v3343_v27 = vpop.f32.mrf.mxu3 }
 0x388   : > { %v3323_v59 = vpop.f32.mrf.mxu2  ;;  %v3387_v8 = vadd.f32 %v3343_v27, %v6551_v54  ;;  %v2573_v18 = vpop.f32.mrf.mxu0 }
 0x389   : > { %v3379_v21 = vadd.f32 %v3323_v59, %v2984_v40  ;;  %v2935_v54 = vpop.f32.mrf.mxu1 }
 0x38a   : > { %v3487_v47 = vadd.f32 %v6507_v53, %v3387_v8  ;;  %v2987_v2 = vadd.f32 %v2935_v54, %v2573_v18 }
 0x38b   : > { %v3479_v13 = vadd.f32 %v6507_v53, %v3379_v21 }
 0x38f   : > { %v3345_v60 = vpop.f32.mrf.mxu3 }
 0x390   : > { %v3325_v25 = vpop.f32.mrf.mxu2  ;;  %v3388_v7 = vadd.f32 %v3345_v60, %v2993_v43  ;;  %v2576_v19 = vpop.f32.mrf.mxu0  ;;  %v2999_v43 = vadd.f32 %v6577_v12, %v6545_v38 }
 0x391   : > { %v3380_v28 = vadd.f32 %v3325_v25, %v2985_v55 }
 0x392   : > { %v3488_v49 = vadd.f32 %v6507_v53, %v3388_v7 }
 0x393   : > { %v3480_v46 = vadd.f32 %v6507_v53, %v3380_v28 }
 0x394   : > { %v4141_v57 = vpack.c.bf16 %v3488_v49, %v3487_v47 }
 0x395   : > { %v4121_v17 = vpack.c.bf16 %v3480_v46, %v3479_v13 }
 0x396   : > { %4169 = vst [vmem:[%s6517_s15 + $0x60] sm:$0xff] %v4141_v57  }
 0x397   : > { %4165 = vst [vmem:[%s6517_s15 + $0x40] sm:$0xff] %v4121_v17   ;;  %v3348_v37 = vpop.f32.mrf.mxu3 }
 0x398   : > { %v3389_v29 = vadd.f32 %v3348_v37, %v6559_v50  ;;  %v2578_v16 = vpop.f32.mrf.mxu0 }
 0x399   : > { %v2938_v42 = vpop.f32.mrf.mxu1 }
 0x39a   : > { %v3489_v3 = vadd.f32 %v6507_v53, %v3389_v29  ;;  %v2988_v31 = vadd.f32 %v2938_v42, %v2576_v19 }
 0x39f   : > { %v3350_v5 = vpop.f32.mrf.mxu3 }
 0x3a0   : > { %v3328_v23 = vpop.f32.mrf.mxu2  ;;  %v3390_v11 = vadd.f32 %v3350_v5, %v2995_v45  ;;  %v2581_v26 = vpop.f32.mrf.mxu0 }
 0x3a1   : > { %v3381_v14 = vadd.f32 %v3328_v23, %v2986_v30  ;;  %v2940_v61 = vpop.f32.mrf.mxu1 }
 0x3a2   : > { %v3490_v4 = vadd.f32 %v6507_v53, %v3390_v11  ;;  %v2989_v63 = vadd.f32 %v2940_v61, %v2578_v16 }
 0x3a3   : > { %v3481_v33 = vadd.f32 %v6507_v53, %v3381_v14 }
 0x3a4   : > { %v4146_v58 = vpack.c.bf16 %v3490_v4, %v3489_v3 }
 0x3a6   : > { %4170 = vst [vmem:[%s6517_s15 + $0x68] sm:$0xff] %v4146_v58  }
 0x3a7   : > { %v3353_v51 = vpop.f32.mrf.mxu3 }
 0x3a8   : > { %v3330_v1 = vpop.f32.mrf.mxu2  ;;  %v3391_v15 = vadd.f32 %v3353_v51, %v6567_v52  ;;  %v2583_v7 = vpop.f32.mrf.mxu0 }
 0x3a9   : > { %v3382_v44 = vadd.f32 %v3330_v1, %v2987_v2  ;;  %v2943_v59 = vpop.f32.mrf.mxu1 }
 0x3aa   : > { %v3491_v34 = vadd.f32 %v6507_v53, %v3391_v15  ;;  %v2990_v60 = vadd.f32 %v2943_v59, %v2581_v26 }
 0x3ab   : > { %v3482_v50 = vadd.f32 %v6507_v53, %v3382_v44 }
 0x3ad   : > { %v4126_v39 = vpack.c.bf16 %v3482_v50, %v3481_v33 }
 0x3af   : > { %4166 = vst [vmem:[%s6517_s15 + $0x48] sm:$0xff] %v4126_v39   ;;  %v3355_v9 = vpop.f32.mrf.mxu3 }
 0x3b0   : > { %v3333_v41 = vpop.f32.mrf.mxu2  ;;  %v3392_v20 = vadd.f32 %v3355_v9, %v2997_v10 }
 0x3b1   : > { %v3383_v56 = vadd.f32 %v3333_v41, %v2988_v31  ;;  %v2945_v25 = vpop.f32.mrf.mxu1 }
 0x3b2   : > { %v3492_v35 = vadd.f32 %v6507_v53, %v3392_v20  ;;  %v2991_v6 = vadd.f32 %v2945_v25, %v2583_v7 }
 0x3b3   : > { %v3483_v62 = vadd.f32 %v6507_v53, %v3383_v56 }
 0x3b4   : > { %v4151_v36 = vpack.c.bf16 %v3492_v35, %v3491_v34 }
 0x3b6   : > { %4171 = vst [vmem:[%s6517_s15 + $0x70] sm:$0xff] %v4151_v36  }
 0x3b7   : > { %v3358_v27 = vpop.f32.mrf.mxu3 }
 0x3b8   : > { %v3335_v24 = vpop.f32.mrf.mxu2  ;;  %v3393_v55 = vadd.f32 %v3358_v27, %v6575_v22 }
 0x3b9   : > { %v3384_v48 = vadd.f32 %v3335_v24, %v2989_v63 }
 0x3ba   : > { %v3493_v32 = vadd.f32 %v6507_v53, %v3393_v55 }
 0x3bb   : > { %v3484_v52 = vadd.f32 %v6507_v53, %v3384_v48 }
 0x3bd   : > { %v4131_v0 = vpack.c.bf16 %v3484_v52, %v3483_v62 }
 0x3bf   : > { %4167 = vst [vmem:[%s6517_s15 + $0x50] sm:$0xff] %v4131_v0   ;;  %v3360_v21 = vpop.f32.mrf.mxu3 }
 0x3c0   : > { %v3338_v40 = vpop.f32.mrf.mxu2  ;;  %v3394_v8 = vadd.f32 %v3360_v21, %v2999_v43 }
 0x3c1   : > { %v3385_v13 = vadd.f32 %v3338_v40, %v2990_v60 }
 0x3c2   : > { %v3494_v28 = vadd.f32 %v6507_v53, %v3394_v8 }
 0x3c3   : > { %v3485_v38 = vadd.f32 %v6507_v53, %v3385_v13 }
 0x3c4   : > { %v4156_v47 = vpack.c.bf16 %v3494_v28, %v3493_v32 }
 0x3c6   : > { %4172 = vst [vmem:[%s6517_s15 + $0x78] sm:$0xff] %v4156_v47  }
 0x3c8   : > { %v3340_v46 = vpop.f32.mrf.mxu2 }
 0x3c9   : > { %v3386_v49 = vadd.f32 %v3340_v46, %v2991_v6 }
 0x3cb   : > { %v3486_v22 = vadd.f32 %v6507_v53, %v3386_v49 }
 0x3cd   : > { %v4136_v12 = vpack.c.bf16 %v3486_v22, %v3485_v38 }
 0x3cf   : > { %4168 = vst [vmem:[%s6517_s15 + $0x58] sm:$0xff] %v4136_v12  }
 0x3d0 PF: > { %p17_p7 = scmp.ge.s32.totalorder %s4520_s29, 4   ;;  %s6763_s24 = smov %s4443_s25 }
 0x3d1   : > { %s6764_s25 = smov %s4447_s26  ;;  %s6765_s26 = smov %s4530_s9 }
 0x3d2   : > { %s6766_s27 = smov %s4520_s29  ;;  %19 = sbr.rel (!%p17_p7) target bundleno = 3 (0x3), region = 93 }
 0x3d7   :  { %3580 = vsyncpa [#allocation5], 1 }
 0x3d8   :  { %3582 = vsyncpa [#allocation5 + $0x1], 1 }

// kernel: residual_block_forward.3
= control target key start
LH: loop header
LB: loop body
LE: loop exit
PB: predicated region body
PF: predicated region fallthrough
CT: control target
= control target key end

     0   :  { %s6012_s13 = smov 0   ;;  %s8221_s0 = inlined_call_operand.vmem [shape: bf16[2,16,16,128], index: 0, kind: input, shape index: {}]   ;;  %s8222_s1 = inlined_call_operand.vmem [shape: f32[128,32], index: 1, kind: input, shape index: {}]   ;;  %s8223_s2 = inlined_call_operand.vmem [shape: f32[32,128], index: 2, kind: input, shape index: {}]   ;;  %s8224_s3 = inlined_call_operand.vmem [shape: f32[1,128], index: 3, kind: input, shape index: {}]   ;;  %s8225_s4 = inlined_call_operand.vmem [shape: f32[1,128], index: 4, kind: input, shape index: {}]   ;;  %s8226_s5 = inlined_call_operand.vmem [shape: bf16[3,384,128], index: 5, kind: input, shape index: {}]   ;;  %s8227_s6 = inlined_call_operand.vmem [shape: f32[1,128], index: 6, kind: input, shape index: {}]   ;;  %s8228_s7 = inlined_call_operand.vmem [shape: f32[2,16,16,32], index: 7, kind: input, shape index: {}]   ;;  %s8229_s8 = inlined_call_operand.vmem [shape: bf16[32,128], index: 8, kind: input, shape index: {}]   ;;  %s8230_s9 = inlined_call_operand.vmem [shape: f32[1,128], index: 9, kind: input, shape index: {}]   ;;  %s8231_s10 = inlined_call_operand.vmem [shape: f32[2,16,16,128], index: 10, kind: output, shape index: {}]  }
   0x1 LB: > { %s4620_s14 = sadd.s32 4294967295, %s5954_s13   ;;  %p4624_p0 = scmp.ge.s32.totalorder %s5954_s13, 1  ;;  %s5954_s13 = sphi %s6012_s13, %s20_s13  }
   0x2   : > { %p322_p1 = scmp.lt.s32.totalorder %s5954_s13, 3 }
   0x4   : > { %p323_p2 = pnand %p4624_p0, %p322_p1 }
   0x6   : > { %326 = sbr.rel (%p323_p2) target bundleno = 1250 (0x4e2), region = 60 }
   0xb   : > { %v566_v0 = vld [vmem:[%s8222_s1 + $0x78] sm:$0xff]  ;;  %v565_v1 = vld [vmem:[%s8222_s1 + $0x70] sm:$0xff]  ;;  %p365_p3 = scmp.lt.s32.totalorder %s4620_s14, 1  ;;  %v564_v2 = vld [vmem:[%s8222_s1 + $0x68] sm:$0xff]  ;;  %vm789_vm0 = vcmask 1040384   ;;  %vm840_vm3 = vcmask 1043459  }
   0xc   : > { %567 = vmatpush.msra.mxu0 %v566_v0  ;;  %588 = vmatpush.msra.mxu1 %v566_v0  ;;  %v563_v3 = vld [vmem:[%s8222_s1 + $0x60] sm:$0xff]  ;;  %v562_v4 = vld [vmem:[%s8222_s1 + $0x58] sm:$0xff]  ;;  %v561_v5 = vld [vmem:[%s8222_s1 + $0x50] sm:$0xff]  ;;  %vm790_vm1 = vsmask.f32 256  ;;  %vm627_vm6 = vcmask 261120  }
   0xd   : > { %s8477_s14 = smov (!%p365_p3, %s4620_s14), 1  ;;  %v560_v8 = vld [vmem:[%s8222_s1 + $0x48] sm:$0xff]  ;;  %v559_v14 = vld [vmem:[%s8222_s1 + $0x40] sm:$0xff]  ;;  %v558_v18 = vld [vmem:[%s8222_s1 + $0x38] sm:$0xff]  ;;  %vm841_vm4 = vsmask.f32 7950 }
   0xe   : > { %568 = vmatpush.msra.mxu0 %v565_v1  ;;  %589 = vmatpush.msra.mxu1 %v565_v1  ;;  %s5619_s23 = sshll.u32 %s8477_s14, 7  ;;  %v557_v24 = vld [vmem:[%s8222_s1 + $0x30] sm:$0xff]  ;;  %v556_v31 = vld [vmem:[%s8222_s1 + $0x28] sm:$0xff]  ;;  %v555_v39 = vld [vmem:[%s8222_s1 + $0x20] sm:$0xff]  ;;  %vm1181_vm10 = vcmask 1043456   ;;  %s5620_s12 = sshll.u32 %s8477_s14, 8 }
   0xf   : > { %s6038_s26 = scalar_lea.vmem %s8221_s0, %s5619_s23  ;;  %v554_v48 = vld [vmem:[%s8222_s1 + $0x18] sm:$0xff]  ;;  %v553_v57 = vld [vmem:[%s8222_s1 + $0x10] sm:$0xff]  ;;  %vm6168_vm2 = vmand %vm789_vm0, %vm790_vm1  ;;  %vm1182_vm11 = vsmask.f32 7938  ;;  %vm891_vm12 = vsmask.f32 4368  ;;  %s7613_s16 = scalar_lea.vmem %s8228_s7, %s5620_s12 }
  0x10   : > { %569 = vmatpush.msra.mxu0 %v564_v2  ;;  %590 = vmatpush.msra.mxu1 %v564_v2  ;;  %v5841_v6 = vld [vmem:[%s6038_s26] sm:$0xff]   ;;  %v5904_v7 = vld [vmem:[%s6038_s26 + $0x8] sm:$0xff]   ;;  %v5905_v9 = vld [vmem:[%s6038_s26 + $0x10] sm:$0xff]   ;;  %vm1280_vm15 = vsmask.f32 3328  ;;  %s7934_s23 = scalar_lea.vmem %s8231_s10, %s5620_s12 }
  0x11   : > { %v6052_v10 = vunpack.c.l.bf16 %v5841_v6  ;;  %v6054_v11 = vunpack.c.h.bf16 %v5841_v6  ;;  %v6056_v12 = vunpack.c.l.bf16 %v5904_v7  ;;  %v6058_v13 = vunpack.c.h.bf16 %v5904_v7  ;;  %v5906_v15 = vld [vmem:[%s6038_s26 + $0x18] sm:$0xff]   ;;  %v5907_v19 = vld [vmem:[%s6038_s26 + $0x20] sm:$0xff]   ;;  %v5908_v25 = vld [vmem:[%s6038_s26 + $0x28] sm:$0xff]  }
  0x12   : > { %570 = vmatpush.msra.mxu0 %v563_v3  ;;  %591 = vmatpush.msra.mxu1 %v563_v3  ;;  %v6064_v16 = vunpack.c.l.bf16 %v5905_v9  ;;  %v6066_v17 = vunpack.c.h.bf16 %v5905_v9  ;;  %v6072_v20 = vunpack.c.l.bf16 %v5906_v15  ;;  %v6074_v21 = vunpack.c.h.bf16 %v5906_v15  ;;  %v5909_v28 = vld [vmem:[%s6038_s26 + $0x30] sm:$0xff]   ;;  %v5910_v32 = vld [vmem:[%s6038_s26 + $0x38] sm:$0xff]   ;;  %v5911_v35 = vld [vmem:[%s6038_s26 + $0x40] sm:$0xff]  }
  0x13   : > { %v445_v22 = vadd.f32 %v6056_v12, %v6052_v10  ;;  %v460_v23 = vadd.f32 %v6058_v13, %v6054_v11  ;;  %v6084_v26 = vunpack.c.l.bf16 %v5907_v19  ;;  %v6086_v27 = vunpack.c.h.bf16 %v5907_v19  ;;  %v5912_v36 = vld [vmem:[%s6038_s26 + $0x48] sm:$0xff]   ;;  %v5913_v41 = vld [vmem:[%s6038_s26 + $0x50] sm:$0xff]   ;;  %v5914_v44 = vld [vmem:[%s6038_s26 + $0x58] sm:$0xff]  }
  0x14   : > { %571 = vmatpush.msra.mxu0 %v562_v4  ;;  %592 = vmatpush.msra.mxu1 %v562_v4  ;;  %v6095_v33 = vunpack.c.l.bf16 %v5908_v25  ;;  %v6097_v34 = vunpack.c.h.bf16 %v5908_v25  ;;  %v6106_v40 = vunpack.c.l.bf16 %v5909_v28  ;;  %v6109_v42 = vunpack.c.h.bf16 %v5909_v28  ;;  %v5915_v45 = vld [vmem:[%s6038_s26 + $0x60] sm:$0xff]   ;;  %v552_v2 = vld [vmem:[%s8222_s1 + $0x8] sm:$0xff]  ;;  %vm6191_vm5 = vmand %vm840_vm3, %vm841_vm4 }
  0x15   : > { %v446_v29 = vadd.f32 %v6064_v16, %v445_v22  ;;  %v461_v30 = vadd.f32 %v6066_v17, %v460_v23  ;;  %v6111_v43 = vunpack.c.l.bf16 %v5910_v32  ;;  %v6120_v49 = vunpack.c.h.bf16 %v5910_v32  ;;  %v551_v7 = vld [vmem:[%s8222_s1] sm:$0xff]  ;;  %v834_v19 = vld [vmem:[#allocation2 + $0x168] sm:$0x1]  ;;  %v879_v32 = vld [vmem:[#allocation2 + $0x14c] sm:$0x8] }
  0x16   : > { %572 = vmatpush.msra.mxu0 %v561_v5  ;;  %593 = vmatpush.msra.mxu1 %v561_v5  ;;  %v6122_v50 = vunpack.c.l.bf16 %v5911_v35  ;;  %v6124_v51 = vunpack.c.h.bf16 %v5911_v35  ;;  %v6126_v52 = vunpack.c.l.bf16 %v5912_v36  ;;  %v6128_v53 = vunpack.c.h.bf16 %v5912_v36  ;;  %vm6519_vm13 = vmand %vm1181_vm10, %vm1182_vm11 }
  0x17   : > { %v447_v37 = vadd.f32 %v6072_v20, %v446_v29  ;;  %v462_v38 = vadd.f32 %v6074_v21, %v461_v30  ;;  %v6130_v54 = vunpack.c.l.bf16 %v5913_v41  ;;  %v6137_v58 = vunpack.c.h.bf16 %v5913_v41  ;;  %vm6539_vm14 = vmor %vm790_vm1, %vm891_vm12 }
  0x18   : > { %573 = vmatpush.msra.mxu0 %v560_v8  ;;  %594 = vmatpush.msra.mxu1 %v560_v8  ;;  %v6139_v59 = vunpack.c.l.bf16 %v5914_v44  ;;  %v6141_v60 = vunpack.c.h.bf16 %v5914_v44  ;;  %v6143_v61 = vunpack.c.l.bf16 %v5915_v45  ;;  %v6145_v62 = vunpack.c.h.bf16 %v5915_v45  ;;  %v882_v44 = vld [vmem:[#allocation2 + $0x164] sm:$0x8]  ;;  %v885_v45 = vld [vmem:[#allocation2 + $0x17c] sm:$0x8]  ;;  %vm6688_vm1 = vmand %vm1181_vm10, %vm1280_vm15 }
  0x19   : > { %v448_v46 = vadd.f32 %v6084_v26, %v447_v37  ;;  %v463_v47 = vadd.f32 %v6086_v27, %v462_v38  ;;  %v482_v1 = vmul.f32 %v6052_v10, %v6052_v10  ;;  %v483_v3 = vmul.f32 %v6054_v11, %v6054_v11 }
  0x1a   : > { %574 = vmatpush.msra.mxu0 %v559_v14  ;;  %595 = vmatpush.msra.mxu1 %v559_v14  ;;  %v484_v4 = vmul.f32 %v6056_v12, %v6056_v12  ;;  %v485_v5 = vmul.f32 %v6058_v13, %v6058_v13  ;;  %v486_v6 = vmul.f32 %v6064_v16, %v6064_v16  ;;  %v828_v14 = vld [vmem:[#allocation2 + $0x138] sm:$0x1]  ;;  %v835_v35 = vsel %vm6168_vm2, 0, %v834_v19 }
  0x1b   : > { %v449_v55 = vadd.f32 %v6095_v33, %v448_v46  ;;  %v464_v56 = vadd.f32 %v6097_v34, %v463_v47  ;;  %v487_v22 = vmul.f32 %v6066_v17, %v6066_v17  ;;  %v488_v23 = vmul.f32 %v6072_v20, %v6072_v20  ;;  %v5916_v47 = vld [vmem:[%s6038_s26 + $0x68] sm:$0xff]   ;;  %836 = vst [vmem:[#allocation2 + $0x168] sm:$0x1] %v835_v35 }
  0x1c   : > { %575 = vmatpush.msra.mxu0 %v558_v18  ;;  %596 = vmatpush.msra.mxu1 %v558_v18  ;;  %v831_v18 = vld [vmem:[#allocation2 + $0x150] sm:$0x1]  ;;  %v829_v29 = vsel %vm6168_vm2, 0, %v828_v14  ;;  %v514_v37 = vadd.f32 %v484_v4, %v482_v1  ;;  %v8287_v41 = vmov 0  ;;  %v529_v46 = vadd.f32 %v485_v5, %v483_v3 }
  0x1d   : > { %v450_v63 = vadd.f32 %v6106_v40, %v449_v55  ;;  %v465_v0 = vadd.f32 %v6109_v42, %v464_v56  ;;  %v832_v30 = vsel %vm6168_vm2, 0, %v831_v18  ;;  %830 = vst [vmem:[#allocation2 + $0x138] sm:$0x1] %v829_v29  ;;  %v8288_v41 = vsel %vm6191_vm5, 4294967295, %v8287_v41  ;;  %v5917_v4 = vld [vmem:[%s6038_s26 + $0x70] sm:$0xff]  }
  0x1e   : > { %576 = vmatpush.msra.mxu0 %v557_v24  ;;  %597 = vmatpush.msra.mxu1 %v557_v24  ;;  %v489_v24 = vmul.f32 %v6074_v21, %v6074_v21  ;;  %833 = vst [vmem:[#allocation2 + $0x150] sm:$0x1] %v832_v30  ;;  %v883_v55 = vsel %vm6191_vm5, 0, %v882_v44  ;;  %v490_v56 = vmul.f32 %v6084_v26, %v6084_v26  ;;  %v886_v1 = vsel %vm6191_vm5, 0, %v885_v45 }
  0x1f   : > { %v451_v8 = vadd.f32 %v6111_v43, %v450_v63  ;;  %v466_v9 = vadd.f32 %v6120_v49, %v465_v0  ;;  %8289 = vst [vmem:[#allocation4_spill] sm:$0xff] %v8288_v41  ;;  %v530_v3 = vadd.f32 %v529_v46, %v487_v22  ;;  %v6215_v14 = vunpack.c.h.bf16 %v5916_v47  ;;  %v5918_v22 = vld [vmem:[%s6038_s26 + $0x78] sm:$0xff]  }
  0x20   : > { %577 = vmatpush.msra.mxu0 %v556_v31  ;;  %598 = vmatpush.msra.mxu1 %v556_v31  ;;  %v837_v31 = vld [vmem:[#allocation2 + $0x180] sm:$0x1]  ;;  %884 = vst [vmem:[#allocation2 + $0x164] sm:$0x8] %v883_v55  ;;  %v6234_v44 = vunpack.c.l.bf16 %v5918_v22  ;;  %vm1281_vm0 = vsmask.f32 7440 }
  0x21   : > { %v452_v25 = vadd.f32 %v6122_v50, %v451_v8  ;;  %v467_v28 = vadd.f32 %v6124_v51, %v466_v9  ;;  %v838_v36 = vsel %vm6168_vm2, 0, %v837_v31  ;;  %v6213_v9 = vunpack.c.l.bf16 %v5916_v47  ;;  %887 = vst [vmem:[#allocation2 + $0x17c] sm:$0x8] %v886_v1  ;;  %vm6700_vm3 = vmor %vm1280_vm15, %vm1281_vm0 }
  0x22   : > { %578 = vmatpush.msra.mxu0 %v555_v39  ;;  %599 = vmatpush.msra.mxu1 %v555_v39  ;;  %839 = vst [vmem:[#allocation2 + $0x180] sm:$0x1] %v838_v36  ;;  %v531_v30 = vadd.f32 %v530_v3, %v489_v24  ;;  %v6226_v31 = vunpack.c.h.bf16 %v5917_v4  ;;  %v495_v36 = vmul.f32 %v6109_v42, %v6109_v42  ;;  %v6236_v24 = vunpack.c.h.bf16 %v5918_v22  ;;  %v625_v22 = vld [vmem:[%s8223_s2 + $0x10] sm:$0xff] }
  0x23   : > { %v453_v38 = vadd.f32 %v6126_v52, %v452_v25  ;;  %v468_v39 = vadd.f32 %v6128_v53, %v467_v28  ;;  %v493_v25 = vmul.f32 %v6097_v34, %v6097_v34  ;;  %v494_v28 = vmul.f32 %v6106_v40, %v6106_v40 }
  0x24   : > { %579 = vmatpush.msra.mxu0 %v554_v48  ;;  %600 = vmatpush.msra.mxu1 %v554_v48  ;;  %v880_v48 = vsel %vm6191_vm5, 0, %v879_v32  ;;  %v497_v47 = vmul.f32 %v6120_v49, %v6120_v49  ;;  %v500_v1 = vmul.f32 %v6126_v52, %v6126_v52 }
  0x25   : > { %v454_v63 = vadd.f32 %v6130_v54, %v453_v38  ;;  %v469_v0 = vadd.f32 %v6137_v58, %v468_v39  ;;  %881 = vst [vmem:[#allocation2 + $0x14c] sm:$0x8] %v880_v48  ;;  %v498_v48 = vmul.f32 %v6122_v50, %v6122_v50 }
  0x26   : > { %580 = vmatpush.msra.mxu0 %v553_v57  ;;  %601 = vmatpush.msra.mxu1 %v553_v57  ;;  %v515_v57 = vadd.f32 %v514_v37, %v486_v6  ;;  %v492_v6 = vmul.f32 %v6095_v33, %v6095_v33  ;;  %v496_v37 = vmul.f32 %v6111_v43, %v6111_v43 }
  0x27   : > { %v455_v18 = vadd.f32 %v6139_v59, %v454_v63  ;;  %v470_v19 = vadd.f32 %v6141_v60, %v469_v0  ;;  %v499_v0 = vmul.f32 %v6124_v51, %v6124_v51 }
  0x28   : > { %581 = vmatpush.msra.mxu0 %v552_v2  ;;  %602 = vmatpush.msra.mxu1 %v552_v2  ;;  %v888_v2 = vld [vmem:[#allocation2 + $0x194] sm:$0x8]  ;;  %v516_v8 = vadd.f32 %v515_v57, %v488_v23  ;;  %v6224_v23 = vunpack.c.l.bf16 %v5917_v4 }
  0x29   : > { %v889_v5 = vsel %vm6191_vm5, 0, %v888_v2  ;;  %v456_v32 = vadd.f32 %v6143_v61, %v455_v18  ;;  %v471_v35 = vadd.f32 %v6145_v62, %v470_v19  ;;  %v626_v19 = vld [vmem:[%s8223_s2 + $0x18] sm:$0xff] }
  0x2a   : > { %582 = vmatpush.msra.mxu0 %v551_v7  ;;  %603 = vmatpush.msra.mxu1 %v551_v7  ;;  %v491_v7 = vmul.f32 %v6086_v27, %v6086_v27  ;;  %v517_v29 = vadd.f32 %v516_v8, %v490_v56  ;;  %890 = vst [vmem:[#allocation2 + $0x194] sm:$0x8] %v889_v5 }
  0x2b   : > { %v457_v45 = vadd.f32 %v6213_v9, %v456_v32  ;;  %v472_v46 = vadd.f32 %v6215_v14, %v471_v35  ;;  %643 = vmatpush.msra.mxu2 %v626_v19  ;;  %666 = vmatpush.msra.mxu3 %v626_v19 }
  0x2c   : > { %v518_v38 = vadd.f32 %v517_v29, %v492_v6  ;;  %v532_v39 = vadd.f32 %v531_v30, %v491_v7  ;;  %v501_v7 = vmul.f32 %v6128_v53, %v6128_v53  ;;  %v502_v6 = vmul.f32 %v6130_v54, %v6130_v54 }
  0x2d   : > { %v458_v57 = vadd.f32 %v6224_v23, %v457_v45  ;;  %v473_v63 = vadd.f32 %v6226_v31, %v472_v46  ;;  %v504_v29 = vmul.f32 %v6139_v59, %v6139_v59  ;;  %644 = vmatpush.msra.mxu2 %v625_v22  ;;  %667 = vmatpush.msra.mxu3 %v625_v22 }
  0x2e   : > { %v519_v55 = vadd.f32 %v518_v38, %v494_v28  ;;  %v533_v56 = vadd.f32 %v532_v39, %v493_v25  ;;  %v503_v28 = vmul.f32 %v6137_v58, %v6137_v58  ;;  %v507_v46 = vmul.f32 %v6145_v62, %v6145_v62 }
  0x2f   : > { %v459_v4 = vadd.f32 %v6234_v44, %v458_v57  ;;  %v474_v5 = vadd.f32 %v6236_v24, %v473_v63  ;;  %v509_v57 = vmul.f32 %v6215_v14, %v6215_v14  ;;  %v510_v63 = vmul.f32 %v6224_v23, %v6224_v23 }
  0x30   : > { %v520_v2 = vadd.f32 %v519_v55, %v496_v37  ;;  %v534_v3 = vadd.f32 %v533_v56, %v495_v36  ;;  %v505_v36 = vmul.f32 %v6141_v60, %v6141_v60  ;;  %v506_v37 = vmul.f32 %v6143_v61, %v6143_v61 }
  0x31   : > { %v475_v25 = vadd.f32 %v474_v5, %v459_v4  ;;  %v512_v4 = vmul.f32 %v6234_v44, %v6234_v44 }
  0x32   : > { %v521_v8 = vadd.f32 %v520_v2, %v498_v48  ;;  %v535_v18 = vadd.f32 %v534_v3, %v497_v47  ;;  %v508_v47 = vmul.f32 %v6213_v9, %v6213_v9  ;;  %v511_v3 = vmul.f32 %v6226_v31, %v6226_v31 }
  0x33   : > { %v476_v35 = vrot.slane %v475_v25, 4 }
  0x34   : > { %v522_v30 = vadd.f32 %v521_v8, %v500_v1  ;;  %v536_v32 = vadd.f32 %v535_v18, %v499_v0  ;;  %v513_v8 = vmul.f32 %v6236_v24, %v6236_v24 }
  0x35   : > { %v477_v45 = vadd.f32 %v476_v35, %v475_v25 }
  0x36   : > { %v523_v38 = vadd.f32 %v522_v30, %v502_v6  ;;  %v537_v39 = vadd.f32 %v536_v32, %v501_v7 }
  0x37   : > { %v478_v56 = vrot.slane %v477_v45, 2 }
  0x38   : > { %v524_v48 = vadd.f32 %v523_v38, %v504_v29  ;;  %v538_v55 = vadd.f32 %v537_v39, %v503_v28 }
  0x39   : > { %v479_v2 = vadd.f32 %v478_v56, %v477_v45  ;;  %v624_v45 = vld [vmem:[%s8223_s2 + $0x8] sm:$0xff] }
  0x3a   : > { %v525_v0 = vadd.f32 %v524_v48, %v506_v37  ;;  %v539_v1 = vadd.f32 %v538_v55, %v505_v36  ;;  %645 = vmatpush.msra.mxu2 %v624_v45  ;;  %668 = vmatpush.msra.mxu3 %v624_v45 }
  0x3b   : > { %v480_v6 = vrot.slane %v479_v2, 1 }
  0x3c   : > { %v526_v5 = vadd.f32 %v525_v0, %v508_v47  ;;  %v540_v7 = vadd.f32 %v539_v1, %v507_v46  ;;  %v623_v46 = vld [vmem:[%s8223_s2] sm:$0xff] }
  0x3d   : > { %v481_v22 = vadd.f32 %v480_v6, %v479_v2  ;;  %646 = vmatpush.msra.mxu2 %v623_v46  ;;  %669 = vmatpush.msra.mxu3 %v623_v46 }
  0x3e   : > { %v527_v18 = vadd.f32 %v526_v5, %v510_v63  ;;  %v541_v19 = vadd.f32 %v540_v7, %v509_v57 }
  0x3f   : > { %583 = vmatmul.f32.vlgmr.msra.gmra.mxu0 %v481_v22  ;;  %v5684_v22 = vld [vmem:[%s8226_s5 + $0x70] sm:$0xff] }
  0x40   : > { %v528_v25 = vadd.f32 %v527_v18, %v512_v4  ;;  %v542_v28 = vadd.f32 %v541_v19, %v511_v3  ;;  %v5685_v18 = vld [vmem:[%s8226_s5 + $0x78] sm:$0xff] }
  0x41   : > { %v5677_v19 = vld [vmem:[%s8226_s5 + $0x38] sm:$0xff]  ;;  %2125 = vmatpush.bf16.msrb.mxu1 %v5685_v18  ;;  %5927 = vmatpush.bf16.msrb.mxu3 %v5685_v18 }
  0x42   : > { %v543_v29 = vadd.f32 %v542_v28, %v513_v8  ;;  %2036 = vmatpush.bf16.msrb.mxu0 %v5677_v19  ;;  %5919 = vmatpush.bf16.msrb.mxu2 %v5677_v19  ;;  %v5683_v28 = vld [vmem:[%s8226_s5 + $0x68] sm:$0xff] }
  0x44   : > { %v544_v30 = vadd.f32 %v543_v29, %v528_v25  ;;  %v5676_v25 = vld [vmem:[%s8226_s5 + $0x30] sm:$0xff]  ;;  %v5675_v29 = vld [vmem:[%s8226_s5 + $0x28] sm:$0xff] }
  0x45   : > { %2126 = vmatpush.bf16.msrb.mxu1 %v5684_v22  ;;  %5928 = vmatpush.bf16.msrb.mxu3 %v5684_v22 }
  0x46   : > { %v545_v32 = vrot.slane %v544_v30, 4  ;;  %2037 = vmatpush.bf16.msrb.mxu0 %v5676_v25  ;;  %5920 = vmatpush.bf16.msrb.mxu2 %v5676_v25 }
  0x48   : > { %v546_v35 = vadd.f32 %v545_v32, %v544_v30  ;;  %v5682_v30 = vld [vmem:[%s8226_s5 + $0x60] sm:$0xff] }
  0x49   : > { %2127 = vmatpush.bf16.msrb.mxu1 %v5683_v28  ;;  %v5674_v32 = vld [vmem:[%s8226_s5 + $0x20] sm:$0xff]  ;;  %5929 = vmatpush.bf16.msrb.mxu3 %v5683_v28 }
  0x4a   : > { %v547_v36 = vrot.slane %v546_v35, 2  ;;  %2038 = vmatpush.bf16.msrb.mxu0 %v5675_v29  ;;  %5921 = vmatpush.bf16.msrb.mxu2 %v5675_v29 }
  0x4c   : > { %v548_v37 = vadd.f32 %v547_v36, %v546_v35  ;;  %v5681_v35 = vld [vmem:[%s8226_s5 + $0x58] sm:$0xff] }
  0x4d   : > { %2128 = vmatpush.bf16.msrb.mxu1 %v5682_v30  ;;  %v5673_v36 = vld [vmem:[%s8226_s5 + $0x18] sm:$0xff]  ;;  %5930 = vmatpush.bf16.msrb.mxu3 %v5682_v30 }
  0x4e   : > { %v549_v38 = vrot.slane %v548_v37, 1  ;;  %2039 = vmatpush.bf16.msrb.mxu0 %v5674_v32  ;;  %5922 = vmatpush.bf16.msrb.mxu2 %v5674_v32 }
  0x50   : > { %v550_v39 = vadd.f32 %v549_v38, %v548_v37  ;;  %v5680_v37 = vld [vmem:[%s8226_s5 + $0x50] sm:$0xff]  ;;  %v5679_v38 = vld [vmem:[%s8226_s5 + $0x48] sm:$0xff] }
  0x51   : > { %2129 = vmatpush.bf16.msrb.mxu1 %v5681_v35  ;;  %5931 = vmatpush.bf16.msrb.mxu3 %v5681_v35 }
  0x52   : > { %604 = vmatmul.f32.vlgmr.msra.gmra.mxu1 %v550_v39  ;;  %2040 = vmatpush.bf16.msrb.mxu0 %v5673_v36  ;;  %v674_v39 = vld [vmem:[%s8224_s3] sm:$0x1] }
  0x53   : > { %5923 = vmatpush.bf16.msrb.mxu2 %v5673_v36 }
  0x55   : > { %2130 = vmatpush.bf16.msrb.mxu1 %v5680_v37  ;;  %5932 = vmatpush.bf16.msrb.mxu3 %v5680_v37 }
  0x59   : > { %2131 = vmatpush.bf16.msrb.mxu1 %v5679_v38  ;;  %5933 = vmatpush.bf16.msrb.mxu3 %v5679_v38 }
  0xbc   : > { %v584_v47 = vpop.f32.mrf.mxu0 }
  0xbd   : > { %v587_v48 = vmul.f32 0.001953125, %v584_v47 }
  0xbf   : > { %4631 = vmatmul.msk.f32.vlgmr.msra.gmra.mxu2 %vm627_vm6, %v587_v48  ;;  %v609_v55 = vmul.f32 %v587_v48, %v587_v48  ;;  %v676_v48 = vld [vmem:[%s8225_s4] sm:$0x1] }
  0xcf   : > { %v605_v56 = vpop.f32.mrf.mxu1 }
  0xd0   : > { %v608_v57 = vmul.f32 0.001953125, %v605_v56 }
  0xd2   : > { %v610_v63 = vsub.f32 %v608_v57, %v609_v55  ;;  %v5956_v57 = vmov 0  }
  0xd3   : > { %779 = vst [vmem:[#allocation2] sm:$0xff] %v5956_v57 }
  0xd4   : > { %v611_v0 = vmax.f32 %v610_v63, 0.0  ;;  %781 = vst [vmem:[#allocation2 + $0xc] sm:$0xff] %v5956_v57 }
  0xd5   : > { %780 = vst [vmem:[#allocation2 + $0x8] sm:$0xf] %v5956_v57 }
  0xd6   : > { %v612_v1 = vadd.f32 1e-05, %v611_v0  ;;  %782 = vst [vmem:[#allocation2 + $0x14] sm:$0xf] %v5956_v57 }
  0xd7   : > { %784 = vst [vmem:[#allocation2 + $0x198] sm:$0xff] %v5956_v57 }
  0xd8   : > { %5946 = vrsqrt.f32 %v612_v1  ;;  %vm619_vm8 = vweird.f32 %v612_v1  ;;  %785 = vst [vmem:[#allocation2 + $0x1a0] sm:$0xf] %v5956_v57 }
  0xd9   : > { %786 = vst [vmem:[#allocation2 + $0x1a4] sm:$0xff] %v5956_v57 }
  0xda   : > { %787 = vst [vmem:[#allocation2 + $0x1ac] sm:$0xf] %v5956_v57 }
  0xde   : > { %v5947_v2 = vpop.eup %5946 }
  0xdf   : > { %v614_v3 = vmul.f32 %v5947_v2, %v612_v1  ;;  %vm620_vm7 = vweird.f32 %v5947_v2  ;;  %v5672_v1 = vld [vmem:[%s8226_s5 + $0x10] sm:$0xff] }
  0xe0   : > { %vm621_vm9 = vmor %vm619_vm8, %vm620_vm7  ;;  %2041 = vmatpush.bf16.msrb.mxu0 %v5672_v1  ;;  %5924 = vmatpush.bf16.msrb.mxu2 %v5672_v1 }
  0xe1   : > { %v615_v4 = vmul.f32 %v5947_v2, %v614_v3 }
  0xe3   : > { %v616_v5 = vmul.f32 0.5, %v615_v4  ;;  %v5678_v4 = vld [vmem:[%s8226_s5 + $0x40] sm:$0xff] }
  0xe4   : > { %2132 = vmatpush.bf16.msrb.mxu1 %v5678_v4  ;;  %5934 = vmatpush.bf16.msrb.mxu3 %v5678_v4 }
  0xe5   : > { %v617_v7 = vsub.f32 1.5, %v616_v5 }
  0xe7   : > { %v618_v6 = vmul.f32 %v5947_v2, %v617_v7 }
  0xe9   : > { %v622_v8 = vsel %vm621_vm9, %v5947_v2, %v618_v6 }
  0xea   : > { %4632 = vmatmul.msk.f32.vlgmr.msra.gmra.mxu3 %vm627_vm6, %v622_v8 }
 0x142   : > { %v648_v47 = vpop.f32.mrf.mxu2 }
 0x16d   : > { %v671_v45 = vpop.f32.mrf.mxu3 }
 0x16e   : > { %v675_v46 = vmul.f32 %v674_v39, %v671_v45 }
 0x170   : > { %v677_v55 = vmul.f32 %v675_v46, %v648_v47  ;;  %v6334_v63 = vperm.slane %v675_v46, 0 }
 0x172   : > { %v678_v56 = vsub.f32 %v676_v48, %v677_v55  ;;  %v692_v2 = vmul.f32 %v6106_v40, %v6334_v63  ;;  %v693_v3 = vmul.f32 %v6109_v42, %v6334_v63  ;;  %v694_v5 = vmul.f32 %v6111_v43, %v6334_v63  ;;  %v5671_v43 = vld [vmem:[%s8226_s5 + $0x8] sm:$0xff] }
 0x173   : > { %v702_v40 = vmul.f32 %v6139_v59, %v6334_v63  ;;  %v703_v42 = vmul.f32 %v6141_v60, %v6334_v63  ;;  %v704_v8 = vmul.f32 %v6143_v61, %v6334_v63  ;;  %v695_v19 = vmul.f32 %v6120_v49, %v6334_v63  ;;  %2042 = vmatpush.bf16.msrb.mxu0 %v5671_v43 }
 0x174   : > { %v6336_v0 = vperm.slane %v678_v56, 0  ;;  %v696_v22 = vmul.f32 %v6122_v50, %v6334_v63  ;;  %v697_v59 = vmul.f32 %v6124_v51, %v6334_v63  ;;  %v705_v60 = vmul.f32 %v6145_v62, %v6334_v63  ;;  %5925 = vmatpush.bf16.msrb.mxu2 %v5671_v43 }
 0x175   : > { %v706_v61 = vmul.f32 %v6213_v9, %v6334_v63  ;;  %v707_v49 = vmul.f32 %v6215_v14, %v6334_v63  ;;  %v698_v62 = vmul.f32 %v6126_v52, %v6334_v63  ;;  %v708_v9 = vmul.f32 %v6224_v23, %v6334_v63 }
 0x176   : > { %v727_v7 = vadd.f32 %v6336_v0, %v692_v2  ;;  %v728_v6 = vadd.f32 %v6336_v0, %v693_v3  ;;  %v729_v18 = vadd.f32 %v6336_v0, %v694_v5  ;;  %v737_v25 = vadd.f32 %v6336_v0, %v702_v40 }
 0x177   : > { %v738_v28 = vadd.f32 %v6336_v0, %v703_v42  ;;  %v739_v29 = vadd.f32 %v6336_v0, %v704_v8  ;;  %v740_v50 = vadd.f32 %v6336_v0, %v705_v60  ;;  %v741_v32 = vadd.f32 %v6336_v0, %v706_v61 }
 0x178   : > { %v6378_v51 = vpack.c.bf16 %v727_v7, %v727_v7  ;;  %v6380_v30 = vpack.c.bf16 %v728_v6, %v728_v6  ;;  %v6387_v35 = vpack.c.bf16 %v729_v18, %v729_v18  ;;  %v699_v14 = vmul.f32 %v6128_v53, %v6334_v63 }
 0x179   : > { %v709_v36 = vmul.f32 %v6226_v31, %v6334_v63  ;;  %v710_v37 = vmul.f32 %v6234_v44, %v6334_v63  ;;  %v742_v38 = vadd.f32 %v6336_v0, %v707_v49  ;;  %v743_v52 = vadd.f32 %v6336_v0, %v708_v9 }
 0x17a   : > { %1260 = vst [vmem:[#allocation2 + $0xac] sm:$0xf] %v6378_v51  ;;  %v6398_v23 = vpack.c.bf16 %v737_v25, %v737_v25  ;;  %v6400_v39 = vpack.c.bf16 %v738_v28, %v738_v28  ;;  %v6402_v45 = vpack.c.bf16 %v739_v29, %v739_v29  ;;  %v700_v53 = vmul.f32 %v6130_v54, %v6334_v63  ;;  %v5670_v25 = vld [vmem:[%s8226_s5] sm:$0xff] }
 0x17b   : > { %1261 = vst [vmem:[#allocation2 + $0xb8] sm:$0xf] %v6380_v30  ;;  %v711_v31 = vmul.f32 %v6236_v24, %v6334_v63  ;;  %v744_v44 = vadd.f32 %v6336_v0, %v709_v36  ;;  %v6410_v46 = vpack.c.bf16 %v740_v50, %v740_v50  ;;  %v701_v47 = vmul.f32 %v6137_v58, %v6334_v63 }
 0x17c   : > { %1262 = vst [vmem:[#allocation2 + $0xc4] sm:$0xf] %v6387_v35  ;;  %v745_v48 = vadd.f32 %v6336_v0, %v710_v37  ;;  %v6416_v55 = vpack.c.bf16 %v741_v32, %v741_v32  ;;  %v730_v54 = vadd.f32 %v6336_v0, %v695_v19  ;;  %v732_v24 = vadd.f32 %v6336_v0, %v697_v59 }
 0x17d   : > { %1270 = vst [vmem:[#allocation2 + $0x124] sm:$0xf] %v6398_v23  ;;  %v746_v56 = vadd.f32 %v6336_v0, %v711_v31  ;;  %v6422_v57 = vpack.c.bf16 %v742_v38, %v742_v38  ;;  %v731_v1 = vadd.f32 %v6336_v0, %v696_v22  ;;  %v733_v58 = vadd.f32 %v6336_v0, %v698_v62  ;;  %v5691_v62 = vld [vmem:[%s8226_s5 + $0xa8] sm:$0xff] }
 0x17e   : > { %1271 = vst [vmem:[#allocation2 + $0x130] sm:$0xf] %v6400_v39  ;;  %v734_v2 = vadd.f32 %v6336_v0, %v699_v14  ;;  %v6428_v3 = vpack.c.bf16 %v743_v52, %v743_v52  ;;  %v735_v4 = vadd.f32 %v6336_v0, %v700_v53  ;;  %v736_v5 = vadd.f32 %v6336_v0, %v701_v47 }
 0x17f   : > { %1272 = vst [vmem:[#allocation2 + $0x13c] sm:$0xf] %v6402_v45  ;;  %v6433_v7 = vpack.c.bf16 %v744_v44, %v744_v44  ;;  %v6438_v6 = vmul.f32 %v6084_v26, %v6334_v63  ;;  %v6442_v40 = vmul.f32 %v6086_v27, %v6334_v63  ;;  %v6444_v42 = vpack.c.bf16 %v745_v48, %v745_v48  ;;  %v1232_v48 = vld [vmem:[#allocation2 + $0x138] sm:$0xf]  ;;  %v1244_v44 = vld [vmem:[#allocation2 + $0x180] sm:$0xf] }
 0x180   : > { %1273 = vst [vmem:[#allocation2 + $0x148] sm:$0xf] %v6410_v46  ;;  %v6449_v8 = vmul.f32 %v6095_v33, %v6334_v63  ;;  %v6453_v18 = vmul.f32 %v6097_v34, %v6334_v63  ;;  %v6455_v43 = vpack.c.bf16 %v732_v24, %v732_v24  ;;  %v6457_v26 = vpack.c.bf16 %v746_v56, %v746_v56 }
 0x181   : > { %1274 = vst [vmem:[#allocation2 + $0x154] sm:$0xf] %v6416_v55  ;;  %v6460_v27 = vpack.c.bf16 %v730_v54, %v730_v54  ;;  %v6462_v19 = vpack.c.bf16 %v731_v1, %v731_v1  ;;  %v6464_v22 = vpack.c.bf16 %v733_v58, %v733_v58  ;;  %v6466_v59 = vpack.c.bf16 %v734_v2, %v734_v2  ;;  %v1236_v54 = vld [vmem:[#allocation2 + $0x150] sm:$0xf]  ;;  %v1240_v2 = vld [vmem:[#allocation2 + $0x168] sm:$0xf] }
 0x182   : > { %8290 = vst [vmem:[#allocation5_spill] sm:$0xff] %v6449_v8  ;;  %v6469_v33 = vpack.c.bf16 %v735_v4, %v735_v4  ;;  %v6471_v34 = vpack.c.bf16 %v736_v5, %v736_v5  ;;  %v8234_v61 = vshrl.u32 %v6402_v45, 16  ;;  %v8243_v9 = vshrl.u32 %v6455_v43, 16  ;;  %2043 = vmatpush.bf16.msrb.mxu0 %v5670_v25  ;;  %5926 = vmatpush.bf16.msrb.mxu2 %v5670_v25  ;;  %v4721_v8 = vld [vmem:[#allocation2 + $0xb4] sm:$0xf0] }
 0x183   : > { %8291 = vst [vmem:[#allocation6_spill] sm:$0xff] %v6453_v18  ;;  %v8242_v32 = vshll.u32 %v6455_v43, 16  ;;  %v8232_v52 = vshrl.u32 %v6416_v55, 16  ;;  %v8233_v47 = vshll.u32 %v6402_v45, 16  ;;  %v8236_v1 = vshll.u32 %v6416_v55, 16 }
 0x184   : > { %1275 = vst [vmem:[#allocation2 + $0x160] sm:$0xf] %v6422_v57  ;;  %v6489_v14 = vrot.slane %v8234_v61, 7  ;;  %v8235_v58 = vshrl.u32 %v6428_v3, 16  ;;  %v8237_v25 = vshrl.u32 %v6433_v7, 16  ;;  %v8239_v49 = vshll.u32 %v6428_v3, 16 }
 0x185   : > { %8292 = vst [vmem:[#allocation7_spill] sm:$0xff] %v6464_v22  ;;  %v6505_v56 = vrot.slane %v8232_v52, 7  ;;  %v8238_v29 = vshrl.u32 %v6444_v42, 16  ;;  %v8240_v52 = vshll.u32 %v6433_v7, 16  ;;  %v8241_v61 = vshrl.u32 %v6457_v26, 16 }
 0x186   : > { %1276 = vst [vmem:[#allocation2 + $0x16c] sm:$0xf] %v6428_v3  ;;  %v1091_v5 = vor.u32 %v8233_v47, %v6489_v14  ;;  %v1120_v28 = vrot.slane %v8235_v58, 7  ;;  %v1128_v60 = vrot.slane %v8237_v25, 7  ;;  %v8245_v47 = vshll.u32 %v6444_v42, 16  ;;  %v5762_v58 = vld [vmem:[%s8226_s5 + $0x160] sm:$0xff] }
 0x187   : > { %8293 = vst [vmem:[#allocation8_spill] sm:$0xff] %v6469_v33  ;;  %v1107_v50 = vor.u32 %v8236_v1, %v6505_v56  ;;  %v1136_v25 = vrot.slane %v8238_v29, 7  ;;  %v8244_v24 = vshll.u32 %v6457_v26, 16  ;;  %v1144_v38 = vrot.slane %v8241_v61, 7  ;;  %v5643_v18 = vld [vmem:[#allocation2 + $0xac] sm:$0xf] }
 0x188   : > { %1277 = vst [vmem:[#allocation2 + $0x178] sm:$0xf] %v6433_v7  ;;  %v1123_v1 = vor.u32 %v8239_v49, %v1120_v28  ;;  %v1124_v4 = vrot.slane %v1120_v28, 4  ;;  %v1131_v31 = vor.u32 %v8240_v52, %v1128_v60  ;;  %v1233_v53 = vsel %vm6519_vm13, %v1091_v5, %v1232_v48 }
 0x189   : > { %1278 = vst [vmem:[#allocation2 + $0x184] sm:$0xf] %v6444_v42  ;;  %v1237_v28 = vsel %vm6519_vm13, %v1107_v50, %v1236_v54  ;;  %v8246_v29 = vshll.u32 %v6398_v23, 16  ;;  %v8248_v49 = vshrl.u32 %v6400_v39, 16  ;;  %v1139_v37 = vor.u32 %v8245_v47, %v1136_v25 }
 0x18a   : > { %1279 = vst [vmem:[#allocation2 + $0x190] sm:$0xf] %v6457_v26  ;;  %v1140_v36 = vrot.slane %v1136_v25, 4  ;;  %v8247_v60 = vshll.u32 %v6400_v39, 16  ;;  %v1132_v61 = vsel %vm6539_vm14, %v1124_v4, %v1131_v31  ;;  %v1147_v48 = vor.u32 %v8244_v24, %v1144_v38 }
 0x18b   : > { %1263 = vst [vmem:[#allocation2 + $0xd0] sm:$0xf] %v6460_v27  ;;  %v8251_v50 = vshll.u32 %v6410_v46, 16  ;;  %v1241_v5 = vsel %vm6519_vm13, %v1123_v1, %v1240_v2  ;;  %v6577_v38 = vrot.slane %v8242_v32, 5  ;;  %v6581_v4 = vrot.slane %v8243_v9, 4 }
 0x18c   : > { %1264 = vst [vmem:[#allocation2 + $0xdc] sm:$0xf] %v6462_v19  ;;  %v1148_v31 = vsel %vm6539_vm14, %v1140_v36, %v1147_v48  ;;  %v8300_v25 = vshrl.u32 %v6464_v22, 16  ;;  %v8304_v36 = vshll.u32 %v6466_v59, 16  ;;  %v8306_v2 = vshrl.u32 %v6466_v59, 16 }
 0x18d   : > { %1265 = vst [vmem:[#allocation2 + $0xe8] sm:$0xf] %v6455_v43  ;;  %v8308_v48 = vshrl.u32 %v6469_v33, 16  ;;  %v8321_v54 = vshrl.u32 %v6402_v45, 16  ;;  %v8344_v41 = vshll.u32 %v6444_v42, 16 }
 0x18e   : > { %1266 = vst [vmem:[#allocation2 + $0xf4] sm:$0xf] %v6464_v22  ;;  %v6585_v1 = vrot.slane %v8300_v25, 4  ;;  %v8316_v25 = vshrl.u32 %v6398_v23, 16 }
 0x18f   : > { %1267 = vst [vmem:[#allocation2 + $0x100] sm:$0xf] %v6466_v59 }
 0x190   : > { %1268 = vst [vmem:[#allocation2 + $0x10c] sm:$0xf] %v6469_v33  ;;  %v6623_v47 = vrot.slane %v8316_v25, 4  ;;  %v8326_v25 = vshrl.u32 %v6464_v22, 16 }
 0x191   : > { %1269 = vst [vmem:[#allocation2 + $0x118] sm:$0xf] %v6471_v34 }
 0x192   : > { %1234 = vst [vmem:[#allocation2 + $0x138] sm:$0xf] %v1233_v53  ;;  %v1245_v53 = vsel %vm6519_vm13, %v1139_v37, %v1244_v44  ;;  %v6593_v44 = vrot.slane %v8304_v36, 5  ;;  %v8314_v36 = vshrl.u32 %v6471_v34, 16 }
 0x193   : > { %1238 = vst [vmem:[#allocation2 + $0x150] sm:$0xf] %v1237_v28  ;;  %v6597_v28 = vrot.slane %v8306_v2, 4  ;;  %v6636_v2 = vrot.slane %v8247_v60, 5  ;;  %v8323_v60 = vshll.u32 %v6402_v45, 16 }
 0x194   : > { %1243 = vst [vmem:[#allocation2 + $0x174] sm:$0xf] %v1132_v61  ;;  %v8302_v61 = vshll.u32 %v6464_v22, 16  ;;  %v6615_v24 = vrot.slane %v8314_v36, 4  ;;  %v1509_v45 = vld [vmem:[#allocation2 + $0x14c] sm:$0xf] }
 0x195   : > { %1246 = vst [vmem:[#allocation2 + $0x180] sm:$0xf] %v1245_v53  ;;  %v6601_v53 = vrot.slane %v8308_v48, 4  ;;  %v6653_v52 = vrot.slane %v8323_v60, 5  ;;  %v6657_v48 = vrot.slane %v8251_v50, 5  ;;  %v8329_v50 = vshll.u32 %v6416_v55, 16 }
 0x196   : > { %8298 = vst [vmem:[#allocation9_spill] sm:$0xff] %v6577_v38  ;;  %v6589_v37 = vrot.slane %v8302_v61, 5  ;;  %v8312_v61 = vshll.u32 %v6471_v34, 16  ;;  %v8333_v38 = vshrl.u32 %v6428_v3, 16  ;;  %v8334_v60 = vshll.u32 %v6428_v3, 16 }
 0x197   : > { %8299 = vst [vmem:[#allocation10_spill] sm:$0xff] %v6581_v4  ;;  %v1401_v4 = vrot.slane %v8329_v50, 5  ;;  %v5622_v50 = vld [vmem:[#allocation2 + $0x4] sm:$0xf] }
 0x198   : > { %8301 = vst [vmem:[#allocation11_spill] sm:$0xff] %v6585_v1  ;;  %v6611_v9 = vrot.slane %v8312_v61, 5  ;;  %v6647_v61 = vrot.slane %v8321_v54, 4  ;;  %v8331_v1 = vshrl.u32 %v6422_v57, 16  ;;  %v1513_v54 = vld [vmem:[#allocation2 + $0x164] sm:$0xf] }
 0x199   : > { %1247 = vst [vmem:[#allocation2 + $0x18c] sm:$0xf] %v1148_v31  ;;  %v8310_v31 = vshll.u32 %v6469_v33, 16 }
 0x19a   : > { %8303 = vst [vmem:[#allocation12_spill] sm:$0xff] %v6589_v37  ;;  %v1406_v37 = vrot.slane %v8331_v1, 4  ;;  %v8337_v1 = vshrl.u32 %v6469_v33, 16 }
 0x19b   : > { %8305 = vst [vmem:[#allocation13_spill] sm:$0xff] %v6593_v44  ;;  %v6607_v32 = vrot.slane %v8310_v31, 5  ;;  %v6627_v31 = vrot.slane %v8246_v29, 5  ;;  %v6643_v29 = vrot.slane %v8248_v49, 4  ;;  %v6661_v49 = vrot.slane %v8326_v25, 7 }
 0x19c   : > { %8307 = vst [vmem:[#allocation14_spill] sm:$0xff] %v6597_v28  ;;  %v8330_v44 = vshll.u32 %v6422_v57, 16 }
 0x19d   : > { %8309 = vst [vmem:[#allocation15_spill] sm:$0xff] %v6601_v53 }
 0x19e   : > { %8311 = vst [vmem:[#allocation16_spill] sm:$0xff] %v6607_v32  ;;  %v1404_v25 = vrot.slane %v8330_v44, 5 }
 0x19f   : > { %8313 = vst [vmem:[#allocation17_spill] sm:$0xff] %v6611_v9  ;;  %v4635_v9 = vld [vmem:[#allocation2] sm:$0xf] }
 0x1a0   : > { %8315 = vst [vmem:[#allocation18_spill] sm:$0xff] %v6615_v24  ;;  %v8327_v24 = vshrl.u32 %v6410_v46, 16 }
 0x1a1   : > { %1242 = vst [vmem:[#allocation2 + $0x168] sm:$0xf] %v1241_v5  ;;  %v8328_v5 = vshrl.u32 %v6416_v55, 16  ;;  %v1410_v55 = vrot.slane %v8334_v60, 5 }
 0x1a2   : > { %8317 = vst [vmem:[#allocation19_spill] sm:$0xff] %v6623_v47  ;;  %v1397_v36 = vrot.slane %v8327_v24, 4 }
 0x1a3   : > { %8318 = vst [vmem:[#allocation20_spill] sm:$0xff] %v6627_v31  ;;  %v1400_v28 = vrot.slane %v8328_v5, 4  ;;  %v8342_v31 = vshrl.u32 %v6433_v7, 16 }
 0x1a4   : > { %8319 = vst [vmem:[#allocation21_spill] sm:$0xff] %v6636_v2  ;;  %v1398_v5 = vor.u32 %v1397_v36, %v6657_v48  ;;  %v1409_v2 = vrot.slane %v8333_v38, 4  ;;  %v8339_v36 = vshll.u32 %v6433_v7, 16  ;;  %v4637_v38 = vld [vmem:[#allocation2 + $0xc] sm:$0xf0] }
 0x1a5   : > { %8320 = vst [vmem:[#allocation22_spill] sm:$0xff] %v6643_v29  ;;  %v8332_v29 = vshrl.u32 %v6466_v59, 16  ;;  %v1415_v53 = vrot.slane %v8342_v31, 4  ;;  %v5623_v31 = vld [vmem:[#allocation2 + $0x8] sm:$0xf0] }
 0x1a6   : > { %8322 = vst [vmem:[#allocation23_spill] sm:$0xff] %v6647_v61  ;;  %v6694_v61 = vrot.slane %v8337_v1, 7  ;;  %v1399_v60 = vrot.slane %v1398_v5, 4  ;;  %v1411_v47 = vor.u32 %v1410_v55, %v1409_v2  ;;  %v8343_v1 = vshrl.u32 %v6444_v42, 16 }
 0x1a7   : > { %8324 = vst [vmem:[#allocation24_spill] sm:$0xff] %v6653_v52  ;;  %v6679_v24 = vrot.slane %v8332_v29, 7  ;;  %v1402_v29 = vor.u32 %v1401_v4, %v1400_v28  ;;  %v1407_v52 = vor.u32 %v1406_v37, %v1404_v25  ;;  %v5757_v37 = vld [vmem:[%s8226_s5 + $0x138] sm:$0xff]  ;;  %v1419_v5 = vrot.slane %v8344_v41, 5 }
 0x1a8   : > { %8325 = vst [vmem:[#allocation25_spill] sm:$0xff] %v6657_v48  ;;  %v1413_v48 = vrot.slane %v8339_v36, 5  ;;  %v1418_v4 = vrot.slane %v8343_v1, 4  ;;  %v5765_v28 = vld [vmem:[%s8226_s5 + $0x178] sm:$0xff]  ;;  %v8345_v2 = vshll.u32 %v6457_v26, 16  ;;  %v1412_v55 = vrot.slane %v1411_v47, 4  ;;  %2969 = vmatpush.bf16.msra.mxu2 %v5757_v37 }
 0x1a9   : > { %8338 = vst [vmem:[#allocation26_spill] sm:$0xff] %v6694_v61  ;;  %v1403_v36 = vrot.slane %v1402_v29, 4  ;;  %v1408_v32 = vrot.slane %v1407_v52, 4  ;;  %v8346_v1 = vshrl.u32 %v6457_v26, 16  ;;  %v1510_v22 = vsel %vm6688_vm1, %v1399_v60, %v1509_v45  ;;  %3058 = vmatpush.bf16.msra.mxu3 %v5765_v28  ;;  %v1517_v52 = vld [vmem:[#allocation2 + $0x17c] sm:$0xf] }
 0x1aa   : > { %v1422_v7 = vrot.slane %v8345_v2, 5  ;;  %v1416_v33 = vor.u32 %v1415_v53, %v1413_v48  ;;  %v1420_v42 = vor.u32 %v1419_v5, %v1418_v4  ;;  %1511 = vst [vmem:[#allocation2 + $0x14c] sm:$0xf] %v1510_v22  ;;  %v4640_v47 = vor.u32 %v5622_v50, %v4637_v38  ;;  %v792_v53 = vld [vmem:[#allocation2 + $0x18] sm:$0x1] }
 0x1ab   : > { %v1424_v61 = vrot.slane %v8346_v1, 4  ;;  %v1405_v41 = vsel %vm6700_vm3, %v1403_v36, %v1404_v25  ;;  %v1514_v29 = vsel %vm6688_vm1, %v1408_v32, %v1513_v54  ;;  %v1414_v26 = vsel %vm6700_vm3, %v1412_v55, %v1413_v48  ;;  %v1521_v37 = vld [vmem:[#allocation2 + $0x194] sm:$0xf] }
 0x1ac   : > { %v1417_v2 = vrot.slane %v1416_v33, 4  ;;  %1512 = vst [vmem:[#allocation2 + $0x158] sm:$0xf] %v1405_v41  ;;  %v4636_v60 = vor.u32 %v5623_v31, %v4635_v9  ;;  %v1421_v28 = vrot.slane %v1420_v42, 4  ;;  %2133 = vmatmul.bf16.vlgmr.msrb.gmra.mxu1 %v4640_v47  ;;  %v680_v25 = vmul.f32 %v6052_v10, %v6334_v63 }
 0x1ad   : > { %v1425_v45 = vor.u32 %v1424_v61, %v1422_v7  ;;  %1516 = vst [vmem:[#allocation2 + $0x170] sm:$0xf] %v1414_v26  ;;  %v681_v32 = vmul.f32 %v6054_v11, %v6334_v63  ;;  %v4724_v22 = vor.u32 %v5643_v18, %v4721_v8  ;;  %v8347_v54 = vshrl.u32 %v6398_v23, 16  ;;  %v810_v18 = vld [vmem:[#allocation2 + $0xa8] sm:$0x1] }
 0x1ae   : > { %v1518_v33 = vsel %vm6688_vm1, %v1417_v2, %v1517_v52  ;;  %1515 = vst [vmem:[#allocation2 + $0x164] sm:$0xf] %v1514_v29  ;;  %2044 = vmatmul.bf16.vlgmr.msrb.gmra.mxu0 %v4636_v60  ;;  %v793_v9 = vsel %vm6168_vm2, 0, %v792_v53  ;;  %v1423_v10 = vsel %vm6700_vm3, %v1421_v28, %v1422_v7  ;;  %v715_v11 = vadd.f32 %v6336_v0, %v680_v25  ;;  %v795_v29 = vld [vmem:[#allocation2 + $0x30] sm:$0x1] }
 0x1af   : > { %v6734_v50 = vrot.slane %v8347_v54, 7  ;;  %v1426_v48 = vrot.slane %v1425_v45, 4  ;;  %1519 = vst [vmem:[#allocation2 + $0x17c] sm:$0xf] %v1518_v33  ;;  %v716_v8 = vadd.f32 %v6336_v0, %v681_v32  ;;  %2168 = vmatmul.bf16.vlgmr.msrb.gmra.mxu3 %v4724_v22  ;;  %v8348_v61 = vshrl.u32 %v6378_v51, 16 }
 0x1b0   : > { %1520 = vst [vmem:[#allocation2 + $0x188] sm:$0xf] %v1423_v10  ;;  %v8349_v36 = vshrl.u32 %v6380_v30, 16  ;;  %v682_v7 = vmul.f32 %v6056_v12, %v6334_v63  ;;  %v683_v31 = vmul.f32 %v6058_v13, %v6334_v63  ;;  %v8350_v55 = vshrl.u32 %v6400_v39, 16  ;;  %v813_v2 = vld [vmem:[#allocation2 + $0xc0] sm:$0x1] }
 0x1b1   : > { %v992_v38 = vrot.slane %v8348_v61, 7  ;;  %v1522_v4 = vsel %vm6688_vm1, %v1426_v48, %v1521_v37  ;;  %v6758_v52 = vpack.c.bf16 %v715_v11, %v715_v11  ;;  %v6760_v41 = vpack.c.bf16 %v716_v8, %v716_v8  ;;  %794 = vst [vmem:[#allocation2 + $0x18] sm:$0x1] %v793_v9  ;;  %v5646_v10 = vld [vmem:[#allocation2 + $0xc4] sm:$0xf] }
 0x1b2   : > { %v1000_v5 = vrot.slane %v8349_v36, 7  ;;  %v6756_v1 = vrot.slane %v8350_v55, 7  ;;  %1523 = vst [vmem:[#allocation2 + $0x194] sm:$0xf] %v1522_v4  ;;  %v811_v47 = vsel %vm6168_vm2, 0, %v810_v18  ;;  %v8351_v12 = vshll.u32 %v6380_v30, 16 }
 0x1b3   : > { %v996_v42 = vrot.slane %v992_v38, 4  ;;  %v717_v13 = vadd.f32 %v6336_v0, %v682_v7  ;;  %v718_v26 = vadd.f32 %v6336_v0, %v683_v31  ;;  %v897_v45 = vshll.u32 %v6758_v52, 16  ;;  %1248 = vst [vmem:[#allocation2 + $0x1c] sm:$0xf] %v6758_v52  ;;  %v4733_v55 = vld [vmem:[#allocation2 + $0xcc] sm:$0xf0] }
 0x1b4   : > { %v1003_v53 = vor.u32 %v8351_v12, %v1000_v5  ;;  %v894_v60 = vshrl.u32 %v6758_v52, 16  ;;  %v8278_v37 = vshrl.u32 %v6760_v41, 16  ;;  %v8352_v28 = vshll.u32 %v6378_v51, 16  ;;  %1249 = vst [vmem:[#allocation2 + $0x28] sm:$0xf] %v6760_v41 }
 0x1b5   : > { %v905_v32 = vshll.u32 %v6760_v41, 16  ;;  %v6780_v54 = vpack.c.bf16 %v717_v13, %v717_v13  ;;  %v6782_v48 = vpack.c.bf16 %v718_v26, %v718_v26  ;;  %812 = vst [vmem:[#allocation2 + $0xa8] sm:$0x1] %v811_v47  ;;  %v796_v11 = vsel %vm6168_vm2, 0, %v795_v29 }
 0x1b6   : > { %v6774_v25 = vor.u32 %v8352_v28, %v992_v38  ;;  %v1004_v22 = vsel %vm6539_vm14, %v996_v42, %v1003_v53  ;;  %v896_v33 = vrot.slane %v894_v60, 7  ;;  %v904_v9 = vrot.slane %v8278_v37, 7  ;;  %797 = vst [vmem:[#allocation2 + $0x30] sm:$0x1] %v796_v11 }
 0x1b7   : > { %v8353_v8 = vshrl.u32 %v6387_v35, 16  ;;  %1211 = vst [vmem:[#allocation2 + $0xb4] sm:$0xf] %v1004_v22  ;;  %v913_v61 = vshll.u32 %v6780_v54, 16  ;;  %v8277_v38 = vshrl.u32 %v6780_v54, 16  ;;  %v8276_v4 = vshrl.u32 %v6782_v48, 16 }
 0x1b8   : > { %v814_v36 = vsel %vm6168_vm2, 0, %v813_v2  ;;  %v899_v5 = vor.u32 %v897_v45, %v896_v33  ;;  %v900_v7 = vrot.slane %v896_v33, 4  ;;  %v907_v31 = vor.u32 %v905_v32, %v904_v9  ;;  %1250 = vst [vmem:[#allocation2 + $0x34] sm:$0xf] %v6780_v54  ;;  %v1184_v2 = vld [vmem:[#allocation2 + $0x18] sm:$0xf] }
 0x1b9   : > { %v1008_v18 = vrot.slane %v8353_v8, 7  ;;  %v921_v42 = vshll.u32 %v6782_v48, 16  ;;  %1251 = vst [vmem:[#allocation2 + $0x40] sm:$0xf] %v6782_v48  ;;  %v912_v29 = vrot.slane %v8277_v38, 7  ;;  %v920_v47 = vrot.slane %v8276_v4, 7 }
 0x1ba   : > { %v8354_v53 = vshrl.u32 %v6460_v27, 16  ;;  %v908_v26 = vsel %vm6539_vm14, %v900_v7, %v907_v31  ;;  %v8279_v28 = vshll.u32 %v6460_v27, 16  ;;  %v5756_v22 = vld [vmem:[%s8226_s5 + $0x130] sm:$0xff]  ;;  %v684_v33 = vmul.f32 %v6064_v16, %v6334_v63  ;;  %v5625_v8 = vld [vmem:[#allocation2 + $0x1c] sm:$0xf] }
 0x1bb   : > { %v1012_v12 = vrot.slane %v1008_v18, 4  ;;  %v685_v9 = vmul.f32 %v6066_v17, %v6334_v63  ;;  %1187 = vst [vmem:[#allocation2 + $0x24] sm:$0xf] %v908_v26  ;;  %v4736_v7 = vor.u32 %v5646_v10, %v4733_v55  ;;  %v916_v31 = vrot.slane %v912_v29, 4  ;;  %v5764_v4 = vld [vmem:[%s8226_s5 + $0x170] sm:$0xff]  ;;  %2970 = vmatpush.bf16.msra.mxu2 %v5756_v22 }
 0x1bc   : > { %v1016_v13 = vrot.slane %v8354_v53, 7  ;;  %v1185_v53 = vsel %vm6519_vm13, %v899_v5, %v1184_v2  ;;  %v923_v11 = vor.u32 %v921_v42, %v920_v47  ;;  %v8355_v38 = vshrl.u32 %v6471_v34, 16  ;;  %v4649_v37 = vld [vmem:[#allocation2 + $0x24] sm:$0xf0]  ;;  %815 = vst [vmem:[#allocation2 + $0xc0] sm:$0x1] %v814_v36  ;;  %3059 = vmatpush.bf16.msra.mxu3 %v5764_v4 }
 0x1bd   : > { %1186 = vst [vmem:[#allocation2 + $0x18] sm:$0xf] %v1185_v53  ;;  %v719_v10 = vadd.f32 %v6336_v0, %v684_v33  ;;  %v720_v5 = vadd.f32 %v6336_v0, %v685_v9  ;;  %v4652_v55 = vor.u32 %v5625_v8, %v4649_v37  ;;  %v1208_v47 = vld [vmem:[#allocation2 + $0xa8] sm:$0xf]  ;;  %v915_v26 = vor.u32 %v913_v61, %v912_v29  ;;  %v816_v9 = vld [vmem:[#allocation2 + $0xd8] sm:$0x1] }
 0x1be   : > { %v6829_v16 = vrot.slane %v8355_v38, 7  ;;  %v1019_v17 = vor.u32 %v8279_v28, %v1016_v13  ;;  %v924_v2 = vsel %vm6539_vm14, %v916_v31, %v923_v11  ;;  %v798_v38 = vld [vmem:[#allocation2 + $0x48] sm:$0x1]  ;;  %v1209_v13 = vsel %vm6519_vm13, %v6774_v25, %v1208_v47 }
 0x1bf   : > { %1191 = vst [vmem:[#allocation2 + $0x3c] sm:$0xf] %v924_v2  ;;  %v6844_v33 = vpack.c.bf16 %v719_v10, %v719_v10  ;;  %v6846_v37 = vpack.c.bf16 %v720_v5, %v720_v5  ;;  %v1076_v29 = vrot.slane %v6734_v50, 4  ;;  %v8356_v36 = vshll.u32 %v6400_v39, 16  ;;  %2138 = vmatmul.bf16.gmra.mxu1 %v4652_v55  ;;  %2173 = vmatmul.bf16.gmra.mxu3 %v4736_v7  ;;  %v1188_v10 = vld [vmem:[#allocation2 + $0x30] sm:$0xf] }
 0x1c0   : > { %v1020_v22 = vsel %vm6539_vm14, %v1012_v12, %v1019_v17  ;;  %1210 = vst [vmem:[#allocation2 + $0xa8] sm:$0xf] %v1209_v13  ;;  %v8357_v25 = vshrl.u32 %v6462_v19, 16  ;;  %v8358_v53 = vshrl.u32 %v6455_v43, 16  ;;  %v1092_v31 = vrot.slane %v6489_v14, 4 }
 0x1c1   : > { %v6852_v4 = vor.u32 %v8356_v36, %v6756_v1  ;;  %v8359_v11 = vshll.u32 %v6387_v35, 16  ;;  %1215 = vst [vmem:[#allocation2 + $0xcc] sm:$0xf] %v1020_v22  ;;  %v799_v39 = vsel %vm6168_vm2, 0, %v798_v38  ;;  %v8280_v1 = vshrl.u32 %v6844_v33, 16 }
 0x1c2   : > { %v1024_v8 = vrot.slane %v8357_v25, 7  ;;  %v1032_v12 = vrot.slane %v8358_v53, 7  ;;  %1252 = vst [vmem:[#allocation2 + $0x4c] sm:$0xf] %v6844_v33  ;;  %v8281_v5 = vshrl.u32 %v6846_v37, 16  ;;  %v817_v55 = vsel %vm6168_vm2, 0, %v816_v9 }
 0x1c3   : > { %v1011_v17 = vor.u32 %v8359_v11, %v1008_v18  ;;  %v686_v7 = vmul.f32 %v6072_v20, %v6334_v63  ;;  %v687_v18 = vmul.f32 %v6074_v21, %v6334_v63  ;;  %v5626_v47 = vld [vmem:[#allocation2 + $0x20] sm:$0xf0]  ;;  %v5644_v2 = vld [vmem:[#allocation2 + $0xb0] sm:$0xf0]  ;;  %v1189_v38 = vsel %vm6519_vm13, %v915_v26, %v1188_v10  ;;  %1253 = vst [vmem:[#allocation2 + $0x58] sm:$0xf] %v6846_v37 }
 0x1c4   : > { %v928_v13 = vrot.slane %v8280_v1, 7  ;;  %v1028_v22 = vrot.slane %v1024_v8, 4  ;;  %v8360_v36 = vshll.u32 %v6455_v43, 16  ;;  %v4647_v25 = vld [vmem:[#allocation2 + $0x18] sm:$0xf]  ;;  %v936_v20 = vrot.slane %v8281_v5, 7 }
 0x1c5   : > { %1190 = vst [vmem:[#allocation2 + $0x30] sm:$0xf] %v1189_v38  ;;  %v8283_v21 = vshll.u32 %v6846_v37, 16  ;;  %v721_v63 = vadd.f32 %v6336_v0, %v686_v7  ;;  %v722_v26 = vadd.f32 %v6336_v0, %v687_v18  ;;  %v8361_v53 = vshrl.u32 %v6410_v46, 16  ;;  %v1212_v28 = vld [vmem:[#allocation2 + $0xc0] sm:$0xf] }
 0x1c6   : > { %v1035_v9 = vor.u32 %v8360_v36, %v1032_v12  ;;  %v4648_v10 = vor.u32 %v5626_v47, %v4647_v25  ;;  %800 = vst [vmem:[#allocation2 + $0x48] sm:$0x1] %v799_v39  ;;  %v932_v1 = vrot.slane %v928_v13, 4  ;;  %v1213_v12 = vsel %vm6519_vm13, %v1011_v17, %v1212_v28  ;;  %v801_v36 = vld [vmem:[#allocation2 + $0x60] sm:$0x1] }
 0x1c7   : > { %v1096_v11 = vrot.slane %v8361_v53, 7  ;;  %v939_v38 = vor.u32 %v8283_v21, %v936_v20  ;;  %818 = vst [vmem:[#allocation2 + $0xd8] sm:$0x1] %v817_v55  ;;  %v6892_v7 = vpack.c.bf16 %v721_v63, %v721_v63  ;;  %v6894_v18 = vpack.c.bf16 %v722_v26, %v722_v26  ;;  %v819_v53 = vld [vmem:[#allocation2 + $0xf0] sm:$0x1] }
 0x1c8   : > { %v1036_v43 = vsel %vm6539_vm14, %v1028_v22, %v1035_v9  ;;  %v8362_v47 = vshrl.u32 %v6422_v57, 16  ;;  %2049 = vmatmul.bf16.gmra.mxu0 %v4648_v10  ;;  %v4719_v25 = vld [vmem:[#allocation2 + $0xa8] sm:$0xf]  ;;  %v5628_v5 = vld [vmem:[#allocation2 + $0x34] sm:$0xf]  ;;  %v929_v22 = vshll.u32 %v6844_v33, 16  ;;  %v723_v28 = vadd.f32 %v6336_v0, %v6438_v6 }
 0x1c9   : > { %1214 = vst [vmem:[#allocation2 + $0xc0] sm:$0xf] %v1213_v12  ;;  %v724_v17 = vadd.f32 %v6336_v0, %v6442_v40  ;;  %v4720_v55 = vor.u32 %v5644_v2, %v4719_v25  ;;  %v4661_v9 = vld [vmem:[#allocation2 + $0x3c] sm:$0xf0]  ;;  %v940_v20 = vsel %vm6539_vm14, %v932_v1, %v939_v38  ;;  %v8282_v63 = vshrl.u32 %v6892_v7, 16 }
 0x1ca   : > { %v1112_v39 = vrot.slane %v8362_v47, 7  ;;  %1219 = vst [vmem:[#allocation2 + $0xe4] sm:$0xf] %v1036_v43  ;;  %v8363_v26 = vshll.u32 %v6466_v59, 16  ;;  %v931_v12 = vor.u32 %v929_v22, %v928_v13  ;;  %v802_v6 = vsel %vm6168_vm2, 0, %v801_v36  ;;  %v5693_v59 = vld [vmem:[%s8226_s5 + $0xb8] sm:$0xff] }
 0x1cb   : > { %1195 = vst [vmem:[#allocation2 + $0x54] sm:$0xf] %v940_v20  ;;  %v950_v40 = vshrl.u32 %v6894_v18, 16  ;;  %v1044_v2 = vrot.slane %v6661_v49, 4  ;;  %v1108_v1 = vrot.slane %v6505_v56, 4  ;;  %2079 = vmatmul.bf16.vlgmr.msrb.gmra.mxu2 %v4720_v55  ;;  %v8364_v38 = vshll.u32 %v6462_v19, 16  ;;  %2214 = vmatpush.bf16.msra.mxu0 %v5693_v59 }
 0x1cc   : > { %v1051_v10 = vor.u32 %v8363_v26, %v6679_v24  ;;  %v5649_v43 = vld [vmem:[#allocation2 + $0xdc] sm:$0xf]  ;;  %1254 = vst [vmem:[#allocation2 + $0x64] sm:$0xf] %v6892_v7  ;;  %v820_v13 = vsel %vm6168_vm2, 0, %v819_v53  ;;  %v6927_v36 = vpack.c.bf16 %v723_v28, %v723_v28  ;;  %v8365_v56 = vshll.u32 %v6410_v46, 16 }
 0x1cd   : > { %v1027_v47 = vor.u32 %v8364_v38, %v1024_v8  ;;  %v5749_v24 = vld [vmem:[%s8226_s5 + $0xf8] sm:$0xff]  ;;  %v4745_v55 = vld [vmem:[#allocation2 + $0xe4] sm:$0xf0]  ;;  %1255 = vst [vmem:[#allocation2 + $0x70] sm:$0xf] %v6894_v18  ;;  %v944_v20 = vrot.slane %v8282_v63, 7  ;;  %v6937_v26 = vpack.c.bf16 %v724_v17, %v724_v17  ;;  %v6944_v53 = vsel %vm6539_vm14, %v1076_v29, %v6852_v4 }
 0x1ce   : > { %v1099_v25 = vor.u32 %v8365_v56, %v1096_v11  ;;  %v5755_v8 = vld [vmem:[%s8226_s5 + $0x128] sm:$0xff]  ;;  %v8366_v46 = vshll.u32 %v6422_v57, 16  ;;  %v4664_v28 = vor.u32 %v5628_v5, %v4661_v9  ;;  %2880 = vmatpush.bf16.msra.mxu1 %v5749_v24  ;;  %803 = vst [vmem:[#allocation2 + $0x60] sm:$0x1] %v802_v6  ;;  %v952_v56 = vrot.slane %v950_v40, 7 }
 0x1cf   : > { %v1192_v38 = vld [vmem:[#allocation2 + $0x48] sm:$0xf]  ;;  %v953_v17 = vshll.u32 %v6894_v18, 16  ;;  %v1216_v21 = vld [vmem:[#allocation2 + $0xd8] sm:$0xf]  ;;  %2971 = vmatpush.bf16.msra.mxu2 %v5755_v8  ;;  %v945_v29 = vshll.u32 %v6892_v7, 16  ;;  %v1052_v57 = vsel %vm6539_vm14, %v1044_v2, %v1051_v10  ;;  %v4748_v24 = vor.u32 %v5649_v43, %v4745_v55 }
 0x1d0   : > { %v1115_v11 = vor.u32 %v8366_v46, %v1112_v39  ;;  %v1193_v63 = vsel %vm6519_vm13, %v931_v12, %v1192_v38  ;;  %v948_v4 = vrot.slane %v944_v20, 4  ;;  %821 = vst [vmem:[#allocation2 + $0xf0] sm:$0x1] %v820_v13  ;;  %v1217_v5 = vsel %vm6519_vm13, %v1027_v47, %v1216_v21  ;;  %v804_v9 = vld [vmem:[#allocation2 + $0x78] sm:$0x1]  ;;  %2143 = vmatmul.bf16.gmra.mxu1 %v4664_v28  ;;  %v5763_v47 = vld [vmem:[%s8226_s5 + $0x168] sm:$0xff] }
 0x1d1   : > { %1194 = vst [vmem:[#allocation2 + $0x48] sm:$0xf] %v1193_v63  ;;  %v955_v39 = vor.u32 %v953_v17, %v952_v56  ;;  %v958_v6 = vshrl.u32 %v6927_v36, 16  ;;  %v8367_v12 = vld [vmem:[#allocation5_spill] sm:$0xff]  ;;  %v947_v13 = vor.u32 %v945_v29, %v944_v20  ;;  %v966_v10 = vshrl.u32 %v6937_v26, 16  ;;  %v8368_v63 = vld [vmem:[#allocation6_spill] sm:$0xff]  ;;  %2178 = vmatmul.bf16.gmra.mxu3 %v4748_v24 }
 0x1d2   : > { %v725_v59 = vadd.f32 %v6336_v0, %v8367_v12  ;;  %1218 = vst [vmem:[#allocation2 + $0xd8] sm:$0xf] %v1217_v5  ;;  %v726_v2 = vadd.f32 %v6336_v0, %v8368_v63  ;;  %v5629_v21 = vld [vmem:[#allocation2 + $0x38] sm:$0xf0]  ;;  %v822_v55 = vld [vmem:[#allocation2 + $0x108] sm:$0x1]  ;;  %v6979_v20 = vsel %vm6539_vm14, %v1092_v31, %v1099_v25  ;;  %v6983_v0 = vsel %vm6539_vm14, %v1108_v1, %v1115_v11 }
 0x1d3   : > { %v956_v8 = vsel %vm6539_vm14, %v948_v4, %v955_v39  ;;  %1223 = vst [vmem:[#allocation2 + $0xfc] sm:$0xf] %v1052_v57  ;;  %v960_v43 = vrot.slane %v958_v6, 7  ;;  %v8369_v46 = vld [vmem:[#allocation7_spill] sm:$0xff]  ;;  %v805_v56 = vsel %vm6168_vm2, 0, %v804_v9  ;;  %v968_v14 = vrot.slane %v966_v10, 7  ;;  %3060 = vmatpush.bf16.msra.mxu3 %v5763_v47 }
 0x1d4   : > { %v8370_v28 = vshll.u32 %v8369_v46, 16  ;;  %1199 = vst [vmem:[#allocation2 + $0x6c] sm:$0xf] %v956_v8  ;;  %v969_v4 = vshll.u32 %v6937_v26, 16  ;;  %v8371_v31 = vshll.u32 %v6471_v34, 16  ;;  %v8372_v39 = vld [vmem:[#allocation26_spill] sm:$0xff]  ;;  %v7003_v12 = vpack.c.bf16 %v726_v2, %v726_v2 }
 0x1d5   : > { %v4659_v1 = vld [vmem:[#allocation2 + $0x30] sm:$0xf]  ;;  %1256 = vst [vmem:[#allocation2 + $0x7c] sm:$0xf] %v6927_v36  ;;  %v964_v11 = vrot.slane %v960_v43, 4  ;;  %v1060_v9 = vrot.slane %v8372_v39, 4 }
 0x1d6   : > { %v1043_v38 = vor.u32 %v8370_v28, %v6661_v49  ;;  %v1067_v25 = vor.u32 %v8371_v31, %v6829_v16  ;;  %v6997_v49 = vpack.c.bf16 %v725_v59, %v725_v59  ;;  %v1196_v57 = vld [vmem:[#allocation2 + $0x60] sm:$0xf]  ;;  %1257 = vst [vmem:[#allocation2 + $0x88] sm:$0xf] %v6937_v26  ;;  %v971_v5 = vor.u32 %v969_v4, %v968_v14  ;;  %v5647_v24 = vld [vmem:[#allocation2 + $0xc8] sm:$0xf0] }
 0x1d7   : > { %v1197_v34 = vsel %vm6519_vm13, %v947_v13, %v1196_v57  ;;  %v1220_v16 = vld [vmem:[#allocation2 + $0xf0] sm:$0xf]  ;;  %806 = vst [vmem:[#allocation2 + $0x78] sm:$0x1] %v805_v56  ;;  %v4660_v63 = vor.u32 %v5629_v21, %v4659_v1  ;;  %v4731_v47 = vld [vmem:[#allocation2 + $0xc0] sm:$0xf]  ;;  %3061 = vmatpush.bf16.msra.mxu3 %v5762_v58 }
 0x1d8   : > { %1198 = vst [vmem:[#allocation2 + $0x60] sm:$0xf] %v1197_v34  ;;  %v1221_v59 = vsel %vm6519_vm13, %v1043_v38, %v1220_v16  ;;  %v972_v8 = vsel %vm6539_vm14, %v964_v11, %v971_v5  ;;  %v823_v46 = vsel %vm6168_vm2, 0, %v822_v55  ;;  %v961_v2 = vshll.u32 %v6927_v36, 16  ;;  %v807_v28 = vld [vmem:[#allocation2 + $0x90] sm:$0x1] }
 0x1d9   : > { %1222 = vst [vmem:[#allocation2 + $0xf0] sm:$0xf] %v1221_v59  ;;  %v1068_v13 = vsel %vm6539_vm14, %v1060_v9, %v1067_v25  ;;  %v974_v21 = vshrl.u32 %v6997_v49, 16  ;;  %2054 = vmatmul.bf16.gmra.mxu0 %v4660_v63  ;;  %v982_v56 = vshrl.u32 %v7003_v12, 16  ;;  %v4732_v38 = vor.u32 %v5647_v24, %v4731_v47  ;;  %v5631_v31 = vld [vmem:[#allocation2 + $0x4c] sm:$0xf] }
 0x1da   : > { %1203 = vst [vmem:[#allocation2 + $0x84] sm:$0xf] %v972_v8  ;;  %v963_v14 = vor.u32 %v961_v2, %v960_v43  ;;  %v808_v25 = vsel %vm6168_vm2, 0, %v807_v28  ;;  %v8284_v11 = vshll.u32 %v7003_v12, 16  ;;  %v5652_v57 = vld [vmem:[#allocation2 + $0xf4] sm:$0xf] }
 0x1db   : > { %824 = vst [vmem:[#allocation2 + $0x108] sm:$0x1] %v823_v46  ;;  %v976_v55 = vrot.slane %v974_v21, 7  ;;  %v984_v1 = vrot.slane %v982_v56, 7  ;;  %2084 = vmatmul.bf16.gmra.mxu2 %v4732_v38  ;;  %v5692_v43 = vld [vmem:[%s8226_s5 + $0xb0] sm:$0xff]  ;;  %v5754_v9 = vld [vmem:[%s8226_s5 + $0x120] sm:$0xff] }
 0x1dc   : > { %1227 = vst [vmem:[#allocation2 + $0x114] sm:$0xf] %v1068_v13  ;;  %v5748_v5 = vld [vmem:[%s8226_s5 + $0xf0] sm:$0xff]  ;;  %v4673_v34 = vld [vmem:[#allocation2 + $0x54] sm:$0xf0]  ;;  %2215 = vmatpush.bf16.msra.mxu0 %v5692_v43  ;;  %2972 = vmatpush.bf16.msra.mxu2 %v5754_v9  ;;  %v8375_v52 = vshll.u32 %v6398_v23, 16 }
 0x1dd   : > { %1258 = vst [vmem:[#allocation2 + $0x94] sm:$0xf] %v6997_v49  ;;  %v980_v24 = vrot.slane %v976_v55, 4  ;;  %v987_v63 = vor.u32 %v8284_v11, %v984_v1  ;;  %v8373_v47 = vld [vmem:[#allocation8_spill] sm:$0xff]  ;;  %v4757_v46 = vld [vmem:[#allocation2 + $0xfc] sm:$0xf0]  ;;  %2881 = vmatpush.bf16.msra.mxu1 %v5748_v5  ;;  %v4676_v11 = vor.u32 %v5631_v31, %v4673_v34 }
 0x1de   : > { %v1200_v16 = vld [vmem:[#allocation2 + $0x78] sm:$0xf]  ;;  %1259 = vst [vmem:[#allocation2 + $0xa0] sm:$0xf] %v7003_v12  ;;  %v8374_v59 = vshll.u32 %v8373_v47, 16  ;;  %v977_v47 = vshll.u32 %v6997_v49, 16 }
 0x1df   : > { %v1201_v13 = vsel %vm6519_vm13, %v963_v14, %v1200_v16  ;;  %809 = vst [vmem:[#allocation2 + $0x90] sm:$0x1] %v808_v25  ;;  %v825_v28 = vld [vmem:[#allocation2 + $0x120] sm:$0x1]  ;;  %v988_v38 = vsel %vm6539_vm14, %v980_v24, %v987_v63  ;;  %v1283_v14 = vrot.slane %v894_v60, 4  ;;  %v1284_v25 = vrot.slane %v897_v45, 5 }
 0x1e0   : > { %v1059_v8 = vor.u32 %v8374_v59, %v8372_v39  ;;  %1202 = vst [vmem:[#allocation2 + $0x78] sm:$0xf] %v1201_v13  ;;  %v826_v1 = vsel %vm6168_vm2, 0, %v825_v28  ;;  %v4760_v39 = vor.u32 %v5652_v57, %v4757_v46  ;;  %2148 = vmatmul.bf16.gmra.mxu1 %v4676_v11  ;;  %v979_v31 = vor.u32 %v977_v47, %v976_v55  ;;  %v4671_v57 = vld [vmem:[#allocation2 + $0x48] sm:$0xf] }
 0x1e1   : > { %1207 = vst [vmem:[#allocation2 + $0x9c] sm:$0xf] %v988_v38  ;;  %v5632_v60 = vld [vmem:[#allocation2 + $0x50] sm:$0xf0]  ;;  %v1075_v45 = vor.u32 %v8375_v52, %v6734_v50  ;;  %v1285_v5 = vor.u32 %v1284_v25, %v1283_v14  ;;  %v4743_v55 = vld [vmem:[#allocation2 + $0xd8] sm:$0xf]  ;;  %2216 = vmatpush.bf16.msra.mxu0 %v5691_v62 }
 0x1e2   : > { %v1224_v43 = vld [vmem:[#allocation2 + $0x108] sm:$0xf]  ;;  %827 = vst [vmem:[#allocation2 + $0x120] sm:$0x1] %v826_v1  ;;  %2183 = vmatmul.bf16.gmra.mxu3 %v4760_v39  ;;  %v4672_v24 = vor.u32 %v5632_v60, %v4671_v57  ;;  %v5650_v34 = vld [vmem:[#allocation2 + $0xe0] sm:$0xf0] }
 0x1e3   : > { %v1225_v15 = vsel %vm6519_vm13, %v1059_v8, %v1224_v43  ;;  %1231 = vst [vmem:[#allocation2 + $0x12c] sm:$0xf] %v6944_v53  ;;  %v1287_v16 = vrot.slane %v905_v32, 5  ;;  %v843_v50 = vld [vmem:[#allocation2 + $0x2c] sm:$0x8]  ;;  %v8376_v63 = vshrl.u32 %v6760_v41, 16  ;;  %v4744_v8 = vor.u32 %v5650_v34, %v4743_v55 }
 0x1e4   : > { %1226 = vst [vmem:[#allocation2 + $0x108] sm:$0xf] %v1225_v15  ;;  %v844_v13 = vsel %vm6191_vm5, 0, %v843_v50  ;;  %v8378_v28 = vshrl.u32 %v6780_v54, 16  ;;  %v5747_v41 = vld [vmem:[%s8226_s5 + $0xe8] sm:$0xff]  ;;  %v1293_v1 = vrot.slane %v913_v61, 5 }
 0x1e5   : > { %1235 = vst [vmem:[#allocation2 + $0x144] sm:$0xf] %v6979_v20  ;;  %v1286_v20 = vrot.slane %v1285_v5, 4  ;;  %v1289_v59 = vrot.slane %v8376_v63, 4  ;;  %v5634_v39 = vld [vmem:[#allocation2 + $0x64] sm:$0xf]  ;;  %2882 = vmatpush.bf16.msra.mxu1 %v5747_v41 }
 0x1e6   : > { %v1204_v11 = vld [vmem:[#allocation2 + $0x90] sm:$0xf]  ;;  %1239 = vst [vmem:[#allocation2 + $0x15c] sm:$0xf] %v6983_v0  ;;  %v1292_v0 = vrot.slane %v8378_v28, 4  ;;  %v5753_v14 = vld [vmem:[%s8226_s5 + $0x118] sm:$0xff] }
 0x1e7   : > { %v1205_v9 = vsel %vm6519_vm13, %v979_v31, %v1204_v11  ;;  %845 = vst [vmem:[#allocation2 + $0x2c] sm:$0x8] %v844_v13  ;;  %v1288_v32 = vsel %vm6700_vm3, %v1286_v20, %v1287_v16  ;;  %v1290_v38 = vor.u32 %v1289_v59, %v1287_v16  ;;  %v4685_v43 = vld [vmem:[#allocation2 + $0x6c] sm:$0xf0]  ;;  %v5655_v25 = vld [vmem:[#allocation2 + $0x10c] sm:$0xf]  ;;  %2973 = vmatpush.bf16.msra.mxu2 %v5753_v14 }
 0x1e8   : > { %1206 = vst [vmem:[#allocation2 + $0x90] sm:$0xf] %v1205_v9  ;;  %v4769_v58 = vld [vmem:[#allocation2 + $0x114] sm:$0xf0]  ;;  %v1294_v15 = vor.u32 %v1293_v1, %v1292_v0  ;;  %v8379_v31 = vshrl.u32 %v6387_v35, 16  ;;  %v5746_v54 = vld [vmem:[%s8226_s5 + $0xe0] sm:$0xff]  ;;  %v4688_v60 = vor.u32 %v5634_v39, %v4685_v43 }
 0x1e9   : > { %v1228_v53 = vld [vmem:[#allocation2 + $0x120] sm:$0xf]  ;;  %2059 = vmatmul.bf16.gmra.mxu0 %v4672_v24  ;;  %1459 = vst [vmem:[#allocation2 + $0x20] sm:$0xf] %v1288_v32  ;;  %v846_v61 = vld [vmem:[#allocation2 + $0x44] sm:$0x8]  ;;  %v4772_v24 = vor.u32 %v5655_v25, %v4769_v58  ;;  %2883 = vmatpush.bf16.msra.mxu1 %v5746_v54 }
 0x1ea   : > { %v1229_v23 = vsel %vm6519_vm13, %v1075_v45, %v1228_v53  ;;  %v7094_v57 = vrot.slane %v8379_v31, 4  ;;  %v1291_v52 = vrot.slane %v1290_v38, 4  ;;  %v847_v45 = vsel %vm6191_vm5, 0, %v846_v61  ;;  %v5635_v16 = vld [vmem:[#allocation2 + $0x68] sm:$0xf0] }
 0x1eb   : > { %1230 = vst [vmem:[#allocation2 + $0x120] sm:$0xf] %v1229_v23  ;;  %2089 = vmatmul.bf16.gmra.mxu2 %v4744_v8  ;;  %v1295_v11 = vrot.slane %v1294_v15, 4  ;;  %v8380_v5 = vshll.u32 %v6387_v35, 16  ;;  %v1296_v55 = vrot.slane %v921_v42, 5  ;;  %v8381_v34 = vshrl.u32 %v6782_v48, 16 }
 0x1ec   : > { %848 = vst [vmem:[#allocation2 + $0x44] sm:$0x8] %v847_v45  ;;  %v5690_v23 = vld [vmem:[%s8226_s5 + $0xa0] sm:$0xff]  ;;  %v8382_v50 = vshrl.u32 %v6844_v33, 16  ;;  %v1302_v35 = vrot.slane %v929_v22, 5  ;;  %v5745_v42 = vld [vmem:[%s8226_s5 + $0xd8] sm:$0xff] }
 0x1ed   : > { %v7103_v9 = vrot.slane %v8380_v5, 5  ;;  %v1298_v53 = vrot.slane %v8381_v34, 4  ;;  %v5761_v48 = vld [vmem:[%s8226_s5 + $0x158] sm:$0xff]  ;;  %v1297_v59 = vsel %vm6700_vm3, %v1295_v11, %v1296_v55  ;;  %v8383_v13 = vshll.u32 %v6846_v37, 16  ;;  %v4683_v0 = vld [vmem:[#allocation2 + $0x60] sm:$0xf]  ;;  %2217 = vmatpush.bf16.msra.mxu0 %v5690_v23  ;;  %2884 = vmatpush.bf16.msra.mxu1 %v5745_v42 }
 0x1ee   : > { %v1301_v20 = vrot.slane %v8382_v50, 4  ;;  %v1461_v63 = vld [vmem:[#allocation2 + $0x2c] sm:$0xf]  ;;  %v8384_v33 = vshrl.u32 %v6846_v37, 16  ;;  %1464 = vst [vmem:[#allocation2 + $0x38] sm:$0xf] %v1297_v59  ;;  %3062 = vmatpush.bf16.msra.mxu3 %v5761_v48  ;;  %v4684_v61 = vor.u32 %v5635_v16, %v4683_v0 }
 0x1ef   : > { %v1299_v8 = vor.u32 %v1298_v53, %v1296_v55  ;;  %v1305_v28 = vrot.slane %v8383_v13, 5  ;;  %v1462_v32 = vsel %vm6688_vm1, %v1291_v52, %v1461_v63  ;;  %v849_v62 = vld [vmem:[#allocation2 + $0x5c] sm:$0x8]  ;;  %v8385_v38 = vshrl.u32 %v6462_v19, 16  ;;  %v5744_v45 = vld [vmem:[%s8226_s5 + $0xd0] sm:$0xff]  ;;  %v5742_v0 = vld [vmem:[%s8226_s5 + $0xc0] sm:$0xff] }
 0x1f0   : > { %2153 = vmatmul.bf16.gmra.mxu1 %v4688_v60  ;;  %v1307_v22 = vrot.slane %v8384_v33, 4  ;;  %v1303_v41 = vor.u32 %v1302_v35, %v1301_v20  ;;  %1463 = vst [vmem:[#allocation2 + $0x2c] sm:$0xf] %v1462_v32  ;;  %v850_v43 = vsel %vm6191_vm5, 0, %v849_v62  ;;  %v1348_v37 = vor.u32 %v7103_v9, %v7094_v57  ;;  %v4755_v60 = vld [vmem:[#allocation2 + $0xf0] sm:$0xf] }
 0x1f1   : > { %v7132_v1 = vrot.slane %v8385_v38, 4  ;;  %v1300_v39 = vrot.slane %v1299_v8, 4  ;;  %v8386_v14 = vshll.u32 %v6462_v19, 16  ;;  %v1316_v58 = vrot.slane %v950_v40, 4  ;;  %851 = vst [vmem:[#allocation2 + $0x5c] sm:$0x8] %v850_v43  ;;  %2885 = vmatpush.bf16.msra.mxu1 %v5744_v45 }
 0x1f2   : > { %2188 = vmatmul.bf16.gmra.mxu3 %v4772_v24  ;;  %v1304_v15 = vrot.slane %v1303_v41, 4  ;;  %v8387_v31 = vshrl.u32 %v6892_v7, 16  ;;  %v5653_v52 = vld [vmem:[#allocation2 + $0xf8] sm:$0xf0]  ;;  %v1308_v11 = vor.u32 %v1307_v22, %v1305_v28  ;;  %v1311_v19 = vrot.slane %v945_v29, 5  ;;  %v5743_v35 = vld [vmem:[%s8226_s5 + $0xc8] sm:$0xff] }
 0x1f3   : > { %v7140_v25 = vrot.slane %v8386_v14, 5  ;;  %v1465_v5 = vld [vmem:[#allocation2 + $0x44] sm:$0xf]  ;;  %v852_v24 = vld [vmem:[#allocation2 + $0x74] sm:$0x8]  ;;  %v1314_v55 = vrot.slane %v953_v17, 5  ;;  %v4756_v23 = vor.u32 %v5653_v52, %v4755_v60 }
 0x1f4   : > { %v1310_v54 = vrot.slane %v8387_v31, 4  ;;  %v1306_v40 = vsel %vm6700_vm3, %v1304_v15, %v1305_v28  ;;  %v1319_v34 = vrot.slane %v958_v6, 4  ;;  %v1466_v53 = vsel %vm6688_vm1, %v1300_v39, %v1465_v5  ;;  %v5658_v6 = vld [vmem:[#allocation2 + $0x124] sm:$0xf]  ;;  %v5689_v20 = vld [vmem:[%s8226_s5 + $0x98] sm:$0xff]  ;;  %v5688_v13 = vld [vmem:[%s8226_s5 + $0x90] sm:$0xff] }
 0x1f5   : > { %1468 = vst [vmem:[#allocation2 + $0x50] sm:$0xf] %v1306_v40  ;;  %v853_v7 = vsel %vm6191_vm5, 0, %v852_v24  ;;  %v1320_v16 = vrot.slane %v961_v2, 5  ;;  %v1309_v18 = vrot.slane %v1308_v11, 4  ;;  %v1317_v17 = vor.u32 %v1316_v58, %v1314_v55  ;;  %2218 = vmatpush.bf16.msra.mxu0 %v5689_v20  ;;  %2886 = vmatpush.bf16.msra.mxu1 %v5743_v35  ;;  %v5752_v43 = vld [vmem:[%s8226_s5 + $0x110] sm:$0xff] }
 0x1f6   : > { %v1312_v29 = vor.u32 %v1311_v19, %v1310_v54  ;;  %1467 = vst [vmem:[#allocation2 + $0x44] sm:$0xf] %v1466_v53  ;;  %v1357_v36 = vor.u32 %v7140_v25, %v7132_v1  ;;  %v5637_v2 = vld [vmem:[#allocation2 + $0x7c] sm:$0xf]  ;;  %v4697_v48 = vld [vmem:[#allocation2 + $0x84] sm:$0xf0]  ;;  %2974 = vmatpush.bf16.msra.mxu2 %v5752_v43 }
 0x1f7   : > { %854 = vst [vmem:[#allocation2 + $0x74] sm:$0x8] %v853_v7  ;;  %v1321_v50 = vor.u32 %v1320_v16, %v1319_v34  ;;  %v1325_v63 = vrot.slane %v966_v10, 4  ;;  %v4781_v8 = vld [vmem:[#allocation2 + $0x12c] sm:$0xf0]  ;;  %v1323_v22 = vrot.slane %v969_v4, 5  ;;  %v4700_v41 = vor.u32 %v5637_v2, %v4697_v48 }
 0x1f8   : > { %v1313_v42 = vrot.slane %v1312_v29, 4  ;;  %v1469_v28 = vld [vmem:[#allocation2 + $0x5c] sm:$0xf]  ;;  %v1318_v32 = vrot.slane %v1317_v17, 4  ;;  %v855_v62 = vld [vmem:[#allocation2 + $0x8c] sm:$0x8]  ;;  %v4784_v39 = vor.u32 %v5658_v6, %v4781_v8 }
 0x1f9   : > { %2064 = vmatmul.bf16.gmra.mxu0 %v4684_v61  ;;  %v1322_v59 = vrot.slane %v1321_v50, 4  ;;  %v1470_v10 = vsel %vm6688_vm1, %v1309_v18, %v1469_v28  ;;  %v856_v26 = vsel %vm6191_vm5, 0, %v855_v62  ;;  %v5687_v4 = vld [vmem:[%s8226_s5 + $0x88] sm:$0xff]  ;;  %v1326_v58 = vor.u32 %v1325_v63, %v1323_v22  ;;  %v5638_v15 = vld [vmem:[#allocation2 + $0x80] sm:$0xf0]  ;;  %2887 = vmatpush.bf16.msra.mxu1 %v5742_v0  ;;  %v8396_v8 = vld [vmem:[#allocation17_spill] sm:$0xff] }
 0x1fa   : > { %v1315_v33 = vsel %vm6700_vm3, %v1313_v42, %v1314_v55  ;;  %1471 = vst [vmem:[#allocation2 + $0x5c] sm:$0xf] %v1470_v10  ;;  %2219 = vmatpush.bf16.msra.mxu0 %v5688_v13  ;;  %v1334_v31 = vrot.slane %v982_v56, 4  ;;  %v1328_v61 = vrot.slane %v974_v21, 4  ;;  %v4695_v60 = vld [vmem:[#allocation2 + $0x78] sm:$0xf] }
 0x1fb   : > { %2094 = vmatmul.bf16.gmra.mxu2 %v4756_v23  ;;  %1472 = vst [vmem:[#allocation2 + $0x68] sm:$0xf] %v1315_v33  ;;  %v1324_v38 = vsel %vm6700_vm3, %v1322_v59, %v1323_v22  ;;  %v858_v52 = vld [vmem:[#allocation2 + $0xa4] sm:$0x8]  ;;  %v1329_v11 = vrot.slane %v977_v47, 5  ;;  %v8388_v56 = vshll.u32 %v7003_v12, 16  ;;  %v4696_v53 = vor.u32 %v5638_v15, %v4695_v60 }
 0x1fc   : > { %857 = vst [vmem:[#allocation2 + $0x8c] sm:$0x8] %v856_v26  ;;  %v859_v45 = vsel %vm6191_vm5, 0, %v858_v52  ;;  %v5686_v5 = vld [vmem:[%s8226_s5 + $0x80] sm:$0xff]  ;;  %v1327_v40 = vrot.slane %v1326_v58, 4  ;;  %v8389_v21 = vld [vmem:[#allocation16_spill] sm:$0xff] }
 0x1fd   : > { %1476 = vst [vmem:[#allocation2 + $0x80] sm:$0xf] %v1324_v38  ;;  %v1332_v19 = vrot.slane %v8388_v56, 5  ;;  %v8390_v24 = vld [vmem:[#allocation15_spill] sm:$0xff]  ;;  %v5656_v29 = vld [vmem:[#allocation2 + $0x110] sm:$0xf0]  ;;  %v1330_v49 = vor.u32 %v1329_v11, %v1328_v61 }
 0x1fe   : > { %v1473_v14 = vld [vmem:[#allocation2 + $0x74] sm:$0xf]  ;;  %2220 = vmatpush.bf16.msra.mxu0 %v5687_v4  ;;  %860 = vst [vmem:[#allocation2 + $0xa4] sm:$0x8] %v859_v45  ;;  %v8391_v55 = vor.u32 %v8389_v21, %v8390_v24  ;;  %v4767_v7 = vld [vmem:[#allocation2 + $0x108] sm:$0xf] }
 0x1ff   : > { %v1474_v54 = vsel %vm6688_vm1, %v1318_v32, %v1473_v14  ;;  %v1335_v47 = vor.u32 %v1334_v31, %v1332_v19  ;;  %v861_v16 = vld [vmem:[#allocation2 + $0xbc] sm:$0x8]  ;;  %v1331_v23 = vrot.slane %v1330_v49, 4  ;;  %v4768_v17 = vor.u32 %v5656_v29, %v4767_v7  ;;  %v8393_v42 = vld [vmem:[#allocation20_spill] sm:$0xff]  ;;  %v8394_v2 = vld [vmem:[#allocation19_spill] sm:$0xff] }
 0x200   : > { %2158 = vmatmul.bf16.gmra.mxu1 %v4700_v41  ;;  %1475 = vst [vmem:[#allocation2 + $0x74] sm:$0xf] %v1474_v54  ;;  %v7213_v34 = vrot.slane %v8391_v55, 4  ;;  %v862_v18 = vsel %vm6191_vm5, 0, %v861_v16  ;;  %v8392_v20 = vshrl.u32 %v6380_v30, 16  ;;  %v8395_v48 = vor.u32 %v8393_v42, %v8394_v2  ;;  %v5760_v22 = vld [vmem:[%s8226_s5 + $0x150] sm:$0xff] }
 0x201   : > { %v1336_v6 = vrot.slane %v1335_v47, 4  ;;  %863 = vst [vmem:[#allocation2 + $0xbc] sm:$0x8] %v862_v18  ;;  %v1333_v59 = vsel %vm6700_vm3, %v1331_v23, %v1332_v19  ;;  %v5640_v28 = vld [vmem:[#allocation2 + $0x94] sm:$0xf]  ;;  %v8397_v0 = vshrl.u32 %v6378_v51, 16  ;;  %3063 = vmatpush.bf16.msra.mxu3 %v5760_v22 }
 0x202   : > { %2193 = vmatmul.bf16.gmra.mxu3 %v4784_v39  ;;  %2221 = vmatpush.bf16.msra.mxu0 %v5686_v5  ;;  %v1343_v35 = vrot.slane %v8392_v20, 4  ;;  %v7224_v63 = vrot.slane %v8395_v48, 4  ;;  %v1378_v13 = vsel %vm6700_vm3, %v7213_v34, %v8396_v8  ;;  %v4709_v33 = vld [vmem:[#allocation2 + $0x9c] sm:$0xf0]  ;;  %1480 = vst [vmem:[#allocation2 + $0x98] sm:$0xf] %v1333_v59 }
 0x203   : > { %v1477_v12 = vld [vmem:[#allocation2 + $0x8c] sm:$0xf]  ;;  %v1337_v10 = vrot.slane %v8397_v0, 4  ;;  %v8398_v62 = vshll.u32 %v6378_v51, 16  ;;  %v8399_v38 = vshll.u32 %v6380_v30, 16  ;;  %v8400_v26 = vshrl.u32 %v6460_v27, 16 }
 0x204   : > { %v1478_v50 = vsel %vm6688_vm1, %v1327_v40, %v1477_v12  ;;  %v5661_v43 = vld [vmem:[#allocation2 + $0x13c] sm:$0xf]  ;;  %v4793_v14 = vld [vmem:[#allocation2 + $0x144] sm:$0xf0]  ;;  %v864_v54 = vld [vmem:[#allocation2 + $0xd4] sm:$0x8]  ;;  %v4712_v30 = vor.u32 %v5640_v28, %v4709_v33 }
 0x205   : > { %1479 = vst [vmem:[#allocation2 + $0x8c] sm:$0xf] %v1478_v50  ;;  %v1481_v32 = vld [vmem:[#allocation2 + $0xa4] sm:$0xf]  ;;  %v1338_v41 = vrot.slane %v8398_v62, 5  ;;  %v1341_v39 = vrot.slane %v8399_v38, 5  ;;  %v4796_v56 = vor.u32 %v5661_v43, %v4793_v14 }
 0x206   : > { %v1352_v4 = vrot.slane %v8400_v26, 4  ;;  %v1482_v58 = vsel %vm6688_vm1, %v1336_v6, %v1481_v32  ;;  %v8401_v61 = vld [vmem:[#allocation21_spill] sm:$0xff]  ;;  %v865_v60 = vsel %vm6191_vm5, 0, %v864_v54  ;;  %v1349_v52 = vrot.slane %v1348_v37, 4  ;;  %v5751_v21 = vld [vmem:[%s8226_s5 + $0x108] sm:$0xff]  ;;  %v8408_v59 = vld [vmem:[#allocation10_spill] sm:$0xff] }
 0x207   : > { %1483 = vst [vmem:[#allocation2 + $0xa4] sm:$0xf] %v1482_v58  ;;  %v1339_v15 = vor.u32 %v1338_v41, %v1337_v10  ;;  %v1344_v31 = vor.u32 %v1343_v35, %v1341_v39  ;;  %v1387_v51 = vsel %vm6700_vm3, %v7224_v63, %v8401_v61  ;;  %v8402_v45 = vshll.u32 %v6460_v27, 16  ;;  %v4707_v37 = vld [vmem:[#allocation2 + $0x90] sm:$0xf]  ;;  %2975 = vmatpush.bf16.msra.mxu2 %v5751_v21  ;;  %v8403_v7 = vld [vmem:[#allocation9_spill] sm:$0xff] }
 0x208   : > { %v1485_v40 = vld [vmem:[#allocation2 + $0xbc] sm:$0xf]  ;;  %866 = vst [vmem:[#allocation2 + $0xd4] sm:$0x8] %v865_v60  ;;  %v1358_v55 = vrot.slane %v1357_v36, 4  ;;  %v8404_v36 = vld [vmem:[#allocation12_spill] sm:$0xff]  ;;  %v8409_v28 = vor.u32 %v8408_v59, %v8403_v7 }
 0x209   : > { %2069 = vmatmul.bf16.gmra.mxu0 %v4696_v53  ;;  %v1350_v11 = vrot.slane %v8402_v45, 5  ;;  %v1340_v19 = vrot.slane %v1339_v15, 4  ;;  %v1345_v5 = vrot.slane %v1344_v31, 4  ;;  %v5641_v53 = vld [vmem:[#allocation2 + $0x98] sm:$0xf0]  ;;  %v8405_v49 = vld [vmem:[#allocation11_spill] sm:$0xff] }
 0x20a   : > { %v1360_v29 = vsel %vm6700_vm3, %v1358_v55, %v8403_v7  ;;  %v867_v25 = vld [vmem:[#allocation2 + $0xec] sm:$0x8]  ;;  %v8406_v47 = vor.u32 %v8404_v36, %v8405_v49  ;;  %v4708_v23 = vor.u32 %v5641_v53, %v4707_v37  ;;  %v4779_v18 = vld [vmem:[#allocation2 + $0x120] sm:$0xf]  ;;  %v8407_v50 = vld [vmem:[#allocation13_spill] sm:$0xff]  ;;  %v1363_v33 = vrot.slane %v8409_v28, 4 }
 0x20b   : > { %2099 = vmatmul.bf16.gmra.mxu2 %v4768_v17  ;;  %v1353_v24 = vor.u32 %v1352_v4, %v1350_v11  ;;  %v1342_v27 = vsel %vm6700_vm3, %v1340_v19, %v1341_v39  ;;  %v1486_v57 = vsel %vm6688_vm1, %v1345_v5, %v1485_v40  ;;  %v1351_v9 = vsel %vm6700_vm3, %v1349_v52, %v1350_v11  ;;  %v5659_v12 = vld [vmem:[#allocation2 + $0x128] sm:$0xf0]  ;;  %v870_v42 = vld [vmem:[#allocation2 + $0x104] sm:$0x8]  ;;  %v4971_v0 = vld [vmem:[#allocation2 + $0x18] sm:$0xf] }
 0x20c   : > { %1484 = vst [vmem:[#allocation2 + $0xb0] sm:$0xf] %v1342_v27  ;;  %v1367_v16 = vrot.slane %v8406_v47, 4  ;;  %v868_v17 = vsel %vm6191_vm5, 0, %v867_v25  ;;  %v4780_v2 = vor.u32 %v5659_v12, %v4779_v18  ;;  %v871_v48 = vsel %vm6191_vm5, 0, %v870_v42  ;;  %v5759_v22 = vld [vmem:[%s8226_s5 + $0x148] sm:$0xff] }
 0x20d   : > { %1487 = vst [vmem:[#allocation2 + $0xbc] sm:$0xf] %v1486_v57  ;;  %v1354_v1 = vrot.slane %v1353_v24, 4  ;;  %v5695_v10 = vld [vmem:[#allocation2 + $0x20] sm:$0xf0]  ;;  %3064 = vmatpush.bf16.msra.mxu3 %v5759_v22  ;;  %v8412_v31 = vld [vmem:[#allocation24_spill] sm:$0xff] }
 0x20e   : > { %1488 = vst [vmem:[#allocation2 + $0xc8] sm:$0xf] %v1351_v9  ;;  %v1369_v6 = vsel %vm6700_vm3, %v1367_v16, %v8407_v50  ;;  %v5664_v32 = vld [vmem:[#allocation2 + $0x154] sm:$0xf]  ;;  %v4805_v62 = vld [vmem:[#allocation2 + $0x15c] sm:$0xf0]  ;;  %v4972_v4 = vor.u32 %v5695_v10, %v4971_v0 }
 0x20f   : > { %1492 = vst [vmem:[#allocation2 + $0xe0] sm:$0xf] %v1360_v29  ;;  %v1489_v20 = vld [vmem:[#allocation2 + $0xd4] sm:$0xf]  ;;  %v8410_v41 = vld [vmem:[#allocation14_spill] sm:$0xff]  ;;  %v4808_v15 = vor.u32 %v5664_v32, %v4805_v62  ;;  %v8413_v54 = vld [vmem:[#allocation23_spill] sm:$0xff] }
 0x210   : > { %2163 = vmatmul.bf16.gmra.mxu1 %v4712_v30  ;;  %869 = vst [vmem:[#allocation2 + $0xec] sm:$0x8] %v868_v17  ;;  %v1490_v35 = vsel %vm6688_vm1, %v1354_v1, %v1489_v20  ;;  %v8411_v38 = vor.u32 %v8410_v41, %v8407_v50  ;;  %v873_v14 = vld [vmem:[#allocation2 + $0x11c] sm:$0x8]  ;;  %v4643_v58 = vld [vmem:[#allocation2 + $0x8] sm:$0xf]  ;;  %v8414_v30 = vor.u32 %v8412_v31, %v8413_v54 }
 0x211   : > { %1491 = vst [vmem:[#allocation2 + $0xd4] sm:$0xf] %v1490_v35  ;;  %v5624_v52 = vld [vmem:[#allocation2 + $0x10] sm:$0xf0]  ;;  %v874_v11 = vsel %vm6191_vm5, 0, %v873_v14  ;;  %v8415_v40 = vld [vmem:[#allocation25_spill] sm:$0xff] }
 0x212   : > { %2198 = vmatmul.bf16.gmra.mxu3 %v4796_v56  ;;  %872 = vst [vmem:[#allocation2 + $0x104] sm:$0x8] %v871_v48  ;;  %v1372_v39 = vrot.slane %v8411_v38, 4  ;;  %v1394_v60 = vrot.slane %v8414_v30, 4  ;;  %v4644_v34 = vor.u32 %v5624_v52, %v4643_v58  ;;  %v4791_v19 = vld [vmem:[#allocation2 + $0x138] sm:$0xf] }
 0x213   : > { %1496 = vst [vmem:[#allocation2 + $0xf8] sm:$0xf] %v1369_v6  ;;  %v8416_v24 = vld [vmem:[#allocation18_spill] sm:$0xff]  ;;  %v5698_v7 = vld [vmem:[#allocation2 + $0x38] sm:$0xf0]  ;;  %v5839_v38 = vld [vmem:[%s8229_s8 + $0x8] sm:$0xff] }
 0x214   : > { %1500 = vst [vmem:[#allocation2 + $0x110] sm:$0xf] %v1378_v13  ;;  %v876_v13 = vld [vmem:[#allocation2 + $0x134] sm:$0x8]  ;;  %v1396_v21 = vsel %vm6700_vm3, %v1394_v60, %v8415_v40  ;;  %v8417_v55 = vor.u32 %v8416_v24, %v8396_v8  ;;  %v5662_v57 = vld [vmem:[#allocation2 + $0x140] sm:$0xf0] }
 0x215   : > { %875 = vst [vmem:[#allocation2 + $0x11c] sm:$0x8] %v874_v11  ;;  %v877_v5 = vsel %vm6191_vm5, 0, %v876_v13  ;;  %v5750_v9 = vld [vmem:[%s8226_s5 + $0x100] sm:$0xff]  ;;  %v4792_v63 = vor.u32 %v5662_v57, %v4791_v19  ;;  %v4983_v8 = vld [vmem:[#allocation2 + $0x30] sm:$0xf] }
 0x216   : > { %1504 = vst [vmem:[#allocation2 + $0x128] sm:$0xf] %v1387_v51  ;;  %v1381_v27 = vrot.slane %v8417_v55, 4  ;;  %2976 = vmatpush.bf16.msra.mxu2 %v5750_v9  ;;  %v8418_v51 = vld [vmem:[#allocation22_spill] sm:$0xff]  ;;  %v5667_v1 = vld [vmem:[#allocation2 + $0x16c] sm:$0xf]  ;;  %v4984_v16 = vor.u32 %v5698_v7, %v4983_v8 }
 0x217   : > { %v1493_v26 = vld [vmem:[#allocation2 + $0xec] sm:$0xf]  ;;  %878 = vst [vmem:[#allocation2 + $0x134] sm:$0x8] %v877_v5  ;;  %v8419_v37 = vor.u32 %v8418_v51, %v8401_v61  ;;  %v4817_v25 = vld [vmem:[#allocation2 + $0x174] sm:$0xf0] }
 0x218   : > { %v1494_v43 = vsel %vm6688_vm1, %v1363_v33, %v1493_v26  ;;  %1508 = vst [vmem:[#allocation2 + $0x140] sm:$0xf] %v1396_v21  ;;  %v5758_v61 = vld [vmem:[%s8226_s5 + $0x140] sm:$0xff]  ;;  %v5627_v17 = vld [vmem:[#allocation2 + $0x28] sm:$0xf0]  ;;  %v5837_v48 = vld [vmem:[%s8226_s5 + $0x238] sm:$0xff] }
 0x219   : > { %2074 = vmatmul.bf16.gmra.mxu0 %v4708_v23  ;;  %1495 = vst [vmem:[#allocation2 + $0xec] sm:$0xf] %v1494_v43  ;;  %v1497_v45 = vld [vmem:[#allocation2 + $0x104] sm:$0xf]  ;;  %v1390_v3 = vrot.slane %v8419_v37, 4  ;;  %v4820_v23 = vor.u32 %v5667_v1, %v4817_v25  ;;  %3065 = vmatpush.bf16.msra.mxu3 %v5758_v61  ;;  %v5821_v62 = vld [vmem:[%s8226_s5 + $0x1b8] sm:$0xff] }
 0x21a   : > { %v1498_v56 = vsel %vm6688_vm1, %v1372_v39, %v1497_v45  ;;  %v4655_v18 = vld [vmem:[#allocation2 + $0x20] sm:$0xf]  ;;  %v4803_v20 = vld [vmem:[#allocation2 + $0x150] sm:$0xf]  ;;  %v5665_v44 = vld [vmem:[#allocation2 + $0x158] sm:$0xf0]  ;;  %3935 = vmatpush.bf16.msrb.mxu2 %v5837_v48  ;;  %3757 = vmatpush.bf16.msrb.mxu0 %v5821_v62 }
 0x21b   : > { %2104 = vmatmul.bf16.gmra.mxu2 %v4780_v2  ;;  %1499 = vst [vmem:[#allocation2 + $0x104] sm:$0xf] %v1498_v56  ;;  %v4656_v35 = vor.u32 %v5627_v17, %v4655_v18  ;;  %v4804_v42 = vor.u32 %v5665_v44, %v4803_v20  ;;  %v4995_v59 = vld [vmem:[#allocation2 + $0x48] sm:$0xf]  ;;  %v5701_v28 = vld [vmem:[#allocation2 + $0x50] sm:$0xf0] }
 0x21c   : > { %v1501_v46 = vld [vmem:[#allocation2 + $0x11c] sm:$0xf]  ;;  %v4979_v22 = vld [vmem:[#allocation2 + $0x20] sm:$0xf]  ;;  %v5696_v0 = vld [vmem:[#allocation2 + $0x28] sm:$0xf0]  ;;  %v4996_v32 = vor.u32 %v5701_v28, %v4995_v59 }
 0x21d   : > { %v1502_v53 = vsel %vm6688_vm1, %v1381_v27, %v1501_v46  ;;  %v5829_v41 = vld [vmem:[%s8226_s5 + $0x1f8] sm:$0xff]  ;;  %v4980_v39 = vor.u32 %v5696_v0, %v4979_v22  ;;  %4370 = vmatpush.bf16.msrb.mxu3 %v5839_v38  ;;  %v4815_v31 = vld [vmem:[#allocation2 + $0x168] sm:$0xf]  ;;  %v5668_v54 = vld [vmem:[#allocation2 + $0x170] sm:$0xf0] }
 0x21e   : > { %1503 = vst [vmem:[#allocation2 + $0x11c] sm:$0xf] %v1502_v53  ;;  %v1505_v36 = vld [vmem:[#allocation2 + $0x134] sm:$0xf]  ;;  %3846 = vmatpush.bf16.msrb.mxu1 %v5829_v41  ;;  %v4667_v26 = vld [vmem:[#allocation2 + $0x38] sm:$0xf]  ;;  %v4816_v60 = vor.u32 %v5668_v54, %v4815_v31 }
 0x21f   : > { %v1506_v47 = vsel %vm6688_vm1, %v1390_v3, %v1505_v36  ;;  %v5007_v52 = vld [vmem:[#allocation2 + $0x60] sm:$0xf]  ;;  %v5704_v45 = vld [vmem:[#allocation2 + $0x68] sm:$0xf0]  ;;  %v5699_v13 = vld [vmem:[#allocation2 + $0x40] sm:$0xf0] }
 0x220   : > { %2888 = vmatmul.bf16.vlgmr.msra.gmra.mxu1 %v4972_v4  ;;  %1507 = vst [vmem:[#allocation2 + $0x134] sm:$0xf] %v1506_v47  ;;  %v5630_v4 = vld [vmem:[#allocation2 + $0x40] sm:$0xf0]  ;;  %v5008_v24 = vor.u32 %v5704_v45, %v5007_v52  ;;  %v4679_v27 = vld [vmem:[#allocation2 + $0x50] sm:$0xf] }
 0x221   : > { %v4668_v30 = vor.u32 %v5630_v4, %v4667_v26  ;;  %v5633_v57 = vld [vmem:[#allocation2 + $0x58] sm:$0xf0]  ;;  %v4973_v8 = vld [vmem:[#allocation2 + $0x24] sm:$0xf0]  ;;  %v5836_v1 = vld [vmem:[%s8226_s5 + $0x230] sm:$0xff] }
 0x222   : > { %2203 = vmatmul.bf16.gmra.mxu3 %v4808_v15  ;;  %v4680_v3 = vor.u32 %v5633_v57, %v4679_v27  ;;  %v5694_v53 = vld [vmem:[#allocation2 + $0x1c] sm:$0xf]  ;;  %v5019_v25 = vld [vmem:[#allocation2 + $0x78] sm:$0xf]  ;;  %v5707_v36 = vld [vmem:[#allocation2 + $0x80] sm:$0xf0]  ;;  %3936 = vmatpush.bf16.msrb.mxu2 %v5836_v1 }
 0x223   : > { %v5702_v61 = vld [vmem:[#allocation2 + $0x58] sm:$0xf0]  ;;  %v5020_v20 = vor.u32 %v5707_v36, %v5019_v25  ;;  %v5820_v44 = vld [vmem:[%s8226_s5 + $0x1b0] sm:$0xff]  ;;  %v4691_v48 = vld [vmem:[#allocation2 + $0x68] sm:$0xf] }
 0x224   : > { %3758 = vmatpush.bf16.msrb.mxu0 %v5820_v44  ;;  %v5636_v59 = vld [vmem:[#allocation2 + $0x70] sm:$0xf0]  ;;  %v4985_v41 = vld [vmem:[#allocation2 + $0x3c] sm:$0xf0]  ;;  %v5031_v26 = vld [vmem:[#allocation2 + $0x90] sm:$0xf] }
 0x225   : > { %v5697_v62 = vld [vmem:[#allocation2 + $0x34] sm:$0xf]  ;;  %v5710_v4 = vld [vmem:[#allocation2 + $0x98] sm:$0xf0]  ;;  %v5700_v57 = vld [vmem:[#allocation2 + $0x4c] sm:$0xf] }
 0x226   : > { %v5705_v31 = vld [vmem:[#allocation2 + $0x70] sm:$0xf0]  ;;  %v5032_v45 = vor.u32 %v5710_v4, %v5031_v26  ;;  %v5027_v1 = vld [vmem:[#allocation2 + $0x80] sm:$0xf]  ;;  %v5708_v25 = vld [vmem:[#allocation2 + $0x88] sm:$0xf0] }
 0x227   : > { %v4715_v44 = vld [vmem:[#allocation2 + $0x98] sm:$0xf]  ;;  %v5716_v26 = vld [vmem:[#allocation2 + $0xc8] sm:$0xf0] }
 0x229   : > { %2222 = vmatmul.bf16.vlgmr.msra.gmra.mxu0 %v4644_v34  ;;  %v2134_v29 = vpop.f32.mrf.mxu1  ;;  %v4991_v34 = vld [vmem:[#allocation2 + $0x38] sm:$0xf] }
 0x22a   : > { %v4992_v55 = vor.u32 %v5699_v13, %v4991_v34  ;;  %v5639_v34 = vld [vmem:[#allocation2 + $0x88] sm:$0xf0] }
 0x22b   : > { %2109 = vmatmul.bf16.gmra.mxu2 %v4792_v63  ;;  %v2045_v49 = vpop.f32.mrf.mxu0 }
 0x22c   : > { %v7329_v12 = vadd.f32 %v2134_v29, %v2045_v49  ;;  %v4976_v29 = vor.u32 %v5694_v53, %v4973_v8  ;;  %v5713_v53 = vld [vmem:[#allocation2 + $0xb0] sm:$0xf0] }
 0x230   : > { %2893 = vmatmul.bf16.gmra.mxu1 %v4984_v16  ;;  %v5003_v16 = vld [vmem:[#allocation2 + $0x50] sm:$0xf] }
 0x231   : > { %v7334_v50 = vpop.f32.mrf.mxu1 }
 0x232   : > { %2208 = vmatmul.bf16.gmra.mxu3 %v4820_v23  ;;  %v2169_v6 = vpop.f32.mrf.mxu3 }
 0x233   : > { %v7336_v2 = vpop.f32.mrf.mxu0 }
 0x239   : > { %2227 = vmatmul.bf16.gmra.mxu0 %v4656_v35  ;;  %v5828_v35 = vld [vmem:[%s8226_s5 + $0x1f0] sm:$0xff] }
 0x23a   : > { %v2171_v33 = vpop.f32.mrf.mxu3  ;;  %3847 = vmatpush.bf16.msrb.mxu1 %v5828_v35  ;;  %v5642_v35 = vld [vmem:[#allocation2 + $0xa0] sm:$0xf0] }
 0x23b   : > { %2114 = vmatmul.bf16.gmra.mxu2 %v4804_v42  ;;  %v5004_v42 = vor.u32 %v5702_v61, %v5003_v16 }
 0x23c   : > { %v2139_v10 = vpop.f32.mrf.mxu1 }
 0x240   : > { %2898 = vmatmul.bf16.gmra.mxu1 %v4996_v32  ;;  %v4692_v32 = vor.u32 %v5636_v59, %v4691_v48 }
 0x242   : > { %3066 = vmatmul.bf16.vlgmr.msra.gmra.mxu3 %v4980_v39  ;;  %v2174_v14 = vpop.f32.mrf.mxu3  ;;  %v4988_v39 = vor.u32 %v5697_v62, %v4985_v41 }
 0x244   : > { %v2141_v15 = vpop.f32.mrf.mxu1 }
 0x245   : > { %v2050_v43 = vpop.f32.mrf.mxu0 }
 0x246   : > { %v7350_v58 = vadd.f32 %v2139_v10, %v2050_v43 }
 0x249   : > { %2232 = vmatmul.bf16.gmra.mxu0 %v4668_v30 }
 0x24a   : > { %v2176_v56 = vpop.f32.mrf.mxu3 }
 0x24b   : > { %2119 = vmatmul.bf16.gmra.mxu2 %v4816_v60 }
 0x24d   : > { %v2052_v11 = vpop.f32.mrf.mxu0  ;;  %v2144_v40 = vpop.f32.mrf.mxu1 }
 0x24e   : > { %v2080_v19 = vpop.f32.mrf.mxu2  ;;  %v7352_v5 = vadd.f32 %v2141_v15, %v2052_v11  ;;  %v5015_v15 = vld [vmem:[#allocation2 + $0x68] sm:$0xf] }
 0x24f   : > { %v7354_v21 = vadd.f32 %v2169_v6, %v2080_v19  ;;  %v5016_v11 = vor.u32 %v5705_v31, %v5015_v15  ;;  %v5039_v15 = vld [vmem:[#allocation2 + $0x98] sm:$0xf]  ;;  %v5711_v31 = vld [vmem:[#allocation2 + $0xa0] sm:$0xf0] }
 0x250   : > { %2903 = vmatmul.bf16.gmra.mxu1 %v5008_v24 }
 0x252   : > { %3071 = vmatmul.bf16.gmra.mxu3 %v4992_v55 }
 0x254   : > { %v2179_v63 = vpop.f32.mrf.mxu3 }
 0x255   : > { %v2146_v37 = vpop.f32.mrf.mxu1 }
 0x256   : > { %v2055_v9 = vpop.f32.mrf.mxu0  ;;  %v2082_v46 = vpop.f32.mrf.mxu2 }
 0x257   : > { %v7356_v51 = vadd.f32 %v2144_v40, %v2055_v9  ;;  %v7358_v7 = vadd.f32 %v2171_v33, %v2082_v46  ;;  %v4997_v9 = vld [vmem:[#allocation2 + $0x54] sm:$0xf0] }
 0x259   : > { %2237 = vmatmul.bf16.gmra.mxu0 %v4680_v3  ;;  %v5043_v3 = vld [vmem:[#allocation2 + $0xa8] sm:$0xf] }
 0x25a   : > { %v5044_v61 = vor.u32 %v5713_v53, %v5043_v3  ;;  %v5021_v3 = vld [vmem:[#allocation2 + $0x84] sm:$0xf0] }
 0x25b   : > { %2977 = vmatmul.bf16.vlgmr.msra.gmra.mxu2 %v4976_v29 }
 0x25c   : > { %v2181_v47 = vpop.f32.mrf.mxu3 }
 0x25d   : > { %v2149_v17 = vpop.f32.mrf.mxu1 }
 0x25e   : > { %v2057_v49 = vpop.f32.mrf.mxu0  ;;  %v2085_v23 = vpop.f32.mrf.mxu2 }
 0x25f   : > { %v7363_v18 = vadd.f32 %v2146_v37, %v2057_v49  ;;  %v7365_v6 = vadd.f32 %v2174_v14, %v2085_v23  ;;  %v5835_v37 = vld [vmem:[%s8226_s5 + $0x228] sm:$0xff] }
 0x260   : > { %2908 = vmatmul.bf16.gmra.mxu1 %v5020_v20  ;;  %3937 = vmatpush.bf16.msrb.mxu2 %v5835_v37  ;;  %v5819_v23 = vld [vmem:[%s8226_s5 + $0x1a8] sm:$0xff]  ;;  %v5028_v20 = vor.u32 %v5708_v25, %v5027_v1  ;;  %v5706_v37 = vld [vmem:[#allocation2 + $0x7c] sm:$0xf]  ;;  %v5067_v1 = vld [vmem:[#allocation2 + $0xd8] sm:$0xf] }
 0x261   : > { %3759 = vmatpush.bf16.msrb.mxu0 %v5819_v23  ;;  %v5719_v25 = vld [vmem:[#allocation2 + $0xe0] sm:$0xf0]  ;;  %v5714_v23 = vld [vmem:[#allocation2 + $0xb8] sm:$0xf0] }
 0x262   : > { %3076 = vmatmul.bf16.gmra.mxu3 %v5004_v42 }
 0x265   : > { %v2184_v33 = vpop.f32.mrf.mxu3  ;;  %v2151_v10 = vpop.f32.mrf.mxu1 }
 0x266   : > { %v2060_v28 = vpop.f32.mrf.mxu0  ;;  %v2087_v22 = vpop.f32.mrf.mxu2 }
 0x267   : > { %v7373_v0 = vadd.f32 %v2149_v17, %v2060_v28  ;;  %v7375_v38 = vadd.f32 %v2176_v56, %v2087_v22  ;;  %v4703_v56 = vld [vmem:[#allocation2 + $0x80] sm:$0xf]  ;;  %v5827_v17 = vld [vmem:[%s8226_s5 + $0x1e8] sm:$0xff]  ;;  %v4716_v22 = vor.u32 %v5642_v35, %v4715_v44  ;;  %v5068_v35 = vor.u32 %v5719_v25, %v5067_v1 }
 0x268   : > { %v4704_v27 = vor.u32 %v5639_v34, %v4703_v56  ;;  %3848 = vmatpush.bf16.msrb.mxu1 %v5827_v17  ;;  %v5040_v34 = vor.u32 %v5711_v31, %v5039_v15  ;;  %v5709_v15 = vld [vmem:[#allocation2 + $0x94] sm:$0xf]  ;;  %v5033_v31 = vld [vmem:[#allocation2 + $0x9c] sm:$0xf0]  ;;  %v5651_v1 = vld [vmem:[#allocation2 + $0xe8] sm:$0xf0] }
 0x269   : > { %2242 = vmatmul.bf16.gmra.mxu0 %v4692_v32  ;;  %v5009_v32 = vld [vmem:[#allocation2 + $0x6c] sm:$0xf0] }
 0x26b   : > { %2982 = vmatmul.bf16.gmra.mxu2 %v4988_v39  ;;  %v5055_v39 = vld [vmem:[#allocation2 + $0xc0] sm:$0xf] }
 0x26c   : > { %v5056_v56 = vor.u32 %v5716_v26, %v5055_v39 }
 0x26d   : > { %v2186_v14 = vpop.f32.mrf.mxu3  ;;  %v2154_v60 = vpop.f32.mrf.mxu1 }
 0x26e   : > { %v2062_v43 = vpop.f32.mrf.mxu0  ;;  %v2090_v54 = vpop.f32.mrf.mxu2 }
 0x26f   : > { %v7377_v30 = vadd.f32 %v2151_v10, %v2062_v43  ;;  %v7379_v52 = vadd.f32 %v2179_v63, %v2090_v54  ;;  %v5000_v63 = vor.u32 %v5700_v57, %v4997_v9  ;;  %v5703_v10 = vld [vmem:[#allocation2 + $0x64] sm:$0xf] }
 0x270   : > { %2913 = vmatmul.bf16.gmra.mxu1 %v5032_v45  ;;  %v5012_v41 = vor.u32 %v5703_v10, %v5009_v32  ;;  %v5648_v10 = vld [vmem:[#allocation2 + $0xd0] sm:$0xf0] }
 0x272   : > { %3081 = vmatmul.bf16.gmra.mxu3 %v5016_v11 }
 0x275   : > { %v2189_v19 = vpop.f32.mrf.mxu3  ;;  %v2156_v55 = vpop.f32.mrf.mxu1 }
 0x276   : > { %v2065_v13 = vpop.f32.mrf.mxu0  ;;  %v2092_v40 = vpop.f32.mrf.mxu2 }
 0x277   : > { %v7381_v24 = vadd.f32 %v2154_v60, %v2065_v13  ;;  %v7383_v46 = vadd.f32 %v2181_v47, %v2092_v40  ;;  %v5645_v13 = vld [vmem:[#allocation2 + $0xb8] sm:$0xf0] }
 0x279   : > { %2247 = vmatmul.bf16.gmra.mxu0 %v4704_v27 }
 0x27b   : > { %2987 = vmatmul.bf16.gmra.mxu2 %v5000_v63 }
 0x27d   : > { %v2191_v29 = vpop.f32.mrf.mxu3  ;;  %v2159_v16 = vpop.f32.mrf.mxu1 }
 0x27e   : > { %v2067_v8 = vpop.f32.mrf.mxu0  ;;  %v2095_v36 = vpop.f32.mrf.mxu2 }
 0x27f   : > { %v7388_v49 = vadd.f32 %v2156_v55, %v2067_v8  ;;  %v7390_v47 = vadd.f32 %v2184_v33, %v2095_v36  ;;  %v5834_v8 = vld [vmem:[%s8226_s5 + $0x220] sm:$0xff] }
 0x280   : > { %2918 = vmatmul.bf16.gmra.mxu1 %v5044_v61  ;;  %v5051_v61 = vld [vmem:[#allocation2 + $0xb0] sm:$0xf]  ;;  %3938 = vmatpush.bf16.msrb.mxu2 %v5834_v8  ;;  %v4751_v8 = vld [vmem:[#allocation2 + $0xe0] sm:$0xf] }
 0x282   : > { %3086 = vmatmul.bf16.gmra.mxu3 %v5028_v20 }
 0x285   : > { %v2194_v48 = vpop.f32.mrf.mxu3  ;;  %v2161_v33 = vpop.f32.mrf.mxu1 }
 0x286   : > { %v2070_v42 = vpop.f32.mrf.mxu0  ;;  %v2097_v59 = vpop.f32.mrf.mxu2 }
 0x287   : > { %v7398_v28 = vadd.f32 %v2159_v16, %v2070_v42  ;;  %v7400_v62 = vadd.f32 %v2186_v14, %v2097_v59  ;;  %v4727_v14 = vld [vmem:[#allocation2 + $0xb0] sm:$0xf]  ;;  %v5818_v42 = vld [vmem:[%s8226_s5 + $0x1a0] sm:$0xff] }
 0x288   : > { %v4728_v63 = vor.u32 %v5645_v13, %v4727_v14  ;;  %v5826_v59 = vld [vmem:[%s8226_s5 + $0x1e0] sm:$0xff]  ;;  %3760 = vmatpush.bf16.msrb.mxu0 %v5818_v42  ;;  %v5722_v14 = vld [vmem:[#allocation2 + $0xf8] sm:$0xf0] }
 0x289   : > { %2252 = vmatmul.bf16.gmra.mxu0 %v4716_v22  ;;  %3849 = vmatpush.bf16.msrb.mxu1 %v5826_v59  ;;  %v4739_v22 = vld [vmem:[#allocation2 + $0xc8] sm:$0xf]  ;;  %v5833_v59 = vld [vmem:[%s8226_s5 + $0x218] sm:$0xff] }
 0x28a   : > { %3939 = vmatpush.bf16.msrb.mxu2 %v5833_v59 }
 0x28b   : > { %2992 = vmatmul.bf16.gmra.mxu2 %v5012_v41 }
 0x28d   : > { %v2196_v43 = vpop.f32.mrf.mxu3  ;;  %v2164_v45 = vpop.f32.mrf.mxu1 }
 0x28e   : > { %v2072_v4 = vpop.f32.mrf.mxu0  ;;  %v2100_v54 = vpop.f32.mrf.mxu2 }
 0x28f   : > { %v7402_v60 = vadd.f32 %v2161_v33, %v2072_v4  ;;  %v7404_v11 = vadd.f32 %v2189_v19, %v2100_v54  ;;  %v5024_v19 = vor.u32 %v5706_v37, %v5021_v3  ;;  %v5052_v33 = vor.u32 %v5714_v23, %v5051_v61 }
 0x290   : > { %2923 = vmatmul.bf16.gmra.mxu1 %v5056_v56  ;;  %v4740_v4 = vor.u32 %v5648_v10, %v4739_v22  ;;  %v2137_v56 = vadd.f32 %v7334_v50, %v7336_v2  ;;  %v4752_v23 = vor.u32 %v5651_v1, %v4751_v8  ;;  %v5725_v22 = vld [vmem:[#allocation2 + $0x110] sm:$0xf0]  ;;  %v5715_v1 = vld [vmem:[#allocation2 + $0xc4] sm:$0xf] }
 0x292   : > { %3091 = vmatmul.bf16.gmra.mxu3 %v5040_v34  ;;  %v5079_v34 = vld [vmem:[#allocation2 + $0xf0] sm:$0xf] }
 0x295   : > { %v2199_v55 = vpop.f32.mrf.mxu3  ;;  %v2166_v9 = vpop.f32.mrf.mxu1 }
 0x296   : > { %v2075_v40 = vpop.f32.mrf.mxu0  ;;  %v2102_v27 = vpop.f32.mrf.mxu2 }
 0x297   : > { %v7406_v57 = vadd.f32 %v2164_v45, %v2075_v40  ;;  %v7408_v53 = vadd.f32 %v2191_v29, %v2102_v27  ;;  %v5036_v45 = vor.u32 %v5709_v15, %v5033_v31  ;;  %v5063_v27 = vld [vmem:[#allocation2 + $0xc8] sm:$0xf] }
 0x299   : > { %2257 = vmatmul.bf16.gmra.mxu0 %v4728_v63 }
 0x29b   : > { %2997 = vmatmul.bf16.gmra.mxu2 %v5024_v19 }
 0x29d   : > { %v2201_v16 = vpop.f32.mrf.mxu3  ;;  %v7415_v44 = vpop.f32.mrf.mxu1 }
 0x29e   : > { %v2077_v36 = vpop.f32.mrf.mxu0  ;;  %v2105_v17 = vpop.f32.mrf.mxu2 }
 0x29f   : > { %v7413_v20 = vadd.f32 %v2166_v9, %v2077_v36  ;;  %v7417_v29 = vadd.f32 %v2194_v48, %v2105_v17  ;;  %v5712_v17 = vld [vmem:[#allocation2 + $0xac] sm:$0xf] }
 0x2a0   : > { %2928 = vmatmul.bf16.gmra.mxu1 %v5068_v35  ;;  %v5045_v35 = vld [vmem:[#allocation2 + $0xb4] sm:$0xf0] }
 0x2a2   : > { %3096 = vmatmul.bf16.gmra.mxu3 %v5052_v33  ;;  %v5091_v33 = vld [vmem:[#allocation2 + $0x108] sm:$0xf] }
 0x2a5   : > { %v2204_v41 = vpop.f32.mrf.mxu3  ;;  %v7428_v26 = vpop.f32.mrf.mxu1 }
 0x2a6   : > { %v2223_v32 = vpop.f32.mrf.mxu0  ;;  %v2107_v48 = vpop.f32.mrf.mxu2 }
 0x2a7   : > { %v7426_v39 = vadd.f32 %v2223_v32, %v7329_v12  ;;  %v7430_v54 = vadd.f32 %v2196_v43, %v2107_v48  ;;  %v5717_v12 = vld [vmem:[#allocation2 + $0xd0] sm:$0xf0]  ;;  %v5080_v43 = vor.u32 %v5722_v14, %v5079_v34  ;;  %v5720_v48 = vld [vmem:[#allocation2 + $0xe8] sm:$0xf0]  ;;  %v5817_v34 = vld [vmem:[%s8226_s5 + $0x198] sm:$0xff] }
 0x2a8   : > { %v5064_v19 = vor.u32 %v5717_v12, %v5063_v27  ;;  %v5825_v14 = vld [vmem:[%s8226_s5 + $0x1d8] sm:$0xff]  ;;  %v5654_v27 = vld [vmem:[#allocation2 + $0x100] sm:$0xf0]  ;;  %3761 = vmatpush.bf16.msrb.mxu0 %v5817_v34 }
 0x2a9   : > { %2262 = vmatmul.bf16.gmra.mxu0 %v4740_v4  ;;  %3850 = vmatpush.bf16.msrb.mxu1 %v5825_v14 }
 0x2ab   : > { %3002 = vmatmul.bf16.gmra.mxu2 %v5036_v45  ;;  %v5092_v45 = vor.u32 %v5725_v22, %v5091_v33  ;;  %v5087_v33 = vld [vmem:[#allocation2 + $0xf8] sm:$0xf]  ;;  %v5723_v22 = vld [vmem:[#allocation2 + $0x100] sm:$0xf0] }
 0x2ad   : > { %v2206_v40 = vpop.f32.mrf.mxu3  ;;  %v7436_v37 = vpop.f32.mrf.mxu1 }
 0x2ae   : > { %v2225_v13 = vpop.f32.mrf.mxu0  ;;  %v2110_v9 = vpop.f32.mrf.mxu2 }
 0x2af   : > { %v7434_v63 = vadd.f32 %v2225_v13, %v2137_v56  ;;  %v7438_v3 = vadd.f32 %v2199_v55, %v2110_v9  ;;  %v5048_v55 = vor.u32 %v5712_v17, %v5045_v35  ;;  %v4763_v13 = vld [vmem:[#allocation2 + $0xf8] sm:$0xf]  ;;  %v5103_v17 = vld [vmem:[#allocation2 + $0x120] sm:$0xf]  ;;  %v5728_v35 = vld [vmem:[#allocation2 + $0x128] sm:$0xf0] }
 0x2b0   : > { %2933 = vmatmul.bf16.gmra.mxu1 %v5080_v43  ;;  %v4764_v8 = vor.u32 %v5654_v27, %v4763_v13 }
 0x2b2   : > { %3101 = vmatmul.bf16.gmra.mxu3 %v5064_v19 }
 0x2b5   : > { %v2209_v2 = vpop.f32.mrf.mxu3  ;;  %v7443_v61 = vpop.f32.mrf.mxu1 }
 0x2b6   : > { %v2228_v50 = vpop.f32.mrf.mxu0  ;;  %v2112_v25 = vpop.f32.mrf.mxu2 }
 0x2b7   : > { %v7441_v36 = vadd.f32 %v2228_v50, %v7350_v58  ;;  %v7445_v42 = vadd.f32 %v2201_v16, %v2112_v25  ;;  %v5075_v58 = vld [vmem:[#allocation2 + $0xe0] sm:$0xf]  ;;  %v5057_v50 = vld [vmem:[#allocation2 + $0xcc] sm:$0xf0] }
 0x2b8   : > { %v5076_v56 = vor.u32 %v5720_v48, %v5075_v58 }
 0x2b9   : > { %2267 = vmatmul.bf16.gmra.mxu0 %v4752_v23  ;;  %v5060_v23 = vor.u32 %v5715_v1, %v5057_v50  ;;  %v5832_v1 = vld [vmem:[%s8226_s5 + $0x210] sm:$0xff]  ;;  %v5115_v50 = vld [vmem:[#allocation2 + $0x138] sm:$0xf] }
 0x2ba   : > { %3940 = vmatpush.bf16.msrb.mxu2 %v5832_v1  ;;  %v5721_v1 = vld [vmem:[#allocation2 + $0xf4] sm:$0xf] }
 0x2bb   : > { %3007 = vmatmul.bf16.gmra.mxu2 %v5048_v55 }
 0x2bd   : > { %v2211_v32 = vpop.f32.mrf.mxu3  ;;  %v7453_v16 = vpop.f32.mrf.mxu1 }
 0x2be   : > { %v2230_v10 = vpop.f32.mrf.mxu0  ;;  %v2115_v4 = vpop.f32.mrf.mxu2 }
 0x2bf   : > { %v7451_v15 = vadd.f32 %v2230_v10, %v7352_v5  ;;  %v7455_v31 = vadd.f32 %v2204_v41, %v2115_v4  ;;  %v5838_v5 = vld [vmem:[%s8229_s8] sm:$0xff]  ;;  %v5104_v4 = vor.u32 %v5728_v35, %v5103_v17 }
 0x2c0   : > { %2938 = vmatmul.bf16.gmra.mxu1 %v5092_v45  ;;  %4371 = vmatpush.bf16.msrb.mxu3 %v5838_v5  ;;  %v4775_v45 = vld [vmem:[#allocation2 + $0x110] sm:$0xf] }
 0x2c2   : > { %3106 = vmatmul.bf16.gmra.mxu3 %v5076_v56  ;;  %v5657_v56 = vld [vmem:[#allocation2 + $0x118] sm:$0xf0] }
 0x2c5   : > { %v3067_v12 = vpop.f32.mrf.mxu3  ;;  %v7469_v19 = vpop.f32.mrf.mxu1 }
 0x2c6   : > { %v2233_v41 = vpop.f32.mrf.mxu0  ;;  %v2117_v9 = vpop.f32.mrf.mxu2 }
 0x2c7   : > { %v7467_v43 = vadd.f32 %v2233_v41, %v7356_v51  ;;  %v7471_v25 = vadd.f32 %v2206_v40, %v2117_v9  ;;  %v5088_v40 = vor.u32 %v5723_v22, %v5087_v33  ;;  %v5718_v41 = vld [vmem:[#allocation2 + $0xdc] sm:$0xf]  ;;  %v5069_v9 = vld [vmem:[#allocation2 + $0xe4] sm:$0xf0] }
 0x2c9   : > { %2272 = vmatmul.bf16.gmra.mxu0 %v4764_v8 }
 0x2cb   : > { %3012 = vmatmul.bf16.gmra.mxu2 %v5060_v23  ;;  %v5731_v23 = vld [vmem:[#allocation2 + $0x140] sm:$0xf0] }
 0x2cd   : > { %v3069_v59 = vpop.f32.mrf.mxu3  ;;  %v7476_v58 = vpop.f32.mrf.mxu1 }
 0x2ce   : > { %v2235_v55 = vpop.f32.mrf.mxu0  ;;  %v2120_v10 = vpop.f32.mrf.mxu2 }
 0x2cf   : > { %v7474_v51 = vadd.f32 %v2235_v55, %v7363_v18  ;;  %v7478_v48 = vadd.f32 %v2209_v2, %v2120_v10  ;;  %v4776_v18 = vor.u32 %v5657_v56, %v4775_v45  ;;  %v5072_v2 = vor.u32 %v5718_v41, %v5069_v9  ;;  %v5726_v55 = vld [vmem:[#allocation2 + $0x118] sm:$0xf0]  ;;  %v5816_v56 = vld [vmem:[%s8226_s5 + $0x190] sm:$0xff] }
 0x2d0   : > { %2943 = vmatmul.bf16.gmra.mxu1 %v5104_v4  ;;  %v5116_v4 = vor.u32 %v5731_v23, %v5115_v50  ;;  %3762 = vmatpush.bf16.msrb.mxu0 %v5816_v56  ;;  %v5081_v50 = vld [vmem:[#allocation2 + $0xfc] sm:$0xf0]  ;;  %v5729_v56 = vld [vmem:[#allocation2 + $0x130] sm:$0xf0] }
 0x2d2   : > { %3111 = vmatmul.bf16.gmra.mxu3 %v5088_v40 }
 0x2d5   : > { %v3072_v14 = vpop.f32.mrf.mxu3  ;;  %v7483_v27 = vpop.f32.mrf.mxu1 }
 0x2d6   : > { %v2238_v34 = vpop.f32.mrf.mxu0  ;;  %v2122_v5 = vpop.f32.mrf.mxu2 }
 0x2d7   : > { %v7481_v13 = vadd.f32 %v2238_v34, %v7373_v0  ;;  %v7485_v8 = vadd.f32 %v2211_v32, %v2122_v5  ;;  %v5099_v0 = vld [vmem:[#allocation2 + $0x110] sm:$0xf]  ;;  %v5660_v5 = vld [vmem:[#allocation2 + $0x130] sm:$0xf0] }
 0x2d8   : > { %v5100_v40 = vor.u32 %v5726_v55, %v5099_v0  ;;  %v5824_v34 = vld [vmem:[%s8226_s5 + $0x1d0] sm:$0xff]  ;;  %v5084_v0 = vor.u32 %v5721_v1, %v5081_v50 }
 0x2d9   : > { %8420 = vst [vmem:[#allocation5_spill] sm:$0xff] %v7485_v8  ;;  %2277 = vmatmul.bf16.gmra.mxu0 %v4776_v18  ;;  %3851 = vmatpush.bf16.msrb.mxu1 %v5824_v34  ;;  %v5127_v55 = vld [vmem:[#allocation2 + $0x150] sm:$0xf]  ;;  %v5724_v8 = vld [vmem:[#allocation2 + $0x10c] sm:$0xf] }
 0x2db   : > { %3017 = vmatmul.bf16.gmra.mxu2 %v5072_v2 }
 0x2dd   : > { %v3074_v35 = vpop.f32.mrf.mxu3  ;;  %v7493_v32 = vpop.f32.mrf.mxu1 }
 0x2de   : > { %v2240_v17 = vpop.f32.mrf.mxu0  ;;  %v2978_v33 = vpop.f32.mrf.mxu2 }
 0x2df   : > { %v7491_v22 = vadd.f32 %v2240_v17, %v7377_v30  ;;  %v2979_v10 = vadd.f32 %v2978_v33, %v7415_v44  ;;  %v4787_v30 = vld [vmem:[#allocation2 + $0x128] sm:$0xf]  ;;  %v5734_v33 = vld [vmem:[#allocation2 + $0x158] sm:$0xf0] }
 0x2e0   : > { %2948 = vmatmul.bf16.gmra.mxu1 %v5116_v4  ;;  %v4788_v2 = vor.u32 %v5660_v5, %v4787_v30 }
 0x2e1   : > { %v7496_v45 = vadd.f32 %v3067_v12, %v2979_v10 }
 0x2e2   : > { %3116 = vmatmul.bf16.gmra.mxu3 %v5100_v40  ;;  %v5111_v40 = vld [vmem:[#allocation2 + $0x128] sm:$0xf] }
 0x2e5   : > { %v3077_v44 = vpop.f32.mrf.mxu3  ;;  %v7507_v9 = vpop.f32.mrf.mxu1 }
 0x2e6   : > { %v2243_v18 = vpop.f32.mrf.mxu0  ;;  %v2980_v41 = vpop.f32.mrf.mxu2 }
 0x2e7   : > { %v7505_v12 = vadd.f32 %v2243_v18, %v7381_v24  ;;  %v2981_v23 = vadd.f32 %v2980_v41, %v7428_v26  ;;  %v5128_v26 = vor.u32 %v5734_v33, %v5127_v55  ;;  %v5112_v18 = vor.u32 %v5729_v56, %v5111_v40  ;;  %v4799_v41 = vld [vmem:[#allocation2 + $0x140] sm:$0xf]  ;;  %v5831_v40 = vld [vmem:[%s8226_s5 + $0x208] sm:$0xff] }
 0x2e8   : > { %v5139_v56 = vld [vmem:[#allocation2 + $0x168] sm:$0xf]  ;;  %3941 = vmatpush.bf16.msrb.mxu2 %v5831_v40 }
 0x2e9   : > { %2282 = vmatmul.bf16.gmra.mxu0 %v4788_v2  ;;  %v7510_v17 = vadd.f32 %v3069_v59, %v2981_v23  ;;  %v5663_v2 = vld [vmem:[#allocation2 + $0x148] sm:$0xf0] }
 0x2eb   : > { %3022 = vmatmul.bf16.gmra.mxu2 %v5084_v0 }
 0x2ed   : > { %v3079_v4 = vpop.f32.mrf.mxu3  ;;  %v7515_v30 = vpop.f32.mrf.mxu1 }
 0x2ee   : > { %v2245_v10 = vpop.f32.mrf.mxu0  ;;  %v2983_v24 = vpop.f32.mrf.mxu2 }
 0x2ef   : > { %v7513_v34 = vadd.f32 %v2245_v10, %v7388_v49  ;;  %v2984_v5 = vadd.f32 %v2983_v24, %v7436_v37  ;;  %v4800_v10 = vor.u32 %v5663_v2, %v4799_v41  ;;  %v5093_v37 = vld [vmem:[#allocation2 + $0x114] sm:$0xf0]  ;;  %v5737_v24 = vld [vmem:[#allocation2 + $0x170] sm:$0xf0]  ;;  %v5732_v41 = vld [vmem:[#allocation2 + $0x148] sm:$0xf0] }
 0x2f0   : > { %2953 = vmatmul.bf16.gmra.mxu1 %v5128_v26  ;;  %v5096_v33 = vor.u32 %v5724_v8, %v5093_v37  ;;  %v5815_v37 = vld [vmem:[%s8226_s5 + $0x188] sm:$0xff] }
 0x2f1   : > { %8421 = vst [vmem:[#allocation6_spill] sm:$0xff] %v7513_v34  ;;  %v7518_v59 = vadd.f32 %v3072_v14, %v2984_v5  ;;  %3763 = vmatpush.bf16.msrb.mxu0 %v5815_v37 }
 0x2f2   : > { %3121 = vmatmul.bf16.gmra.mxu3 %v5112_v18  ;;  %v5123_v18 = vld [vmem:[#allocation2 + $0x140] sm:$0xf] }
 0x2f5   : > { %v7520_v50 = vpop.f32.mrf.mxu3  ;;  %v7525_v49 = vpop.f32.mrf.mxu1 }
 0x2f6   : > { %v2248_v1 = vpop.f32.mrf.mxu0  ;;  %v2985_v23 = vpop.f32.mrf.mxu2 }
 0x2f7   : > { %v7523_v0 = vadd.f32 %v2248_v1, %v7398_v28  ;;  %v2986_v55 = vadd.f32 %v2985_v23, %v7443_v61  ;;  %v5823_v28 = vld [vmem:[%s8226_s5 + $0x1c8] sm:$0xff]  ;;  %v5140_v1 = vor.u32 %v5737_v24, %v5139_v56  ;;  %v5124_v23 = vor.u32 %v5732_v41, %v5123_v18  ;;  %v5105_v18 = vld [vmem:[#allocation2 + $0x12c] sm:$0xf0] }
 0x2f8   : > { %3852 = vmatpush.bf16.msrb.mxu1 %v5823_v28 }
 0x2f9   : > { %8422 = vst [vmem:[#allocation7_spill] sm:$0xff] %v7523_v0  ;;  %2287 = vmatmul.bf16.gmra.mxu0 %v4800_v10  ;;  %v7528_v14 = vadd.f32 %v3074_v35, %v2986_v55  ;;  %v5822_v55 = vld [vmem:[%s8226_s5 + $0x1c0] sm:$0xff] }
 0x2fb   : > { %3027 = vmatmul.bf16.gmra.mxu2 %v5096_v33  ;;  %v5666_v33 = vld [vmem:[#allocation2 + $0x160] sm:$0xf0] }
 0x2fc   : > { %3853 = vmatpush.bf16.msrb.mxu1 %v5822_v55 }
 0x2fd   : > { %v3084_v26 = vpop.f32.mrf.mxu3  ;;  %v7539_v35 = vpop.f32.mrf.mxu1 }
 0x2fe   : > { %v2250_v5 = vpop.f32.mrf.mxu0  ;;  %v2988_v61 = vpop.f32.mrf.mxu2 }
 0x2ff   : > { %v7537_v8 = vadd.f32 %v2250_v5, %v7402_v60  ;;  %v2989_v2 = vadd.f32 %v2988_v61, %v7453_v16  ;;  %v4811_v60 = vld [vmem:[#allocation2 + $0x158] sm:$0xf]  ;;  %v5727_v5 = vld [vmem:[#allocation2 + $0x124] sm:$0xf] }
 0x300   : > { %2958 = vmatmul.bf16.gmra.mxu1 %v5140_v1  ;;  %v4812_v24 = vor.u32 %v5666_v33, %v4811_v60  ;;  %v5814_v1 = vld [vmem:[%s8226_s5 + $0x180] sm:$0xff] }
 0x301   : > { %8423 = vst [vmem:[#allocation26_spill] sm:$0xff] %v7537_v8  ;;  %v7542_v10 = vadd.f32 %v3077_v44, %v2989_v2  ;;  %v5108_v2 = vor.u32 %v5727_v5, %v5105_v18  ;;  %3764 = vmatpush.bf16.msrb.mxu0 %v5814_v1  ;;  %v5735_v60 = vld [vmem:[#allocation2 + $0x160] sm:$0xf0]  ;;  %v4823_v18 = vld [vmem:[#allocation2 + $0x170] sm:$0xf] }
 0x302   : > { %3126 = vmatmul.bf16.gmra.mxu3 %v5124_v23  ;;  %v5151_v23 = vld [vmem:[#allocation2 + $0x180] sm:$0xf] }
 0x305   : > { %v3087_v16 = vpop.f32.mrf.mxu3  ;;  %v7553_v56 = vpop.f32.mrf.mxu1 }
 0x306   : > { %v2253_v40 = vpop.f32.mrf.mxu0  ;;  %v2990_v28 = vpop.f32.mrf.mxu2 }
 0x307   : > { %v7551_v44 = vadd.f32 %v2253_v40, %v7406_v57  ;;  %v2991_v41 = vadd.f32 %v2990_v28, %v7469_v19  ;;  %v5740_v57 = vld [vmem:[#allocation2 + $0x188] sm:$0xf0]  ;;  %v5135_v40 = vld [vmem:[#allocation2 + $0x158] sm:$0xf] }
 0x308   : > { %v5152_v28 = vor.u32 %v5740_v57, %v5151_v23 }
 0x309   : > { %8424 = vst [vmem:[#allocation8_spill] sm:$0xff] %v7551_v44  ;;  %2292 = vmatmul.bf16.gmra.mxu0 %v4812_v24  ;;  %v7556_v61 = vadd.f32 %v3079_v4, %v2991_v41  ;;  %v5136_v24 = vor.u32 %v5735_v60, %v5135_v40  ;;  %v5669_v41 = vld [vmem:[#allocation2 + $0x178] sm:$0xf0]  ;;  %v5830_v40 = vld [vmem:[%s8226_s5 + $0x200] sm:$0xff]  ;;  %v5766_v60 = vld [vmem:[#allocation2 + $0x34] sm:$0xf] }
 0x30a   : > { %3942 = vmatpush.bf16.msrb.mxu2 %v5830_v40 }
 0x30b   : > { %3032 = vmatmul.bf16.gmra.mxu2 %v5108_v2 }
 0x30d   : > { %v3089_v55 = vpop.f32.mrf.mxu3  ;;  %v7564_v19 = vpop.f32.mrf.mxu1 }
 0x30e   : > { %v2255_v37 = vpop.f32.mrf.mxu0  ;;  %v2993_v33 = vpop.f32.mrf.mxu2 }
 0x30f   : > { %v7562_v44 = vadd.f32 %v2255_v37, %v7413_v20  ;;  %v2994_v4 = vadd.f32 %v2993_v33, %v7476_v58  ;;  %v4824_v37 = vor.u32 %v5669_v41, %v4823_v18  ;;  %v5117_v58 = vld [vmem:[#allocation2 + $0x144] sm:$0xf0]  ;;  %v5309_v33 = vld [vmem:[#allocation2 + $0x3c] sm:$0xf0] }
 0x310   : > { %2963 = vmatmul.bf16.gmra.mxu1 %v5152_v28  ;;  %v5147_v28 = vld [vmem:[#allocation2 + $0x170] sm:$0xf] }
 0x311   : > { %8425 = vst [vmem:[#allocation4_spill] sm:$0xff] %v7562_v44  ;;  %v7568_v5 = vadd.f32 %v7520_v50, %v2994_v4  ;;  %v5730_v44 = vld [vmem:[#allocation2 + $0x13c] sm:$0xf] }
 0x312   : > { %3131 = vmatmul.bf16.gmra.mxu3 %v5136_v24  ;;  %v5120_v57 = vor.u32 %v5730_v44, %v5117_v58  ;;  %v5738_v24 = vld [vmem:[#allocation2 + $0x178] sm:$0xf0] }
 0x313   : > { %v5148_v44 = vor.u32 %v5738_v24, %v5147_v28  ;;  %v5767_v58 = vld [vmem:[#allocation2 + $0x38] sm:$0xf0]  ;;  %v5321_v28 = vld [vmem:[#allocation2 + $0x54] sm:$0xf0] }
 0x315   : > { %v3092_v1 = vpop.f32.mrf.mxu3  ;;  %v7573_v20 = vpop.f32.mrf.mxu1 }
 0x316   : > { %v2258_v2 = vpop.f32.mrf.mxu0  ;;  %v2995_v8 = vpop.f32.mrf.mxu2 }
 0x317   : > { %v7571_v0 = vadd.f32 %v2258_v2, %v7354_v21  ;;  %v2996_v23 = vadd.f32 %v2995_v8, %v7483_v27  ;;  %v5312_v8 = vor.u32 %v5766_v60, %v5309_v33  ;;  %v5769_v33 = vld [vmem:[#allocation2 + $0x4c] sm:$0xf] }
 0x319   : > { %8426 = vst [vmem:[#allocation16_spill] sm:$0xff] %v7571_v0  ;;  %2297 = vmatmul.bf16.gmra.mxu0 %v4824_v37  ;;  %v7576_v50 = vadd.f32 %v3084_v26, %v2996_v23  ;;  %v5307_v37 = vld [vmem:[#allocation2 + $0x30] sm:$0xf] }
 0x31a   : > { %v5308_v34 = vor.u32 %v5767_v58, %v5307_v37  ;;  %v5770_v58 = vld [vmem:[#allocation2 + $0x50] sm:$0xf0] }
 0x31b   : > { %3037 = vmatmul.bf16.gmra.mxu2 %v5120_v57 }
 0x31d   : > { %v3094_v4 = vpop.f32.mrf.mxu3  ;;  %v7584_v27 = vpop.f32.mrf.mxu1 }
 0x31e   : > { %v2260_v21 = vpop.f32.mrf.mxu0  ;;  %v2998_v18 = vpop.f32.mrf.mxu2 }
 0x31f   : > { %v7582_v41 = vadd.f32 %v2260_v21, %v7358_v7  ;;  %v2999_v26 = vadd.f32 %v2998_v18, %v7493_v32  ;;  %v5733_v21 = vld [vmem:[#allocation2 + $0x154] sm:$0xf] }
 0x320   : > { %3854 = vmatmul.bf16.vlgmr.msrb.gmra.mxu1 %v5312_v8 }
 0x321   : > { %8427 = vst [vmem:[#allocation15_spill] sm:$0xff] %v7582_v41  ;;  %v7587_v2 = vadd.f32 %v3087_v16, %v2999_v26  ;;  %v5129_v41 = vld [vmem:[#allocation2 + $0x15c] sm:$0xf0]  ;;  %v5159_v26 = vld [vmem:[#allocation2 + $0x188] sm:$0xf] }
 0x322   : > { %3136 = vmatmul.bf16.gmra.mxu3 %v5148_v44  ;;  %v5132_v60 = vor.u32 %v5733_v21, %v5129_v41  ;;  %v5319_v41 = vld [vmem:[#allocation2 + $0x48] sm:$0xf] }
 0x325   : > { %v3097_v57 = vpop.f32.mrf.mxu3  ;;  %v7592_v7 = vpop.f32.mrf.mxu1 }
 0x326   : > { %v2263_v23 = vpop.f32.mrf.mxu0  ;;  %v3000_v0 = vpop.f32.mrf.mxu2 }
 0x327   : > { %v7590_v40 = vadd.f32 %v2263_v23, %v7365_v6  ;;  %v3001_v32 = vadd.f32 %v3000_v0, %v7507_v9  ;;  %v5741_v6 = vld [vmem:[#allocation2 + $0x190] sm:$0xf0] }
 0x328   : > { %v5160_v0 = vor.u32 %v5741_v6, %v5159_v26  ;;  %v4156_v6 = vld [vmem:[%s7613_s16] sm:$0xff] }
 0x329   : > { %8428 = vst [vmem:[#allocation20_spill] sm:$0xff] %v7590_v40  ;;  %3765 = vmatmul.bf16.vlgmr.msrb.gmra.mxu0 %v5308_v34  ;;  %v7595_v16 = vadd.f32 %v3089_v55, %v3001_v32  ;;  %v5324_v34 = vor.u32 %v5769_v33, %v5321_v28  ;;  %v5736_v32 = vld [vmem:[#allocation2 + $0x16c] sm:$0xf]  ;;  %v5320_v33 = vor.u32 %v5770_v58, %v5319_v41 }
 0x32b   : > { %3042 = vmatmul.bf16.gmra.mxu2 %v5132_v60  ;;  %v5141_v60 = vld [vmem:[#allocation2 + $0x174] sm:$0xf0] }
 0x32c   : > { %v5144_v26 = vor.u32 %v5736_v32, %v5141_v60  ;;  %v5331_v60 = vld [vmem:[#allocation2 + $0x60] sm:$0xf] }
 0x32d   : > { %v3099_v18 = vpop.f32.mrf.mxu3  ;;  %v7600_v37 = vpop.f32.mrf.mxu1 }
 0x32e   : > { %v2265_v24 = vpop.f32.mrf.mxu0  ;;  %v3003_v8 = vpop.f32.mrf.mxu2 }
 0x32f   : > { %v7598_v44 = vadd.f32 %v2265_v24, %v7375_v38  ;;  %v3004_v9 = vadd.f32 %v3003_v8, %v7515_v30  ;;  %v4157_v8 = vld [vmem:[%s7613_s16 + $0x8] sm:$0xff] }
 0x330   : > { %3859 = vmatmul.bf16.gmra.mxu1 %v5324_v34  ;;  %v4189_v34 = vpack.c.bf16 %v4157_v8, %v4157_v8 }
 0x331   : > { %8429 = vst [vmem:[#allocation19_spill] sm:$0xff] %v7598_v44  ;;  %v7603_v55 = vadd.f32 %v3092_v1, %v3004_v9  ;;  %v4188_v9 = vpack.c.bf16 %v4156_v6, %v4156_v6  ;;  %v5333_v44 = vld [vmem:[#allocation2 + $0x6c] sm:$0xf0] }
 0x332   : > { %3141 = vmatmul.bf16.gmra.mxu3 %v5160_v0  ;;  %v5772_v0 = vld [vmem:[#allocation2 + $0x64] sm:$0xf] }
 0x333   : > { %8430 = vst [vmem:[#allocation17_spill] sm:$0xff] %v7603_v55 }
 0x335   : > { %v7606_v21 = vpop.f32.mrf.mxu3  ;;  %v7618_v1 = vpop.f32.mrf.mxu1 }
 0x336   : > { %v2268_v23 = vpop.f32.mrf.mxu0  ;;  %v3005_v38 = vpop.f32.mrf.mxu2 }
 0x337   : > { %v7616_v30 = vadd.f32 %v2268_v23, %v7379_v52  ;;  %v3006_v28 = vadd.f32 %v3005_v38, %v7525_v49  ;;  %v4256_v52 = vunpack.c.l.b16 %v4188_v9  ;;  %v4257_v23 = vunpack.c.l.b16 %v4189_v34  ;;  %v4158_v34 = vld [vmem:[%s7613_s16 + $0x10] sm:$0xff] }
 0x338   : > { %v5336_v38 = vor.u32 %v5772_v0, %v5333_v44  ;;  %v5153_v44 = vld [vmem:[#allocation2 + $0x18c] sm:$0xf0]  ;;  %v4159_v0 = vld [vmem:[%s7613_s16 + $0x18] sm:$0xff] }
 0x339   : > { %8431 = vst [vmem:[#allocation21_spill] sm:$0xff] %v7616_v30  ;;  %3770 = vmatmul.bf16.gmra.mxu0 %v5320_v33  ;;  %v7621_v24 = vadd.f32 %v3094_v4, %v3006_v28  ;;  %v4288_v4 = vpack.c.b16 %v4257_v23, %v4256_v52  ;;  %v5773_v33 = vld [vmem:[#allocation2 + $0x68] sm:$0xf0]  ;;  %v4190_v52 = vpack.c.bf16 %v4158_v34, %v4158_v34 }
 0x33a   : > { %v4191_v23 = vpack.c.bf16 %v4159_v0, %v4159_v0 }
 0x33b   : > { %3047 = vmatmul.bf16.gmra.mxu2 %v5144_v26 }
 0x33d   : > { %v3104_v40 = vpop.f32.mrf.mxu3  ;;  %v7628_v49 = vpop.f32.mrf.mxu1 }
 0x33e   : > { %v2270_v30 = vpop.f32.mrf.mxu0  ;;  %v3008_v55 = vpop.f32.mrf.mxu2 }
 0x33f   : > { %v7626_v41 = vadd.f32 %v2270_v30, %v7383_v46  ;;  %v3009_v58 = vadd.f32 %v3008_v55, %v7539_v35  ;;  %v5739_v35 = vld [vmem:[#allocation2 + $0x184] sm:$0xf] }
 0x340   : > { %3864 = vmatmul.bf16.gmra.mxu1 %v5336_v38  ;;  %v5156_v9 = vor.u32 %v5739_v35, %v5153_v44  ;;  %v4259_v38 = vunpack.c.l.b16 %v4191_v23 }
 0x341   : > { %8432 = vst [vmem:[#allocation9_spill] sm:$0xff] %v7626_v41  ;;  %v7631_v32 = vadd.f32 %v3097_v57, %v3009_v58  ;;  %v5332_v57 = vor.u32 %v5773_v33, %v5331_v60  ;;  %v5345_v58 = vld [vmem:[#allocation2 + $0x84] sm:$0xf0]  ;;  %v7653_v33 = vadd.f32 %v7496_v45, %v7426_v39 }
 0x342   : > { %5601 = vmatmul.msk.bf16.vlgmr.msrb.gmra.mxu3 %vm627_vm6, %v4288_v4  ;;  %v5775_v4 = vld [vmem:[#allocation2 + $0x7c] sm:$0xf] }
 0x343   : > { %v5348_v35 = vor.u32 %v5775_v4, %v5345_v58  ;;  %v4160_v58 = vld [vmem:[%s7613_s16 + $0x20] sm:$0xff] }
 0x345   : > { %v7634_v26 = vpop.f32.mrf.mxu3  ;;  %v7639_v6 = vpop.f32.mrf.mxu1 }
 0x346   : > { %v2273_v28 = vpop.f32.mrf.mxu0  ;;  %v3010_v46 = vpop.f32.mrf.mxu2 }
 0x347   : > { %v7637_v30 = vadd.f32 %v2273_v28, %v7390_v47  ;;  %v3011_v55 = vadd.f32 %v3010_v46, %v7553_v56  ;;  %v4258_v47 = vunpack.c.l.b16 %v4190_v52  ;;  %v7670_v52 = vadd.f32 %v7510_v17, %v7434_v63 }
 0x349   : > { %8433 = vst [vmem:[#allocation12_spill] sm:$0xff] %v7637_v30  ;;  %3775 = vmatmul.bf16.gmra.mxu0 %v5332_v57  ;;  %v7642_v8 = vadd.f32 %v3099_v18, %v3011_v55  ;;  %v4289_v18 = vpack.c.b16 %v4259_v38, %v4258_v47  ;;  %v5343_v57 = vld [vmem:[#allocation2 + $0x78] sm:$0xf]  ;;  %v4161_v47 = vld [vmem:[%s7613_s16 + $0x28] sm:$0xff]  ;;  %v4192_v38 = vpack.c.bf16 %v4160_v58, %v4160_v58 }
 0x34b   : > { %3052 = vmatmul.bf16.gmra.mxu2 %v5156_v9 }
 0x34d   : > { %v3109_v30 = vpop.f32.mrf.mxu3  ;;  %v7649_v56 = vpop.f32.mrf.mxu1 }
 0x34e   : > { %v2275_v28 = vpop.f32.mrf.mxu0  ;;  %v3013_v41 = vpop.f32.mrf.mxu2 }
 0x34f   : > { %v7647_v60 = vadd.f32 %v2275_v28, %v7400_v62  ;;  %v3014_v46 = vadd.f32 %v3013_v41, %v7564_v19  ;;  %v5776_v62 = vld [vmem:[#allocation2 + $0x80] sm:$0xf0]  ;;  %v5315_v41 = vld [vmem:[#allocation2 + $0x38] sm:$0xf]  ;;  %v5778_v28 = vld [vmem:[#allocation2 + $0x94] sm:$0xf] }
 0x350   : > { %3869 = vmatmul.bf16.gmra.mxu1 %v5348_v35  ;;  %v5344_v19 = vor.u32 %v5776_v62, %v5343_v57 }
 0x351   : > { %v7657_v44 = vadd.f32 %v7606_v21, %v3014_v46  ;;  %v5768_v21 = vld [vmem:[#allocation2 + $0x40] sm:$0xf0]  ;;  %v4260_v46 = vunpack.c.l.b16 %v4192_v38 }
 0x352   : > { %5602 = vmatmul.msk.bf16.gmra.mxu3 %vm627_vm6, %v4289_v18  ;;  %v5316_v4 = vor.u32 %v5768_v21, %v5315_v41  ;;  %v5357_v18 = vld [vmem:[#allocation2 + $0x9c] sm:$0xf0]  ;;  %v5779_v21 = vld [vmem:[#allocation2 + $0x98] sm:$0xf0] }
 0x355   : > { %v7660_v9 = vpop.f32.mrf.mxu3  ;;  %v7665_v45 = vpop.f32.mrf.mxu1 }
 0x356   : > { %v2278_v55 = vpop.f32.mrf.mxu0  ;;  %v3015_v34 = vpop.f32.mrf.mxu2 }
 0x357   : > { %v7663_v39 = vadd.f32 %v2278_v55, %v7404_v11  ;;  %v3016_v0 = vadd.f32 %v3015_v34, %v7573_v20  ;;  %v4193_v11 = vpack.c.bf16 %v4161_v47, %v4161_v47  ;;  %v5360_v34 = vor.u32 %v5778_v28, %v5357_v18  ;;  %v4162_v18 = vld [vmem:[%s7613_s16 + $0x30] sm:$0xff] }
 0x359   : > { %3780 = vmatmul.bf16.gmra.mxu0 %v5344_v19  ;;  %v7672_v23 = vadd.f32 %v3104_v40, %v3016_v0  ;;  %v4261_v35 = vunpack.c.l.b16 %v4193_v11  ;;  %v7684_v19 = vadd.f32 %v7518_v59, %v7441_v36  ;;  %v5327_v59 = vld [vmem:[#allocation2 + $0x50] sm:$0xf] }
 0x35b   : > { %3943 = vmatmul.bf16.vlgmr.msrb.gmra.mxu2 %v5316_v4  ;;  %v4290_v17 = vpack.c.b16 %v4261_v35, %v4260_v46  ;;  %v4163_v46 = vld [vmem:[%s7613_s16 + $0x38] sm:$0xff]  ;;  %v4194_v35 = vpack.c.bf16 %v4162_v18, %v4162_v18 }
 0x35d   : > { %v3114_v62 = vpop.f32.mrf.mxu3  ;;  %v7679_v63 = vpop.f32.mrf.mxu1 }
 0x35e   : > { %v2280_v57 = vpop.f32.mrf.mxu0  ;;  %v3018_v20 = vpop.f32.mrf.mxu2 }
 0x35f   : > { %v7677_v55 = vadd.f32 %v2280_v57, %v7408_v53  ;;  %v3019_v40 = vadd.f32 %v3018_v20, %v7584_v27  ;;  %v5355_v53 = vld [vmem:[#allocation2 + $0x90] sm:$0xf]  ;;  %v4195_v57 = vpack.c.bf16 %v4163_v46, %v4163_v46  ;;  %v7704_v20 = vadd.f32 %v7528_v14, %v7451_v15 }
 0x360   : > { %3874 = vmatmul.bf16.gmra.mxu1 %v5360_v34  ;;  %v5356_v36 = vor.u32 %v5779_v21, %v5355_v53  ;;  %v7718_v14 = vadd.f32 %v7542_v10, %v7467_v43 }
 0x361   : > { %v7687_v41 = vadd.f32 %v7634_v26, %v3019_v40  ;;  %v5771_v26 = vld [vmem:[#allocation2 + $0x58] sm:$0xf0]  ;;  %v4262_v40 = vunpack.c.l.b16 %v4194_v35  ;;  %v4263_v34 = vunpack.c.l.b16 %v4195_v57  ;;  %v5339_v35 = vld [vmem:[#allocation2 + $0x68] sm:$0xf]  ;;  %v5774_v57 = vld [vmem:[#allocation2 + $0x70] sm:$0xf0] }
 0x362   : > { %5603 = vmatmul.msk.bf16.gmra.mxu3 %vm627_vm6, %v4290_v17  ;;  %v5328_v28 = vor.u32 %v5771_v26, %v5327_v59  ;;  %v5369_v17 = vld [vmem:[#allocation2 + $0xb4] sm:$0xf0]  ;;  %v5782_v26 = vld [vmem:[#allocation2 + $0xb0] sm:$0xf0]  ;;  %v5340_v10 = vor.u32 %v5774_v57, %v5339_v35 }
 0x365   : > { %v7690_v4 = vpop.f32.mrf.mxu3  ;;  %v7695_v47 = vpop.f32.mrf.mxu1 }
 0x366   : > { %v2283_v0 = vpop.f32.mrf.mxu0  ;;  %v3020_v58 = vpop.f32.mrf.mxu2 }
 0x367   : > { %v7693_v27 = vadd.f32 %v2283_v0, %v7417_v29  ;;  %v3021_v38 = vadd.f32 %v3020_v58, %v7592_v7  ;;  %v5781_v29 = vld [vmem:[#allocation2 + $0xac] sm:$0xf]  ;;  %v4291_v58 = vpack.c.b16 %v4263_v34, %v4262_v40 }
 0x368   : > { %v5372_v59 = vor.u32 %v5781_v29, %v5369_v17  ;;  %v4164_v17 = vld [vmem:[%s7613_s16 + $0x40] sm:$0xff]  ;;  %v4165_v40 = vld [vmem:[%s7613_s16 + $0x48] sm:$0xff] }
 0x369   : > { %3785 = vmatmul.bf16.gmra.mxu0 %v5356_v36  ;;  %v7698_v11 = vadd.f32 %v3109_v30, %v3021_v38  ;;  %v4196_v34 = vpack.c.bf16 %v4164_v17, %v4164_v17 }
 0x36b   : > { %3948 = vmatmul.bf16.gmra.mxu2 %v5328_v28 }
 0x36d   : > { %v3119_v21 = vpop.f32.mrf.mxu3  ;;  %v7709_v0 = vpop.f32.mrf.mxu1 }
 0x36e   : > { %v2285_v53 = vpop.f32.mrf.mxu0  ;;  %v3023_v7 = vpop.f32.mrf.mxu2 }
 0x36f   : > { %v7707_v30 = vadd.f32 %v2285_v53, %v7430_v54  ;;  %v3024_v36 = vadd.f32 %v3023_v7, %v7600_v37  ;;  %v5367_v54 = vld [vmem:[#allocation2 + $0xa8] sm:$0xf]  ;;  %v4197_v53 = vpack.c.bf16 %v4165_v40, %v4165_v40  ;;  %v5784_v7 = vld [vmem:[#allocation2 + $0xc4] sm:$0xf] }
 0x370   : > { %3879 = vmatmul.bf16.gmra.mxu1 %v5372_v59  ;;  %v5368_v46 = vor.u32 %v5782_v26, %v5367_v54  ;;  %v7734_v59 = vadd.f32 %v7556_v61, %v7474_v51  ;;  %v5379_v51 = vld [vmem:[#allocation2 + $0xc0] sm:$0xf]  ;;  %v5785_v61 = vld [vmem:[#allocation2 + $0xc8] sm:$0xf0] }
 0x371   : > { %v7713_v15 = vadd.f32 %v7660_v9, %v3024_v36  ;;  %v4265_v36 = vunpack.c.l.b16 %v4197_v53  ;;  %v5380_v40 = vor.u32 %v5785_v61, %v5379_v51  ;;  %v5777_v53 = vld [vmem:[#allocation2 + $0x88] sm:$0xf0] }
 0x372   : > { %5604 = vmatmul.msk.bf16.gmra.mxu3 %vm627_vm6, %v4291_v58  ;;  %v5381_v58 = vld [vmem:[#allocation2 + $0xcc] sm:$0xf0] }
 0x373   : > { %v5384_v35 = vor.u32 %v5784_v7, %v5381_v58 }
 0x375   : > { %v7720_v28 = vpop.f32.mrf.mxu3  ;;  %v7725_v9 = vpop.f32.mrf.mxu1 }
 0x376   : > { %v2288_v38 = vpop.f32.mrf.mxu0  ;;  %v3025_v18 = vpop.f32.mrf.mxu2 }
 0x377   : > { %v7723_v37 = vadd.f32 %v2288_v38, %v7438_v3  ;;  %v3026_v29 = vadd.f32 %v3025_v18, %v7618_v1  ;;  %v4264_v3 = vunpack.c.l.b16 %v4196_v34  ;;  %v5351_v34 = vld [vmem:[#allocation2 + $0x80] sm:$0xf] }
 0x379   : > { %3790 = vmatmul.bf16.gmra.mxu0 %v5368_v46  ;;  %v7728_v43 = vadd.f32 %v3114_v62, %v3026_v29  ;;  %v4292_v18 = vpack.c.b16 %v4265_v36, %v4264_v3  ;;  %v5352_v3 = vor.u32 %v5777_v53, %v5351_v34 }
 0x37b   : > { %3953 = vmatmul.bf16.gmra.mxu2 %v5340_v10 }
 0x37d   : > { %v3124_v26 = vpop.f32.mrf.mxu3  ;;  %v7739_v38 = vpop.f32.mrf.mxu1 }
 0x37e   : > { %v2290_v54 = vpop.f32.mrf.mxu0  ;;  %v3028_v1 = vpop.f32.mrf.mxu2 }
 0x37f   : > { %v7737_v62 = vadd.f32 %v2290_v54, %v7445_v42  ;;  %v3029_v46 = vadd.f32 %v3028_v1, %v7628_v49  ;;  %v7748_v42 = vadd.f32 %v7568_v5, %v7481_v13  ;;  %v4166_v13 = vld [vmem:[%s7613_s16 + $0x50] sm:$0xff]  ;;  %v4167_v5 = vld [vmem:[%s7613_s16 + $0x58] sm:$0xff] }
 0x380   : > { %3884 = vmatmul.bf16.gmra.mxu1 %v5384_v35  ;;  %v4198_v36 = vpack.c.bf16 %v4166_v13, %v4166_v13  ;;  %v4199_v54 = vpack.c.bf16 %v4167_v5, %v4167_v5  ;;  %v5787_v1 = vld [vmem:[#allocation2 + $0xdc] sm:$0xf]  ;;  %v7764_v35 = vadd.f32 %v7576_v50, %v7491_v22  ;;  %v5391_v22 = vld [vmem:[#allocation2 + $0xd8] sm:$0xf]  ;;  %v5788_v50 = vld [vmem:[#allocation2 + $0xe0] sm:$0xf0] }
 0x381   : > { %v7743_v57 = vadd.f32 %v7690_v4, %v3029_v46 }
 0x382   : > { %5605 = vmatmul.msk.bf16.gmra.mxu3 %vm627_vm6, %v4292_v18  ;;  %v5393_v18 = vld [vmem:[#allocation2 + $0xe4] sm:$0xf0]  ;;  %v4267_v46 = vunpack.c.l.b16 %v4199_v54  ;;  %v5780_v54 = vld [vmem:[#allocation2 + $0xa0] sm:$0xf0] }
 0x383   : > { %v5396_v34 = vor.u32 %v5787_v1, %v5393_v18 }
 0x385   : > { %v7750_v10 = vpop.f32.mrf.mxu3  ;;  %v7755_v4 = vpop.f32.mrf.mxu1 }
 0x386   : > { %v2293_v29 = vpop.f32.mrf.mxu0  ;;  %v3030_v17 = vpop.f32.mrf.mxu2 }
 0x387   : > { %v7753_v49 = vadd.f32 %v2293_v29, %v7455_v31  ;;  %v3031_v7 = vadd.f32 %v3030_v17, %v7639_v6  ;;  %v4266_v31 = vunpack.c.l.b16 %v4198_v36  ;;  %v5363_v36 = vld [vmem:[#allocation2 + $0x98] sm:$0xf] }
 0x389   : > { %8434 = vst [vmem:[#allocation11_spill] sm:$0xff] %v7753_v49  ;;  %3795 = vmatmul.bf16.gmra.mxu0 %v5380_v40  ;;  %v7758_v58 = vadd.f32 %v3119_v21, %v3031_v7  ;;  %v4293_v17 = vpack.c.b16 %v4267_v46, %v4266_v31  ;;  %v5364_v31 = vor.u32 %v5780_v54, %v5363_v36  ;;  %v4168_v46 = vld [vmem:[%s7613_s16 + $0x60] sm:$0xff] }
 0x38b   : > { %3958 = vmatmul.bf16.gmra.mxu2 %v5352_v3 }
 0x38d   : > { %v3129_v61 = vpop.f32.mrf.mxu3  ;;  %v7769_v29 = vpop.f32.mrf.mxu1 }
 0x38e   : > { %v2295_v51 = vpop.f32.mrf.mxu0  ;;  %v3033_v6 = vpop.f32.mrf.mxu2 }
 0x38f   : > { %v7767_v21 = vadd.f32 %v2295_v51, %v7471_v25  ;;  %v3034_v40 = vadd.f32 %v3033_v6, %v7649_v56  ;;  %v7778_v25 = vadd.f32 %v7587_v2, %v7505_v12  ;;  %v4169_v12 = vld [vmem:[%s7613_s16 + $0x68] sm:$0xff]  ;;  %v4200_v2 = vpack.c.bf16 %v4168_v46, %v4168_v46  ;;  %v5790_v6 = vld [vmem:[#allocation2 + $0xf4] sm:$0xf]  ;;  %v5791_v46 = vld [vmem:[#allocation2 + $0xf8] sm:$0xf0] }
 0x390   : > { %3889 = vmatmul.bf16.gmra.mxu1 %v5396_v34  ;;  %v4201_v51 = vpack.c.bf16 %v4169_v12, %v4169_v12  ;;  %v8437_v34 = vld [vmem:[#allocation6_spill] sm:$0xff]  ;;  %v8440_v12 = vld [vmem:[#allocation7_spill] sm:$0xff] }
 0x391   : > { %8435 = vst [vmem:[#allocation13_spill] sm:$0xff] %v7767_v21  ;;  %v7773_v53 = vadd.f32 %v7720_v28, %v3034_v40  ;;  %v5392_v28 = vor.u32 %v5788_v50, %v5391_v22  ;;  %v7792_v22 = vadd.f32 %v7595_v16, %v8437_v34  ;;  %v5403_v16 = vld [vmem:[#allocation2 + $0xf0] sm:$0xf] }
 0x392   : > { %5606 = vmatmul.msk.bf16.gmra.mxu3 %vm627_vm6, %v4293_v17  ;;  %v5405_v17 = vld [vmem:[#allocation2 + $0xfc] sm:$0xf0]  ;;  %v4269_v40 = vunpack.c.l.b16 %v4201_v51 }
 0x395   : > { %v3132_v3 = vpop.f32.mrf.mxu3  ;;  %v7783_v5 = vpop.f32.mrf.mxu1 }
 0x396   : > { %v2298_v7 = vpop.f32.mrf.mxu0  ;;  %v3035_v13 = vpop.f32.mrf.mxu2 }
 0x397   : > { %v7781_v56 = vadd.f32 %v2298_v7, %v7478_v48  ;;  %v3036_v1 = vadd.f32 %v3035_v13, %v7665_v45  ;;  %v4268_v48 = vunpack.c.l.b16 %v4200_v2  ;;  %v8438_v13 = vld [vmem:[#allocation5_spill] sm:$0xff] }
 0x398   : > { %v8441_v2 = vld [vmem:[#allocation17_spill] sm:$0xff] }
 0x399   : > { %8436 = vst [vmem:[#allocation10_spill] sm:$0xff] %v7781_v56  ;;  %3800 = vmatmul.bf16.gmra.mxu0 %v5392_v28  ;;  %v7786_v18 = vadd.f32 %v3124_v26, %v3036_v1  ;;  %v4294_v36 = vpack.c.b16 %v4269_v40, %v4268_v48  ;;  %v5408_v1 = vor.u32 %v5790_v6, %v5405_v17  ;;  %v5375_v6 = vld [vmem:[#allocation2 + $0xb0] sm:$0xf]  ;;  %v5783_v17 = vld [vmem:[#allocation2 + $0xb8] sm:$0xf0] }
 0x39a   : > { %v7806_v51 = vadd.f32 %v8441_v2, %v8440_v12  ;;  %v5793_v2 = vld [vmem:[#allocation2 + $0x10c] sm:$0xf] }
 0x39b   : > { %3963 = vmatmul.bf16.gmra.mxu2 %v5364_v31 }
 0x39c   : > { %8442 = vst [vmem:[#allocation24_spill] sm:$0xff] %v7806_v51 }
 0x39d   : > { %v3134_v7 = vpop.f32.mrf.mxu3  ;;  %v7797_v28 = vpop.f32.mrf.mxu1 }
 0x39e   : > { %v2300_v50 = vpop.f32.mrf.mxu0  ;;  %v3038_v45 = vpop.f32.mrf.mxu2 }
 0x39f   : > { %v7795_v26 = vadd.f32 %v2300_v50, %v8438_v13  ;;  %v3039_v54 = vadd.f32 %v3038_v45, %v7679_v63  ;;  %v5404_v63 = vor.u32 %v5791_v46, %v5403_v16  ;;  %v5376_v13 = vor.u32 %v5783_v17, %v5375_v6  ;;  %v8443_v16 = vld [vmem:[#allocation26_spill] sm:$0xff] }
 0x3a0   : > { %3894 = vmatmul.bf16.gmra.mxu1 %v5408_v1  ;;  %v7819_v46 = vadd.f32 %v7621_v24, %v8443_v16  ;;  %v5794_v24 = vld [vmem:[#allocation2 + $0x110] sm:$0xf0] }
 0x3a1   : > { %8439 = vst [vmem:[#allocation14_spill] sm:$0xff] %v7795_v26  ;;  %v7801_v31 = vadd.f32 %v7750_v10, %v3039_v54  ;;  %v4171_v54 = vld [vmem:[%s7613_s16 + $0x78] sm:$0xff] }
 0x3a2   : > { %5607 = vmatmul.msk.bf16.gmra.mxu3 %vm627_vm6, %v4294_v36  ;;  %v4170_v36 = vld [vmem:[%s7613_s16 + $0x70] sm:$0xff]  ;;  %v4203_v12 = vpack.c.bf16 %v4171_v54, %v4171_v54  ;;  %v5417_v26 = vld [vmem:[#allocation2 + $0x114] sm:$0xf0]  ;;  %8444 = vst [vmem:[#allocation23_spill] sm:$0xff] %v7819_v46 }
 0x3a3   : > { %v4202_v1 = vpack.c.bf16 %v4170_v36, %v4170_v36  ;;  %v5420_v17 = vor.u32 %v5793_v2, %v5417_v26  ;;  %v5415_v36 = vld [vmem:[#allocation2 + $0x108] sm:$0xf]  ;;  %v8445_v54 = vld [vmem:[#allocation8_spill] sm:$0xff] }
 0x3a4   : > { %v4271_v21 = vunpack.c.l.b16 %v4203_v12  ;;  %v5786_v26 = vld [vmem:[#allocation2 + $0xd0] sm:$0xf0] }
 0x3a5   : > { %v3137_v48 = vpop.f32.mrf.mxu3  ;;  %v7811_v50 = vpop.f32.mrf.mxu1  ;;  %v4270_v56 = vunpack.c.l.b16 %v4202_v1  ;;  %v7831_v1 = vadd.f32 %v7631_v32, %v8445_v54  ;;  %v5796_v54 = vld [vmem:[#allocation2 + $0x124] sm:$0xf] }
 0x3a6   : > { %v7808_v34 = vpop.f32.mrf.mxu0  ;;  %v3040_v40 = vpop.f32.mrf.mxu2 }
 0x3a7   : > { %v3041_v10 = vadd.f32 %v3040_v40, %v7695_v47  ;;  %8446 = vst [vmem:[#allocation25_spill] sm:$0xff] %v7831_v1  ;;  %v5429_v1 = vld [vmem:[#allocation2 + $0x12c] sm:$0xf0] }
 0x3a9   : > { %3805 = vmatmul.bf16.gmra.mxu0 %v5404_v63  ;;  %v7813_v45 = vadd.f32 %v3129_v61, %v3041_v10  ;;  %v4295_v61 = vpack.c.b16 %v4271_v21, %v4270_v56  ;;  %v5416_v56 = vor.u32 %v5794_v24, %v5415_v36  ;;  %v8447_v36 = vld [vmem:[#allocation4_spill] sm:$0xff] }
 0x3aa   : > { %v7844_v24 = vadd.f32 %v7642_v8, %v8447_v36 }
 0x3ab   : > { %3968 = vmatmul.bf16.gmra.mxu2 %v5376_v13 }
 0x3ac   : > { %8448 = vst [vmem:[#allocation18_spill] sm:$0xff] %v7844_v24  ;;  %v8454_v24 = vld [vmem:[#allocation20_spill] sm:$0xff] }
 0x3ad   : > { %v3139_v40 = vpop.f32.mrf.mxu3  ;;  %v7826_v13 = vpop.f32.mrf.mxu1 }
 0x3ae   : > { %v7821_v47 = vpop.f32.mrf.mxu0  ;;  %v3043_v63 = vpop.f32.mrf.mxu2 }
 0x3af   : > { %v3044_v6 = vadd.f32 %v3043_v63, %v7709_v0 }
 0x3b0   : > { %3899 = vmatmul.bf16.gmra.mxu1 %v5420_v17 }
 0x3b1   : > { %v7824_v10 = vadd.f32 %v3132_v3, %v3044_v6  ;;  %v5387_v3 = vld [vmem:[#allocation2 + $0xc8] sm:$0xf] }
 0x3b2   : > { %5608 = vmatmul.msk.bf16.gmra.mxu3 %vm627_vm6, %v4295_v61  ;;  %v5388_v63 = vor.u32 %v5786_v26, %v5387_v3  ;;  %v4172_v61 = vld [vmem:[%s7613_s16 + $0x80] sm:$0xff]  ;;  %v4173_v6 = vld [vmem:[%s7613_s16 + $0x88] sm:$0xff]  ;;  %v5432_v26 = vor.u32 %v5796_v54, %v5429_v1 }
 0x3b3   : > { %v4204_v17 = vpack.c.bf16 %v4172_v61, %v4172_v61  ;;  %v4205_v46 = vpack.c.bf16 %v4173_v6, %v4173_v6  ;;  %v5797_v61 = vld [vmem:[#allocation2 + $0x128] sm:$0xf0] }
 0x3b5   : > { %v3142_v21 = vpop.f32.mrf.mxu3  ;;  %v7840_v32 = vpop.f32.mrf.mxu1  ;;  %v4272_v49 = vunpack.c.l.b16 %v4204_v17  ;;  %v4273_v51 = vunpack.c.l.b16 %v4205_v46  ;;  %v8449_v46 = vld [vmem:[#allocation16_spill] sm:$0xff] }
 0x3b6   : > { %v7833_v12 = vpop.f32.mrf.mxu0  ;;  %v3045_v0 = vpop.f32.mrf.mxu2  ;;  %v7854_v6 = vadd.f32 %v7657_v44, %v8449_v46  ;;  %v5799_v44 = vld [vmem:[#allocation2 + $0x13c] sm:$0xf] }
 0x3b7   : > { %v3046_v2 = vadd.f32 %v3045_v0, %v7725_v9 }
 0x3b8   : > { %8450 = vst [vmem:[#allocation22_spill] sm:$0xff] %v7854_v6 }
 0x3b9   : > { %3810 = vmatmul.bf16.gmra.mxu0 %v5416_v56  ;;  %v7836_v16 = vadd.f32 %v3134_v7, %v3046_v2  ;;  %v4296_v56 = vpack.c.b16 %v4273_v51, %v4272_v49  ;;  %v5399_v51 = vld [vmem:[#allocation2 + $0xe0] sm:$0xf] }
 0x3bb   : > { %3973 = vmatmul.bf16.gmra.mxu2 %v5388_v63  ;;  %v5427_v63 = vld [vmem:[#allocation2 + $0x120] sm:$0xf] }
 0x3bd   : > { %v3144_v7 = vpop.f32.mrf.mxu3  ;;  %v7860_v36 = vpop.f32.mrf.mxu1 }
 0x3be   : > { %v7846_v9 = vpop.f32.mrf.mxu0  ;;  %v3048_v0 = vpop.f32.mrf.mxu2 }
 0x3bf   : > { %v3049_v3 = vadd.f32 %v3048_v0, %v7739_v38  ;;  %v5428_v38 = vor.u32 %v5797_v61, %v5427_v63 }
 0x3c0   : > { %3904 = vmatmul.bf16.gmra.mxu1 %v5432_v26 }
 0x3c1   : > { %v7849_v2 = vadd.f32 %v3137_v48, %v3049_v3  ;;  %v5789_v48 = vld [vmem:[#allocation2 + $0xe8] sm:$0xf0] }
 0x3c2   : > { %5609 = vmatmul.msk.bf16.gmra.mxu3 %vm627_vm6, %v4296_v56  ;;  %v5400_v0 = vor.u32 %v5789_v48, %v5399_v51  ;;  %v5441_v56 = vld [vmem:[#allocation2 + $0x144] sm:$0xf0]  ;;  %v4175_v51 = vld [vmem:[%s7613_s16 + $0x98] sm:$0xff] }
 0x3c3   : > { %v8452_v3 = vld [vmem:[#allocation15_spill] sm:$0xff] }
 0x3c4   : > { %v7867_v26 = vadd.f32 %v7672_v23, %v8452_v3  ;;  %v5800_v23 = vld [vmem:[#allocation2 + $0x140] sm:$0xf0] }
 0x3c5   : > { %v7858_v17 = vpop.f32.mrf.mxu3 }
 0x3c6   : > { %v7856_v8 = vpop.f32.mrf.mxu0  ;;  %v3050_v49 = vpop.f32.mrf.mxu2  ;;  %8453 = vst [vmem:[#allocation5_spill] sm:$0xff] %v7867_v26 }
 0x3c7   : > { %v3051_v1 = vadd.f32 %v3050_v49, %v7755_v4  ;;  %v5444_v4 = vor.u32 %v5799_v44, %v5441_v56  ;;  %v7874_v49 = vpop.f32.mrf.mxu1 }
 0x3c9   : > { %3815 = vmatmul.bf16.gmra.mxu0 %v5428_v38  ;;  %v7863_v54 = vadd.f32 %v3139_v40, %v3051_v1  ;;  %v4174_v38 = vld [vmem:[%s7613_s16 + $0x90] sm:$0xff]  ;;  %v4207_v1 = vpack.c.bf16 %v4175_v51, %v4175_v51 }
 0x3ca   : > { %v4206_v48 = vpack.c.bf16 %v4174_v38, %v4174_v38 }
 0x3cb   : > { %8451 = vst [vmem:[#allocation6_spill] sm:$0xff] %v7863_v54  ;;  %3978 = vmatmul.bf16.gmra.mxu2 %v5400_v0  ;;  %v5439_v0 = vld [vmem:[#allocation2 + $0x138] sm:$0xf]  ;;  %v4275_v26 = vunpack.c.l.b16 %v4207_v1  ;;  %v7882_v54 = vadd.f32 %v7687_v41, %v8454_v24  ;;  %v5453_v1 = vld [vmem:[#allocation2 + $0x15c] sm:$0xf0] }
 0x3cc   : > { %v4274_v3 = vunpack.c.l.b16 %v4206_v48  ;;  %v5440_v56 = vor.u32 %v5800_v23, %v5439_v0  ;;  %v5802_v48 = vld [vmem:[#allocation2 + $0x154] sm:$0xf]  ;;  %v8455_v0 = vld [vmem:[#allocation19_spill] sm:$0xff] }
 0x3cd   : > { %v7869_v46 = vpop.f32.mrf.mxu3 }
 0x3ce   : > { %v3053_v63 = vpop.f32.mrf.mxu2  ;;  %v7872_v6 = vpop.f32.mrf.mxu0 }
 0x3cf   : > { %v3054_v61 = vadd.f32 %v3053_v63, %v7769_v29  ;;  %v5411_v63 = vld [vmem:[#allocation2 + $0xf8] sm:$0xf]  ;;  %v7892_v24 = vpop.f32.mrf.mxu1 }
 0x3d0   : > { %3909 = vmatmul.bf16.gmra.mxu1 %v5444_v4 }
 0x3d1   : > { %v7876_v40 = vadd.f32 %v3142_v21, %v3054_v61  ;;  %v5792_v21 = vld [vmem:[#allocation2 + $0x100] sm:$0xf0]  ;;  %v4297_v61 = vpack.c.b16 %v4275_v26, %v4274_v3  ;;  %v7896_v26 = vadd.f32 %v7698_v11, %v8455_v0  ;;  %v4177_v11 = vld [vmem:[%s7613_s16 + $0xa8] sm:$0xff]  ;;  %v5451_v0 = vld [vmem:[#allocation2 + $0x150] sm:$0xf] }
 0x3d2   : > { %v5412_v41 = vor.u32 %v5792_v21, %v5411_v63  ;;  %v4176_v21 = vld [vmem:[%s7613_s16 + $0xa0] sm:$0xff] }
 0x3d3   : > { %5610 = vmatmul.msk.bf16.gmra.mxu3 %vm627_vm6, %v4297_v61  ;;  %8456 = vst [vmem:[#allocation7_spill] sm:$0xff] %v7896_v26  ;;  %v4208_v61 = vpack.c.bf16 %v4176_v21, %v4176_v21  ;;  %v5795_v26 = vld [vmem:[#allocation2 + $0x118] sm:$0xf0] }
 0x3d5   : > { %v7884_v29 = vpop.f32.mrf.mxu3 }
 0x3d6   : > { %v3055_v44 = vpop.f32.mrf.mxu2  ;;  %v7890_v51 = vpop.f32.mrf.mxu0 }
 0x3d7   : > { %v3056_v4 = vadd.f32 %v3055_v44, %v7783_v5  ;;  %v3856_v5 = vadd.f32 %v7797_v28, %v7808_v34  ;;  %v7905_v44 = vld [vmem:[%s8227_s6] ss:$0 sm:$0xff] }
 0x3d8   : > { %v7914_v34 = vld [vmem:[%s8230_s9] ss:$0 sm:$0xff] }
 0x3d9   : > { %3820 = vmatmul.bf16.gmra.mxu0 %v5440_v56  ;;  %v7888_v38 = vadd.f32 %v3144_v7, %v3056_v4  ;;  %v5456_v56 = vor.u32 %v5802_v48, %v5453_v1  ;;  %v4209_v4 = vpack.c.bf16 %v4177_v11, %v4177_v11  ;;  %v7918_v48 = vpop.f32.mrf.mxu1 }
 0x3db   : > { %3983 = vmatmul.bf16.gmra.mxu2 %v5412_v41  ;;  %v4277_v1 = vunpack.c.l.b16 %v4209_v4  ;;  %v5423_v4 = vld [vmem:[#allocation2 + $0x110] sm:$0xf] }
 0x3dd   : > { %v7900_v23 = vpop.f32.mrf.mxu3 }
 0x3de   : > { %v3944_v7 = vpop.f32.mrf.mxu2  ;;  %v7916_v41 = vpop.f32.mrf.mxu0 }
 0x3df   : > { %v3945_v3 = vadd.f32 %v3944_v7, %v3856_v5  ;;  %v5803_v5 = vld [vmem:[#allocation2 + $0x158] sm:$0xf0] }
 0x3e0   : > { %3914 = vmatmul.bf16.gmra.mxu1 %v5456_v56  ;;  %v8457_v7 = vld [vmem:[#allocation21_spill] sm:$0xff]  ;;  %v3858_v56 = vadd.f32 %v7811_v50, %v7821_v47  ;;  %v5424_v47 = vor.u32 %v5795_v26, %v5423_v4 }
 0x3e1   : > { %v4024_v63 = vadd.f32 %v3945_v3, %v7653_v33  ;;  %v4276_v33 = vunpack.c.l.b16 %v4208_v61  ;;  %v7922_v3 = vadd.f32 %v7713_v15, %v8457_v7  ;;  %v5452_v61 = vor.u32 %v5803_v5, %v5451_v0  ;;  %v5465_v0 = vld [vmem:[#allocation2 + $0x174] sm:$0xf0]  ;;  %v7952_v26 = vpop.f32.mrf.mxu1 }
 0x3e2   : > { %v8459_v5 = vld [vmem:[#allocation9_spill] sm:$0xff] }
 0x3e3   : > { %v4124_v28 = vadd.f32 %v7905_v44, %v4024_v63  ;;  %8458 = vst [vmem:[#allocation17_spill] sm:$0xff] %v7922_v3  ;;  %v4298_v15 = vpack.c.b16 %v4277_v1, %v4276_v33  ;;  %v7943_v33 = vadd.f32 %v7728_v43, %v8459_v5  ;;  %v3861_v1 = vadd.f32 %v7826_v13, %v7833_v12 }
 0x3e5   : > { %v4453_v63 = vadd.f32 %v7858_v17, %v4124_v28  ;;  %v7927_v21 = vpop.f32.mrf.mxu3  ;;  %5611 = vmatmul.msk.bf16.gmra.mxu3 %vm627_vm6, %v4298_v15  ;;  %v5805_v28 = vld [vmem:[#allocation2 + $0x16c] sm:$0xf]  ;;  %8460 = vst [vmem:[#allocation26_spill] sm:$0xff] %v7943_v33  ;;  %v4178_v15 = vld [vmem:[%s7613_s16 + $0xb0] sm:$0xff] }
 0x3e6   : > { %v3946_v11 = vpop.f32.mrf.mxu2  ;;  %v5468_v4 = vor.u32 %v5805_v28, %v5465_v0  ;;  %v4210_v13 = vpack.c.bf16 %v4178_v15, %v4178_v15  ;;  %v8461_v33 = vld [vmem:[#allocation12_spill] sm:$0xff]  ;;  %v3863_v28 = vadd.f32 %v7840_v32, %v7846_v9 }
 0x3e7   : > { %v4489_v7 = vadd.f32 %v7914_v34, %v4453_v63  ;;  %v3947_v3 = vadd.f32 %v3946_v11, %v3858_v56  ;;  %v7948_v63 = vpop.f32.mrf.mxu0 }
 0x3e9   : > { %3825 = vmatmul.bf16.gmra.mxu0 %v5452_v61  ;;  %4521 = vst [vmem:[%s7934_s23] sm:$0xff] %v4489_v7  ;;  %v4025_v50 = vadd.f32 %v3947_v3, %v7670_v52  ;;  %v4179_v7 = vld [vmem:[%s7613_s16 + $0xb8] sm:$0xff] }
 0x3ea   : > { %v4211_v12 = vpack.c.bf16 %v4179_v7, %v4179_v7 }
 0x3eb   : > { %v4125_v17 = vadd.f32 %v7905_v44, %v4025_v50  ;;  %3988 = vmatmul.bf16.gmra.mxu2 %v5424_v47  ;;  %v5463_v50 = vld [vmem:[#allocation2 + $0x168] sm:$0xf]  ;;  %v5806_v47 = vld [vmem:[#allocation2 + $0x170] sm:$0xf0] }
 0x3ec   : > { %v4279_v5 = vunpack.c.l.b16 %v4211_v12  ;;  %v7980_v12 = vadd.f32 %v7758_v58, %v7647_v60  ;;  %v4180_v60 = vld [vmem:[%s7613_s16 + $0xc0] sm:$0xff]  ;;  %v4181_v58 = vld [vmem:[%s7613_s16 + $0xc8] sm:$0xff] }
 0x3ed   : > { %v4454_v56 = vadd.f32 %v7869_v46, %v4125_v17  ;;  %v7950_v52 = vpop.f32.mrf.mxu3  ;;  %v4278_v17 = vunpack.c.l.b16 %v4210_v13  ;;  %v7972_v13 = vpop.f32.mrf.mxu1 }
 0x3ee   : > { %v3949_v3 = vpop.f32.mrf.mxu2 }
 0x3ef   : > { %v4490_v11 = vadd.f32 %v7914_v34, %v4454_v56  ;;  %v3950_v61 = vadd.f32 %v3949_v3, %v3861_v1  ;;  %v7962_v56 = vadd.f32 %v7743_v57, %v8461_v33  ;;  %v5464_v3 = vor.u32 %v5806_v47, %v5463_v50  ;;  %v7970_v15 = vpop.f32.mrf.mxu0  ;;  %v5477_v33 = vld [vmem:[#allocation2 + $0x18c] sm:$0xf0] }
 0x3f0   : > { %3919 = vmatmul.bf16.gmra.mxu1 %v5468_v4  ;;  %v4299_v4 = vpack.c.b16 %v4279_v5, %v4278_v17 }
 0x3f1   : > { %4522 = vst [vmem:[%s7934_s23 + $0x8] sm:$0xff] %v4490_v11  ;;  %v4026_v43 = vadd.f32 %v3950_v61, %v7684_v19  ;;  %v5435_v11 = vld [vmem:[#allocation2 + $0x128] sm:$0xf]  ;;  %v5798_v61 = vld [vmem:[#allocation2 + $0x130] sm:$0xf0] }
 0x3f2   : > { %v5436_v32 = vor.u32 %v5798_v61, %v5435_v11  ;;  %v5475_v11 = vld [vmem:[#allocation2 + $0x180] sm:$0xf]  ;;  %v5809_v61 = vld [vmem:[#allocation2 + $0x188] sm:$0xf0] }
 0x3f3   : > { %v4126_v46 = vadd.f32 %v7905_v44, %v4026_v43 }
 0x3f5   : > { %v4455_v19 = vadd.f32 %v7884_v29, %v4126_v46  ;;  %v7967_v0 = vpop.f32.mrf.mxu3  ;;  %5612 = vmatmul.msk.bf16.gmra.mxu3 %vm627_vm6, %v4299_v4  ;;  %v5808_v29 = vld [vmem:[#allocation2 + $0x184] sm:$0xf]  ;;  %v3866_v46 = vadd.f32 %v7860_v36, %v7856_v8  ;;  %v4212_v8 = vpack.c.bf16 %v4180_v60, %v4180_v60  ;;  %v4213_v36 = vpack.c.bf16 %v4181_v58, %v4181_v58 }
 0x3f6   : > { %v3951_v1 = vpop.f32.mrf.mxu2 }
 0x3f7   : > { %v4491_v43 = vadd.f32 %v7914_v34, %v4455_v19  ;;  %v3952_v7 = vadd.f32 %v3951_v1, %v3863_v28  ;;  %v5480_v28 = vor.u32 %v5808_v29, %v5477_v33  ;;  %v7989_v19 = vpop.f32.mrf.mxu0  ;;  %v4280_v4 = vunpack.c.l.b16 %v4212_v8  ;;  %v5447_v33 = vld [vmem:[#allocation2 + $0x140] sm:$0xf] }
 0x3f8   : > { %v5476_v29 = vor.u32 %v5809_v61, %v5475_v11  ;;  %v4183_v11 = vld [vmem:[%s7613_s16 + $0xd8] sm:$0xff] }
 0x3f9   : > { %3830 = vmatmul.bf16.gmra.mxu0 %v5464_v3  ;;  %4523 = vst [vmem:[%s7934_s23 + $0x10] sm:$0xff] %v4491_v43  ;;  %v4027_v57 = vadd.f32 %v3952_v7, %v7704_v20  ;;  %v7994_v3 = vpop.f32.mrf.mxu1  ;;  %v4281_v43 = vunpack.c.l.b16 %v4213_v36  ;;  %v7999_v7 = vadd.f32 %v7773_v53, %v7663_v39 }
 0x3fb   : > { %v4127_v9 = vadd.f32 %v7905_v44, %v4027_v57  ;;  %3993 = vmatmul.bf16.gmra.mxu2 %v5436_v32 }
 0x3fd   : > { %v4456_v50 = vadd.f32 %v7900_v23, %v4127_v9  ;;  %v7985_v47 = vpop.f32.mrf.mxu3 }
 0x3fe   : > { %v3954_v20 = vpop.f32.mrf.mxu2 }
 0x3ff   : > { %v4492_v17 = vadd.f32 %v7914_v34, %v4456_v50  ;;  %v3955_v5 = vadd.f32 %v3954_v20, %v3866_v46  ;;  %v5801_v46 = vld [vmem:[#allocation2 + $0x148] sm:$0xf0]  ;;  %v4300_v50 = vpack.c.b16 %v4281_v43, %v4280_v4  ;;  %v4215_v4 = vpack.c.bf16 %v4183_v11, %v4183_v11 }
 0x400   : > { %3924 = vmatmul.bf16.gmra.mxu1 %v5480_v28  ;;  %v5448_v53 = vor.u32 %v5801_v46, %v5447_v33  ;;  %v3871_v28 = vadd.f32 %v7892_v24, %v7890_v51  ;;  %v8032_v24 = vadd.f32 %v7801_v31, %v7693_v27  ;;  %v5804_v33 = vld [vmem:[#allocation2 + $0x160] sm:$0xf0] }
 0x401   : > { %4524 = vst [vmem:[%s7934_s23 + $0x18] sm:$0xff] %v4492_v17  ;;  %v4028_v1 = vadd.f32 %v3955_v5, %v7718_v14  ;;  %v3868_v14 = vadd.f32 %v7874_v49, %v7872_v6  ;;  %v8010_v6 = vpop.f32.mrf.mxu0  ;;  %v8017_v5 = vadd.f32 %v7786_v18, %v7677_v55  ;;  %v4283_v51 = vunpack.c.l.b16 %v4215_v4  ;;  %v5471_v4 = vld [vmem:[#allocation2 + $0x170] sm:$0xf] }
 0x403   : > { %v4128_v23 = vadd.f32 %v7905_v44, %v4028_v1 }
 0x405   : > { %v4457_v57 = vadd.f32 %v7927_v21, %v4128_v23  ;;  %v8004_v32 = vpop.f32.mrf.mxu3  ;;  %5613 = vmatmul.msk.bf16.gmra.mxu3 %vm627_vm6, %v4300_v50  ;;  %v8013_v21 = vpop.f32.mrf.mxu1  ;;  %v4182_v23 = vld [vmem:[%s7613_s16 + $0xd0] sm:$0xff] }
 0x406   : > { %v3956_v9 = vpop.f32.mrf.mxu2  ;;  %v4214_v61 = vpack.c.bf16 %v4182_v23, %v4182_v23  ;;  %v3878_v23 = vadd.f32 %v7972_v13, %v7970_v15 }
 0x407   : > { %v4493_v20 = vadd.f32 %v7914_v34, %v4457_v57  ;;  %v3957_v17 = vadd.f32 %v3956_v9, %v3868_v14 }
 0x408   : > { %v4282_v18 = vunpack.c.l.b16 %v4214_v61 }
 0x409   : > { %3835 = vmatmul.bf16.gmra.mxu0 %v5476_v29  ;;  %4525 = vst [vmem:[%s7934_s23 + $0x20] sm:$0xff] %v4493_v20  ;;  %v4029_v39 = vadd.f32 %v3957_v17, %v7734_v59  ;;  %v8036_v43 = vpop.f32.mrf.mxu0  ;;  %v5459_v29 = vld [vmem:[#allocation2 + $0x158] sm:$0xf] }
 0x40a   : > { %v4301_v46 = vpack.c.b16 %v4283_v51, %v4282_v18  ;;  %v5460_v31 = vor.u32 %v5804_v33, %v5459_v29 }
 0x40b   : > { %v4129_v49 = vadd.f32 %v7905_v44, %v4029_v39  ;;  %3998 = vmatmul.bf16.gmra.mxu2 %v5448_v53 }
 0x40d   : > { %v4458_v1 = vadd.f32 %v7950_v52, %v4129_v49  ;;  %v8022_v60 = vpop.f32.mrf.mxu3  ;;  %v3873_v52 = vadd.f32 %v7918_v48, %v7916_v41  ;;  %v8041_v57 = vpop.f32.mrf.mxu1  ;;  %v8050_v48 = vadd.f32 %v7813_v45, %v7707_v30  ;;  %v4184_v30 = vld [vmem:[%s7613_s16 + $0xe0] sm:$0xff]  ;;  %v4185_v45 = vld [vmem:[%s7613_s16 + $0xe8] sm:$0xff] }
 0x40e   : > { %v3959_v59 = vpop.f32.mrf.mxu2 }
 0x40f   : > { %v4494_v58 = vadd.f32 %v7914_v34, %v4458_v1  ;;  %v3960_v8 = vadd.f32 %v3959_v59, %v3871_v28 }
 0x411   : > { %4526 = vst [vmem:[%s7934_s23 + $0x28] sm:$0xff] %v4494_v58  ;;  %v4030_v36 = vadd.f32 %v3960_v8, %v7748_v42  ;;  %v8057_v49 = vpop.f32.mrf.mxu0  ;;  %v4216_v58 = vpack.c.bf16 %v4184_v30, %v4184_v30  ;;  %v4217_v8 = vpack.c.bf16 %v4185_v45, %v4185_v45  ;;  %v8463_v45 = vld [vmem:[#allocation11_spill] sm:$0xff] }
 0x413   : > { %v4130_v55 = vadd.f32 %v7905_v44, %v4030_v36  ;;  %v8069_v36 = vadd.f32 %v7824_v10, %v7723_v37 }
 0x415   : > { %v4459_v42 = vadd.f32 %v7967_v0, %v4130_v55  ;;  %v8039_v14 = vpop.f32.mrf.mxu3  ;;  %5614 = vmatmul.msk.bf16.gmra.mxu3 %vm627_vm6, %v4301_v46  ;;  %v3876_v0 = vadd.f32 %v7952_v26, %v7948_v63  ;;  %v8060_v1 = vpop.f32.mrf.mxu1  ;;  %v4284_v26 = vunpack.c.l.b16 %v4216_v58  ;;  %v5807_v55 = vld [vmem:[#allocation2 + $0x178] sm:$0xf0]  ;;  %v8104_v58 = vadd.f32 %v7849_v2, %v8463_v45  ;;  %v8469_v45 = vld [vmem:[#allocation18_spill] sm:$0xff] }
 0x416   : > { %v3961_v9 = vpop.f32.mrf.mxu2  ;;  %v5472_v10 = vor.u32 %v5807_v55, %v5471_v4 }
 0x417   : > { %v4495_v50 = vadd.f32 %v7914_v34, %v4459_v42  ;;  %v3962_v20 = vadd.f32 %v3961_v9, %v3873_v52  ;;  %v3881_v9 = vadd.f32 %v7994_v3, %v7989_v19 }
 0x419   : > { %4527 = vst [vmem:[%s7934_s23 + $0x30] sm:$0xff] %v4495_v50  ;;  %v4031_v27 = vadd.f32 %v3962_v20, %v7764_v35  ;;  %v8078_v42 = vpop.f32.mrf.mxu0  ;;  %v8462_v20 = vld [vmem:[#allocation24_spill] sm:$0xff] }
 0x41b   : > { %v4131_v41 = vadd.f32 %v7905_v44, %v4031_v27  ;;  %4003 = vmatmul.bf16.gmra.mxu2 %v5460_v31  ;;  %v5487_v31 = vld [vmem:[#allocation2 + $0x198] sm:$0xf] }
 0x41d   : > { %v4460_v17 = vadd.f32 %v7985_v47, %v4131_v41  ;;  %v8055_v39 = vpop.f32.mrf.mxu3  ;;  %v4285_v47 = vunpack.c.l.b16 %v4217_v8  ;;  %v8082_v15 = vpop.f32.mrf.mxu1  ;;  %v5812_v41 = vld [vmem:[#allocation2 + $0x1a0] sm:$0xf0]  ;;  %v3883_v8 = vadd.f32 %v8013_v21, %v8010_v6  ;;  %v8465_v21 = vld [vmem:[#allocation13_spill] sm:$0xff] }
 0x41e   : > { %v3964_v53 = vpop.f32.mrf.mxu2 }
 0x41f   : > { %v4496_v35 = vadd.f32 %v7914_v34, %v4460_v17  ;;  %v3965_v28 = vadd.f32 %v3964_v53, %v3876_v0  ;;  %v4302_v18 = vpack.c.b16 %v4285_v47, %v4284_v26  ;;  %v4186_v0 = vld [vmem:[%s7613_s16 + $0xf0] sm:$0xff]  ;;  %v5488_v17 = vor.u32 %v5812_v41, %v5487_v31  ;;  %v4187_v53 = vld [vmem:[%s7613_s16 + $0xf8] sm:$0xff] }
 0x421   : > { %4528 = vst [vmem:[%s7934_s23 + $0x38] sm:$0xff] %v4496_v35  ;;  %v4032_v59 = vadd.f32 %v3965_v28, %v7778_v25  ;;  %v4218_v35 = vpack.c.bf16 %v4186_v0, %v4186_v0  ;;  %v8099_v19 = vpop.f32.mrf.mxu0  ;;  %v4219_v28 = vpack.c.bf16 %v4187_v53, %v4187_v53  ;;  %3840 = vmatmul.bf16.gmra.mxu0 %v5488_v17  ;;  %v5495_v0 = vld [vmem:[#allocation2 + $0x1a0] sm:$0xf]  ;;  %v5813_v17 = vld [vmem:[#allocation2 + $0x1a8] sm:$0xf0] }
 0x423   : > { %v4132_v63 = vadd.f32 %v7905_v44, %v4032_v59  ;;  %v4286_v30 = vunpack.c.l.b16 %v4218_v35  ;;  %v4287_v26 = vunpack.c.l.b16 %v4219_v28 }
 0x425   : > { %v4461_v11 = vadd.f32 %v8004_v32, %v4132_v63  ;;  %v8074_v61 = vpop.f32.mrf.mxu3  ;;  %5615 = vmatmul.msk.bf16.gmra.mxu3 %vm627_vm6, %v4302_v18  ;;  %v8087_v32 = vadd.f32 %v7836_v16, %v7737_v62  ;;  %v5811_v62 = vld [vmem:[#allocation2 + $0x19c] sm:$0xf]  ;;  %v5489_v16 = vld [vmem:[#allocation2 + $0x1a4] sm:$0xf0]  ;;  %v3892_v59 = vpop.f32.mrf.mxu1  ;;  %v4303_v18 = vpack.c.b16 %v4287_v26, %v4286_v30 }
 0x426   : > { %v3966_v25 = vpop.f32.mrf.mxu2 }
 0x427   : > { %v4497_v51 = vadd.f32 %v7914_v34, %v4461_v11  ;;  %v3967_v52 = vadd.f32 %v3966_v25, %v3878_v23  ;;  %v5483_v11 = vld [vmem:[#allocation2 + $0x188] sm:$0xf]  ;;  %v5810_v25 = vld [vmem:[#allocation2 + $0x190] sm:$0xf0] }
 0x429   : > { %4529 = vst [vmem:[%s7934_s23 + $0x40] sm:$0xff] %v4497_v51  ;;  %v4033_v37 = vadd.f32 %v3967_v52, %v7792_v22  ;;  %v8464_v51 = vld [vmem:[#allocation23_spill] sm:$0xff]  ;;  %v5484_v52 = vor.u32 %v5810_v25, %v5483_v11 }
 0x42b   : > { %v4133_v13 = vadd.f32 %v7905_v44, %v4033_v37  ;;  %4008 = vmatmul.bf16.gmra.mxu2 %v5472_v10  ;;  %v3886_v10 = vadd.f32 %v8041_v57, %v8036_v43  ;;  %v3888_v57 = vadd.f32 %v8060_v1, %v8057_v49  ;;  %v3891_v1 = vadd.f32 %v8082_v15, %v8078_v42 }
 0x42d   : > { %v4462_v29 = vadd.f32 %v8022_v60, %v4133_v13  ;;  %v8092_v33 = vpop.f32.mrf.mxu3  ;;  %v5492_v60 = vor.u32 %v5811_v62, %v5489_v16  ;;  %v3806_v13 = vpop.f32.mrf.mxu0  ;;  %v8468_v62 = vld [vmem:[#allocation10_spill] sm:$0xff] }
 0x42e   : > { %v3969_v22 = vpop.f32.mrf.mxu2  ;;  %v8127_v43 = vadd.f32 %v7876_v40, %v8468_v62 }
 0x42f   : > { %v4498_v46 = vadd.f32 %v7914_v34, %v4462_v29  ;;  %v3970_v50 = vadd.f32 %v3969_v22, %v3881_v9  ;;  %3929 = vmatmul.bf16.gmra.mxu1 %v5492_v60  ;;  %v3895_v22 = vpop.f32.mrf.mxu1  ;;  %v5496_v60 = vor.u32 %v5813_v17, %v5495_v0 }
 0x431   : > { %4530 = vst [vmem:[%s7934_s23 + $0x48] sm:$0xff] %v4498_v46  ;;  %v4034_v27 = vadd.f32 %v3970_v50, %v8462_v20 }
 0x433   : > { %v4134_v3 = vadd.f32 %v7905_v44, %v4034_v27  ;;  %v8467_v27 = vld [vmem:[#allocation25_spill] sm:$0xff] }
 0x435   : > { %v4463_v63 = vadd.f32 %v8039_v14, %v4134_v3  ;;  %v4408_v47 = vpop.f32.mrf.mxu3  ;;  %5616 = vmatmul.msk.bf16.gmra.mxu3 %vm627_vm6, %v4303_v18  ;;  %v8466_v14 = vld [vmem:[#allocation6_spill] sm:$0xff]  ;;  %v3808_v53 = vpop.f32.mrf.mxu0 }
 0x436   : > { %v3971_v23 = vpop.f32.mrf.mxu2  ;;  %v8116_v37 = vadd.f32 %v8466_v14, %v8465_v21 }
 0x437   : > { %v4499_v4 = vadd.f32 %v7914_v34, %v4463_v63  ;;  %v3972_v55 = vadd.f32 %v3971_v23, %v3883_v8  ;;  %v3897_v30 = vpop.f32.mrf.mxu1  ;;  %v8470_v63 = vld [vmem:[#allocation14_spill] sm:$0xff] }
 0x438   : > { %v8138_v49 = vadd.f32 %v7888_v38, %v8470_v63  ;;  %v3893_v38 = vadd.f32 %v3892_v59, %v8099_v19  ;;  %v3898_v0 = vadd.f32 %v3897_v30, %v3808_v53 }
 0x439   : > { %4531 = vst [vmem:[%s7934_s23 + $0x50] sm:$0xff] %v4499_v4  ;;  %v4035_v2 = vadd.f32 %v3972_v55, %v8464_v51  ;;  %v8471_v4 = vld [vmem:[#allocation22_spill] sm:$0xff] }
 0x43b   : > { %v4135_v6 = vadd.f32 %v7905_v44, %v4035_v2  ;;  %4013 = vmatmul.bf16.gmra.mxu2 %v5484_v52 }
 0x43d   : > { %v4464_v9 = vadd.f32 %v8055_v39, %v4135_v6  ;;  %v4410_v29 = vpop.f32.mrf.mxu3  ;;  %v3811_v25 = vpop.f32.mrf.mxu0  ;;  %v8472_v6 = vld [vmem:[#allocation5_spill] sm:$0xff] }
 0x43e   : > { %v3974_v46 = vpop.f32.mrf.mxu2 }
 0x43f   : > { %v4500_v50 = vadd.f32 %v7914_v34, %v4464_v9  ;;  %v3975_v20 = vadd.f32 %v3974_v46, %v3886_v10  ;;  %v3900_v51 = vpop.f32.mrf.mxu1 }
 0x441   : > { %4532 = vst [vmem:[%s7934_s23 + $0x58] sm:$0xff] %v4500_v50  ;;  %v4036_v31 = vadd.f32 %v3975_v20, %v8467_v27  ;;  %v3896_v50 = vadd.f32 %v3895_v22, %v3806_v13 }
 0x443   : > { %v4136_v41 = vadd.f32 %v7905_v44, %v4036_v31 }
 0x445   : > { %v4465_v39 = vadd.f32 %v8074_v61, %v4136_v41  ;;  %v4413_v28 = vpop.f32.mrf.mxu3  ;;  %v3813_v14 = vpop.f32.mrf.mxu0 }
 0x446   : > { %v3976_v16 = vpop.f32.mrf.mxu2 }
 0x447   : > { %v4501_v35 = vadd.f32 %v7914_v34, %v4465_v39  ;;  %v3977_v3 = vadd.f32 %v3976_v16, %v3888_v57  ;;  %v3902_v46 = vpop.f32.mrf.mxu1 }
 0x449   : > { %4533 = vst [vmem:[%s7934_s23 + $0x60] sm:$0xff] %v4501_v35  ;;  %v4037_v8 = vadd.f32 %v3977_v3, %v8469_v45  ;;  %v3901_v3 = vadd.f32 %v3900_v51, %v3811_v25 }
 0x44b   : > { %v4137_v40 = vadd.f32 %v7905_v44, %v4037_v8  ;;  %4018 = vmatmul.bf16.gmra.mxu2 %v5496_v60 }
 0x44d   : > { %v4466_v61 = vadd.f32 %v8092_v33, %v4137_v40  ;;  %v4415_v18 = vpop.f32.mrf.mxu3  ;;  %v3816_v17 = vpop.f32.mrf.mxu0  ;;  %v8474_v40 = vld [vmem:[#allocation17_spill] sm:$0xff] }
 0x44e   : > { %v3979_v26 = vpop.f32.mrf.mxu2 }
 0x44f   : > { %v4502_v23 = vadd.f32 %v7914_v34, %v4466_v61  ;;  %v3980_v11 = vadd.f32 %v3979_v26, %v3891_v1  ;;  %v3905_v57 = vpop.f32.mrf.mxu1  ;;  %v3903_v61 = vadd.f32 %v3902_v46, %v3813_v14 }
 0x451   : > { %4534 = vst [vmem:[%s7934_s23 + $0x68] sm:$0xff] %v4502_v23  ;;  %v4038_v55 = vadd.f32 %v3980_v11, %v8471_v4 }
 0x453   : > { %v4138_v2 = vadd.f32 %v7905_v44, %v4038_v55 }
 0x455   : > { %v4467_v52 = vadd.f32 %v4408_v47, %v4138_v2  ;;  %v3818_v8 = vpop.f32.mrf.mxu0 }
 0x456   : > { %v3981_v42 = vpop.f32.mrf.mxu2  ;;  %v4418_v9 = vpop.f32.mrf.mxu3 }
 0x457   : > { %v4503_v15 = vadd.f32 %v7914_v34, %v4467_v52  ;;  %v3982_v33 = vadd.f32 %v3981_v42, %v3893_v38  ;;  %v3907_v30 = vpop.f32.mrf.mxu1  ;;  %v3906_v52 = vadd.f32 %v3905_v57, %v3816_v17 }
 0x459   : > { %4535 = vst [vmem:[%s7934_s23 + $0x70] sm:$0xff] %v4503_v15  ;;  %v4039_v21 = vadd.f32 %v3982_v33, %v8472_v6 }
 0x45b   : > { %v4139_v10 = vadd.f32 %v7905_v44, %v4039_v21 }
 0x45d   : > { %v4468_v20 = vadd.f32 %v4410_v29, %v4139_v10  ;;  %v8473_v29 = vld [vmem:[#allocation7_spill] sm:$0xff]  ;;  %v3821_v55 = vpop.f32.mrf.mxu0 }
 0x45e   : > { %v3984_v27 = vpop.f32.mrf.mxu2  ;;  %v4420_v41 = vpop.f32.mrf.mxu3 }
 0x45f   : > { %v4504_v19 = vadd.f32 %v7914_v34, %v4468_v20  ;;  %v3985_v59 = vadd.f32 %v3984_v27, %v3896_v50  ;;  %v3910_v2 = vpop.f32.mrf.mxu1  ;;  %v3908_v50 = vadd.f32 %v3907_v30, %v3818_v8 }
 0x461   : > { %4536 = vst [vmem:[%s7934_s23 + $0x78] sm:$0xff] %v4504_v19  ;;  %v4040_v47 = vadd.f32 %v3985_v59, %v7882_v54 }
 0x463   : > { %v4140_v31 = vadd.f32 %v7905_v44, %v4040_v47 }
 0x465   : > { %v4469_v62 = vadd.f32 %v4413_v28, %v4140_v31  ;;  %v3823_v10 = vpop.f32.mrf.mxu0 }
 0x466   : > { %v3986_v39 = vpop.f32.mrf.mxu2 }
 0x467   : > { %v4505_v13 = vadd.f32 %v7914_v34, %v4469_v62  ;;  %v3987_v22 = vadd.f32 %v3986_v39, %v3898_v0  ;;  %v3912_v46 = vpop.f32.mrf.mxu1  ;;  %v3911_v0 = vadd.f32 %v3910_v2, %v3821_v55 }
 0x468   : > { %v4423_v45 = vpop.f32.mrf.mxu3 }
 0x469   : > { %4537 = vst [vmem:[%s7934_s23 + $0x80] sm:$0xff] %v4505_v13  ;;  %v4041_v16 = vadd.f32 %v3987_v22, %v8473_v29 }
 0x46b   : > { %v4141_v35 = vadd.f32 %v7905_v44, %v4041_v16  ;;  %v3913_v16 = vadd.f32 %v3912_v46, %v3823_v10 }
 0x46d   : > { %v4470_v60 = vadd.f32 %v4415_v18, %v4141_v35  ;;  %v8475_v18 = vld [vmem:[#allocation26_spill] sm:$0xff] }
 0x46e   : > { %v3989_v54 = vpop.f32.mrf.mxu2 }
 0x46f   : > { %v4506_v53 = vadd.f32 %v7914_v34, %v4470_v60  ;;  %v3990_v28 = vadd.f32 %v3989_v54, %v3901_v3  ;;  %v3915_v62 = vpop.f32.mrf.mxu1 }
 0x470   : > { %v4425_v4 = vpop.f32.mrf.mxu3 }
 0x471   : > { %4538 = vst [vmem:[%s7934_s23 + $0x88] sm:$0xff] %v4506_v53  ;;  %v4042_v63 = vadd.f32 %v3990_v28, %v8474_v40 }
 0x473   : > { %v4142_v1 = vadd.f32 %v7905_v44, %v4042_v63 }
 0x475   : > { %v4471_v26 = vadd.f32 %v4418_v9, %v4142_v1 }
 0x476   : > { %v3991_v23 = vpop.f32.mrf.mxu2 }
 0x477   : > { %v4507_v11 = vadd.f32 %v7914_v34, %v4471_v26  ;;  %v3992_v25 = vadd.f32 %v3991_v23, %v3903_v61  ;;  %v3917_v8 = vpop.f32.mrf.mxu1 }
 0x478   : > { %v4428_v14 = vpop.f32.mrf.mxu3 }
 0x479   : > { %4539 = vst [vmem:[%s7934_s23 + $0x90] sm:$0xff] %v4507_v11  ;;  %v4043_v51 = vadd.f32 %v3992_v25, %v8475_v18 }
 0x47b   : > { %v4143_v38 = vadd.f32 %v7905_v44, %v4043_v51 }
 0x47d   : > { %v4472_v42 = vadd.f32 %v4420_v41, %v4143_v38 }
 0x47e   : > { %v3994_v15 = vpop.f32.mrf.mxu2 }
 0x47f   : > { %v4508_v33 = vadd.f32 %v7914_v34, %v4472_v42  ;;  %v3995_v6 = vadd.f32 %v3994_v15, %v3906_v52  ;;  %v3920_v11 = vpop.f32.mrf.mxu1 }
 0x480   : > { %v4430_v41 = vpop.f32.mrf.mxu3 }
 0x481   : > { %4540 = vst [vmem:[%s7934_s23 + $0x98] sm:$0xff] %v4508_v33  ;;  %v4044_v21 = vadd.f32 %v3995_v6, %v7962_v56  ;;  %v3826_v56 = vpop.f32.mrf.mxu0 }
 0x482   : > { %v3916_v30 = vadd.f32 %v3915_v62, %v3826_v56 }
 0x483   : > { %v4144_v9 = vadd.f32 %v7905_v44, %v4044_v21 }
 0x485   : > { %v4473_v20 = vadd.f32 %v4423_v45, %v4144_v9 }
 0x486   : > { %v3996_v27 = vpop.f32.mrf.mxu2 }
 0x487   : > { %v4509_v19 = vadd.f32 %v7914_v34, %v4473_v20  ;;  %v3997_v59 = vadd.f32 %v3996_v27, %v3908_v50  ;;  %v3922_v15 = vpop.f32.mrf.mxu1 }
 0x488   : > { %v4433_v3 = vpop.f32.mrf.mxu3 }
 0x489   : > { %4541 = vst [vmem:[%s7934_s23 + $0xa0] sm:$0xff] %v4509_v19  ;;  %v4045_v47 = vadd.f32 %v3997_v59, %v7980_v12  ;;  %v3828_v60 = vpop.f32.mrf.mxu0 }
 0x48b   : > { %v4145_v31 = vadd.f32 %v7905_v44, %v4045_v47 }
 0x48d   : > { %v4474_v17 = vadd.f32 %v4425_v4, %v4145_v31  ;;  %v3918_v4 = vadd.f32 %v3917_v8, %v3828_v60 }
 0x48e   : > { %v3999_v57 = vpop.f32.mrf.mxu2 }
 0x48f   : > { %v4510_v39 = vadd.f32 %v7914_v34, %v4474_v17  ;;  %v4000_v13 = vadd.f32 %v3999_v57, %v3911_v0  ;;  %v3925_v27 = vpop.f32.mrf.mxu1 }
 0x490   : > { %v4435_v61 = vpop.f32.mrf.mxu3 }
 0x491   : > { %4542 = vst [vmem:[%s7934_s23 + $0xa8] sm:$0xff] %v4510_v39  ;;  %v4046_v22 = vadd.f32 %v4000_v13, %v7999_v7  ;;  %v3831_v26 = vpop.f32.mrf.mxu0 }
 0x492   : > { %v3921_v33 = vadd.f32 %v3920_v11, %v3831_v26 }
 0x493   : > { %v4146_v29 = vadd.f32 %v7905_v44, %v4046_v22 }
 0x495   : > { %v4475_v35 = vadd.f32 %v4428_v14, %v4146_v29 }
 0x496   : > { %v4001_v12 = vpop.f32.mrf.mxu2 }
 0x497   : > { %v4511_v54 = vadd.f32 %v7914_v34, %v4475_v35  ;;  %v4002_v45 = vadd.f32 %v4001_v12, %v3913_v16  ;;  %v3927_v13 = vpop.f32.mrf.mxu1 }
 0x498   : > { %v4438_v38 = vpop.f32.mrf.mxu3 }
 0x499   : > { %4543 = vst [vmem:[%s7934_s23 + $0xb0] sm:$0xff] %v4511_v54  ;;  %v4047_v53 = vadd.f32 %v4002_v45, %v8017_v5  ;;  %v3833_v52 = vpop.f32.mrf.mxu0 }
 0x49a   : > { %v3923_v50 = vadd.f32 %v3922_v15, %v3833_v52 }
 0x49b   : > { %v4147_v28 = vadd.f32 %v7905_v44, %v4047_v53 }
 0x49d   : > { %v4476_v7 = vadd.f32 %v4430_v41, %v4147_v28 }
 0x49e   : > { %v4004_v40 = vpop.f32.mrf.mxu2 }
 0x49f   : > { %v4512_v63 = vadd.f32 %v7914_v34, %v4476_v7  ;;  %v4005_v1 = vadd.f32 %v4004_v40, %v3916_v30 }
 0x4a0   : > { %v4440_v46 = vpop.f32.mrf.mxu3 }
 0x4a1   : > { %4544 = vst [vmem:[%s7934_s23 + $0xb8] sm:$0xff] %v4512_v63  ;;  %v4048_v23 = vadd.f32 %v4005_v1, %v8032_v24 }
 0x4a3   : > { %v4148_v25 = vadd.f32 %v7905_v44, %v4048_v23 }
 0x4a5   : > { %v4477_v5 = vadd.f32 %v4433_v3, %v4148_v25 }
 0x4a6   : > { %v4006_v55 = vpop.f32.mrf.mxu2 }
 0x4a7   : > { %v4513_v18 = vadd.f32 %v7914_v34, %v4477_v5  ;;  %v4007_v51 = vadd.f32 %v4006_v55, %v3918_v4 }
 0x4a9   : > { %4545 = vst [vmem:[%s7934_s23 + $0xc0] sm:$0xff] %v4513_v18  ;;  %v4049_v2 = vadd.f32 %v4007_v51, %v8050_v48  ;;  %v3836_v48 = vpop.f32.mrf.mxu0 }
 0x4aa   : > { %v3926_v0 = vadd.f32 %v3925_v27, %v3836_v48 }
 0x4ab   : > { %v4149_v42 = vadd.f32 %v7905_v44, %v4049_v2 }
 0x4ac   : > { %v3930_v54 = vpop.f32.mrf.mxu1 }
 0x4ad   : > { %v4478_v24 = vadd.f32 %v4435_v61, %v4149_v42 }
 0x4ae   : > { %v4009_v6 = vpop.f32.mrf.mxu2 }
 0x4af   : > { %v4514_v21 = vadd.f32 %v7914_v34, %v4478_v24  ;;  %v4010_v14 = vadd.f32 %v4009_v6, %v3921_v33 }
 0x4b1   : > { %4546 = vst [vmem:[%s7934_s23 + $0xc8] sm:$0xff] %v4514_v21  ;;  %v4050_v10 = vadd.f32 %v4010_v14, %v8069_v36  ;;  %v4443_v36 = vpop.f32.mrf.mxu3  ;;  %v3838_v62 = vpop.f32.mrf.mxu0 }
 0x4b2   : > { %v3928_v16 = vadd.f32 %v3927_v13, %v3838_v62 }
 0x4b3   : > { %v4150_v9 = vadd.f32 %v7905_v44, %v4050_v10 }
 0x4b4   : > { %v3932_v61 = vpop.f32.mrf.mxu1 }
 0x4b5   : > { %v4479_v20 = vadd.f32 %v4438_v38, %v4150_v9 }
 0x4b6   : > { %v4011_v19 = vpop.f32.mrf.mxu2 }
 0x4b7   : > { %v4515_v59 = vadd.f32 %v7914_v34, %v4479_v20  ;;  %v4012_v47 = vadd.f32 %v4011_v19, %v3923_v50 }
 0x4b9   : > { %4547 = vst [vmem:[%s7934_s23 + $0xd0] sm:$0xff] %v4515_v59  ;;  %v4051_v31 = vadd.f32 %v4012_v47, %v8087_v32  ;;  %v3841_v3 = vpop.f32.mrf.mxu0  ;;  %v4445_v45 = vpop.f32.mrf.mxu3 }
 0x4ba   : > { %v3931_v53 = vadd.f32 %v3930_v54, %v3841_v3 }
 0x4bb   : > { %v4151_v41 = vadd.f32 %v7905_v44, %v4051_v31 }
 0x4bd   : > { %v4480_v56 = vadd.f32 %v4440_v46, %v4151_v41 }
 0x4be   : > { %v4014_v17 = vpop.f32.mrf.mxu2 }
 0x4bf   : > { %v4516_v57 = vadd.f32 %v7914_v34, %v4480_v56  ;;  %v4015_v39 = vadd.f32 %v4014_v17, %v3926_v0 }
 0x4c1   : > { %4548 = vst [vmem:[%s7934_s23 + $0xd8] sm:$0xff] %v4516_v57  ;;  %v4052_v22 = vadd.f32 %v4015_v39, %v8104_v58  ;;  %v3843_v63 = vpop.f32.mrf.mxu0  ;;  %v4448_v26 = vpop.f32.mrf.mxu3 }
 0x4c2   : > { %v3933_v11 = vadd.f32 %v3932_v61, %v3843_v63 }
 0x4c3   : > { %v4152_v29 = vadd.f32 %v7905_v44, %v4052_v22 }
 0x4c5   : > { %v4481_v32 = vadd.f32 %v4443_v36, %v4152_v29 }
 0x4c6   : > { %v4016_v35 = vpop.f32.mrf.mxu2 }
 0x4c7   : > { %v4517_v12 = vadd.f32 %v7914_v34, %v4481_v32  ;;  %v4017_v60 = vadd.f32 %v4016_v35, %v3928_v16 }
 0x4c9   : > { %4549 = vst [vmem:[%s7934_s23 + $0xe0] sm:$0xff] %v4517_v12  ;;  %v4053_v8 = vadd.f32 %v4017_v60, %v8116_v37  ;;  %v4450_v51 = vpop.f32.mrf.mxu3 }
 0x4cb   : > { %v4153_v28 = vadd.f32 %v7905_v44, %v4053_v8 }
 0x4cd   : > { %v4482_v58 = vadd.f32 %v4445_v45, %v4153_v28 }
 0x4ce   : > { %v4019_v30 = vpop.f32.mrf.mxu2 }
 0x4cf   : > { %v4518_v7 = vadd.f32 %v7914_v34, %v4482_v58  ;;  %v4020_v40 = vadd.f32 %v4019_v30, %v3931_v53 }
 0x4d1   : > { %4550 = vst [vmem:[%s7934_s23 + $0xe8] sm:$0xff] %v4518_v7  ;;  %v4054_v1 = vadd.f32 %v4020_v40, %v8127_v43 }
 0x4d3   : > { %v4154_v23 = vadd.f32 %v7905_v44, %v4054_v1 }
 0x4d5   : > { %v4483_v37 = vadd.f32 %v4448_v26, %v4154_v23 }
 0x4d6   : > { %v4021_v25 = vpop.f32.mrf.mxu2 }
 0x4d7   : > { %v4519_v4 = vadd.f32 %v7914_v34, %v4483_v37  ;;  %v4022_v5 = vadd.f32 %v4021_v25, %v3933_v11 }
 0x4d9   : > { %4551 = vst [vmem:[%s7934_s23 + $0xf0] sm:$0xff] %v4519_v4  ;;  %v4055_v55 = vadd.f32 %v4022_v5, %v8138_v49 }
 0x4db   : > { %v4155_v18 = vadd.f32 %v7905_v44, %v4055_v55 }
 0x4dd   : > { %v4484_v2 = vadd.f32 %v4450_v51, %v4155_v18 }
 0x4df   : > { %v4520_v38 = vadd.f32 %v7914_v34, %v4484_v2 }
 0x4e1   : > { %4552 = vst [vmem:[%s7934_s23 + $0xf8] sm:$0xff] %v4520_v38 }
 0x4e2 PF: > { %s20_s13 = sadd.s32 1, %s5954_s13  }
 0x4e3   : > { %p17_p4 = scmp.ge.s32.totalorder %s20_s13, 4  }
 0x4e5   :  { %19 = sbr.rel (!%p17_p4) target bundleno = 1 (0x1), region = 98 }

</bundles_post_ra>
